<compile_context>
chip_gen: v7x
topology: tpu7x:2x2x1
jax: 0.10.0
libtpu: 0.0.40
codegen_flags: <defaults>
</compile_context>

<pallas_src>
import functools
import math

import jax
import jax.numpy as jnp
from jax.experimental import pallas as pl
from jax.experimental.pallas import tpu as pltpu


# ------------------------------------------------------------------ utils
def _round_up(x, m):
    return (x + m - 1) // m * m


# ------------------------------------------------------------------ Pallas kernels
def _mm_bias_kernel(a_ref, b_ref, bias_ref, o_ref, *, relu):
    """o = maybe_relu(A @ B + bias), single K block (no accumulator scratch)."""
    acc = jnp.dot(a_ref[...], b_ref[...], preferred_element_type=jnp.float32)
    y = acc + bias_ref[...]
    if relu:
        y = jnp.maximum(y, 0.0)
    o_ref[...] = y.astype(o_ref.dtype)


def _mm_bias_acc_kernel(a_ref, b_ref, bias_ref, o_ref, acc_ref, *, relu):
    """o = maybe_relu(A @ B + bias), accumulated over the K grid axis (axis 1).

    (Unused for this net's shapes now that k_cap=4096; kept for generality.)
    """
    k = pl.program_id(1)

    @pl.when(k == 0)
    def _():
        acc_ref[...] = jnp.zeros_like(acc_ref)

    acc_ref[...] += jnp.dot(a_ref[...], b_ref[...], preferred_element_type=jnp.float32)

    @pl.when(k == pl.num_programs(1) - 1)
    def _():
        y = acc_ref[...] + bias_ref[...]
        if relu:
            y = jnp.maximum(y, 0.0)
        o_ref[...] = y.astype(o_ref.dtype)


def _decoder_plane_kernel(g_ref, t_ref, o_ref):
    """One decoder output plane: (256, Kd) @ (Kd, 256) -> (256, 256), bias folded in."""
    o_ref[...] = jnp.dot(g_ref[...], t_ref[...], preferred_element_type=jnp.float32)


# ------------------------------------------------------------------ fused GEMM wrapper
def matmul_bias(A, B, bias, *, relu=False, out_dtype=jnp.float32,
                m_cap=2048, k_cap=4096, tm_big=2048):
    """Fused maybe_relu(A @ B + bias) on the MXU.

    bf16 operands, f32 accumulate + epilogue.  N is always a single lane block
    (N <= 384 in this net); M/K are tiled only when they exceed the caps
    (never for this net's shapes -> every encoder conv is one single-block GEMM).
    """
    M, K = A.shape
    _, N = B.shape

    A = A.astype(jnp.bfloat16)
    B = B.astype(jnp.bfloat16)
    bias2 = bias.astype(jnp.float32).reshape(1, N)

    # --- M tiling: single full block when small, else tm_big tiles.
    if M <= m_cap:
        tm, Mp = M, M
    else:
        tm = tm_big
        Mp = _round_up(M, tm)
        if Mp != M:
            A = jnp.pad(A, ((0, Mp - M), (0, 0)))

    # --- K tiling: single full block when it fits, else k_cap tiles + accumulator.
    if K <= k_cap:
        tk, Kp = K, K
    else:
        tk = k_cap
        Kp = _round_up(K, tk)
        A = jnp.pad(A, ((0, 0), (0, Kp - K)))
        B = jnp.pad(B, ((0, Kp - K), (0, 0)))
    nk = Kp // tk

    if nk == 1:
        kernel = functools.partial(_mm_bias_kernel, relu=relu)
        grid = (Mp // tm,)
        in_specs = [
            pl.BlockSpec((tm, tk), lambda i: (i, 0)),
            pl.BlockSpec((tk, N), lambda i: (0, 0)),
            pl.BlockSpec((1, N), lambda i: (0, 0)),
        ]
        out_specs = pl.BlockSpec((tm, N), lambda i: (i, 0))
        scratch = []
        dims = ("parallel",)
    else:
        kernel = functools.partial(_mm_bias_acc_kernel, relu=relu)
        grid = (Mp // tm, nk)
        in_specs = [
            pl.BlockSpec((tm, tk), lambda i, k: (i, k)),
            pl.BlockSpec((tk, N), lambda i, k: (k, 0)),
            pl.BlockSpec((1, N), lambda i, k: (0, 0)),
        ]
        out_specs = pl.BlockSpec((tm, N), lambda i, k: (i, 0))
        scratch = [pltpu.VMEM((tm, N), jnp.float32)]
        dims = ("parallel", "arbitrary")

    out = pl.pallas_call(
        kernel,
        out_shape=jax.ShapeDtypeStruct((Mp, N), out_dtype),
        grid_spec=pltpu.PrefetchScalarGridSpec(
            num_scalar_prefetch=0,
            grid=grid,
            in_specs=in_specs,
            out_specs=out_specs,
            scratch_shapes=scratch,
        ),
        compiler_params=pltpu.CompilerParams(dimension_semantics=dims),
    )(A, B, bias2)

    return out if Mp == M else out[:M]


# ------------------------------------------------------------------ conv / pool
def conv2d(x, w, b, *, stride, pad, relu):
    """NHWC conv = bf16 im2col (XLA glue) + fused Pallas GEMM.  w: (KH, KW, Cin, Cout)."""
    N, H, W, C = x.shape
    KH, KW, Cin, Cout = w.shape
    Ho = (H + 2 * pad - KH) // stride + 1
    Wo = (W + 2 * pad - KW) // stride + 1
    xp = x if pad == 0 else jnp.pad(x, ((0, 0), (pad, pad), (pad, pad), (0, 0)))
    xp = xp.astype(jnp.bfloat16)  # bf16 im2col: halves glue + kernel DMA bytes
    cols = []
    for i in range(KH):
        for j in range(KW):
            cols.append(xp[:, i:i + stride * (Ho - 1) + 1:stride,
                           j:j + stride * (Wo - 1) + 1:stride, :])
    A = jnp.concatenate(cols, axis=-1).reshape(N * Ho * Wo, KH * KW * Cin)
    out = matmul_bias(A, w.reshape(KH * KW * Cin, Cout), b, relu=relu,
                      out_dtype=jnp.bfloat16)
    return out.reshape(N, Ho, Wo, Cout)


def maxpool2d(x, k=3, s=2):
    """MaxPool2d(kernel_size=3, stride=2, padding=0) as a fused running max.

    # TODO(synk): left as fused XLA elementwise max per perf review (a Pallas kernel would
    # only re-materialize the 9 shifted taps for a trivial VPU max on tiny tensors).
    """
    N, H, W, C = x.shape
    Ho = (H - k) // s + 1
    Wo = (W - k) // s + 1
    out = None
    for i in range(k):
        for j in range(k):
            v = x[:, i:i + s * (Ho - 1) + 1:s, j:j + s * (Wo - 1) + 1:s, :]
            out = v if out is None else jnp.maximum(out, v)
    return out


# ------------------------------------------------------------------ bilinear helpers
def _resize_idx(in_size, out_size):
    """PyTorch bilinear, align_corners=False source indices / lerp weights."""
    scale = in_size / out_size
    src = (jnp.arange(out_size, dtype=jnp.float32) + 0.5) * scale - 0.5
    src = jnp.maximum(src, 0.0)
    i0 = jnp.minimum(jnp.floor(src).astype(jnp.int32), in_size - 1)
    i1 = jnp.minimum(i0 + 1, in_size - 1)
    w1 = src - i0.astype(jnp.float32)
    w0 = 1.0 - w1
    return i0, i1, w0, w1


def _bilinear_weight_matrix(in_size, out_size):
    """A[out, in] so that upsampled = A @ x along one spatial axis."""
    i0, i1, w0, w1 = _resize_idx(in_size, out_size)
    rows = jnp.arange(out_size)
    A = jnp.zeros((out_size, in_size), jnp.float32)
    A = A.at[rows, i0].add(w0)
    A = A.at[rows, i1].add(w1)
    return A


def _tap_weight_matrix(in_size, out_size):
    """G[in, out, tap] = A_zeropadded[out + tap, in] for the 3x3, pad=1 conv taps."""
    A = _bilinear_weight_matrix(in_size, out_size)   # (out, in)
    A_pad = jnp.pad(A, ((1, 1), (0, 0)))             # zero rows == conv's zero padding
    oh = jnp.arange(out_size)[:, None]
    di = jnp.arange(3)[None, :]
    G = A_pad[oh + di, :]                            # (out, 3, in)
    return jnp.transpose(G, (2, 0, 1))               # (in, out, 3)


def bilinear_upsample_nhwc(x, out_h, out_w):
    """Direct gather+lerp bilinear upsample (used only by the f32 reference check)."""
    N, H, W, C = x.shape
    y0, y1, wy0, wy1 = _resize_idx(H, out_h)
    x0, x1, wx0, wx1 = _resize_idx(W, out_w)
    xf = x.astype(jnp.float32)
    c = (xf[:, :, x0, :] * wx0[None, None, :, None]
         + xf[:, :, x1, :] * wx1[None, None, :, None])          # (N, H, out_w, C)
    u = (c[:, y0, :, :] * wy0[None, :, None, None]
         + c[:, y1, :, :] * wy1[None, :, None, None])           # (N, out_h, out_w, C)
    return u


# ------------------------------------------------------------------ decoder
def decoder(x_enc, w, b, out_h=256, out_w=256):
    """Upsample(size=(out_h,out_w), bilinear, align_corners=False) + Conv2d(k3, pad=1).

    Exact commuted/separable form: since the channel-mixing conv weight acts pointwise
    over space and the bilinear upsample acts pointwise over channels,
        conv3x3(upsample(x)) == shift_add(upsample(x @ W)),
    and the shift-add + separable bilinear weights + bias fold into one small GEMM per
    (batch, out-channel) plane:  out[n,c] = GhM_aug @ T_aug[n,c]   (lane-dense, NCHW).
    """
    N, Hin, Win, Cin = x_enc.shape
    KH, KW, _, Cout = w.shape  # 3, 3, Cin, 3

    # Channel mixing on the tiny pre-upsample activation (M = N*Hin*Win = 8): XLA einsum.
    ysm = jnp.einsum('nhwk,dekc->nhwdec',
                     x_enc.astype(jnp.float32), w.astype(jnp.float32))

    Gh = _tap_weight_matrix(Hin, out_h)   # (Hin, out_h, 3)
    Gw = _tap_weight_matrix(Win, out_w)   # (Win, out_w, 3)

    # Contract the width/tap_j side (tiny): T[n, c, ih, di, ow]
    T = jnp.einsum('nhwdec,wqe->nchdq', ysm, Gw)          # (N, Cout, Hin, 3, out_w)
    T = T.reshape(N, Cout, Hin * 3, out_w)

    GhM = jnp.transpose(Gh, (1, 0, 2)).reshape(out_h, Hin * 3)   # (out_h, Hin*3)

    # Fold the bias in as an extra K row.
    GhM = jnp.concatenate([GhM, jnp.ones((out_h, 1), jnp.float32)], axis=1)
    bias_row = jnp.broadcast_to(b.astype(jnp.float32).reshape(1, Cout, 1, 1),
                                (N, Cout, 1, out_w))
    T = jnp.concatenate([T, bias_row], axis=2)            # (N, Cout, Hin*3+1, out_w)

    # Pad K up to a multiple of 8 (zero rows/cols contribute nothing).
    Kd = Hin * 3 + 1
    Kp = _round_up(Kd, 8)
    if Kp != Kd:
        GhM = jnp.pad(GhM, ((0, 0), (0, Kp - Kd)))
        T = jnp.pad(T, ((0, 0), (0, 0), (0, Kp - Kd), (0, 0)))
        Kd = Kp

    out = pl.pallas_call(
        _decoder_plane_kernel,
        out_shape=jax.ShapeDtypeStruct((N, Cout, out_h, out_w), jnp.float32),
        grid_spec=pltpu.PrefetchScalarGridSpec(
            num_scalar_prefetch=0,
            grid=(N, Cout),
            in_specs=[
                pl.BlockSpec((out_h, Kd), lambda n, c: (0, 0)),
                pl.BlockSpec((None, None, Kd, out_w), lambda n, c: (n, c, 0, 0)),
            ],
            out_specs=pl.BlockSpec((None, None, out_h, out_w),
                                   lambda n, c: (n, c, 0, 0)),
        ),
        compiler_params=pltpu.CompilerParams(
            dimension_semantics=("parallel", "parallel")),
    )(GhM, T)
    return out  # already NCHW


# ------------------------------------------------------------------ params / forward
def init_params(seed=0):
    key = jax.random.PRNGKey(seed)
    ks = iter(jax.random.split(key, 16))

    def conv(kh, kw, cin, cout):
        w = jax.random.normal(next(ks), (kh, kw, cin, cout), jnp.float32) / math.sqrt(kh * kw * cin)
        b = jax.random.uniform(next(ks), (cout,), jnp.float32, -0.05, 0.05)
        return w, b

    p = {}
    p["conv1"] = conv(11, 11, 1, 64)    # features[0] replaced: Conv2d(1, 64, k11, s4, p2)
    p["conv2"] = conv(5, 5, 64, 192)
    p["conv3"] = conv(3, 3, 192, 384)
    p["conv4"] = conv(3, 3, 384, 256)
    p["conv5"] = conv(3, 3, 256, 256)
    p["final"] = conv(3, 3, 256, 3)     # decoder Conv2d(256, 3, k3, p1)
    return p


def alexnet_restoration_forward(params, x_nchw):
    # NCHW (PyTorch) -> NHWC (internal)
    x = jnp.transpose(x_nchw.astype(jnp.float32), (0, 2, 3, 1))

    # ----- encoder (AlexNet features) -----
    w, b = params["conv1"]
    x = conv2d(x, w, b, stride=4, pad=2, relu=True)
    x = maxpool2d(x)
    w, b = params["conv2"]
    x = conv2d(x, w, b, stride=1, pad=2, relu=True)
    x = maxpool2d(x)
    w, b = params["conv3"]
    x = conv2d(x, w, b, stride=1, pad=1, relu=True)
    w, b = params["conv4"]
    x = conv2d(x, w, b, stride=1, pad=1, relu=True)
    w, b = params["conv5"]
    x = conv2d(x, w, b, stride=1, pad=1, relu=True)
    x = maxpool2d(x)

    # ----- decoder: Upsample(size=(256,256), bilinear) + Conv2d(256->3, k3, p1) -----
    w, b = params["final"]
    return decoder(x, w, b, 256, 256)   # NCHW output


# ------------------------------------------------------------------ pure-f32 XLA reference
def _reference_forward(params, x_nchw):
    x = jnp.transpose(x_nchw.astype(jnp.float32), (0, 2, 3, 1))

    def conv(x, w, b, stride, pad, relu):
        y = jax.lax.conv_general_dilated(
            x, w, window_strides=(stride, stride),
            padding=[(pad, pad), (pad, pad)],
            dimension_numbers=("NHWC", "HWIO", "NHWC"))
        y = y + b
        return jnp.maximum(y, 0.0) if relu else y

    def pool(x):
        return jax.lax.reduce_window(x, -jnp.inf, jax.lax.max,
                                     (1, 3, 3, 1), (1, 2, 2, 1), "VALID")

    x = pool(conv(x, *params["conv1"], 4, 2, True))
    x = pool(conv(x, *params["conv2"], 1, 2, True))
    x = conv(x, *params["conv3"], 1, 1, True)
    x = conv(x, *params["conv4"], 1, 1, True)
    x = pool(conv(x, *params["conv5"], 1, 1, True))
    u = bilinear_upsample_nhwc(x, 256, 256)
    y = conv(u, *params["final"], 1, 1, False)
    return jnp.transpose(y, (0, 3, 1, 2))


# ------------------------------------------------------------------ main
if __name__ == "__main__":
    params = init_params(seed=0)
    # 96x96 is (near-)minimal spatial size surviving AlexNet's stride-4 stem + 3 pools
    # (encoder output is 2x2x256); the decoder always emits 256x256 -> (2, 3, 256, 256).
    x = jax.random.normal(jax.random.PRNGKey(0), (2, 1, 96, 96), jnp.float32)

    fwd = jax.jit(alexnet_restoration_forward)
    y = jax.block_until_ready(fwd(params, x))

    assert y.shape == (2, 3, 256, 256), y.shape
    assert bool(jnp.all(jnp.isfinite(y)))

    # Tolerance check vs the pure-f32 XLA reference (Pallas path uses bf16 GEMM operands).
    y_ref = jax.block_until_ready(jax.jit(_reference_forward)(params, x))
    diff = float(jnp.max(jnp.abs(y - y_ref)))
    scale = float(jnp.max(jnp.abs(y_ref)))
    assert diff <= 0.1 * (1.0 + scale), (diff, scale)

    print("KERNEL_OK")
</pallas_src>

<mosaic_0001>
module attributes {stable_mosaic.version = 11 : i64} {
  func.func private @main(%arg0: i32) attributes {dimension_semantics = [#tpu.dimension_semantics<core_parallel>], iteration_bounds = array<i64: 2>, tpu.core_type = #tpu.core_type<sc_scalar_subcore>, window_params = []} {
    return
  }
}

module attributes {stable_mosaic.version = 11 : i64} {
  func.func private @main(%arg0: i32) attributes {dimension_semantics = [#tpu.dimension_semantics<core_parallel>], iteration_bounds = array<i64: 2>, tpu.core_type = #tpu.core_type<sc_scalar_subcore>, window_params = []} {
    return
  }
}

module attributes {stable_mosaic.version = 11 : i64} {
  func.func @_mm_bias_kernel(%arg0: i32, %arg1: memref<1058x121xbf16, #tpu.memory_space<vmem>>, %arg2: memref<121x64xbf16, #tpu.memory_space<vmem>>, %arg3: memref<1x64xf32, #tpu.memory_space<vmem>>, %arg4: memref<1058x64xbf16, #tpu.memory_space<vmem>>) attributes {dimension_semantics = [#tpu.dimension_semantics<parallel>], iteration_bounds = array<i64: 1>, scalar_prefetch = 0 : i64, scratch_operands = 0 : i64, tpu.core_type = #tpu.core_type<tc>, window_params = [{transform_indices = @transform_0, window_bounds = array<i64: 1058, 121>}, {pipeline_mode = #tpu.pipeline_mode<synchronous>, transform_indices = @transform_1, window_bounds = array<i64: 121, 64>}, {pipeline_mode = #tpu.pipeline_mode<synchronous>, transform_indices = @transform_2, window_bounds = array<i64: 1, 64>}, {transform_indices = @transform_3, window_bounds = array<i64: 1058, 64>}]} {
    %c0 = arith.constant 0 : index
    %c0_0 = arith.constant 0 : index
    %0 = vector.load %arg1[%c0, %c0_0] : memref<1058x121xbf16, #tpu.memory_space<vmem>>, vector<1058x121xbf16>
    %c0_1 = arith.constant 0 : index
    %c0_2 = arith.constant 0 : index
    %1 = vector.load %arg2[%c0_1, %c0_2] : memref<121x64xbf16, #tpu.memory_space<vmem>>, vector<121x64xbf16>
    %cst = arith.constant dense<0.000000e+00> : vector<1058x64xf32>
    %2 = tpu.matmul %0, %1, %cst {dimension_numbers = #tpu.dot_dimension_numbers<[1], [0], [0], [1], [0, 0, 1, 1], [], []>} : vector<1058x121xbf16>, vector<121x64xbf16>, vector<1058x64xf32> -> vector<1058x64xf32>
    %c0_3 = arith.constant 0 : index
    %c0_4 = arith.constant 0 : index
    %3 = vector.load %arg3[%c0_3, %c0_4] : memref<1x64xf32, #tpu.memory_space<vmem>>, vector<1x64xf32>
    %4 = vector.broadcast %3 : vector<1x64xf32> to vector<1058x64xf32>
    %5 = arith.addf %2, %4 : vector<1058x64xf32>
    %cst_5 = arith.constant 0.000000e+00 : f32
    %6 = vector.broadcast %cst_5 : f32 to vector<1058x64xf32>
    %7 = arith.maximumf %5, %6 : vector<1058x64xf32>
    %8 = arith.truncf %7 : vector<1058x64xf32> to vector<1058x64xbf16>
    %c0_6 = arith.constant 0 : index
    %c0_7 = arith.constant 0 : index
    %9 = vector.load %arg4[%c0_6, %c0_7] : memref<1058x64xbf16, #tpu.memory_space<vmem>>, vector<1058x64xbf16>
    tpu.vector_store %arg4[%c0_6, %c0_7], %8 {strides = array<i32>} : memref<1058x64xbf16, #tpu.memory_space<vmem>>, vector<1058x64xbf16>,
    return
  }
  func.func @transform_0(%arg0: i32) -> (i32, i32) {
    %c0_i32 = arith.constant 0 : i32
    %c0_i32_0 = arith.constant 0 : i32
    return %arg0, %c0_i32 : i32, i32
  }
  func.func @transform_1(%arg0: i32) -> (i32, i32) {
    %c0_i32 = arith.constant 0 : i32
    %c0_i32_0 = arith.constant 0 : i32
    %c0_i32_1 = arith.constant 0 : i32
    return %c0_i32, %c0_i32_0 : i32, i32
  }
  func.func @transform_2(%arg0: i32) -> (i32, i32) {
    %c0_i32 = arith.constant 0 : i32
    %c0_i32_0 = arith.constant 0 : i32
    %c0_i32_1 = arith.constant 0 : i32
    return %c0_i32, %c0_i32_0 : i32, i32
  }
  func.func @transform_3(%arg0: i32) -> (i32, i32) {
    %c0_i32 = arith.constant 0 : i32
    %c0_i32_0 = arith.constant 0 : i32
    return %arg0, %c0_i32 : i32, i32
  }
}

module attributes {stable_mosaic.version = 11 : i64} {
  func.func @_mm_bias_kernel(%arg0: i32, %arg1: memref<242x1600xbf16, #tpu.memory_space<vmem>>, %arg2: memref<1600x192xbf16, #tpu.memory_space<vmem>>, %arg3: memref<1x192xf32, #tpu.memory_space<vmem>>, %arg4: memref<242x192xbf16, #tpu.memory_space<vmem>>) attributes {dimension_semantics = [#tpu.dimension_semantics<parallel>], iteration_bounds = array<i64: 1>, scalar_prefetch = 0 : i64, scratch_operands = 0 : i64, tpu.core_type = #tpu.core_type<tc>, window_params = [{transform_indices = @transform_0, window_bounds = array<i64: 242, 1600>}, {pipeline_mode = #tpu.pipeline_mode<synchronous>, transform_indices = @transform_1, window_bounds = array<i64: 1600, 192>}, {pipeline_mode = #tpu.pipeline_mode<synchronous>, transform_indices = @transform_2, window_bounds = array<i64: 1, 192>}, {transform_indices = @transform_3, window_bounds = array<i64: 242, 192>}]} {
    %c0 = arith.constant 0 : index
    %c0_0 = arith.constant 0 : index
    %0 = vector.load %arg1[%c0, %c0_0] : memref<242x1600xbf16, #tpu.memory_space<vmem>>, vector<242x1600xbf16>
    %c0_1 = arith.constant 0 : index
    %c0_2 = arith.constant 0 : index
    %1 = vector.load %arg2[%c0_1, %c0_2] : memref<1600x192xbf16, #tpu.memory_space<vmem>>, vector<1600x192xbf16>
    %cst = arith.constant dense<0.000000e+00> : vector<242x192xf32>
    %2 = tpu.matmul %0, %1, %cst {dimension_numbers = #tpu.dot_dimension_numbers<[1], [0], [0], [1], [0, 0, 1, 1], [], []>} : vector<242x1600xbf16>, vector<1600x192xbf16>, vector<242x192xf32> -> vector<242x192xf32>
    %c0_3 = arith.constant 0 : index
    %c0_4 = arith.constant 0 : index
    %3 = vector.load %arg3[%c0_3, %c0_4] : memref<1x192xf32, #tpu.memory_space<vmem>>, vector<1x192xf32>
    %4 = vector.broadcast %3 : vector<1x192xf32> to vector<242x192xf32>
    %5 = arith.addf %2, %4 : vector<242x192xf32>
    %cst_5 = arith.constant 0.000000e+00 : f32
    %6 = vector.broadcast %cst_5 : f32 to vector<242x192xf32>
    %7 = arith.maximumf %5, %6 : vector<242x192xf32>
    %8 = arith.truncf %7 : vector<242x192xf32> to vector<242x192xbf16>
    %c0_6 = arith.constant 0 : index
    %c0_7 = arith.constant 0 : index
    %9 = vector.load %arg4[%c0_6, %c0_7] : memref<242x192xbf16, #tpu.memory_space<vmem>>, vector<242x192xbf16>
    tpu.vector_store %arg4[%c0_6, %c0_7], %8 {strides = array<i32>} : memref<242x192xbf16, #tpu.memory_space<vmem>>, vector<242x192xbf16>,
    return
  }
  func.func @transform_0(%arg0: i32) -> (i32, i32) {
    %c0_i32 = arith.constant 0 : i32
    %c0_i32_0 = arith.constant 0 : i32
    return %arg0, %c0_i32 : i32, i32
  }
  func.func @transform_1(%arg0: i32) -> (i32, i32) {
    %c0_i32 = arith.constant 0 : i32
    %c0_i32_0 = arith.constant 0 : i32
    %c0_i32_1 = arith.constant 0 : i32
    return %c0_i32, %c0_i32_0 : i32, i32
  }
  func.func @transform_2(%arg0: i32) -> (i32, i32) {
    %c0_i32 = arith.constant 0 : i32
    %c0_i32_0 = arith.constant 0 : i32
    %c0_i32_1 = arith.constant 0 : i32
    return %c0_i32, %c0_i32_0 : i32, i32
  }
  func.func @transform_3(%arg0: i32) -> (i32, i32) {
    %c0_i32 = arith.constant 0 : i32
    %c0_i32_0 = arith.constant 0 : i32
    return %arg0, %c0_i32 : i32, i32
  }
}

module attributes {stable_mosaic.version = 11 : i64} {
  func.func @_mm_bias_kernel(%arg0: i32, %arg1: memref<50x1728xbf16, #tpu.memory_space<vmem>>, %arg2: memref<1728x384xbf16, #tpu.memory_space<vmem>>, %arg3: memref<1x384xf32, #tpu.memory_space<vmem>>, %arg4: memref<50x384xbf16, #tpu.memory_space<vmem>>) attributes {dimension_semantics = [#tpu.dimension_semantics<parallel>], iteration_bounds = array<i64: 1>, scalar_prefetch = 0 : i64, scratch_operands = 0 : i64, tpu.core_type = #tpu.core_type<tc>, window_params = [{transform_indices = @transform_0, window_bounds = array<i64: 50, 1728>}, {pipeline_mode = #tpu.pipeline_mode<synchronous>, transform_indices = @transform_1, window_bounds = array<i64: 1728, 384>}, {pipeline_mode = #tpu.pipeline_mode<synchronous>, transform_indices = @transform_2, window_bounds = array<i64: 1, 384>}, {transform_indices = @transform_3, window_bounds = array<i64: 50, 384>}]} {
    %c0 = arith.constant 0 : index
    %c0_0 = arith.constant 0 : index
    %0 = vector.load %arg1[%c0, %c0_0] : memref<50x1728xbf16, #tpu.memory_space<vmem>>, vector<50x1728xbf16>
    %c0_1 = arith.constant 0 : index
    %c0_2 = arith.constant 0 : index
    %1 = vector.load %arg2[%c0_1, %c0_2] : memref<1728x384xbf16, #tpu.memory_space<vmem>>, vector<1728x384xbf16>
    %cst = arith.constant dense<0.000000e+00> : vector<50x384xf32>
    %2 = tpu.matmul %0, %1, %cst {dimension_numbers = #tpu.dot_dimension_numbers<[1], [0], [0], [1], [0, 0, 1, 1], [], []>} : vector<50x1728xbf16>, vector<1728x384xbf16>, vector<50x384xf32> -> vector<50x384xf32>
    %c0_3 = arith.constant 0 : index
    %c0_4 = arith.constant 0 : index
    %3 = vector.load %arg3[%c0_3, %c0_4] : memref<1x384xf32, #tpu.memory_space<vmem>>, vector<1x384xf32>
    %4 = vector.broadcast %3 : vector<1x384xf32> to vector<50x384xf32>
    %5 = arith.addf %2, %4 : vector<50x384xf32>
    %cst_5 = arith.constant 0.000000e+00 : f32
    %6 = vector.broadcast %cst_5 : f32 to vector<50x384xf32>
    %7 = arith.maximumf %5, %6 : vector<50x384xf32>
    %8 = arith.truncf %7 : vector<50x384xf32> to vector<50x384xbf16>
    %c0_6 = arith.constant 0 : index
    %c0_7 = arith.constant 0 : index
    %9 = vector.load %arg4[%c0_6, %c0_7] : memref<50x384xbf16, #tpu.memory_space<vmem>>, vector<50x384xbf16>
    tpu.vector_store %arg4[%c0_6, %c0_7], %8 {strides = array<i32>} : memref<50x384xbf16, #tpu.memory_space<vmem>>, vector<50x384xbf16>,
    return
  }
  func.func @transform_0(%arg0: i32) -> (i32, i32) {
    %c0_i32 = arith.constant 0 : i32
    %c0_i32_0 = arith.constant 0 : i32
    return %arg0, %c0_i32 : i32, i32
  }
  func.func @transform_1(%arg0: i32) -> (i32, i32) {
    %c0_i32 = arith.constant 0 : i32
    %c0_i32_0 = arith.constant 0 : i32
    %c0_i32_1 = arith.constant 0 : i32
    return %c0_i32, %c0_i32_0 : i32, i32
  }
  func.func @transform_2(%arg0: i32) -> (i32, i32) {
    %c0_i32 = arith.constant 0 : i32
    %c0_i32_0 = arith.constant 0 : i32
    %c0_i32_1 = arith.constant 0 : i32
    return %c0_i32, %c0_i32_0 : i32, i32
  }
  func.func @transform_3(%arg0: i32) -> (i32, i32) {
    %c0_i32 = arith.constant 0 : i32
    %c0_i32_0 = arith.constant 0 : i32
    return %arg0, %c0_i32 : i32, i32
  }
}

module attributes {stable_mosaic.version = 11 : i64} {
  func.func @_mm_bias_kernel(%arg0: i32, %arg1: memref<50x3456xbf16, #tpu.memory_space<vmem>>, %arg2: memref<3456x256xbf16, #tpu.memory_space<vmem>>, %arg3: memref<1x256xf32, #tpu.memory_space<vmem>>, %arg4: memref<50x256xbf16, #tpu.memory_space<vmem>>) attributes {dimension_semantics = [#tpu.dimension_semantics<parallel>], iteration_bounds = array<i64: 1>, scalar_prefetch = 0 : i64, scratch_operands = 0 : i64, tpu.core_type = #tpu.core_type<tc>, window_params = [{transform_indices = @transform_0, window_bounds = array<i64: 50, 3456>}, {pipeline_mode = #tpu.pipeline_mode<synchronous>, transform_indices = @transform_1, window_bounds = array<i64: 3456, 256>}, {pipeline_mode = #tpu.pipeline_mode<synchronous>, transform_indices = @transform_2, window_bounds = array<i64: 1, 256>}, {transform_indices = @transform_3, window_bounds = array<i64: 50, 256>}]} {
    %c0 = arith.constant 0 : index
    %c0_0 = arith.constant 0 : index
    %0 = vector.load %arg1[%c0, %c0_0] : memref<50x3456xbf16, #tpu.memory_space<vmem>>, vector<50x3456xbf16>
    %c0_1 = arith.constant 0 : index
    %c0_2 = arith.constant 0 : index
    %1 = vector.load %arg2[%c0_1, %c0_2] : memref<3456x256xbf16, #tpu.memory_space<vmem>>, vector<3456x256xbf16>
    %cst = arith.constant dense<0.000000e+00> : vector<50x256xf32>
    %2 = tpu.matmul %0, %1, %cst {dimension_numbers = #tpu.dot_dimension_numbers<[1], [0], [0], [1], [0, 0, 1, 1], [], []>} : vector<50x3456xbf16>, vector<3456x256xbf16>, vector<50x256xf32> -> vector<50x256xf32>
    %c0_3 = arith.constant 0 : index
    %c0_4 = arith.constant 0 : index
    %3 = vector.load %arg3[%c0_3, %c0_4] : memref<1x256xf32, #tpu.memory_space<vmem>>, vector<1x256xf32>
    %4 = vector.broadcast %3 : vector<1x256xf32> to vector<50x256xf32>
    %5 = arith.addf %2, %4 : vector<50x256xf32>
    %cst_5 = arith.constant 0.000000e+00 : f32
    %6 = vector.broadcast %cst_5 : f32 to vector<50x256xf32>
    %7 = arith.maximumf %5, %6 : vector<50x256xf32>
    %8 = arith.truncf %7 : vector<50x256xf32> to vector<50x256xbf16>
    %c0_6 = arith.constant 0 : index
    %c0_7 = arith.constant 0 : index
    %9 = vector.load %arg4[%c0_6, %c0_7] : memref<50x256xbf16, #tpu.memory_space<vmem>>, vector<50x256xbf16>
    tpu.vector_store %arg4[%c0_6, %c0_7], %8 {strides = array<i32>} : memref<50x256xbf16, #tpu.memory_space<vmem>>, vector<50x256xbf16>,
    return
  }
  func.func @transform_0(%arg0: i32) -> (i32, i32) {
    %c0_i32 = arith.constant 0 : i32
    %c0_i32_0 = arith.constant 0 : i32
    return %arg0, %c0_i32 : i32, i32
  }
  func.func @transform_1(%arg0: i32) -> (i32, i32) {
    %c0_i32 = arith.constant 0 : i32
    %c0_i32_0 = arith.constant 0 : i32
    %c0_i32_1 = arith.constant 0 : i32
    return %c0_i32, %c0_i32_0 : i32, i32
  }
  func.func @transform_2(%arg0: i32) -> (i32, i32) {
    %c0_i32 = arith.constant 0 : i32
    %c0_i32_0 = arith.constant 0 : i32
    %c0_i32_1 = arith.constant 0 : i32
    return %c0_i32, %c0_i32_0 : i32, i32
  }
  func.func @transform_3(%arg0: i32) -> (i32, i32) {
    %c0_i32 = arith.constant 0 : i32
    %c0_i32_0 = arith.constant 0 : i32
    return %arg0, %c0_i32 : i32, i32
  }
}

module attributes {stable_mosaic.version = 11 : i64} {
  func.func @_mm_bias_kernel(%arg0: i32, %arg1: memref<50x2304xbf16, #tpu.memory_space<vmem>>, %arg2: memref<2304x256xbf16, #tpu.memory_space<vmem>>, %arg3: memref<1x256xf32, #tpu.memory_space<vmem>>, %arg4: memref<50x256xbf16, #tpu.memory_space<vmem>>) attributes {dimension_semantics = [#tpu.dimension_semantics<parallel>], iteration_bounds = array<i64: 1>, scalar_prefetch = 0 : i64, scratch_operands = 0 : i64, tpu.core_type = #tpu.core_type<tc>, window_params = [{transform_indices = @transform_0, window_bounds = array<i64: 50, 2304>}, {pipeline_mode = #tpu.pipeline_mode<synchronous>, transform_indices = @transform_1, window_bounds = array<i64: 2304, 256>}, {pipeline_mode = #tpu.pipeline_mode<synchronous>, transform_indices = @transform_2, window_bounds = array<i64: 1, 256>}, {transform_indices = @transform_3, window_bounds = array<i64: 50, 256>}]} {
    %c0 = arith.constant 0 : index
    %c0_0 = arith.constant 0 : index
    %0 = vector.load %arg1[%c0, %c0_0] : memref<50x2304xbf16, #tpu.memory_space<vmem>>, vector<50x2304xbf16>
    %c0_1 = arith.constant 0 : index
    %c0_2 = arith.constant 0 : index
    %1 = vector.load %arg2[%c0_1, %c0_2] : memref<2304x256xbf16, #tpu.memory_space<vmem>>, vector<2304x256xbf16>
    %cst = arith.constant dense<0.000000e+00> : vector<50x256xf32>
    %2 = tpu.matmul %0, %1, %cst {dimension_numbers = #tpu.dot_dimension_numbers<[1], [0], [0], [1], [0, 0, 1, 1], [], []>} : vector<50x2304xbf16>, vector<2304x256xbf16>, vector<50x256xf32> -> vector<50x256xf32>
    %c0_3 = arith.constant 0 : index
    %c0_4 = arith.constant 0 : index
    %3 = vector.load %arg3[%c0_3, %c0_4] : memref<1x256xf32, #tpu.memory_space<vmem>>, vector<1x256xf32>
    %4 = vector.broadcast %3 : vector<1x256xf32> to vector<50x256xf32>
    %5 = arith.addf %2, %4 : vector<50x256xf32>
    %cst_5 = arith.constant 0.000000e+00 : f32
    %6 = vector.broadcast %cst_5 : f32 to vector<50x256xf32>
    %7 = arith.maximumf %5, %6 : vector<50x256xf32>
    %8 = arith.truncf %7 : vector<50x256xf32> to vector<50x256xbf16>
    %c0_6 = arith.constant 0 : index
    %c0_7 = arith.constant 0 : index
    %9 = vector.load %arg4[%c0_6, %c0_7] : memref<50x256xbf16, #tpu.memory_space<vmem>>, vector<50x256xbf16>
    tpu.vector_store %arg4[%c0_6, %c0_7], %8 {strides = array<i32>} : memref<50x256xbf16, #tpu.memory_space<vmem>>, vector<50x256xbf16>,
    return
  }
  func.func @transform_0(%arg0: i32) -> (i32, i32) {
    %c0_i32 = arith.constant 0 : i32
    %c0_i32_0 = arith.constant 0 : i32
    return %arg0, %c0_i32 : i32, i32
  }
  func.func @transform_1(%arg0: i32) -> (i32, i32) {
    %c0_i32 = arith.constant 0 : i32
    %c0_i32_0 = arith.constant 0 : i32
    %c0_i32_1 = arith.constant 0 : i32
    return %c0_i32, %c0_i32_0 : i32, i32
  }
  func.func @transform_2(%arg0: i32) -> (i32, i32) {
    %c0_i32 = arith.constant 0 : i32
    %c0_i32_0 = arith.constant 0 : i32
    %c0_i32_1 = arith.constant 0 : i32
    return %c0_i32, %c0_i32_0 : i32, i32
  }
  func.func @transform_3(%arg0: i32) -> (i32, i32) {
    %c0_i32 = arith.constant 0 : i32
    %c0_i32_0 = arith.constant 0 : i32
    return %arg0, %c0_i32 : i32, i32
  }
}

module attributes {stable_mosaic.version = 11 : i64} {
  func.func @_decoder_plane_kernel(%arg0: i32, %arg1: i32, %arg2: memref<256x8xf32, #tpu.memory_space<vmem>>, %arg3: memref<1x1x8x256xf32, #tpu.memory_space<vmem>>, %arg4: memref<1x1x256x256xf32, #tpu.memory_space<vmem>>) attributes {dimension_semantics = [#tpu.dimension_semantics<parallel>, #tpu.dimension_semantics<parallel>], iteration_bounds = array<i64: 2, 3>, scalar_prefetch = 0 : i64, scratch_operands = 0 : i64, tpu.core_type = #tpu.core_type<tc>, window_params = [{pipeline_mode = #tpu.pipeline_mode<synchronous>, transform_indices = @transform_0, window_bounds = array<i64: 256, 8>}, {transform_indices = @transform_1, window_bounds = array<i64: 1, 1, 8, 256>}, {transform_indices = @transform_2, window_bounds = array<i64: 1, 1, 256, 256>}]} {
    %c0 = arith.constant 0 : index
    %c0_0 = arith.constant 0 : index
    %0 = vector.load %arg2[%c0, %c0_0] : memref<256x8xf32, #tpu.memory_space<vmem>>, vector<256x8xf32>
    %c0_1 = arith.constant 0 : index
    %c0_2 = arith.constant 0 : index
    %c0_3 = arith.constant 0 : index
    %c0_4 = arith.constant 0 : index
    %1 = vector.load %arg3[%c0_1, %c0_2, %c0_3, %c0_4] : memref<1x1x8x256xf32, #tpu.memory_space<vmem>>, vector<1x1x8x256xf32>
    %2 = vector.shape_cast %1 : vector<1x1x8x256xf32> to vector<8x256xf32>
    %cst = arith.constant dense<0.000000e+00> : vector<256x256xf32>
    %3 = tpu.matmul %0, %2, %cst {dimension_numbers = #tpu.dot_dimension_numbers<[1], [0], [0], [1], [0, 0, 1, 1], [], []>} : vector<256x8xf32>, vector<8x256xf32>, vector<256x256xf32> -> vector<256x256xf32>
    %c0_5 = arith.constant 0 : index
    %c0_6 = arith.constant 0 : index
    %c0_7 = arith.constant 0 : index
    %c0_8 = arith.constant 0 : index
    %4 = vector.load %arg4[%c0_5, %c0_6, %c0_7, %c0_8] : memref<1x1x256x256xf32, #tpu.memory_space<vmem>>, vector<1x1x256x256xf32>
    %5 = vector.shape_cast %4 : vector<1x1x256x256xf32> to vector<256x256xf32>
    %6 = vector.shape_cast %3 : vector<256x256xf32> to vector<1x1x256x256xf32>
    tpu.vector_store %arg4[%c0_5, %c0_6, %c0_7, %c0_8], %6 {strides = array<i32>} : memref<1x1x256x256xf32, #tpu.memory_space<vmem>>, vector<1x1x256x256xf32>,
    return
  }
  func.func @transform_0(%arg0: i32, %arg1: i32) -> (i32, i32) {
    %c0_i32 = arith.constant 0 : i32
    %c0_i32_0 = arith.constant 0 : i32
    %c0_i32_1 = arith.constant 0 : i32
    return %c0_i32, %c0_i32_0 : i32, i32
  }
  func.func @transform_1(%arg0: i32, %arg1: i32) -> (i32, i32, i32, i32) {
    %c0_i32 = arith.constant 0 : i32
    %c0_i32_0 = arith.constant 0 : i32
    %c0_i32_1 = arith.constant 0 : i32
    return %arg0, %arg1, %c0_i32, %c0_i32_0 : i32, i32, i32, i32
  }
  func.func @transform_2(%arg0: i32, %arg1: i32) -> (i32, i32, i32, i32) {
    %c0_i32 = arith.constant 0 : i32
    %c0_i32_0 = arith.constant 0 : i32
    %c0_i32_1 = arith.constant 0 : i32
    return %arg0, %arg1, %c0_i32, %c0_i32_0 : i32, i32, i32, i32
  }
}

</mosaic_0001>

<bundles_post_ra>
// kernel: alexnet_restoration_forward.6
= control target key start
LH: loop header
LB: loop body
LE: loop exit
PB: predicated region body
PF: predicated region fallthrough
CT: control target
= control target key end

     0   :  { %v2996_v0 = vmov 0.0   ;;  %vm2997_vm0 = vmmov 0   ;;  %vm753_vm1 = vcmask 1043456   ;;  %vm754_vm2 = vcmask 1044480   ;;  %s4135_s1 = inlined_call_operand.vmem [shape: bf16[121,64], index: 1, kind: input, shape index: {}]   ;;  %s4136_s0 = inlined_call_operand.vmem [shape: bf16[1058,121], index: 0, kind: input, shape index: {}]   ;;  %s4137_s2 = inlined_call_operand.vmem [shape: f32[1,64], index: 2, kind: input, shape index: {}]   ;;  %s4138_s3 = inlined_call_operand.vmem [shape: bf16[1058,64], index: 3, kind: output, shape index: {}]  }
   0x1   :  { %2617 = vmatprep.subr.bf16.mxu0 %v2996_v0  ;;  %v2920_v1 = vld [vmem:[%s4135_s1] sm:$0xff]   ;;  %2901 = vmatprep.subr.bf16.mxu1 %v2996_v0  ;;  %v2921_v2 = vld [vmem:[%s4135_s1 + $0x8] sm:$0xff]   ;;  %v2922_v3 = vld [vmem:[%s4135_s1 + $0x10] sm:$0xff]   ;;  %v2998_v7 = vmov 65535   ;;  %vm551_vm3 = vcmask 990208   ;;  %vm1994_vm4 = vcmask 519168  }
   0x2   :  { %2618 = vmatpush3.bf16.msra.mxu0 %v2920_v1  ;;  %2909 = vmatpush3.bf16.msra.mxu1 %v2920_v1  ;;  %v2923_v4 = vld [vmem:[%s4135_s1 + $0x18] sm:$0xff]   ;;  %v2924_v5 = vld [vmem:[%s4135_s1 + $0x20] sm:$0xff]   ;;  %v2925_v6 = vld [vmem:[%s4135_s1 + $0x28] sm:$0xff]   ;;  %v755_v8 = vsel %vm753_vm1, 4294967295, %v2998_v7  ;;  %vm2127_vm5 = vcmask 516096  }
   0x3   :  { %2619 = vmatprep.subr.bf16.mxu0 %v2996_v0  ;;  %2902 = vmatprep.subr.bf16.mxu1 %v2996_v0  ;;  %v2926_v9 = vld [vmem:[%s4135_s1 + $0x30] sm:$0xff]   ;;  %v2927_v10 = vld [vmem:[%s4135_s1 + $0x38] sm:$0x1f]   ;;  %v756_v11 = vsel %vm754_vm2, %v755_v8, 0  ;;  %v2928_v13 = vld [vmem:[%s4136_s0] sm:$0xff]  }
   0x4   :  { %2633 = vmatprep.mubr.msk.bf16.mxu0 %vm2997_vm0, %v2996_v0  ;;  %2769 = vmatprep.mubr.msk.bf16.mxu1 %vm2997_vm0, %v2996_v0  ;;  %v758_v12 = vand.u32 %v2927_v10, %v756_v11  ;;  %v2929_v14 = vld [vmem:[%s4136_s0 + $0x110] sm:$0xff]   ;;  %v2930_v15 = vld [vmem:[%s4136_s0 + $0x8] sm:$0xff]   ;;  %v2931_v16 = vld [vmem:[%s4136_s0 + $0x118] sm:$0xff]  }
   0x5   :  { %v2932_v17 = vld [vmem:[%s4136_s0 + $0x10] sm:$0xff]   ;;  %v2933_v18 = vld [vmem:[%s4136_s0 + $0x120] sm:$0xff]   ;;  %v2934_v19 = vld [vmem:[%s4136_s0 + $0x18] sm:$0xff]  }
   0x6   :  { %2620 = vmatpush3.bf16.msra.mxu0 %v2921_v2  ;;  %2910 = vmatpush3.bf16.msra.mxu1 %v2921_v2  ;;  %v2935_v20 = vld [vmem:[%s4136_s0 + $0x128] sm:$0xff]   ;;  %v2936_v21 = vld [vmem:[%s4136_s0 + $0x20] sm:$0xff]   ;;  %v2937_v22 = vld [vmem:[%s4136_s0 + $0x130] sm:$0xff]  }
   0x7   :  { %2621 = vmatprep.subr.bf16.mxu0 %v2996_v0  ;;  %2903 = vmatprep.subr.bf16.mxu1 %v2996_v0  ;;  %v2938_v23 = vld [vmem:[%s4136_s0 + $0x28] sm:$0xff]   ;;  %v2939_v24 = vld [vmem:[%s4136_s0 + $0x138] sm:$0xff]   ;;  %v2940_v25 = vld [vmem:[%s4136_s0 + $0x30] sm:$0xff]  }
   0x8   :  { %v2941_v26 = vld [vmem:[%s4136_s0 + $0x140] sm:$0xff]   ;;  %v2942_v27 = vld [vmem:[%s4136_s0 + $0x38] sm:$0xff]   ;;  %v2943_v28 = vld [vmem:[%s4136_s0 + $0x148] sm:$0xff]  }
   0x9   :  { %v2944_v29 = vld [vmem:[%s4136_s0 + $0x40] sm:$0xff]   ;;  %v2945_v30 = vld [vmem:[%s4136_s0 + $0x150] sm:$0xff]   ;;  %v2946_v31 = vld [vmem:[%s4136_s0 + $0x48] sm:$0xff]  }
   0xa   :  { %2622 = vmatpush3.bf16.msra.mxu0 %v2922_v3  ;;  %2911 = vmatpush3.bf16.msra.mxu1 %v2922_v3  ;;  %v2947_v32 = vld [vmem:[%s4136_s0 + $0x158] sm:$0xff]   ;;  %v2948_v33 = vld [vmem:[%s4136_s0 + $0x50] sm:$0xff]   ;;  %v2949_v34 = vld [vmem:[%s4136_s0 + $0x160] sm:$0xff]  }
   0xb   :  { %2623 = vmatprep.subr.bf16.mxu0 %v2996_v0  ;;  %2904 = vmatprep.subr.bf16.mxu1 %v2996_v0  ;;  %v2950_v35 = vld [vmem:[%s4136_s0 + $0x58] sm:$0xff]   ;;  %v2951_v36 = vld [vmem:[%s4136_s0 + $0x168] sm:$0xff]   ;;  %v2952_v37 = vld [vmem:[%s4136_s0 + $0x60] sm:$0xff]  }
   0xc   :  { %v2953_v38 = vld [vmem:[%s4136_s0 + $0x170] sm:$0xff]   ;;  %v2954_v39 = vld [vmem:[%s4136_s0 + $0x68] sm:$0xff]   ;;  %v2955_v40 = vld [vmem:[%s4136_s0 + $0x178] sm:$0xff]  }
   0xd   :  { %v2956_v41 = vld [vmem:[%s4136_s0 + $0x70] sm:$0xff]   ;;  %v2957_v42 = vld [vmem:[%s4136_s0 + $0x180] sm:$0xff]   ;;  %v2958_v43 = vld [vmem:[%s4136_s0 + $0x78] sm:$0xff]  }
   0xe   :  { %2624 = vmatpush3.bf16.msra.mxu0 %v2923_v4  ;;  %2912 = vmatpush3.bf16.msra.mxu1 %v2923_v4  ;;  %v2959_v44 = vld [vmem:[%s4136_s0 + $0x188] sm:$0xff]   ;;  %v2960_v45 = vld [vmem:[%s4136_s0 + $0x80] sm:$0xff]   ;;  %v2961_v46 = vld [vmem:[%s4136_s0 + $0x190] sm:$0xff]  }
   0xf   :  { %2625 = vmatprep.subr.bf16.mxu0 %v2996_v0  ;;  %2905 = vmatprep.subr.bf16.mxu1 %v2996_v0  ;;  %v2962_v47 = vld [vmem:[%s4136_s0 + $0x88] sm:$0xff]   ;;  %v2963_v48 = vld [vmem:[%s4136_s0 + $0x198] sm:$0xff]   ;;  %v2964_v49 = vld [vmem:[%s4136_s0 + $0x90] sm:$0xff]  }
  0x10   :  { %v2965_v50 = vld [vmem:[%s4136_s0 + $0x1a0] sm:$0xff]   ;;  %v2966_v51 = vld [vmem:[%s4136_s0 + $0x98] sm:$0xff]   ;;  %v2967_v52 = vld [vmem:[%s4136_s0 + $0x1a8] sm:$0xff]  }
  0x11   :  { %v2968_v53 = vld [vmem:[%s4136_s0 + $0xa0] sm:$0xff]   ;;  %v2969_v54 = vld [vmem:[%s4136_s0 + $0x1b0] sm:$0xff]   ;;  %v2970_v55 = vld [vmem:[%s4136_s0 + $0xa8] sm:$0xff]  }
  0x12   :  { %2626 = vmatpush3.bf16.msra.mxu0 %v2924_v5  ;;  %2913 = vmatpush3.bf16.msra.mxu1 %v2924_v5  ;;  %v2971_v56 = vld [vmem:[%s4136_s0 + $0x1b8] sm:$0xff]   ;;  %v2972_v57 = vld [vmem:[%s4136_s0 + $0xb0] sm:$0xff]   ;;  %v2973_v58 = vld [vmem:[%s4136_s0 + $0x1c0] sm:$0xff]  }
  0x13   :  { %2627 = vmatprep.subr.bf16.mxu0 %v2996_v0  ;;  %2906 = vmatprep.subr.bf16.mxu1 %v2996_v0  ;;  %v2974_v59 = vld [vmem:[%s4136_s0 + $0xb8] sm:$0xff]   ;;  %v2975_v60 = vld [vmem:[%s4136_s0 + $0x1c8] sm:$0xff]   ;;  %v2976_v61 = vld [vmem:[%s4136_s0 + $0xc0] sm:$0xff]  }
  0x14   :  { %v2977_v62 = vld [vmem:[%s4136_s0 + $0x1d0] sm:$0xff]   ;;  %v2978_v63 = vld [vmem:[%s4136_s0 + $0xc8] sm:$0xff]   ;;  %v2979_v1 = vld [vmem:[%s4136_s0 + $0x1d8] sm:$0xff]  }
  0x15   :  { %v2980_v2 = vld [vmem:[%s4136_s0 + $0xd0] sm:$0xff]   ;;  %v2981_v3 = vld [vmem:[%s4136_s0 + $0x1e0] sm:$0xff]  }
  0x16   :  { %2628 = vmatpush3.bf16.msra.mxu0 %v2925_v6  ;;  %2914 = vmatpush3.bf16.msra.mxu1 %v2925_v6  ;;  %v3386_v4 = vld [vmem:[%s4137_s2] ss:$0 sm:$0xff] }
  0x17   :  { %2629 = vmatprep.subr.bf16.mxu0 %v2996_v0  ;;  %2907 = vmatprep.subr.bf16.mxu1 %v2996_v0 }
  0x1a   :  { %2630 = vmatpush3.bf16.msra.mxu0 %v2926_v9  ;;  %2915 = vmatpush3.bf16.msra.mxu1 %v2926_v9  ;;  %v2982_v9 = vld [vmem:[%s4136_s0 + $0xd8] sm:$0xff]  }
  0x1b   :  { %2631 = vmatprep.subr.bf16.mxu0 %v2996_v0  ;;  %2908 = vmatprep.subr.bf16.mxu1 %v2996_v0 }
  0x1e   :  { %2632 = vmatpush3.bf16.msra.mxu0 %v758_v12  ;;  %2916 = vmatpush3.bf16.msra.mxu1 %v758_v12  ;;  %v2983_v12 = vld [vmem:[%s4136_s0 + $0x1e8] sm:$0xff]  }
  0x21   :  { %2634 = vmatmul.mubr.msk.bf16.vlgmr.msra.gmra.mrb[0].mxu0 %vm551_vm3, %v2928_v13  ;;  %2770 = vmatmul.mubr.msk.bf16.vlgmr.msra.gmra.mrb[0].mxu1 %vm551_vm3, %v2929_v14 }
  0x22   :  { %2637 = vmatprep.mubr.msk.bf16.mxu0 %vm2997_vm0, %v2996_v0  ;;  %2773 = vmatprep.mubr.msk.bf16.mxu1 %vm2997_vm0, %v2996_v0 }
  0x29   :  { %2638 = vmatmul.mubr.msk.bf16.gmra.mrb[4].mxu0 %vm551_vm3, %v2930_v15  ;;  %2774 = vmatmul.mubr.msk.bf16.gmra.mrb[4].mxu1 %vm551_vm3, %v2931_v16 }
  0x2a   :  { %2641 = vmatprep.mubr.msk.bf16.mxu0 %vm2997_vm0, %v2996_v0  ;;  %2777 = vmatprep.mubr.msk.bf16.mxu1 %vm2997_vm0, %v2996_v0 }
  0x31   :  { %2642 = vmatmul.mubr.msk.bf16.gmra.mrb[8].mxu0 %vm551_vm3, %v2932_v17  ;;  %2778 = vmatmul.mubr.msk.bf16.gmra.mrb[8].mxu1 %vm551_vm3, %v2933_v18 }
  0x32   :  { %2645 = vmatprep.mubr.msk.bf16.mxu0 %vm2997_vm0, %v2996_v0  ;;  %2781 = vmatprep.mubr.msk.bf16.mxu1 %vm2997_vm0, %v2996_v0 }
  0x39   :  { %2646 = vmatmul.mubr.msk.bf16.gmra.mrb[12].mxu0 %vm551_vm3, %v2934_v19  ;;  %2782 = vmatmul.mubr.msk.bf16.gmra.mrb[12].mxu1 %vm551_vm3, %v2935_v20 }
  0x3a   :  { %2649 = vmatprep.mubr.msk.bf16.mxu0 %vm2997_vm0, %v2996_v0  ;;  %2785 = vmatprep.mubr.msk.bf16.mxu1 %vm2997_vm0, %v2996_v0 }
  0x41   :  { %2650 = vmatmul.mubr.msk.bf16.gmra.mrb[16].mxu0 %vm551_vm3, %v2936_v21  ;;  %2786 = vmatmul.mubr.msk.bf16.gmra.mrb[16].mxu1 %vm551_vm3, %v2937_v22 }
  0x42   :  { %2653 = vmatprep.mubr.msk.bf16.mxu0 %vm2997_vm0, %v2996_v0  ;;  %2789 = vmatprep.mubr.msk.bf16.mxu1 %vm2997_vm0, %v2996_v0 }
  0x49   :  { %2654 = vmatmul.mubr.msk.bf16.gmra.mrb[20].mxu0 %vm551_vm3, %v2938_v23  ;;  %2790 = vmatmul.mubr.msk.bf16.gmra.mrb[20].mxu1 %vm551_vm3, %v2939_v24 }
  0x4a   :  { %2657 = vmatprep.mubr.msk.bf16.mxu0 %vm2997_vm0, %v2996_v0  ;;  %2793 = vmatprep.mubr.msk.bf16.mxu1 %vm2997_vm0, %v2996_v0 }
  0x51   :  { %2658 = vmatmul.mubr.msk.bf16.gmra.mrb[24].mxu0 %vm551_vm3, %v2940_v25  ;;  %2794 = vmatmul.mubr.msk.bf16.gmra.mrb[24].mxu1 %vm551_vm3, %v2941_v26 }
  0x52   :  { %2661 = vmatprep.mubr.msk.bf16.mxu0 %vm2997_vm0, %v2996_v0  ;;  %2797 = vmatprep.mubr.msk.bf16.mxu1 %vm2997_vm0, %v2996_v0 }
  0x59   :  { %2662 = vmatmul.mubr.msk.bf16.gmra.mrb[28].mxu0 %vm551_vm3, %v2942_v27  ;;  %2798 = vmatmul.mubr.msk.bf16.gmra.mrb[28].mxu1 %vm551_vm3, %v2943_v28 }
  0x5a   :  { %2665 = vmatprep.mubr.msk.bf16.mxu0 %vm2997_vm0, %v2996_v0  ;;  %2801 = vmatprep.mubr.msk.bf16.mxu1 %vm2997_vm0, %v2996_v0 }
  0x61   :  { %2666 = vmatmul.mubr.msk.bf16.gmra.mrb[32].mxu0 %vm551_vm3, %v2944_v29  ;;  %2802 = vmatmul.mubr.msk.bf16.gmra.mrb[32].mxu1 %vm551_vm3, %v2945_v30 }
  0x62   :  { %2669 = vmatprep.mubr.msk.bf16.mxu0 %vm2997_vm0, %v2996_v0  ;;  %2805 = vmatprep.mubr.msk.bf16.mxu1 %vm2997_vm0, %v2996_v0 }
  0x69   :  { %2670 = vmatmul.mubr.msk.bf16.gmra.mrb[36].mxu0 %vm551_vm3, %v2946_v31  ;;  %2806 = vmatmul.mubr.msk.bf16.gmra.mrb[36].mxu1 %vm551_vm3, %v2947_v32  ;;  %v2984_v31 = vld [vmem:[%s4136_s0 + $0xe0] sm:$0xff]  }
  0x6a   :  { %2673 = vmatprep.mubr.msk.bf16.mxu0 %vm2997_vm0, %v2996_v0  ;;  %2809 = vmatprep.mubr.msk.bf16.mxu1 %vm2997_vm0, %v2996_v0 }
  0x71   :  { %2674 = vmatmul.mubr.msk.bf16.gmra.mrb[40].mxu0 %vm551_vm3, %v2948_v33  ;;  %2810 = vmatmul.mubr.msk.bf16.gmra.mrb[40].mxu1 %vm551_vm3, %v2949_v34  ;;  %v2985_v34 = vld [vmem:[%s4136_s0 + $0x1f0] sm:$0xff]  }
  0x72   :  { %2677 = vmatprep.mubr.msk.bf16.mxu0 %vm2997_vm0, %v2996_v0  ;;  %2813 = vmatprep.mubr.msk.bf16.mxu1 %vm2997_vm0, %v2996_v0 }
  0x79   :  { %2678 = vmatmul.mubr.msk.bf16.gmra.mrb[44].mxu0 %vm551_vm3, %v2950_v35  ;;  %2814 = vmatmul.mubr.msk.bf16.gmra.mrb[44].mxu1 %vm551_vm3, %v2951_v36 }
  0x7a   :  { %2681 = vmatprep.mubr.msk.bf16.mxu0 %vm2997_vm0, %v2996_v0  ;;  %2817 = vmatprep.mubr.msk.bf16.mxu1 %vm2997_vm0, %v2996_v0 }
  0x81   :  { %2682 = vmatmul.mubr.msk.bf16.gmra.mrb[48].mxu0 %vm551_vm3, %v2952_v37  ;;  %2818 = vmatmul.mubr.msk.bf16.gmra.mrb[48].mxu1 %vm551_vm3, %v2953_v38 }
  0x82   :  { %2685 = vmatprep.mubr.msk.bf16.mxu0 %vm2997_vm0, %v2996_v0  ;;  %2821 = vmatprep.mubr.msk.bf16.mxu1 %vm2997_vm0, %v2996_v0 }
  0x89   :  { %2686 = vmatmul.mubr.msk.bf16.gmra.mrb[52].mxu0 %vm551_vm3, %v2954_v39  ;;  %2822 = vmatmul.mubr.msk.bf16.gmra.mrb[52].mxu1 %vm551_vm3, %v2955_v40 }
  0x8a   :  { %2689 = vmatprep.mubr.msk.bf16.mxu0 %vm2997_vm0, %v2996_v0  ;;  %2825 = vmatprep.mubr.msk.bf16.mxu1 %vm2997_vm0, %v2996_v0 }
  0x91   :  { %2690 = vmatmul.mubr.msk.bf16.gmra.mrb[56].mxu0 %vm551_vm3, %v2956_v41  ;;  %2826 = vmatmul.mubr.msk.bf16.gmra.mrb[56].mxu1 %vm551_vm3, %v2957_v42 }
  0x92   :  { %2693 = vmatprep.mubr.msk.bf16.mxu0 %vm2997_vm0, %v2996_v0  ;;  %2829 = vmatprep.mubr.msk.bf16.mxu1 %vm2997_vm0, %v2996_v0 }
  0x99   :  { %2694 = vmatmul.mubr.msk.bf16.gmra.mrb[60].mxu0 %vm551_vm3, %v2958_v43  ;;  %2830 = vmatmul.mubr.msk.bf16.gmra.mrb[60].mxu1 %vm551_vm3, %v2959_v44 }
  0x9a   :  { %2697 = vmatprep.mubr.msk.bf16.mxu0 %vm2997_vm0, %v2996_v0  ;;  %2833 = vmatprep.mubr.msk.bf16.mxu1 %vm2997_vm0, %v2996_v0 }
  0xa1   :  { %2698 = vmatmul.mubr.msk.bf16.gmra.mrb[64].mxu0 %vm551_vm3, %v2960_v45  ;;  %2834 = vmatmul.mubr.msk.bf16.gmra.mrb[64].mxu1 %vm551_vm3, %v2961_v46 }
  0xa2   :  { %2701 = vmatprep.mubr.msk.bf16.mxu0 %vm2997_vm0, %v2996_v0  ;;  %2837 = vmatprep.mubr.msk.bf16.mxu1 %vm2997_vm0, %v2996_v0 }
  0xa9   :  { %2702 = vmatmul.mubr.msk.bf16.gmra.mrb[68].mxu0 %vm551_vm3, %v2962_v47  ;;  %2838 = vmatmul.mubr.msk.bf16.gmra.mrb[68].mxu1 %vm551_vm3, %v2963_v48 }
  0xaa   :  { %2705 = vmatprep.mubr.msk.bf16.mxu0 %vm2997_vm0, %v2996_v0  ;;  %2841 = vmatprep.mubr.msk.bf16.mxu1 %vm2997_vm0, %v2996_v0 }
  0xb1   :  { %2706 = vmatmul.mubr.msk.bf16.gmra.mrb[72].mxu0 %vm551_vm3, %v2964_v49  ;;  %2842 = vmatmul.mubr.msk.bf16.gmra.mrb[72].mxu1 %vm551_vm3, %v2965_v50 }
  0xb2   :  { %2709 = vmatprep.mubr.msk.bf16.mxu0 %vm2997_vm0, %v2996_v0  ;;  %2845 = vmatprep.mubr.msk.bf16.mxu1 %vm2997_vm0, %v2996_v0 }
  0xb9   :  { %2710 = vmatmul.mubr.msk.bf16.gmra.mrb[76].mxu0 %vm551_vm3, %v2966_v51  ;;  %2846 = vmatmul.mubr.msk.bf16.gmra.mrb[76].mxu1 %vm551_vm3, %v2967_v52 }
  0xba   :  { %2713 = vmatprep.mubr.msk.bf16.mxu0 %vm2997_vm0, %v2996_v0  ;;  %2849 = vmatprep.mubr.msk.bf16.mxu1 %vm2997_vm0, %v2996_v0 }
  0xc1   :  { %2714 = vmatmul.mubr.msk.bf16.gmra.mrb[80].mxu0 %vm551_vm3, %v2968_v53  ;;  %2850 = vmatmul.mubr.msk.bf16.gmra.mrb[80].mxu1 %vm551_vm3, %v2969_v54  ;;  %v2986_v53 = vld [vmem:[%s4136_s0 + $0xe8] sm:$0xff]  }
  0xc2   :  { %2717 = vmatprep.mubr.msk.bf16.mxu0 %vm2997_vm0, %v2996_v0  ;;  %2853 = vmatprep.mubr.msk.bf16.mxu1 %vm2997_vm0, %v2996_v0 }
  0xc9   :  { %2718 = vmatmul.mubr.msk.bf16.gmra.mrb[84].mxu0 %vm551_vm3, %v2970_v55  ;;  %2854 = vmatmul.mubr.msk.bf16.gmra.mrb[84].mxu1 %vm551_vm3, %v2971_v56  ;;  %v2987_v56 = vld [vmem:[%s4136_s0 + $0x1f8] sm:$0xff]  }
  0xca   :  { %2721 = vmatprep.mubr.msk.bf16.mxu0 %vm2997_vm0, %v2996_v0  ;;  %2857 = vmatprep.mubr.msk.bf16.mxu1 %vm2997_vm0, %v2996_v0 }
  0xd1   :  { %2722 = vmatmul.mubr.msk.bf16.gmra.mrb[88].mxu0 %vm551_vm3, %v2972_v57  ;;  %2858 = vmatmul.mubr.msk.bf16.gmra.mrb[88].mxu1 %vm551_vm3, %v2973_v58 }
  0xd2   :  { %2725 = vmatprep.mubr.msk.bf16.mxu0 %vm2997_vm0, %v2996_v0  ;;  %2861 = vmatprep.mubr.msk.bf16.mxu1 %vm2997_vm0, %v2996_v0 }
  0xd9   :  { %2726 = vmatmul.mubr.msk.bf16.gmra.mrb[92].mxu0 %vm551_vm3, %v2974_v59  ;;  %2862 = vmatmul.mubr.msk.bf16.gmra.mrb[92].mxu1 %vm551_vm3, %v2975_v60 }
  0xda   :  { %2729 = vmatprep.mubr.msk.bf16.mxu0 %vm2997_vm0, %v2996_v0  ;;  %2865 = vmatprep.mubr.msk.bf16.mxu1 %vm2997_vm0, %v2996_v0 }
  0xe1   :  { %2730 = vmatmul.mubr.msk.bf16.gmra.mrb[96].mxu0 %vm551_vm3, %v2976_v61  ;;  %2866 = vmatmul.mubr.msk.bf16.gmra.mrb[96].mxu1 %vm551_vm3, %v2977_v62 }
  0xe2   :  { %2733 = vmatprep.mubr.msk.bf16.mxu0 %vm2997_vm0, %v2996_v0  ;;  %2869 = vmatprep.mubr.msk.bf16.mxu1 %vm2997_vm0, %v2996_v0 }
  0xe9   :  { %2734 = vmatmul.mubr.msk.bf16.gmra.mrb[100].mxu0 %vm551_vm3, %v2978_v63  ;;  %2870 = vmatmul.mubr.msk.bf16.gmra.mrb[100].mxu1 %vm551_vm3, %v2979_v1 }
  0xea   :  { %2737 = vmatprep.mubr.msk.bf16.mxu0 %vm2997_vm0, %v2996_v0  ;;  %2873 = vmatprep.mubr.msk.bf16.mxu1 %vm2997_vm0, %v2996_v0 }
  0xf1   :  { %2738 = vmatmul.mubr.msk.bf16.gmra.mrb[104].mxu0 %vm551_vm3, %v2980_v2  ;;  %2874 = vmatmul.mubr.msk.bf16.gmra.mrb[104].mxu1 %vm551_vm3, %v2981_v3 }
  0xf2   :  { %2741 = vmatprep.mubr.msk.bf16.mxu0 %vm2997_vm0, %v2996_v0  ;;  %2877 = vmatprep.mubr.msk.bf16.mxu1 %vm2997_vm0, %v2996_v0 }
  0xf4   :  { %v794_v5 = vpop.f32.mrb[0].mxu0  ;;  %v1066_v6 = vpop.f32.mrb[0].mxu1 }
  0xf5   :  { %v795_v7 = vadd.f32 %v3386_v4, %v794_v5  ;;  %v2635_v8 = vpop.f32.mrb[1].mxu0  ;;  %v1067_v10 = vadd.f32 %v3386_v4, %v1066_v6  ;;  %v2771_v11 = vpop.f32.mrb[1].mxu1 }
  0xf6   :  { %v797_v13 = vpop.f32.mrb[2].mxu0  ;;  %v1069_v14 = vpop.f32.mrb[2].mxu1 }
  0xf7   :  { %v1328_v15 = vmax.f32 %v795_v7, 0.0  ;;  %v798_v16 = vadd.f32 %v3386_v4, %v797_v13  ;;  %v2636_v17 = vpop.f32.mrb[3].mxu0  ;;  %v1396_v18 = vmax.f32 %v1067_v10, 0.0  ;;  %v1070_v19 = vadd.f32 %v3386_v4, %v1069_v14  ;;  %v2772_v20 = vpop.f32.mrb[3].mxu1  ;;  %v2988_v13 = vld [vmem:[%s4136_s0 + $0xf0] sm:$0xff]  }
  0xf9   :  { %v2409_v21 = vpack.c.bf16 %v1328_v15, %v1328_v15  ;;  %v1329_v22 = vmax.f32 %v798_v16, 0.0  ;;  %2742 = vmatmul.mubr.msk.bf16.gmra.mrb[108].mxu0 %vm551_vm3, %v2982_v9  ;;  %v2477_v23 = vpack.c.bf16 %v1396_v18, %v1396_v18  ;;  %v1397_v24 = vmax.f32 %v1070_v19, 0.0  ;;  %2878 = vmatmul.mubr.msk.bf16.gmra.mrb[108].mxu1 %vm551_vm3, %v2983_v12  ;;  %v2989_v16 = vld [vmem:[%s4136_s0 + $0x200] sm:$0xff]  }
  0xfa   :  { %2745 = vmatprep.mubr.msk.bf16.mxu0 %vm2997_vm0, %v2996_v0  ;;  %2881 = vmatprep.mubr.msk.bf16.mxu1 %vm2997_vm0, %v2996_v0 }
  0xfb   :  { %1995 = vst.msk [vmem:[%s4138_s3] sm:$0xf] %vm1994_vm4, %v2409_v21  ;;  %v2410_v25 = vpack.c.bf16 %v1329_v22, %v1329_v22  ;;  %2063 = vst.msk [vmem:[%s4138_s3 + $0x110] sm:$0xf] %vm1994_vm4, %v2477_v23  ;;  %v2478_v26 = vpack.c.bf16 %v1397_v24, %v1397_v24 }
  0xfc   :  { %v802_v27 = vpop.f32.mrb[4].mxu0  ;;  %v1074_v28 = vpop.f32.mrb[4].mxu1 }
  0xfd   :  { %1996 = vst.msk [vmem:[%s4138_s3 + $0x4] sm:$0xf] %vm1994_vm4, %v2410_v25  ;;  %v803_v29 = vadd.f32 %v3386_v4, %v802_v27  ;;  %v2639_v30 = vpop.f32.mrb[5].mxu0  ;;  %2064 = vst.msk [vmem:[%s4138_s3 + $0x114] sm:$0xf] %vm1994_vm4, %v2478_v26  ;;  %v1075_v32 = vadd.f32 %v3386_v4, %v1074_v28  ;;  %v2775_v33 = vpop.f32.mrb[5].mxu1 }
  0xfe   :  { %v805_v35 = vpop.f32.mrb[6].mxu0  ;;  %v1077_v36 = vpop.f32.mrb[6].mxu1 }
  0xff   :  { %v1330_v37 = vmax.f32 %v803_v29, 0.0  ;;  %v806_v38 = vadd.f32 %v3386_v4, %v805_v35  ;;  %v2640_v39 = vpop.f32.mrb[7].mxu0  ;;  %v1398_v40 = vmax.f32 %v1075_v32, 0.0  ;;  %v1078_v41 = vadd.f32 %v3386_v4, %v1077_v36  ;;  %v2776_v42 = vpop.f32.mrb[7].mxu1  ;;  %v2990_v35 = vld [vmem:[%s4136_s0 + $0xf8] sm:$0xff]  }
 0x101   :  { %v2411_v43 = vpack.c.bf16 %v1330_v37, %v1330_v37  ;;  %v1331_v44 = vmax.f32 %v806_v38, 0.0  ;;  %2746 = vmatmul.mubr.msk.bf16.gmra.mrb[112].mxu0 %vm551_vm3, %v2984_v31  ;;  %v2479_v45 = vpack.c.bf16 %v1398_v40, %v1398_v40  ;;  %v1399_v46 = vmax.f32 %v1078_v41, 0.0  ;;  %2882 = vmatmul.mubr.msk.bf16.gmra.mrb[112].mxu1 %vm551_vm3, %v2985_v34  ;;  %v2991_v38 = vld [vmem:[%s4136_s0 + $0x208] sm:$0xff]  }
 0x102   :  { %2749 = vmatprep.mubr.msk.bf16.mxu0 %vm2997_vm0, %v2996_v0  ;;  %2885 = vmatprep.mubr.msk.bf16.mxu1 %vm2997_vm0, %v2996_v0 }
 0x103   :  { %1997 = vst.msk [vmem:[%s4138_s3 + $0x8] sm:$0xf] %vm1994_vm4, %v2411_v43  ;;  %v2412_v47 = vpack.c.bf16 %v1331_v44, %v1331_v44  ;;  %2065 = vst.msk [vmem:[%s4138_s3 + $0x118] sm:$0xf] %vm1994_vm4, %v2479_v45  ;;  %v2480_v48 = vpack.c.bf16 %v1399_v46, %v1399_v46 }
 0x104   :  { %v810_v49 = vpop.f32.mrb[8].mxu0  ;;  %v1082_v50 = vpop.f32.mrb[8].mxu1 }
 0x105   :  { %1998 = vst.msk [vmem:[%s4138_s3 + $0xc] sm:$0xf] %vm1994_vm4, %v2412_v47  ;;  %v811_v51 = vadd.f32 %v3386_v4, %v810_v49  ;;  %v2643_v52 = vpop.f32.mrb[9].mxu0  ;;  %2066 = vst.msk [vmem:[%s4138_s3 + $0x11c] sm:$0xf] %vm1994_vm4, %v2480_v48  ;;  %v1083_v54 = vadd.f32 %v3386_v4, %v1082_v50  ;;  %v2779_v55 = vpop.f32.mrb[9].mxu1 }
 0x106   :  { %v813_v57 = vpop.f32.mrb[10].mxu0  ;;  %v1085_v58 = vpop.f32.mrb[10].mxu1 }
 0x107   :  { %v1332_v59 = vmax.f32 %v811_v51, 0.0  ;;  %v814_v60 = vadd.f32 %v3386_v4, %v813_v57  ;;  %v2644_v61 = vpop.f32.mrb[11].mxu0  ;;  %v1400_v62 = vmax.f32 %v1083_v54, 0.0  ;;  %v1086_v63 = vadd.f32 %v3386_v4, %v1085_v58  ;;  %v2780_v1 = vpop.f32.mrb[11].mxu1  ;;  %v2992_v57 = vld [vmem:[%s4136_s0 + $0x100] sm:$0xff]  }
 0x109   :  { %v2413_v2 = vpack.c.bf16 %v1332_v59, %v1332_v59  ;;  %v1333_v3 = vmax.f32 %v814_v60, 0.0  ;;  %2750 = vmatmul.mubr.msk.bf16.gmra.mrb[116].mxu0 %vm551_vm3, %v2986_v53  ;;  %v2481_v5 = vpack.c.bf16 %v1400_v62, %v1400_v62  ;;  %v1401_v6 = vmax.f32 %v1086_v63, 0.0  ;;  %2886 = vmatmul.mubr.msk.bf16.gmra.mrb[116].mxu1 %vm551_vm3, %v2987_v56  ;;  %v2993_v60 = vld [vmem:[%s4136_s0 + $0x210] ss:$0 sps:$4 sm:$0x11]  }
 0x10a   :  { %2753 = vmatprep.mubr.msk.bf16.mxu0 %vm2997_vm0, %v2996_v0  ;;  %2889 = vmatprep.mubr.msk.bf16.mxu1 %vm2997_vm0, %v2996_v0 }
 0x10b   :  { %1999 = vst.msk [vmem:[%s4138_s3 + $0x10] sm:$0xf] %vm1994_vm4, %v2413_v2  ;;  %v2414_v7 = vpack.c.bf16 %v1333_v3, %v1333_v3  ;;  %2067 = vst.msk [vmem:[%s4138_s3 + $0x120] sm:$0xf] %vm1994_vm4, %v2481_v5  ;;  %v2482_v8 = vpack.c.bf16 %v1401_v6, %v1401_v6 }
 0x10c   :  { %v818_v9 = vpop.f32.mrb[12].mxu0  ;;  %v1090_v10 = vpop.f32.mrb[12].mxu1 }
 0x10d   :  { %2000 = vst.msk [vmem:[%s4138_s3 + $0x14] sm:$0xf] %vm1994_vm4, %v2414_v7  ;;  %v819_v11 = vadd.f32 %v3386_v4, %v818_v9  ;;  %v2647_v12 = vpop.f32.mrb[13].mxu0  ;;  %2068 = vst.msk [vmem:[%s4138_s3 + $0x124] sm:$0xf] %vm1994_vm4, %v2482_v8  ;;  %v1091_v14 = vadd.f32 %v3386_v4, %v1090_v10  ;;  %v2783_v15 = vpop.f32.mrb[13].mxu1 }
 0x10e   :  { %v821_v17 = vpop.f32.mrb[14].mxu0  ;;  %v1093_v18 = vpop.f32.mrb[14].mxu1 }
 0x10f   :  { %v1334_v19 = vmax.f32 %v819_v11, 0.0  ;;  %v822_v20 = vadd.f32 %v3386_v4, %v821_v17  ;;  %v2648_v21 = vpop.f32.mrb[15].mxu0  ;;  %v1402_v22 = vmax.f32 %v1091_v14, 0.0  ;;  %v1094_v23 = vadd.f32 %v3386_v4, %v1093_v18  ;;  %v2784_v24 = vpop.f32.mrb[15].mxu1 }
 0x111   :  { %v2415_v25 = vpack.c.bf16 %v1334_v19, %v1334_v19  ;;  %v1335_v26 = vmax.f32 %v822_v20, 0.0  ;;  %2754 = vmatmul.mubr.msk.bf16.gmra.mrb[120].mxu0 %vm551_vm3, %v2988_v13  ;;  %v2483_v27 = vpack.c.bf16 %v1402_v22, %v1402_v22  ;;  %v1403_v28 = vmax.f32 %v1094_v23, 0.0  ;;  %2890 = vmatmul.mubr.msk.bf16.gmra.mrb[120].mxu1 %vm551_vm3, %v2989_v16  ;;  %v2994_v16 = vld [vmem:[%s4136_s0 + $0x108] sm:$0xff]  }
 0x112   :  { %2757 = vmatprep.mubr.msk.bf16.mxu0 %vm2997_vm0, %v2996_v0  ;;  %2893 = vmatprep.mubr.msk.bf16.mxu1 %vm2997_vm0, %v2996_v0 }
 0x113   :  { %2001 = vst.msk [vmem:[%s4138_s3 + $0x18] sm:$0xf] %vm1994_vm4, %v2415_v25  ;;  %v2416_v29 = vpack.c.bf16 %v1335_v26, %v1335_v26  ;;  %2069 = vst.msk [vmem:[%s4138_s3 + $0x128] sm:$0xf] %vm1994_vm4, %v2483_v27  ;;  %v2484_v30 = vpack.c.bf16 %v1403_v28, %v1403_v28 }
 0x114   :  { %v826_v31 = vpop.f32.mrb[16].mxu0  ;;  %v1098_v32 = vpop.f32.mrb[16].mxu1 }
 0x115   :  { %2002 = vst.msk [vmem:[%s4138_s3 + $0x1c] sm:$0xf] %vm1994_vm4, %v2416_v29  ;;  %v827_v33 = vadd.f32 %v3386_v4, %v826_v31  ;;  %v2651_v34 = vpop.f32.mrb[17].mxu0  ;;  %2070 = vst.msk [vmem:[%s4138_s3 + $0x12c] sm:$0xf] %vm1994_vm4, %v2484_v30  ;;  %v1099_v36 = vadd.f32 %v3386_v4, %v1098_v32  ;;  %v2787_v37 = vpop.f32.mrb[17].mxu1 }
 0x116   :  { %v829_v39 = vpop.f32.mrb[18].mxu0  ;;  %v1101_v40 = vpop.f32.mrb[18].mxu1 }
 0x117   :  { %v1336_v41 = vmax.f32 %v827_v33, 0.0  ;;  %v830_v42 = vadd.f32 %v3386_v4, %v829_v39  ;;  %v2652_v43 = vpop.f32.mrb[19].mxu0  ;;  %v1404_v44 = vmax.f32 %v1099_v36, 0.0  ;;  %v1102_v45 = vadd.f32 %v3386_v4, %v1101_v40  ;;  %v2788_v46 = vpop.f32.mrb[19].mxu1 }
 0x119   :  { %v2417_v47 = vpack.c.bf16 %v1336_v41, %v1336_v41  ;;  %v1337_v48 = vmax.f32 %v830_v42, 0.0  ;;  %2758 = vmatmul.mubr.msk.bf16.gmra.mrb[124].mxu0 %vm551_vm3, %v2990_v35  ;;  %v2485_v49 = vpack.c.bf16 %v1404_v44, %v1404_v44  ;;  %v1405_v50 = vmax.f32 %v1102_v45, 0.0  ;;  %2894 = vmatmul.mubr.msk.bf16.gmra.mrb[124].mxu1 %vm551_vm3, %v2991_v38 }
 0x11a   :  { %2761 = vmatprep.mubr.msk.bf16.mxu0 %vm2997_vm0, %v2996_v0  ;;  %2897 = vmatprep.mubr.msk.bf16.mxu1 %vm2997_vm0, %v2996_v0 }
 0x11b   :  { %2003 = vst.msk [vmem:[%s4138_s3 + $0x20] sm:$0xf] %vm1994_vm4, %v2417_v47  ;;  %v2418_v51 = vpack.c.bf16 %v1337_v48, %v1337_v48  ;;  %2071 = vst.msk [vmem:[%s4138_s3 + $0x130] sm:$0xf] %vm1994_vm4, %v2485_v49  ;;  %v2486_v52 = vpack.c.bf16 %v1405_v50, %v1405_v50 }
 0x11c   :  { %v834_v53 = vpop.f32.mrb[20].mxu0  ;;  %v1106_v54 = vpop.f32.mrb[20].mxu1 }
 0x11d   :  { %2004 = vst.msk [vmem:[%s4138_s3 + $0x24] sm:$0xf] %vm1994_vm4, %v2418_v51  ;;  %v835_v55 = vadd.f32 %v3386_v4, %v834_v53  ;;  %v2655_v56 = vpop.f32.mrb[21].mxu0  ;;  %2072 = vst.msk [vmem:[%s4138_s3 + $0x134] sm:$0xf] %vm1994_vm4, %v2486_v52  ;;  %v1107_v58 = vadd.f32 %v3386_v4, %v1106_v54  ;;  %v2791_v59 = vpop.f32.mrb[21].mxu1 }
 0x11e   :  { %v837_v61 = vpop.f32.mrb[22].mxu0  ;;  %v1109_v62 = vpop.f32.mrb[22].mxu1 }
 0x11f   :  { %v1338_v63 = vmax.f32 %v835_v55, 0.0  ;;  %v838_v1 = vadd.f32 %v3386_v4, %v837_v61  ;;  %v2656_v2 = vpop.f32.mrb[23].mxu0  ;;  %v1406_v3 = vmax.f32 %v1107_v58, 0.0  ;;  %v1110_v5 = vadd.f32 %v3386_v4, %v1109_v62  ;;  %v2792_v6 = vpop.f32.mrb[23].mxu1 }
 0x121   :  { %v2419_v7 = vpack.c.bf16 %v1338_v63, %v1338_v63  ;;  %v1339_v8 = vmax.f32 %v838_v1, 0.0  ;;  %2762 = vmatmul.mubr.msk.bf16.gmra.mrb[128].mxu0 %vm551_vm3, %v2992_v57  ;;  %v2487_v9 = vpack.c.bf16 %v1406_v3, %v1406_v3  ;;  %v1407_v10 = vmax.f32 %v1110_v5, 0.0  ;;  %2898 = vmatmul.mubr.msk.bf16.gmra.mrb[128].mxu1 %vm551_vm3, %v2993_v60 }
 0x122   :  { %2765 = vmatprep.mubr.msk.bf16.mxu0 %vm2997_vm0, %v2996_v0 }
 0x123   :  { %2005 = vst.msk [vmem:[%s4138_s3 + $0x28] sm:$0xf] %vm1994_vm4, %v2419_v7  ;;  %v2420_v11 = vpack.c.bf16 %v1339_v8, %v1339_v8  ;;  %2073 = vst.msk [vmem:[%s4138_s3 + $0x138] sm:$0xf] %vm1994_vm4, %v2487_v9  ;;  %v2488_v12 = vpack.c.bf16 %v1407_v10, %v1407_v10 }
 0x124   :  { %v842_v13 = vpop.f32.mrb[24].mxu0  ;;  %v1114_v14 = vpop.f32.mrb[24].mxu1 }
 0x125   :  { %2006 = vst.msk [vmem:[%s4138_s3 + $0x2c] sm:$0xf] %vm1994_vm4, %v2420_v11  ;;  %v843_v0 = vadd.f32 %v3386_v4, %v842_v13  ;;  %v2659_v15 = vpop.f32.mrb[25].mxu0  ;;  %2074 = vst.msk [vmem:[%s4138_s3 + $0x13c] sm:$0xf] %vm1994_vm4, %v2488_v12  ;;  %v1115_v17 = vadd.f32 %v3386_v4, %v1114_v14  ;;  %v2795_v18 = vpop.f32.mrb[25].mxu1 }
 0x126   :  { %v845_v19 = vpop.f32.mrb[26].mxu0  ;;  %v1117_v20 = vpop.f32.mrb[26].mxu1 }
 0x127   :  { %v1340_v21 = vmax.f32 %v843_v0, 0.0  ;;  %v846_v22 = vadd.f32 %v3386_v4, %v845_v19  ;;  %v2660_v23 = vpop.f32.mrb[27].mxu0  ;;  %v1408_v24 = vmax.f32 %v1115_v17, 0.0  ;;  %v1118_v25 = vadd.f32 %v3386_v4, %v1117_v20  ;;  %v2796_v26 = vpop.f32.mrb[27].mxu1 }
 0x129   :  { %v2421_v27 = vpack.c.bf16 %v1340_v21, %v1340_v21  ;;  %v1341_v28 = vmax.f32 %v846_v22, 0.0  ;;  %2766 = vmatmul.mubr.msk.bf16.gmra.mrb[132].mxu0 %vm551_vm3, %v2994_v16  ;;  %v2489_v29 = vpack.c.bf16 %v1408_v24, %v1408_v24  ;;  %v1409_v30 = vmax.f32 %v1118_v25, 0.0 }
 0x12b   :  { %2007 = vst.msk [vmem:[%s4138_s3 + $0x30] sm:$0xf] %vm1994_vm4, %v2421_v27  ;;  %v2422_v31 = vpack.c.bf16 %v1341_v28, %v1341_v28  ;;  %2075 = vst.msk [vmem:[%s4138_s3 + $0x140] sm:$0xf] %vm1994_vm4, %v2489_v29  ;;  %v2490_v32 = vpack.c.bf16 %v1409_v30, %v1409_v30 }
 0x12c   :  { %v850_v33 = vpop.f32.mrb[28].mxu0  ;;  %v1122_v34 = vpop.f32.mrb[28].mxu1 }
 0x12d   :  { %2008 = vst.msk [vmem:[%s4138_s3 + $0x34] sm:$0xf] %vm1994_vm4, %v2422_v31  ;;  %v851_v35 = vadd.f32 %v3386_v4, %v850_v33  ;;  %v2663_v36 = vpop.f32.mrb[29].mxu0  ;;  %2076 = vst.msk [vmem:[%s4138_s3 + $0x144] sm:$0xf] %vm1994_vm4, %v2490_v32  ;;  %v1123_v37 = vadd.f32 %v3386_v4, %v1122_v34  ;;  %v2799_v38 = vpop.f32.mrb[29].mxu1 }
 0x12e   :  { %v853_v39 = vpop.f32.mrb[30].mxu0  ;;  %v1125_v40 = vpop.f32.mrb[30].mxu1 }
 0x12f   :  { %v1342_v41 = vmax.f32 %v851_v35, 0.0  ;;  %v854_v42 = vadd.f32 %v3386_v4, %v853_v39  ;;  %v2664_v43 = vpop.f32.mrb[31].mxu0  ;;  %v1410_v44 = vmax.f32 %v1123_v37, 0.0  ;;  %v1126_v45 = vadd.f32 %v3386_v4, %v1125_v40  ;;  %v2800_v46 = vpop.f32.mrb[31].mxu1 }
 0x131   :  { %v2423_v47 = vpack.c.bf16 %v1342_v41, %v1342_v41  ;;  %v1343_v48 = vmax.f32 %v854_v42, 0.0  ;;  %v2491_v49 = vpack.c.bf16 %v1410_v44, %v1410_v44  ;;  %v1411_v50 = vmax.f32 %v1126_v45, 0.0 }
 0x133   :  { %2009 = vst.msk [vmem:[%s4138_s3 + $0x38] sm:$0xf] %vm1994_vm4, %v2423_v47  ;;  %v2424_v51 = vpack.c.bf16 %v1343_v48, %v1343_v48  ;;  %2077 = vst.msk [vmem:[%s4138_s3 + $0x148] sm:$0xf] %vm1994_vm4, %v2491_v49  ;;  %v2492_v52 = vpack.c.bf16 %v1411_v50, %v1411_v50 }
 0x134   :  { %v858_v53 = vpop.f32.mrb[32].mxu0  ;;  %v1130_v54 = vpop.f32.mrb[32].mxu1 }
 0x135   :  { %2010 = vst.msk [vmem:[%s4138_s3 + $0x3c] sm:$0xf] %vm1994_vm4, %v2424_v51  ;;  %v859_v55 = vadd.f32 %v3386_v4, %v858_v53  ;;  %v2667_v56 = vpop.f32.mrb[33].mxu0  ;;  %2078 = vst.msk [vmem:[%s4138_s3 + $0x14c] sm:$0xf] %vm1994_vm4, %v2492_v52  ;;  %v1131_v57 = vadd.f32 %v3386_v4, %v1130_v54  ;;  %v2803_v58 = vpop.f32.mrb[33].mxu1 }
 0x136   :  { %v861_v59 = vpop.f32.mrb[34].mxu0  ;;  %v1133_v60 = vpop.f32.mrb[34].mxu1 }
 0x137   :  { %v1344_v61 = vmax.f32 %v859_v55, 0.0  ;;  %v862_v62 = vadd.f32 %v3386_v4, %v861_v59  ;;  %v2668_v63 = vpop.f32.mrb[35].mxu0  ;;  %v1412_v1 = vmax.f32 %v1131_v57, 0.0  ;;  %v1134_v2 = vadd.f32 %v3386_v4, %v1133_v60  ;;  %v2804_v3 = vpop.f32.mrb[35].mxu1 }
 0x139   :  { %v2425_v5 = vpack.c.bf16 %v1344_v61, %v1344_v61  ;;  %v1345_v6 = vmax.f32 %v862_v62, 0.0  ;;  %v2493_v7 = vpack.c.bf16 %v1412_v1, %v1412_v1  ;;  %v1413_v8 = vmax.f32 %v1134_v2, 0.0 }
 0x13b   :  { %2011 = vst.msk [vmem:[%s4138_s3 + $0x40] sm:$0xf] %vm1994_vm4, %v2425_v5  ;;  %v2426_v9 = vpack.c.bf16 %v1345_v6, %v1345_v6  ;;  %2079 = vst.msk [vmem:[%s4138_s3 + $0x150] sm:$0xf] %vm1994_vm4, %v2493_v7  ;;  %v2494_v10 = vpack.c.bf16 %v1413_v8, %v1413_v8 }
 0x13c   :  { %v866_v11 = vpop.f32.mrb[36].mxu0  ;;  %v1138_v12 = vpop.f32.mrb[36].mxu1 }
 0x13d   :  { %2012 = vst.msk [vmem:[%s4138_s3 + $0x44] sm:$0xf] %vm1994_vm4, %v2426_v9  ;;  %v867_v13 = vadd.f32 %v3386_v4, %v866_v11  ;;  %v2671_v14 = vpop.f32.mrb[37].mxu0  ;;  %2080 = vst.msk [vmem:[%s4138_s3 + $0x154] sm:$0xf] %vm1994_vm4, %v2494_v10  ;;  %v1139_v0 = vadd.f32 %v3386_v4, %v1138_v12  ;;  %v2807_v15 = vpop.f32.mrb[37].mxu1 }
 0x13e   :  { %v869_v16 = vpop.f32.mrb[38].mxu0  ;;  %v1141_v17 = vpop.f32.mrb[38].mxu1 }
 0x13f   :  { %v1346_v18 = vmax.f32 %v867_v13, 0.0  ;;  %v870_v19 = vadd.f32 %v3386_v4, %v869_v16  ;;  %v2672_v20 = vpop.f32.mrb[39].mxu0  ;;  %v1414_v21 = vmax.f32 %v1139_v0, 0.0  ;;  %v1142_v22 = vadd.f32 %v3386_v4, %v1141_v17  ;;  %v2808_v23 = vpop.f32.mrb[39].mxu1 }
 0x141   :  { %v2427_v24 = vpack.c.bf16 %v1346_v18, %v1346_v18  ;;  %v1347_v25 = vmax.f32 %v870_v19, 0.0  ;;  %v2495_v26 = vpack.c.bf16 %v1414_v21, %v1414_v21  ;;  %v1415_v27 = vmax.f32 %v1142_v22, 0.0 }
 0x143   :  { %2013 = vst.msk [vmem:[%s4138_s3 + $0x48] sm:$0xf] %vm1994_vm4, %v2427_v24  ;;  %v2428_v28 = vpack.c.bf16 %v1347_v25, %v1347_v25  ;;  %2081 = vst.msk [vmem:[%s4138_s3 + $0x158] sm:$0xf] %vm1994_vm4, %v2495_v26  ;;  %v2496_v29 = vpack.c.bf16 %v1415_v27, %v1415_v27 }
 0x144   :  { %v874_v30 = vpop.f32.mrb[40].mxu0  ;;  %v1146_v31 = vpop.f32.mrb[40].mxu1 }
 0x145   :  { %2014 = vst.msk [vmem:[%s4138_s3 + $0x4c] sm:$0xf] %vm1994_vm4, %v2428_v28  ;;  %v875_v32 = vadd.f32 %v3386_v4, %v874_v30  ;;  %v2675_v33 = vpop.f32.mrb[41].mxu0  ;;  %2082 = vst.msk [vmem:[%s4138_s3 + $0x15c] sm:$0xf] %vm1994_vm4, %v2496_v29  ;;  %v1147_v34 = vadd.f32 %v3386_v4, %v1146_v31  ;;  %v2811_v35 = vpop.f32.mrb[41].mxu1 }
 0x146   :  { %v877_v36 = vpop.f32.mrb[42].mxu0  ;;  %v1149_v37 = vpop.f32.mrb[42].mxu1 }
 0x147   :  { %v1348_v38 = vmax.f32 %v875_v32, 0.0  ;;  %v878_v39 = vadd.f32 %v3386_v4, %v877_v36  ;;  %v2676_v40 = vpop.f32.mrb[43].mxu0  ;;  %v1416_v41 = vmax.f32 %v1147_v34, 0.0  ;;  %v1150_v42 = vadd.f32 %v3386_v4, %v1149_v37  ;;  %v2812_v43 = vpop.f32.mrb[43].mxu1 }
 0x149   :  { %v2429_v44 = vpack.c.bf16 %v1348_v38, %v1348_v38  ;;  %v1349_v45 = vmax.f32 %v878_v39, 0.0  ;;  %v2497_v46 = vpack.c.bf16 %v1416_v41, %v1416_v41  ;;  %v1417_v47 = vmax.f32 %v1150_v42, 0.0 }
 0x14b   :  { %2015 = vst.msk [vmem:[%s4138_s3 + $0x50] sm:$0xf] %vm1994_vm4, %v2429_v44  ;;  %v2430_v48 = vpack.c.bf16 %v1349_v45, %v1349_v45  ;;  %2083 = vst.msk [vmem:[%s4138_s3 + $0x160] sm:$0xf] %vm1994_vm4, %v2497_v46  ;;  %v2498_v49 = vpack.c.bf16 %v1417_v47, %v1417_v47 }
 0x14c   :  { %v882_v50 = vpop.f32.mrb[44].mxu0  ;;  %v1154_v51 = vpop.f32.mrb[44].mxu1 }
 0x14d   :  { %2016 = vst.msk [vmem:[%s4138_s3 + $0x54] sm:$0xf] %vm1994_vm4, %v2430_v48  ;;  %v883_v52 = vadd.f32 %v3386_v4, %v882_v50  ;;  %v2679_v53 = vpop.f32.mrb[45].mxu0  ;;  %2084 = vst.msk [vmem:[%s4138_s3 + $0x164] sm:$0xf] %vm1994_vm4, %v2498_v49  ;;  %v1155_v54 = vadd.f32 %v3386_v4, %v1154_v51  ;;  %v2815_v55 = vpop.f32.mrb[45].mxu1 }
 0x14e   :  { %v885_v56 = vpop.f32.mrb[46].mxu0  ;;  %v1157_v57 = vpop.f32.mrb[46].mxu1 }
 0x14f   :  { %v1350_v58 = vmax.f32 %v883_v52, 0.0  ;;  %v886_v59 = vadd.f32 %v3386_v4, %v885_v56  ;;  %v2680_v60 = vpop.f32.mrb[47].mxu0  ;;  %v1418_v61 = vmax.f32 %v1155_v54, 0.0  ;;  %v1158_v62 = vadd.f32 %v3386_v4, %v1157_v57  ;;  %v2816_v63 = vpop.f32.mrb[47].mxu1 }
 0x151   :  { %v2431_v1 = vpack.c.bf16 %v1350_v58, %v1350_v58  ;;  %v1351_v2 = vmax.f32 %v886_v59, 0.0  ;;  %v2499_v3 = vpack.c.bf16 %v1418_v61, %v1418_v61  ;;  %v1419_v5 = vmax.f32 %v1158_v62, 0.0 }
 0x153   :  { %2017 = vst.msk [vmem:[%s4138_s3 + $0x58] sm:$0xf] %vm1994_vm4, %v2431_v1  ;;  %v2432_v6 = vpack.c.bf16 %v1351_v2, %v1351_v2  ;;  %2085 = vst.msk [vmem:[%s4138_s3 + $0x168] sm:$0xf] %vm1994_vm4, %v2499_v3  ;;  %v2500_v7 = vpack.c.bf16 %v1419_v5, %v1419_v5 }
 0x154   :  { %v890_v8 = vpop.f32.mrb[48].mxu0  ;;  %v1162_v9 = vpop.f32.mrb[48].mxu1 }
 0x155   :  { %2018 = vst.msk [vmem:[%s4138_s3 + $0x5c] sm:$0xf] %vm1994_vm4, %v2432_v6  ;;  %v891_v10 = vadd.f32 %v3386_v4, %v890_v8  ;;  %v2683_v11 = vpop.f32.mrb[49].mxu0  ;;  %2086 = vst.msk [vmem:[%s4138_s3 + $0x16c] sm:$0xf] %vm1994_vm4, %v2500_v7  ;;  %v1163_v12 = vadd.f32 %v3386_v4, %v1162_v9  ;;  %v2819_v13 = vpop.f32.mrb[49].mxu1 }
 0x156   :  { %v893_v14 = vpop.f32.mrb[50].mxu0  ;;  %v1165_v0 = vpop.f32.mrb[50].mxu1 }
 0x157   :  { %v1352_v15 = vmax.f32 %v891_v10, 0.0  ;;  %v894_v16 = vadd.f32 %v3386_v4, %v893_v14  ;;  %v2684_v17 = vpop.f32.mrb[51].mxu0  ;;  %v1420_v18 = vmax.f32 %v1163_v12, 0.0  ;;  %v1166_v19 = vadd.f32 %v3386_v4, %v1165_v0  ;;  %v2820_v20 = vpop.f32.mrb[51].mxu1 }
 0x159   :  { %v2433_v21 = vpack.c.bf16 %v1352_v15, %v1352_v15  ;;  %v1353_v22 = vmax.f32 %v894_v16, 0.0  ;;  %v2501_v23 = vpack.c.bf16 %v1420_v18, %v1420_v18  ;;  %v1421_v24 = vmax.f32 %v1166_v19, 0.0 }
 0x15b   :  { %2019 = vst.msk [vmem:[%s4138_s3 + $0x60] sm:$0xf] %vm1994_vm4, %v2433_v21  ;;  %v2434_v25 = vpack.c.bf16 %v1353_v22, %v1353_v22  ;;  %2087 = vst.msk [vmem:[%s4138_s3 + $0x170] sm:$0xf] %vm1994_vm4, %v2501_v23  ;;  %v2502_v26 = vpack.c.bf16 %v1421_v24, %v1421_v24 }
 0x15c   :  { %v898_v27 = vpop.f32.mrb[52].mxu0  ;;  %v1170_v28 = vpop.f32.mrb[52].mxu1 }
 0x15d   :  { %2020 = vst.msk [vmem:[%s4138_s3 + $0x64] sm:$0xf] %vm1994_vm4, %v2434_v25  ;;  %v899_v29 = vadd.f32 %v3386_v4, %v898_v27  ;;  %v2687_v30 = vpop.f32.mrb[53].mxu0  ;;  %2088 = vst.msk [vmem:[%s4138_s3 + $0x174] sm:$0xf] %vm1994_vm4, %v2502_v26  ;;  %v1171_v31 = vadd.f32 %v3386_v4, %v1170_v28  ;;  %v2823_v32 = vpop.f32.mrb[53].mxu1 }
 0x15e   :  { %v901_v33 = vpop.f32.mrb[54].mxu0  ;;  %v1173_v34 = vpop.f32.mrb[54].mxu1 }
 0x15f   :  { %v1354_v35 = vmax.f32 %v899_v29, 0.0  ;;  %v902_v36 = vadd.f32 %v3386_v4, %v901_v33  ;;  %v2688_v37 = vpop.f32.mrb[55].mxu0  ;;  %v1422_v38 = vmax.f32 %v1171_v31, 0.0  ;;  %v1174_v39 = vadd.f32 %v3386_v4, %v1173_v34  ;;  %v2824_v40 = vpop.f32.mrb[55].mxu1 }
 0x161   :  { %v2435_v41 = vpack.c.bf16 %v1354_v35, %v1354_v35  ;;  %v1355_v42 = vmax.f32 %v902_v36, 0.0  ;;  %v2503_v43 = vpack.c.bf16 %v1422_v38, %v1422_v38  ;;  %v1423_v44 = vmax.f32 %v1174_v39, 0.0 }
 0x163   :  { %2021 = vst.msk [vmem:[%s4138_s3 + $0x68] sm:$0xf] %vm1994_vm4, %v2435_v41  ;;  %v2436_v45 = vpack.c.bf16 %v1355_v42, %v1355_v42  ;;  %2089 = vst.msk [vmem:[%s4138_s3 + $0x178] sm:$0xf] %vm1994_vm4, %v2503_v43  ;;  %v2504_v46 = vpack.c.bf16 %v1423_v44, %v1423_v44 }
 0x164   :  { %v906_v47 = vpop.f32.mrb[56].mxu0  ;;  %v1178_v48 = vpop.f32.mrb[56].mxu1 }
 0x165   :  { %2022 = vst.msk [vmem:[%s4138_s3 + $0x6c] sm:$0xf] %vm1994_vm4, %v2436_v45  ;;  %v907_v49 = vadd.f32 %v3386_v4, %v906_v47  ;;  %v2691_v50 = vpop.f32.mrb[57].mxu0  ;;  %2090 = vst.msk [vmem:[%s4138_s3 + $0x17c] sm:$0xf] %vm1994_vm4, %v2504_v46  ;;  %v1179_v51 = vadd.f32 %v3386_v4, %v1178_v48  ;;  %v2827_v52 = vpop.f32.mrb[57].mxu1 }
 0x166   :  { %v909_v53 = vpop.f32.mrb[58].mxu0  ;;  %v1181_v54 = vpop.f32.mrb[58].mxu1 }
 0x167   :  { %v1356_v55 = vmax.f32 %v907_v49, 0.0  ;;  %v910_v56 = vadd.f32 %v3386_v4, %v909_v53  ;;  %v2692_v57 = vpop.f32.mrb[59].mxu0  ;;  %v1424_v58 = vmax.f32 %v1179_v51, 0.0  ;;  %v1182_v59 = vadd.f32 %v3386_v4, %v1181_v54  ;;  %v2828_v60 = vpop.f32.mrb[59].mxu1 }
 0x169   :  { %v2437_v61 = vpack.c.bf16 %v1356_v55, %v1356_v55  ;;  %v1357_v62 = vmax.f32 %v910_v56, 0.0  ;;  %v2505_v63 = vpack.c.bf16 %v1424_v58, %v1424_v58  ;;  %v1425_v1 = vmax.f32 %v1182_v59, 0.0 }
 0x16b   :  { %2023 = vst.msk [vmem:[%s4138_s3 + $0x70] sm:$0xf] %vm1994_vm4, %v2437_v61  ;;  %v2438_v2 = vpack.c.bf16 %v1357_v62, %v1357_v62  ;;  %2091 = vst.msk [vmem:[%s4138_s3 + $0x180] sm:$0xf] %vm1994_vm4, %v2505_v63  ;;  %v2506_v3 = vpack.c.bf16 %v1425_v1, %v1425_v1 }
 0x16c   :  { %v914_v5 = vpop.f32.mrb[60].mxu0  ;;  %v1186_v6 = vpop.f32.mrb[60].mxu1 }
 0x16d   :  { %2024 = vst.msk [vmem:[%s4138_s3 + $0x74] sm:$0xf] %vm1994_vm4, %v2438_v2  ;;  %v915_v7 = vadd.f32 %v3386_v4, %v914_v5  ;;  %v2695_v8 = vpop.f32.mrb[61].mxu0  ;;  %2092 = vst.msk [vmem:[%s4138_s3 + $0x184] sm:$0xf] %vm1994_vm4, %v2506_v3  ;;  %v1187_v9 = vadd.f32 %v3386_v4, %v1186_v6  ;;  %v2831_v10 = vpop.f32.mrb[61].mxu1 }
 0x16e   :  { %v917_v11 = vpop.f32.mrb[62].mxu0  ;;  %v1189_v12 = vpop.f32.mrb[62].mxu1 }
 0x16f   :  { %v1358_v13 = vmax.f32 %v915_v7, 0.0  ;;  %v918_v14 = vadd.f32 %v3386_v4, %v917_v11  ;;  %v2696_v0 = vpop.f32.mrb[63].mxu0  ;;  %v1426_v15 = vmax.f32 %v1187_v9, 0.0  ;;  %v1190_v16 = vadd.f32 %v3386_v4, %v1189_v12  ;;  %v2832_v17 = vpop.f32.mrb[63].mxu1 }
 0x171   :  { %v2439_v18 = vpack.c.bf16 %v1358_v13, %v1358_v13  ;;  %v1359_v19 = vmax.f32 %v918_v14, 0.0  ;;  %v2507_v20 = vpack.c.bf16 %v1426_v15, %v1426_v15  ;;  %v1427_v21 = vmax.f32 %v1190_v16, 0.0 }
 0x173   :  { %2025 = vst.msk [vmem:[%s4138_s3 + $0x78] sm:$0xf] %vm1994_vm4, %v2439_v18  ;;  %v2440_v22 = vpack.c.bf16 %v1359_v19, %v1359_v19  ;;  %2093 = vst.msk [vmem:[%s4138_s3 + $0x188] sm:$0xf] %vm1994_vm4, %v2507_v20  ;;  %v2508_v23 = vpack.c.bf16 %v1427_v21, %v1427_v21 }
 0x174   :  { %v922_v24 = vpop.f32.mrb[64].mxu0  ;;  %v1194_v25 = vpop.f32.mrb[64].mxu1 }
 0x175   :  { %2026 = vst.msk [vmem:[%s4138_s3 + $0x7c] sm:$0xf] %vm1994_vm4, %v2440_v22  ;;  %v923_v26 = vadd.f32 %v3386_v4, %v922_v24  ;;  %v2699_v27 = vpop.f32.mrb[65].mxu0  ;;  %2094 = vst.msk [vmem:[%s4138_s3 + $0x18c] sm:$0xf] %vm1994_vm4, %v2508_v23  ;;  %v1195_v28 = vadd.f32 %v3386_v4, %v1194_v25  ;;  %v2835_v29 = vpop.f32.mrb[65].mxu1 }
 0x176   :  { %v925_v30 = vpop.f32.mrb[66].mxu0  ;;  %v1197_v31 = vpop.f32.mrb[66].mxu1 }
 0x177   :  { %v1360_v32 = vmax.f32 %v923_v26, 0.0  ;;  %v926_v33 = vadd.f32 %v3386_v4, %v925_v30  ;;  %v2700_v34 = vpop.f32.mrb[67].mxu0  ;;  %v1428_v35 = vmax.f32 %v1195_v28, 0.0  ;;  %v1198_v36 = vadd.f32 %v3386_v4, %v1197_v31  ;;  %v2836_v37 = vpop.f32.mrb[67].mxu1 }
 0x179   :  { %v2441_v38 = vpack.c.bf16 %v1360_v32, %v1360_v32  ;;  %v1361_v39 = vmax.f32 %v926_v33, 0.0  ;;  %v2509_v40 = vpack.c.bf16 %v1428_v35, %v1428_v35  ;;  %v1429_v41 = vmax.f32 %v1198_v36, 0.0 }
 0x17b   :  { %2027 = vst.msk [vmem:[%s4138_s3 + $0x80] sm:$0xf] %vm1994_vm4, %v2441_v38  ;;  %v2442_v42 = vpack.c.bf16 %v1361_v39, %v1361_v39  ;;  %2095 = vst.msk [vmem:[%s4138_s3 + $0x190] sm:$0xf] %vm1994_vm4, %v2509_v40  ;;  %v2510_v43 = vpack.c.bf16 %v1429_v41, %v1429_v41 }
 0x17c   :  { %v930_v44 = vpop.f32.mrb[68].mxu0  ;;  %v1202_v45 = vpop.f32.mrb[68].mxu1 }
 0x17d   :  { %2028 = vst.msk [vmem:[%s4138_s3 + $0x84] sm:$0xf] %vm1994_vm4, %v2442_v42  ;;  %v931_v46 = vadd.f32 %v3386_v4, %v930_v44  ;;  %v2703_v47 = vpop.f32.mrb[69].mxu0  ;;  %2096 = vst.msk [vmem:[%s4138_s3 + $0x194] sm:$0xf] %vm1994_vm4, %v2510_v43  ;;  %v1203_v48 = vadd.f32 %v3386_v4, %v1202_v45  ;;  %v2839_v49 = vpop.f32.mrb[69].mxu1 }
 0x17e   :  { %v933_v50 = vpop.f32.mrb[70].mxu0  ;;  %v1205_v51 = vpop.f32.mrb[70].mxu1 }
 0x17f   :  { %v1362_v52 = vmax.f32 %v931_v46, 0.0  ;;  %v934_v53 = vadd.f32 %v3386_v4, %v933_v50  ;;  %v2704_v54 = vpop.f32.mrb[71].mxu0  ;;  %v1430_v55 = vmax.f32 %v1203_v48, 0.0  ;;  %v1206_v56 = vadd.f32 %v3386_v4, %v1205_v51  ;;  %v2840_v57 = vpop.f32.mrb[71].mxu1 }
 0x181   :  { %v2443_v58 = vpack.c.bf16 %v1362_v52, %v1362_v52  ;;  %v1363_v59 = vmax.f32 %v934_v53, 0.0  ;;  %v2511_v60 = vpack.c.bf16 %v1430_v55, %v1430_v55  ;;  %v1431_v61 = vmax.f32 %v1206_v56, 0.0 }
 0x183   :  { %2029 = vst.msk [vmem:[%s4138_s3 + $0x88] sm:$0xf] %vm1994_vm4, %v2443_v58  ;;  %v2444_v62 = vpack.c.bf16 %v1363_v59, %v1363_v59  ;;  %2097 = vst.msk [vmem:[%s4138_s3 + $0x198] sm:$0xf] %vm1994_vm4, %v2511_v60  ;;  %v2512_v63 = vpack.c.bf16 %v1431_v61, %v1431_v61 }
 0x184   :  { %v938_v1 = vpop.f32.mrb[72].mxu0  ;;  %v1210_v2 = vpop.f32.mrb[72].mxu1 }
 0x185   :  { %2030 = vst.msk [vmem:[%s4138_s3 + $0x8c] sm:$0xf] %vm1994_vm4, %v2444_v62  ;;  %v939_v3 = vadd.f32 %v3386_v4, %v938_v1  ;;  %v2707_v5 = vpop.f32.mrb[73].mxu0  ;;  %2098 = vst.msk [vmem:[%s4138_s3 + $0x19c] sm:$0xf] %vm1994_vm4, %v2512_v63  ;;  %v1211_v6 = vadd.f32 %v3386_v4, %v1210_v2  ;;  %v2843_v7 = vpop.f32.mrb[73].mxu1 }
 0x186   :  { %v941_v8 = vpop.f32.mrb[74].mxu0  ;;  %v1213_v9 = vpop.f32.mrb[74].mxu1 }
 0x187   :  { %v1364_v10 = vmax.f32 %v939_v3, 0.0  ;;  %v942_v11 = vadd.f32 %v3386_v4, %v941_v8  ;;  %v2708_v12 = vpop.f32.mrb[75].mxu0  ;;  %v1432_v13 = vmax.f32 %v1211_v6, 0.0  ;;  %v1214_v14 = vadd.f32 %v3386_v4, %v1213_v9  ;;  %v2844_v0 = vpop.f32.mrb[75].mxu1 }
 0x189   :  { %v2445_v15 = vpack.c.bf16 %v1364_v10, %v1364_v10  ;;  %v1365_v16 = vmax.f32 %v942_v11, 0.0  ;;  %v2513_v17 = vpack.c.bf16 %v1432_v13, %v1432_v13  ;;  %v1433_v18 = vmax.f32 %v1214_v14, 0.0 }
 0x18b   :  { %2031 = vst.msk [vmem:[%s4138_s3 + $0x90] sm:$0xf] %vm1994_vm4, %v2445_v15  ;;  %v2446_v19 = vpack.c.bf16 %v1365_v16, %v1365_v16  ;;  %2099 = vst.msk [vmem:[%s4138_s3 + $0x1a0] sm:$0xf] %vm1994_vm4, %v2513_v17  ;;  %v2514_v20 = vpack.c.bf16 %v1433_v18, %v1433_v18 }
 0x18c   :  { %v946_v21 = vpop.f32.mrb[76].mxu0  ;;  %v1218_v22 = vpop.f32.mrb[76].mxu1 }
 0x18d   :  { %2032 = vst.msk [vmem:[%s4138_s3 + $0x94] sm:$0xf] %vm1994_vm4, %v2446_v19  ;;  %v947_v23 = vadd.f32 %v3386_v4, %v946_v21  ;;  %v2711_v24 = vpop.f32.mrb[77].mxu0  ;;  %2100 = vst.msk [vmem:[%s4138_s3 + $0x1a4] sm:$0xf] %vm1994_vm4, %v2514_v20  ;;  %v1219_v25 = vadd.f32 %v3386_v4, %v1218_v22  ;;  %v2847_v26 = vpop.f32.mrb[77].mxu1 }
 0x18e   :  { %v949_v27 = vpop.f32.mrb[78].mxu0  ;;  %v1221_v28 = vpop.f32.mrb[78].mxu1 }
 0x18f   :  { %v1366_v29 = vmax.f32 %v947_v23, 0.0  ;;  %v950_v30 = vadd.f32 %v3386_v4, %v949_v27  ;;  %v2712_v31 = vpop.f32.mrb[79].mxu0  ;;  %v1434_v32 = vmax.f32 %v1219_v25, 0.0  ;;  %v1222_v33 = vadd.f32 %v3386_v4, %v1221_v28  ;;  %v2848_v34 = vpop.f32.mrb[79].mxu1  ;;  %v3865_v4 = vld [vmem:[%s4137_s2] ss:$0 sm:$0xff] }
 0x191   :  { %v2447_v35 = vpack.c.bf16 %v1366_v29, %v1366_v29  ;;  %v1367_v36 = vmax.f32 %v950_v30, 0.0  ;;  %v2515_v37 = vpack.c.bf16 %v1434_v32, %v1434_v32  ;;  %v1435_v38 = vmax.f32 %v1222_v33, 0.0 }
 0x193   :  { %2033 = vst.msk [vmem:[%s4138_s3 + $0x98] sm:$0xf] %vm1994_vm4, %v2447_v35  ;;  %v2448_v39 = vpack.c.bf16 %v1367_v36, %v1367_v36  ;;  %2101 = vst.msk [vmem:[%s4138_s3 + $0x1a8] sm:$0xf] %vm1994_vm4, %v2515_v37  ;;  %v2516_v40 = vpack.c.bf16 %v1435_v38, %v1435_v38 }
 0x194   :  { %v954_v41 = vpop.f32.mrb[80].mxu0  ;;  %v1226_v42 = vpop.f32.mrb[80].mxu1 }
 0x195   :  { %2034 = vst.msk [vmem:[%s4138_s3 + $0x9c] sm:$0xf] %vm1994_vm4, %v2448_v39  ;;  %v955_v43 = vadd.f32 %v3865_v4, %v954_v41  ;;  %v2715_v44 = vpop.f32.mrb[81].mxu0  ;;  %2102 = vst.msk [vmem:[%s4138_s3 + $0x1ac] sm:$0xf] %vm1994_vm4, %v2516_v40  ;;  %v1227_v45 = vadd.f32 %v3865_v4, %v1226_v42  ;;  %v2851_v46 = vpop.f32.mrb[81].mxu1 }
 0x196   :  { %v957_v47 = vpop.f32.mrb[82].mxu0  ;;  %v1229_v48 = vpop.f32.mrb[82].mxu1 }
 0x197   :  { %v1368_v49 = vmax.f32 %v955_v43, 0.0  ;;  %v958_v50 = vadd.f32 %v3865_v4, %v957_v47  ;;  %v2716_v51 = vpop.f32.mrb[83].mxu0  ;;  %v1436_v52 = vmax.f32 %v1227_v45, 0.0  ;;  %v1230_v53 = vadd.f32 %v3865_v4, %v1229_v48  ;;  %v2852_v54 = vpop.f32.mrb[83].mxu1 }
 0x199   :  { %v2449_v55 = vpack.c.bf16 %v1368_v49, %v1368_v49  ;;  %v1369_v56 = vmax.f32 %v958_v50, 0.0  ;;  %v2517_v57 = vpack.c.bf16 %v1436_v52, %v1436_v52  ;;  %v1437_v58 = vmax.f32 %v1230_v53, 0.0 }
 0x19b   :  { %2035 = vst.msk [vmem:[%s4138_s3 + $0xa0] sm:$0xf] %vm1994_vm4, %v2449_v55  ;;  %v2450_v59 = vpack.c.bf16 %v1369_v56, %v1369_v56  ;;  %2103 = vst.msk [vmem:[%s4138_s3 + $0x1b0] sm:$0xf] %vm1994_vm4, %v2517_v57  ;;  %v2518_v60 = vpack.c.bf16 %v1437_v58, %v1437_v58 }
 0x19c   :  { %v962_v61 = vpop.f32.mrb[84].mxu0  ;;  %v1234_v62 = vpop.f32.mrb[84].mxu1 }
 0x19d   :  { %2036 = vst.msk [vmem:[%s4138_s3 + $0xa4] sm:$0xf] %vm1994_vm4, %v2450_v59  ;;  %v963_v63 = vadd.f32 %v3865_v4, %v962_v61  ;;  %v2719_v1 = vpop.f32.mrb[85].mxu0  ;;  %2104 = vst.msk [vmem:[%s4138_s3 + $0x1b4] sm:$0xf] %vm1994_vm4, %v2518_v60  ;;  %v1235_v2 = vadd.f32 %v3865_v4, %v1234_v62  ;;  %v2855_v3 = vpop.f32.mrb[85].mxu1 }
 0x19e   :  { %v965_v5 = vpop.f32.mrb[86].mxu0  ;;  %v1237_v6 = vpop.f32.mrb[86].mxu1 }
 0x19f   :  { %v1370_v7 = vmax.f32 %v963_v63, 0.0  ;;  %v966_v8 = vadd.f32 %v3865_v4, %v965_v5  ;;  %v2720_v9 = vpop.f32.mrb[87].mxu0  ;;  %v1438_v10 = vmax.f32 %v1235_v2, 0.0  ;;  %v1238_v11 = vadd.f32 %v3865_v4, %v1237_v6  ;;  %v2856_v12 = vpop.f32.mrb[87].mxu1 }
 0x1a1   :  { %v2451_v13 = vpack.c.bf16 %v1370_v7, %v1370_v7  ;;  %v1371_v14 = vmax.f32 %v966_v8, 0.0  ;;  %v2519_v0 = vpack.c.bf16 %v1438_v10, %v1438_v10  ;;  %v1439_v15 = vmax.f32 %v1238_v11, 0.0 }
 0x1a3   :  { %2037 = vst.msk [vmem:[%s4138_s3 + $0xa8] sm:$0xf] %vm1994_vm4, %v2451_v13  ;;  %v2452_v16 = vpack.c.bf16 %v1371_v14, %v1371_v14  ;;  %2105 = vst.msk [vmem:[%s4138_s3 + $0x1b8] sm:$0xf] %vm1994_vm4, %v2519_v0  ;;  %v2520_v17 = vpack.c.bf16 %v1439_v15, %v1439_v15 }
 0x1a4   :  { %v970_v18 = vpop.f32.mrb[88].mxu0  ;;  %v1242_v19 = vpop.f32.mrb[88].mxu1 }
 0x1a5   :  { %2038 = vst.msk [vmem:[%s4138_s3 + $0xac] sm:$0xf] %vm1994_vm4, %v2452_v16  ;;  %v971_v20 = vadd.f32 %v3865_v4, %v970_v18  ;;  %v2723_v21 = vpop.f32.mrb[89].mxu0  ;;  %2106 = vst.msk [vmem:[%s4138_s3 + $0x1bc] sm:$0xf] %vm1994_vm4, %v2520_v17  ;;  %v1243_v22 = vadd.f32 %v3865_v4, %v1242_v19  ;;  %v2859_v23 = vpop.f32.mrb[89].mxu1 }
 0x1a6   :  { %v973_v24 = vpop.f32.mrb[90].mxu0  ;;  %v1245_v25 = vpop.f32.mrb[90].mxu1 }
 0x1a7   :  { %v1372_v26 = vmax.f32 %v971_v20, 0.0  ;;  %v974_v27 = vadd.f32 %v3865_v4, %v973_v24  ;;  %v2724_v28 = vpop.f32.mrb[91].mxu0  ;;  %v1440_v29 = vmax.f32 %v1243_v22, 0.0  ;;  %v1246_v30 = vadd.f32 %v3865_v4, %v1245_v25  ;;  %v2860_v31 = vpop.f32.mrb[91].mxu1 }
 0x1a9   :  { %v2453_v32 = vpack.c.bf16 %v1372_v26, %v1372_v26  ;;  %v1373_v33 = vmax.f32 %v974_v27, 0.0  ;;  %v2521_v34 = vpack.c.bf16 %v1440_v29, %v1440_v29  ;;  %v1441_v35 = vmax.f32 %v1246_v30, 0.0 }
 0x1ab   :  { %2039 = vst.msk [vmem:[%s4138_s3 + $0xb0] sm:$0xf] %vm1994_vm4, %v2453_v32  ;;  %v2454_v36 = vpack.c.bf16 %v1373_v33, %v1373_v33  ;;  %2107 = vst.msk [vmem:[%s4138_s3 + $0x1c0] sm:$0xf] %vm1994_vm4, %v2521_v34  ;;  %v2522_v37 = vpack.c.bf16 %v1441_v35, %v1441_v35 }
 0x1ac   :  { %v978_v38 = vpop.f32.mrb[92].mxu0  ;;  %v1250_v39 = vpop.f32.mrb[92].mxu1 }
 0x1ad   :  { %2040 = vst.msk [vmem:[%s4138_s3 + $0xb4] sm:$0xf] %vm1994_vm4, %v2454_v36  ;;  %v979_v40 = vadd.f32 %v3865_v4, %v978_v38  ;;  %v2727_v41 = vpop.f32.mrb[93].mxu0  ;;  %2108 = vst.msk [vmem:[%s4138_s3 + $0x1c4] sm:$0xf] %vm1994_vm4, %v2522_v37  ;;  %v1251_v42 = vadd.f32 %v3865_v4, %v1250_v39  ;;  %v2863_v43 = vpop.f32.mrb[93].mxu1 }
 0x1ae   :  { %v981_v44 = vpop.f32.mrb[94].mxu0  ;;  %v1253_v45 = vpop.f32.mrb[94].mxu1 }
 0x1af   :  { %v1374_v46 = vmax.f32 %v979_v40, 0.0  ;;  %v982_v47 = vadd.f32 %v3865_v4, %v981_v44  ;;  %v2728_v48 = vpop.f32.mrb[95].mxu0  ;;  %v1442_v49 = vmax.f32 %v1251_v42, 0.0  ;;  %v1254_v50 = vadd.f32 %v3865_v4, %v1253_v45  ;;  %v2864_v51 = vpop.f32.mrb[95].mxu1 }
 0x1b1   :  { %v2455_v52 = vpack.c.bf16 %v1374_v46, %v1374_v46  ;;  %v1375_v53 = vmax.f32 %v982_v47, 0.0  ;;  %v2523_v54 = vpack.c.bf16 %v1442_v49, %v1442_v49  ;;  %v1443_v55 = vmax.f32 %v1254_v50, 0.0 }
 0x1b3   :  { %2041 = vst.msk [vmem:[%s4138_s3 + $0xb8] sm:$0xf] %vm1994_vm4, %v2455_v52  ;;  %v2456_v56 = vpack.c.bf16 %v1375_v53, %v1375_v53  ;;  %2109 = vst.msk [vmem:[%s4138_s3 + $0x1c8] sm:$0xf] %vm1994_vm4, %v2523_v54  ;;  %v2524_v57 = vpack.c.bf16 %v1443_v55, %v1443_v55 }
 0x1b4   :  { %v986_v58 = vpop.f32.mrb[96].mxu0  ;;  %v1258_v59 = vpop.f32.mrb[96].mxu1 }
 0x1b5   :  { %2042 = vst.msk [vmem:[%s4138_s3 + $0xbc] sm:$0xf] %vm1994_vm4, %v2456_v56  ;;  %v987_v60 = vadd.f32 %v3865_v4, %v986_v58  ;;  %v2731_v61 = vpop.f32.mrb[97].mxu0  ;;  %2110 = vst.msk [vmem:[%s4138_s3 + $0x1cc] sm:$0xf] %vm1994_vm4, %v2524_v57  ;;  %v1259_v62 = vadd.f32 %v3865_v4, %v1258_v59  ;;  %v2867_v63 = vpop.f32.mrb[97].mxu1 }
 0x1b6   :  { %v989_v1 = vpop.f32.mrb[98].mxu0  ;;  %v1261_v2 = vpop.f32.mrb[98].mxu1 }
 0x1b7   :  { %v1376_v3 = vmax.f32 %v987_v60, 0.0  ;;  %v990_v5 = vadd.f32 %v3865_v4, %v989_v1  ;;  %v2732_v6 = vpop.f32.mrb[99].mxu0  ;;  %v1444_v7 = vmax.f32 %v1259_v62, 0.0  ;;  %v1262_v8 = vadd.f32 %v3865_v4, %v1261_v2  ;;  %v2868_v9 = vpop.f32.mrb[99].mxu1 }
 0x1b9   :  { %v2457_v10 = vpack.c.bf16 %v1376_v3, %v1376_v3  ;;  %v1377_v11 = vmax.f32 %v990_v5, 0.0  ;;  %v2525_v12 = vpack.c.bf16 %v1444_v7, %v1444_v7  ;;  %v1445_v13 = vmax.f32 %v1262_v8, 0.0 }
 0x1bb   :  { %2043 = vst.msk [vmem:[%s4138_s3 + $0xc0] sm:$0xf] %vm1994_vm4, %v2457_v10  ;;  %v2458_v14 = vpack.c.bf16 %v1377_v11, %v1377_v11  ;;  %2111 = vst.msk [vmem:[%s4138_s3 + $0x1d0] sm:$0xf] %vm1994_vm4, %v2525_v12  ;;  %v2526_v0 = vpack.c.bf16 %v1445_v13, %v1445_v13 }
 0x1bc   :  { %v994_v15 = vpop.f32.mrb[100].mxu0  ;;  %v1266_v16 = vpop.f32.mrb[100].mxu1 }
 0x1bd   :  { %2044 = vst.msk [vmem:[%s4138_s3 + $0xc4] sm:$0xf] %vm1994_vm4, %v2458_v14  ;;  %v995_v17 = vadd.f32 %v3865_v4, %v994_v15  ;;  %v2735_v18 = vpop.f32.mrb[101].mxu0  ;;  %2112 = vst.msk [vmem:[%s4138_s3 + $0x1d4] sm:$0xf] %vm1994_vm4, %v2526_v0  ;;  %v1267_v19 = vadd.f32 %v3865_v4, %v1266_v16  ;;  %v2871_v20 = vpop.f32.mrb[101].mxu1 }
 0x1be   :  { %v997_v21 = vpop.f32.mrb[102].mxu0  ;;  %v1269_v22 = vpop.f32.mrb[102].mxu1 }
 0x1bf   :  { %v1378_v23 = vmax.f32 %v995_v17, 0.0  ;;  %v998_v24 = vadd.f32 %v3865_v4, %v997_v21  ;;  %v2736_v25 = vpop.f32.mrb[103].mxu0  ;;  %v1446_v26 = vmax.f32 %v1267_v19, 0.0  ;;  %v1270_v27 = vadd.f32 %v3865_v4, %v1269_v22  ;;  %v2872_v28 = vpop.f32.mrb[103].mxu1 }
 0x1c1   :  { %v2459_v29 = vpack.c.bf16 %v1378_v23, %v1378_v23  ;;  %v1379_v30 = vmax.f32 %v998_v24, 0.0  ;;  %v2527_v31 = vpack.c.bf16 %v1446_v26, %v1446_v26  ;;  %v1447_v32 = vmax.f32 %v1270_v27, 0.0 }
 0x1c3   :  { %2045 = vst.msk [vmem:[%s4138_s3 + $0xc8] sm:$0xf] %vm1994_vm4, %v2459_v29  ;;  %v2460_v33 = vpack.c.bf16 %v1379_v30, %v1379_v30  ;;  %2113 = vst.msk [vmem:[%s4138_s3 + $0x1d8] sm:$0xf] %vm1994_vm4, %v2527_v31  ;;  %v2528_v34 = vpack.c.bf16 %v1447_v32, %v1447_v32 }
 0x1c4   :  { %v1002_v35 = vpop.f32.mrb[104].mxu0  ;;  %v1274_v36 = vpop.f32.mrb[104].mxu1 }
 0x1c5   :  { %2046 = vst.msk [vmem:[%s4138_s3 + $0xcc] sm:$0xf] %vm1994_vm4, %v2460_v33  ;;  %v1003_v37 = vadd.f32 %v3865_v4, %v1002_v35  ;;  %v2739_v38 = vpop.f32.mrb[105].mxu0  ;;  %2114 = vst.msk [vmem:[%s4138_s3 + $0x1dc] sm:$0xf] %vm1994_vm4, %v2528_v34  ;;  %v1275_v39 = vadd.f32 %v3865_v4, %v1274_v36  ;;  %v2875_v40 = vpop.f32.mrb[105].mxu1 }
 0x1c6   :  { %v1005_v41 = vpop.f32.mrb[106].mxu0  ;;  %v1277_v42 = vpop.f32.mrb[106].mxu1 }
 0x1c7   :  { %v1380_v43 = vmax.f32 %v1003_v37, 0.0  ;;  %v1006_v44 = vadd.f32 %v3865_v4, %v1005_v41  ;;  %v2740_v45 = vpop.f32.mrb[107].mxu0  ;;  %v1448_v46 = vmax.f32 %v1275_v39, 0.0  ;;  %v1278_v47 = vadd.f32 %v3865_v4, %v1277_v42  ;;  %v2876_v48 = vpop.f32.mrb[107].mxu1 }
 0x1c9   :  { %v2461_v49 = vpack.c.bf16 %v1380_v43, %v1380_v43  ;;  %v1381_v50 = vmax.f32 %v1006_v44, 0.0  ;;  %v2529_v51 = vpack.c.bf16 %v1448_v46, %v1448_v46  ;;  %v1449_v52 = vmax.f32 %v1278_v47, 0.0 }
 0x1cb   :  { %2047 = vst.msk [vmem:[%s4138_s3 + $0xd0] sm:$0xf] %vm1994_vm4, %v2461_v49  ;;  %v2462_v53 = vpack.c.bf16 %v1381_v50, %v1381_v50  ;;  %2115 = vst.msk [vmem:[%s4138_s3 + $0x1e0] sm:$0xf] %vm1994_vm4, %v2529_v51  ;;  %v2530_v54 = vpack.c.bf16 %v1449_v52, %v1449_v52 }
 0x1cc   :  { %v1010_v55 = vpop.f32.mrb[108].mxu0  ;;  %v1282_v56 = vpop.f32.mrb[108].mxu1 }
 0x1cd   :  { %2048 = vst.msk [vmem:[%s4138_s3 + $0xd4] sm:$0xf] %vm1994_vm4, %v2462_v53  ;;  %v1011_v57 = vadd.f32 %v3865_v4, %v1010_v55  ;;  %v2743_v58 = vpop.f32.mrb[109].mxu0  ;;  %2116 = vst.msk [vmem:[%s4138_s3 + $0x1e4] sm:$0xf] %vm1994_vm4, %v2530_v54  ;;  %v1283_v59 = vadd.f32 %v3865_v4, %v1282_v56  ;;  %v2879_v60 = vpop.f32.mrb[109].mxu1 }
 0x1ce   :  { %v1013_v61 = vpop.f32.mrb[110].mxu0  ;;  %v1285_v62 = vpop.f32.mrb[110].mxu1 }
 0x1cf   :  { %v1382_v63 = vmax.f32 %v1011_v57, 0.0  ;;  %v1014_v1 = vadd.f32 %v3865_v4, %v1013_v61  ;;  %v2744_v2 = vpop.f32.mrb[111].mxu0  ;;  %v1450_v3 = vmax.f32 %v1283_v59, 0.0  ;;  %v1286_v5 = vadd.f32 %v3865_v4, %v1285_v62  ;;  %v2880_v6 = vpop.f32.mrb[111].mxu1 }
 0x1d1   :  { %v2463_v7 = vpack.c.bf16 %v1382_v63, %v1382_v63  ;;  %v1383_v8 = vmax.f32 %v1014_v1, 0.0  ;;  %v2531_v9 = vpack.c.bf16 %v1450_v3, %v1450_v3  ;;  %v1451_v10 = vmax.f32 %v1286_v5, 0.0 }
 0x1d3   :  { %2049 = vst.msk [vmem:[%s4138_s3 + $0xd8] sm:$0xf] %vm1994_vm4, %v2463_v7  ;;  %v2464_v11 = vpack.c.bf16 %v1383_v8, %v1383_v8  ;;  %2117 = vst.msk [vmem:[%s4138_s3 + $0x1e8] sm:$0xf] %vm1994_vm4, %v2531_v9  ;;  %v2532_v12 = vpack.c.bf16 %v1451_v10, %v1451_v10 }
 0x1d4   :  { %v1018_v13 = vpop.f32.mrb[112].mxu0  ;;  %v1290_v14 = vpop.f32.mrb[112].mxu1 }
 0x1d5   :  { %2050 = vst.msk [vmem:[%s4138_s3 + $0xdc] sm:$0xf] %vm1994_vm4, %v2464_v11  ;;  %v1019_v0 = vadd.f32 %v3865_v4, %v1018_v13  ;;  %v2747_v15 = vpop.f32.mrb[113].mxu0  ;;  %2118 = vst.msk [vmem:[%s4138_s3 + $0x1ec] sm:$0xf] %vm1994_vm4, %v2532_v12  ;;  %v1291_v16 = vadd.f32 %v3865_v4, %v1290_v14  ;;  %v2883_v17 = vpop.f32.mrb[113].mxu1 }
 0x1d6   :  { %v1021_v18 = vpop.f32.mrb[114].mxu0  ;;  %v1293_v19 = vpop.f32.mrb[114].mxu1 }
 0x1d7   :  { %v1384_v20 = vmax.f32 %v1019_v0, 0.0  ;;  %v1022_v21 = vadd.f32 %v3865_v4, %v1021_v18  ;;  %v2748_v22 = vpop.f32.mrb[115].mxu0  ;;  %v1452_v23 = vmax.f32 %v1291_v16, 0.0  ;;  %v1294_v24 = vadd.f32 %v3865_v4, %v1293_v19  ;;  %v2884_v25 = vpop.f32.mrb[115].mxu1 }
 0x1d9   :  { %v2465_v26 = vpack.c.bf16 %v1384_v20, %v1384_v20  ;;  %v1385_v27 = vmax.f32 %v1022_v21, 0.0  ;;  %v2533_v28 = vpack.c.bf16 %v1452_v23, %v1452_v23  ;;  %v1453_v29 = vmax.f32 %v1294_v24, 0.0 }
 0x1db   :  { %2051 = vst.msk [vmem:[%s4138_s3 + $0xe0] sm:$0xf] %vm1994_vm4, %v2465_v26  ;;  %v2466_v30 = vpack.c.bf16 %v1385_v27, %v1385_v27  ;;  %2119 = vst.msk [vmem:[%s4138_s3 + $0x1f0] sm:$0xf] %vm1994_vm4, %v2533_v28  ;;  %v2534_v31 = vpack.c.bf16 %v1453_v29, %v1453_v29 }
 0x1dc   :  { %v1026_v32 = vpop.f32.mrb[116].mxu0  ;;  %v1298_v33 = vpop.f32.mrb[116].mxu1 }
 0x1dd   :  { %2052 = vst.msk [vmem:[%s4138_s3 + $0xe4] sm:$0xf] %vm1994_vm4, %v2466_v30  ;;  %v1027_v34 = vadd.f32 %v3865_v4, %v1026_v32  ;;  %v2751_v35 = vpop.f32.mrb[117].mxu0  ;;  %2120 = vst.msk [vmem:[%s4138_s3 + $0x1f4] sm:$0xf] %vm1994_vm4, %v2534_v31  ;;  %v1299_v36 = vadd.f32 %v3865_v4, %v1298_v33  ;;  %v2887_v37 = vpop.f32.mrb[117].mxu1 }
 0x1de   :  { %v1029_v38 = vpop.f32.mrb[118].mxu0  ;;  %v1301_v39 = vpop.f32.mrb[118].mxu1 }
 0x1df   :  { %v1386_v40 = vmax.f32 %v1027_v34, 0.0  ;;  %v1030_v41 = vadd.f32 %v3865_v4, %v1029_v38  ;;  %v2752_v42 = vpop.f32.mrb[119].mxu0  ;;  %v1454_v43 = vmax.f32 %v1299_v36, 0.0  ;;  %v1302_v44 = vadd.f32 %v3865_v4, %v1301_v39  ;;  %v2888_v45 = vpop.f32.mrb[119].mxu1 }
 0x1e1   :  { %v2467_v46 = vpack.c.bf16 %v1386_v40, %v1386_v40  ;;  %v1387_v47 = vmax.f32 %v1030_v41, 0.0  ;;  %v2535_v48 = vpack.c.bf16 %v1454_v43, %v1454_v43  ;;  %v1455_v49 = vmax.f32 %v1302_v44, 0.0 }
 0x1e3   :  { %2053 = vst.msk [vmem:[%s4138_s3 + $0xe8] sm:$0xf] %vm1994_vm4, %v2467_v46  ;;  %v2468_v50 = vpack.c.bf16 %v1387_v47, %v1387_v47  ;;  %2121 = vst.msk [vmem:[%s4138_s3 + $0x1f8] sm:$0xf] %vm1994_vm4, %v2535_v48  ;;  %v2536_v51 = vpack.c.bf16 %v1455_v49, %v1455_v49 }
 0x1e4   :  { %v1034_v52 = vpop.f32.mrb[120].mxu0  ;;  %v1306_v53 = vpop.f32.mrb[120].mxu1 }
 0x1e5   :  { %2054 = vst.msk [vmem:[%s4138_s3 + $0xec] sm:$0xf] %vm1994_vm4, %v2468_v50  ;;  %v1035_v54 = vadd.f32 %v3865_v4, %v1034_v52  ;;  %v2755_v55 = vpop.f32.mrb[121].mxu0  ;;  %2122 = vst.msk [vmem:[%s4138_s3 + $0x1fc] sm:$0xf] %vm1994_vm4, %v2536_v51  ;;  %v1307_v56 = vadd.f32 %v3865_v4, %v1306_v53  ;;  %v2891_v57 = vpop.f32.mrb[121].mxu1 }
 0x1e6   :  { %v1037_v58 = vpop.f32.mrb[122].mxu0  ;;  %v1309_v59 = vpop.f32.mrb[122].mxu1 }
 0x1e7   :  { %v1388_v60 = vmax.f32 %v1035_v54, 0.0  ;;  %v1038_v61 = vadd.f32 %v3865_v4, %v1037_v58  ;;  %v2756_v62 = vpop.f32.mrb[123].mxu0  ;;  %v1456_v63 = vmax.f32 %v1307_v56, 0.0  ;;  %v1310_v1 = vadd.f32 %v3865_v4, %v1309_v59  ;;  %v2892_v2 = vpop.f32.mrb[123].mxu1 }
 0x1e9   :  { %v2469_v3 = vpack.c.bf16 %v1388_v60, %v1388_v60  ;;  %v1389_v5 = vmax.f32 %v1038_v61, 0.0  ;;  %v2537_v6 = vpack.c.bf16 %v1456_v63, %v1456_v63  ;;  %v1457_v7 = vmax.f32 %v1310_v1, 0.0 }
 0x1eb   :  { %2055 = vst.msk [vmem:[%s4138_s3 + $0xf0] sm:$0xf] %vm1994_vm4, %v2469_v3  ;;  %v2470_v8 = vpack.c.bf16 %v1389_v5, %v1389_v5  ;;  %2123 = vst.msk [vmem:[%s4138_s3 + $0x200] sm:$0xf] %vm1994_vm4, %v2537_v6  ;;  %v2538_v9 = vpack.c.bf16 %v1457_v7, %v1457_v7 }
 0x1ec   :  { %v1042_v10 = vpop.f32.mrb[124].mxu0  ;;  %v1314_v11 = vpop.f32.mrb[124].mxu1 }
 0x1ed   :  { %2056 = vst.msk [vmem:[%s4138_s3 + $0xf4] sm:$0xf] %vm1994_vm4, %v2470_v8  ;;  %v1043_v12 = vadd.f32 %v3865_v4, %v1042_v10  ;;  %v2759_v13 = vpop.f32.mrb[125].mxu0  ;;  %2124 = vst.msk [vmem:[%s4138_s3 + $0x204] sm:$0xf] %vm1994_vm4, %v2538_v9  ;;  %v1315_v14 = vadd.f32 %v3865_v4, %v1314_v11  ;;  %v2895_v0 = vpop.f32.mrb[125].mxu1 }
 0x1ee   :  { %v1045_v15 = vpop.f32.mrb[126].mxu0  ;;  %v1317_v16 = vpop.f32.mrb[126].mxu1 }
 0x1ef   :  { %v1390_v17 = vmax.f32 %v1043_v12, 0.0  ;;  %v1046_v18 = vadd.f32 %v3865_v4, %v1045_v15  ;;  %v2760_v19 = vpop.f32.mrb[127].mxu0  ;;  %v1458_v20 = vmax.f32 %v1315_v14, 0.0  ;;  %v1318_v21 = vadd.f32 %v3865_v4, %v1317_v16  ;;  %v2896_v22 = vpop.f32.mrb[127].mxu1 }
 0x1f1   :  { %v2471_v23 = vpack.c.bf16 %v1390_v17, %v1390_v17  ;;  %v1391_v24 = vmax.f32 %v1046_v18, 0.0  ;;  %v2539_v25 = vpack.c.bf16 %v1458_v20, %v1458_v20  ;;  %v1459_v26 = vmax.f32 %v1318_v21, 0.0 }
 0x1f3   :  { %2057 = vst.msk [vmem:[%s4138_s3 + $0xf8] sm:$0xf] %vm1994_vm4, %v2471_v23  ;;  %v2472_v27 = vpack.c.bf16 %v1391_v24, %v1391_v24  ;;  %2125 = vst.msk [vmem:[%s4138_s3 + $0x208] sm:$0xf] %vm1994_vm4, %v2539_v25  ;;  %v2540_v28 = vpack.c.bf16 %v1459_v26, %v1459_v26 }
 0x1f4   :  { %v1050_v29 = vpop.f32.mrb[128].mxu0  ;;  %v1322_v30 = vpop.f32.mrb[128].mxu1 }
 0x1f5   :  { %2058 = vst.msk [vmem:[%s4138_s3 + $0xfc] sm:$0xf] %vm1994_vm4, %v2472_v27  ;;  %v1051_v31 = vadd.f32 %v3865_v4, %v1050_v29  ;;  %v2763_v32 = vpop.f32.mrb[129].mxu0  ;;  %2126 = vst.msk [vmem:[%s4138_s3 + $0x20c] sm:$0xf] %vm1994_vm4, %v2540_v28  ;;  %v1323_v33 = vadd.f32 %v3865_v4, %v1322_v30  ;;  %v2899_v34 = vpop.f32.mrb[129].mxu1 }
 0x1f6   :  { %v1053_v35 = vpop.f32.mrb[130].mxu0  ;;  %v1325_v36 = vpop.f32.mrb[130].mxu1 }
 0x1f7   :  { %v1392_v37 = vmax.f32 %v1051_v31, 0.0  ;;  %v1054_v38 = vadd.f32 %v3865_v4, %v1053_v35  ;;  %v2764_v39 = vpop.f32.mrb[131].mxu0  ;;  %v1460_v40 = vmax.f32 %v1323_v33, 0.0  ;;  %v2900_v41 = vpop.f32.mrb[131].mxu1 }
 0x1f9   :  { %v2473_v42 = vpack.c.bf16 %v1392_v37, %v1392_v37  ;;  %v1393_v43 = vmax.f32 %v1054_v38, 0.0  ;;  %v2541_v44 = vpack.c.bf16 %v1460_v40, %v1460_v40 }
 0x1fb   :  { %2059 = vst.msk [vmem:[%s4138_s3 + $0x100] sm:$0xf] %vm1994_vm4, %v2473_v42  ;;  %v2474_v45 = vpack.c.bf16 %v1393_v43, %v1393_v43 }
 0x1fc   :  { %2128 = vst.msk [vmem:[%s4138_s3 + $0x210] sm:$0x1] %vm2127_vm5, %v2541_v44  ;;  %v1058_v46 = vpop.f32.mrb[132].mxu0 }
 0x1fd   :  { %2060 = vst.msk [vmem:[%s4138_s3 + $0x104] sm:$0xf] %vm1994_vm4, %v2474_v45  ;;  %v1059_v47 = vadd.f32 %v3865_v4, %v1058_v46  ;;  %v2767_v48 = vpop.f32.mrb[133].mxu0 }
 0x1fe   :  { %v1061_v49 = vpop.f32.mrb[134].mxu0 }
 0x1ff   :  { %v1394_v50 = vmax.f32 %v1059_v47, 0.0  ;;  %v1062_v51 = vadd.f32 %v3865_v4, %v1061_v49  ;;  %v2768_v52 = vpop.f32.mrb[135].mxu0 }
 0x201   :  { %v2475_v53 = vpack.c.bf16 %v1394_v50, %v1394_v50  ;;  %v1395_v54 = vmax.f32 %v1062_v51, 0.0 }
 0x203   :  { %2061 = vst.msk [vmem:[%s4138_s3 + $0x108] sm:$0xf] %vm1994_vm4, %v2475_v53  ;;  %v2476_v55 = vpack.c.bf16 %v1395_v54, %v1395_v54 }
 0x205   :  { %2062 = vst.msk [vmem:[%s4138_s3 + $0x10c] sm:$0xf] %vm1994_vm4, %v2476_v55 }

// kernel: alexnet_restoration_forward.7
= control target key start
LH: loop header
LB: loop body
LE: loop exit
PB: predicated region body
PF: predicated region fallthrough
CT: control target
= control target key end

     0   :  { %vm2464_vm0 = vcmask 523264   ;;  %vm4100_vm1 = vcmask 1043456   ;;  %vm4101_vm2 = vcmask 523268   ;;  %vm4133_vm4 = vcmask 1040384   ;;  %s7387_s1 = inlined_call_operand.vmem [shape: bf16[1600,192], index: 1, kind: input, shape index: {}]   ;;  %s7388_s0 = inlined_call_operand.vmem [shape: bf16[242,1600], index: 0, kind: input, shape index: {}]   ;;  %s7389_s2 = inlined_call_operand.vmem [shape: f32[1,192], index: 2, kind: input, shape index: {}]   ;;  %s7390_s3 = inlined_call_operand.vmem [shape: bf16[242,192], index: 3, kind: output, shape index: {}]  }
   0x1   :  { %v5104_v0 = vld [vmem:[%s7387_s1 + $0x4] ss:$8 sps:$4 sm:$0xff]   ;;  %v5108_v2 = vld [vmem:[%s7387_s1] ss:$8 sps:$4 sm:$0xff]   ;;  %v5110_v4 = vld [vmem:[%s7387_s1 + $0x14] ss:$8 sps:$4 sm:$0xff]  }
   0x2   :  { %v5106_v1 = vld [vmem:[%s7387_s1 + $0x304] ss:$8 sps:$4 sm:$0xff]   ;;  %2513 = vmatprep.subr.bf16.mxu1 %v5104_v0  ;;  %v5109_v3 = vld [vmem:[%s7387_s1 + $0x300] ss:$8 sps:$4 sm:$0xff]   ;;  %v5112_v5 = vld [vmem:[%s7387_s1 + $0x314] ss:$8 sps:$4 sm:$0xff]  }
   0x3   :  { %3086 = vmatprep.subr.bf16.mxu0 %v5106_v1  ;;  %2514 = vmatpush1.bf16.msra.mxu1 %v5108_v2  ;;  %v5114_v6 = vld [vmem:[%s7387_s1 + $0x10] ss:$8 sps:$4 sm:$0xff]   ;;  %v5116_v8 = vld [vmem:[%s7387_s1 + $0x24] ss:$8 sps:$4 sm:$0xff]   ;;  %v5120_v10 = vld [vmem:[%s7387_s1 + $0x20] ss:$8 sps:$4 sm:$0xff]  }
   0x4   :  { %3087 = vmatpush1.bf16.msra.mxu0 %v5109_v3  ;;  %2515 = vmatprep.subr.bf16.mxu1 %v5110_v4  ;;  %v5115_v7 = vld [vmem:[%s7387_s1 + $0x310] ss:$8 sps:$4 sm:$0xff]   ;;  %v5118_v9 = vld [vmem:[%s7387_s1 + $0x324] ss:$8 sps:$4 sm:$0xff]   ;;  %v5121_v11 = vld [vmem:[%s7387_s1 + $0x320] ss:$8 sps:$4 sm:$0xff]  }
   0x5   :  { %3088 = vmatprep.subr.bf16.mxu0 %v5112_v5  ;;  %v5122_v12 = vld [vmem:[%s7387_s1 + $0x34] ss:$8 sps:$4 sm:$0xff]   ;;  %v5126_v14 = vld [vmem:[%s7387_s1 + $0x30] ss:$8 sps:$4 sm:$0xff]   ;;  %v5128_v16 = vld [vmem:[%s7387_s1 + $0x44] ss:$8 sps:$4 sm:$0xff]  }
   0x6   :  { %v5124_v13 = vld [vmem:[%s7387_s1 + $0x334] ss:$8 sps:$4 sm:$0xff]   ;;  %v5127_v15 = vld [vmem:[%s7387_s1 + $0x330] ss:$8 sps:$4 sm:$0xff]   ;;  %v5130_v17 = vld [vmem:[%s7387_s1 + $0x344] ss:$8 sps:$4 sm:$0xff]  }
   0x7   :  { %2516 = vmatpush1.bf16.msra.mxu1 %v5114_v6  ;;  %v5132_v18 = vld [vmem:[%s7387_s1 + $0x40] ss:$8 sps:$4 sm:$0xff]   ;;  %v5134_v20 = vld [vmem:[%s7387_s1 + $0x54] ss:$8 sps:$4 sm:$0xff]   ;;  %v5138_v22 = vld [vmem:[%s7387_s1 + $0x50] ss:$8 sps:$4 sm:$0xff]  }
   0x8   :  { %3089 = vmatpush1.bf16.msra.mxu0 %v5115_v7  ;;  %2517 = vmatprep.subr.bf16.mxu1 %v5116_v8  ;;  %v5133_v19 = vld [vmem:[%s7387_s1 + $0x340] ss:$8 sps:$4 sm:$0xff]   ;;  %v5136_v21 = vld [vmem:[%s7387_s1 + $0x354] ss:$8 sps:$4 sm:$0xff]   ;;  %v5139_v23 = vld [vmem:[%s7387_s1 + $0x350] ss:$8 sps:$4 sm:$0xff]  }
   0x9   :  { %3090 = vmatprep.subr.bf16.mxu0 %v5118_v9  ;;  %v5140_v24 = vld [vmem:[%s7387_s1 + $0x64] ss:$8 sps:$4 sm:$0xff]   ;;  %v5144_v26 = vld [vmem:[%s7387_s1 + $0x60] ss:$8 sps:$4 sm:$0xff]   ;;  %v5146_v28 = vld [vmem:[%s7387_s1 + $0x74] ss:$8 sps:$4 sm:$0xff]  }
   0xa   :  { %v5142_v25 = vld [vmem:[%s7387_s1 + $0x364] ss:$8 sps:$4 sm:$0xff]   ;;  %v5145_v27 = vld [vmem:[%s7387_s1 + $0x360] ss:$8 sps:$4 sm:$0xff]   ;;  %v5148_v29 = vld [vmem:[%s7387_s1 + $0x374] ss:$8 sps:$4 sm:$0xff]  }
   0xb   :  { %2518 = vmatpush1.bf16.msra.mxu1 %v5120_v10  ;;  %v5150_v30 = vld [vmem:[%s7387_s1 + $0x70] ss:$8 sps:$4 sm:$0xff]   ;;  %v5152_v32 = vld [vmem:[%s7387_s1 + $0x84] ss:$8 sps:$4 sm:$0xff]   ;;  %v5156_v34 = vld [vmem:[%s7387_s1 + $0x80] ss:$8 sps:$4 sm:$0xff]  }
   0xc   :  { %3091 = vmatpush1.bf16.msra.mxu0 %v5121_v11  ;;  %2519 = vmatprep.subr.bf16.mxu1 %v5122_v12  ;;  %v5151_v31 = vld [vmem:[%s7387_s1 + $0x370] ss:$8 sps:$4 sm:$0xff]   ;;  %v5154_v33 = vld [vmem:[%s7387_s1 + $0x384] ss:$8 sps:$4 sm:$0xff]   ;;  %v5157_v35 = vld [vmem:[%s7387_s1 + $0x380] ss:$8 sps:$4 sm:$0xff]  }
   0xd   :  { %3092 = vmatprep.subr.bf16.mxu0 %v5124_v13  ;;  %v5158_v36 = vld [vmem:[%s7387_s1 + $0x94] ss:$8 sps:$4 sm:$0xff]   ;;  %v5162_v38 = vld [vmem:[%s7387_s1 + $0x90] ss:$8 sps:$4 sm:$0xff]   ;;  %v5164_v40 = vld [vmem:[%s7387_s1 + $0xa4] ss:$8 sps:$4 sm:$0xff]  }
   0xe   :  { %v5160_v37 = vld [vmem:[%s7387_s1 + $0x394] ss:$8 sps:$4 sm:$0xff]   ;;  %v5163_v39 = vld [vmem:[%s7387_s1 + $0x390] ss:$8 sps:$4 sm:$0xff]   ;;  %v5166_v41 = vld [vmem:[%s7387_s1 + $0x3a4] ss:$8 sps:$4 sm:$0xff]  }
   0xf   :  { %2520 = vmatpush1.bf16.msra.mxu1 %v5126_v14  ;;  %v5168_v42 = vld [vmem:[%s7387_s1 + $0xa0] ss:$8 sps:$4 sm:$0xff]   ;;  %v5170_v44 = vld [vmem:[%s7387_s1 + $0xb4] ss:$8 sps:$4 sm:$0xff]   ;;  %v5174_v46 = vld [vmem:[%s7387_s1 + $0xb0] ss:$8 sps:$4 sm:$0xff]  }
  0x10   :  { %3093 = vmatpush1.bf16.msra.mxu0 %v5127_v15  ;;  %2521 = vmatprep.subr.bf16.mxu1 %v5128_v16  ;;  %v5169_v43 = vld [vmem:[%s7387_s1 + $0x3a0] ss:$8 sps:$4 sm:$0xff]   ;;  %v5172_v45 = vld [vmem:[%s7387_s1 + $0x3b4] ss:$8 sps:$4 sm:$0xff]   ;;  %v5175_v47 = vld [vmem:[%s7387_s1 + $0x3b0] ss:$8 sps:$4 sm:$0xff]  }
  0x11   :  { %3094 = vmatprep.subr.bf16.mxu0 %v5130_v17  ;;  %v5176_v48 = vld [vmem:[%s7387_s1 + $0xc4] ss:$8 sps:$4 sm:$0xff]   ;;  %v5205_v51 = vld [vmem:[%s7388_s0 + $0x1c] ss:$52 sps:$4 sm:$0xff]   ;;  %v5180_v52 = vld [vmem:[%s7387_s1 + $0xc0] ss:$8 sps:$4 sm:$0xff]  }
  0x12   :  { %v5202_v49 = vld [vmem:[%s7388_s0 + $0x4] ss:$52 sps:$4 sm:$0xff]   ;;  %v5181_v53 = vld [vmem:[%s7387_s1 + $0x3c0] ss:$8 sps:$4 sm:$0xff]   ;;  %3118 = vmatprep.mubr.bf16.mxu0 %v5205_v51  ;;  %v5182_v54 = vld [vmem:[%s7387_s1 + $0xd4] ss:$8 sps:$4 sm:$0xff]  }
  0x13   :  { %2522 = vmatpush1.bf16.msra.mxu1 %v5132_v18  ;;  %v5178_v50 = vld [vmem:[%s7387_s1 + $0x3c4] ss:$8 sps:$4 sm:$0xff]   ;;  %2545 = vmatprep.mubr.bf16.mxu1 %v5202_v49  ;;  %v5184_v55 = vld [vmem:[%s7387_s1 + $0x3d4] ss:$8 sps:$4 sm:$0xff]   ;;  %v5186_v56 = vld [vmem:[%s7387_s1 + $0xd0] ss:$8 sps:$4 sm:$0xff]  }
  0x14   :  { %3095 = vmatpush1.bf16.msra.mxu0 %v5133_v19  ;;  %2523 = vmatprep.subr.bf16.mxu1 %v5134_v20  ;;  %v5187_v57 = vld [vmem:[%s7387_s1 + $0x3d0] ss:$8 sps:$4 sm:$0xff]   ;;  %v5188_v58 = vld [vmem:[%s7387_s1 + $0xe4] ss:$8 sps:$4 sm:$0xff]   ;;  %v5192_v60 = vld [vmem:[%s7387_s1 + $0xe0] ss:$8 sps:$4 sm:$0xff]  }
  0x15   :  { %3096 = vmatprep.subr.bf16.mxu0 %v5136_v21  ;;  %v5190_v59 = vld [vmem:[%s7387_s1 + $0x3e4] ss:$8 sps:$4 sm:$0xff]   ;;  %v5193_v61 = vld [vmem:[%s7387_s1 + $0x3e0] ss:$8 sps:$4 sm:$0xff]   ;;  %v5194_v62 = vld [vmem:[%s7387_s1 + $0xf4] ss:$8 sps:$4 sm:$0xff]  }
  0x16   :  { %v5196_v63 = vld [vmem:[%s7387_s1 + $0x3f4] ss:$8 sps:$4 sm:$0xff]   ;;  %v5198_v0 = vld [vmem:[%s7387_s1 + $0xf0] ss:$8 sps:$4 sm:$0xff]   ;;  %v5208_v2 = vld [vmem:[%s7387_s1 + $0x104] ss:$8 sps:$4 sm:$0xff]  }
  0x17   :  { %2524 = vmatpush1.bf16.msra.mxu1 %v5138_v22  ;;  %v5199_v1 = vld [vmem:[%s7387_s1 + $0x3f0] ss:$8 sps:$4 sm:$0xff]   ;;  %v5211_v3 = vld [vmem:[%s7387_s1 + $0x404] ss:$8 sps:$4 sm:$0xff]   ;;  %v5200_v4 = vld [vmem:[%s7388_s0] ss:$52 sps:$4 sm:$0xff]  }
  0x18   :  { %3097 = vmatpush1.bf16.msra.mxu0 %v5139_v23  ;;  %2525 = vmatprep.subr.bf16.mxu1 %v5140_v24  ;;  %v5203_v5 = vld [vmem:[%s7388_s0 + $0x18] ss:$52 sps:$4 sm:$0xff]   ;;  %v5206_v6 = vld [vmem:[%s7387_s1 + $0x100] ss:$8 sps:$4 sm:$0xff]   ;;  %v5214_v8 = vld [vmem:[%s7387_s1 + $0x414] ss:$8 sps:$4 sm:$0xff]  }
  0x19   :  { %3098 = vmatprep.subr.bf16.mxu0 %v5142_v25  ;;  %v5209_v7 = vld [vmem:[%s7387_s1 + $0x400] ss:$8 sps:$4 sm:$0xff]   ;;  %v5217_v10 = vld [vmem:[%s7388_s0 + $0x84] ss:$52 sps:$4 sm:$0xff]   ;;  %v5222_v11 = vld [vmem:[%s7387_s1 + $0x114] ss:$8 sps:$4 sm:$0xff]  }
  0x1a   :  { %v5215_v9 = vld [vmem:[%s7388_s0 + $0x6c] ss:$52 sps:$4 sm:$0xff]   ;;  %v5212_v12 = vld [vmem:[%s7387_s1 + $0x410] ss:$8 sps:$4 sm:$0xff]   ;;  %v5219_v16 = vld [vmem:[%s7388_s0 + $0x68] ss:$52 sps:$4 sm:$0xff]  }
  0x1b   :  { %2526 = vmatpush1.bf16.msra.mxu1 %v5144_v26  ;;  %v5220_v13 = vld [vmem:[%s7387_s1 + $0x110] ss:$8 sps:$4 sm:$0xff]   ;;  %v5226_v14 = vld [vmem:[%s7387_s1 + $0x424] ss:$8 sps:$4 sm:$0xff]   ;;  %v5223_v17 = vld [vmem:[%s7388_s0 + $0x80] ss:$52 sps:$4 sm:$0xff]  }
  0x1c   :  { %3099 = vmatpush1.bf16.msra.mxu0 %v5145_v27  ;;  %2527 = vmatprep.subr.bf16.mxu1 %v5146_v28  ;;  %v5237_v15 = vld [vmem:[%s7387_s1 + $0x124] ss:$8 sps:$4 sm:$0xff]   ;;  %v5224_v18 = vld [vmem:[%s7387_s1 + $0x420] ss:$8 sps:$4 sm:$0xff]   ;;  %v5229_v19 = vld [vmem:[%s7387_s1 + $0x434] ss:$8 sps:$4 sm:$0xff]  }
  0x1d   :  { %3100 = vmatprep.subr.bf16.mxu0 %v5148_v29  ;;  %v5230_v20 = vld [vmem:[%s7388_s0 + $0xd4] ss:$52 sps:$4 sm:$0xff]   ;;  %v5232_v21 = vld [vmem:[%s7388_s0 + $0xec] ss:$52 sps:$4 sm:$0xff]   ;;  %v5227_v24 = vld [vmem:[%s7387_s1 + $0x430] ss:$8 sps:$4 sm:$0xff]  }
  0x1e   :  { %v5235_v22 = vld [vmem:[%s7387_s1 + $0x120] ss:$8 sps:$4 sm:$0xff]   ;;  %v5252_v23 = vld [vmem:[%s7387_s1 + $0x134] ss:$8 sps:$4 sm:$0xff]   ;;  %v5234_v25 = vld [vmem:[%s7388_s0 + $0xd0] ss:$52 sps:$4 sm:$0xff]  }
  0x1f   :  { %2528 = vmatpush1.bf16.msra.mxu1 %v5150_v30  ;;  %v5241_v26 = vld [vmem:[%s7387_s1 + $0x444] ss:$8 sps:$4 sm:$0xff]   ;;  %v5250_v27 = vld [vmem:[%s7387_s1 + $0x130] ss:$8 sps:$4 sm:$0xff]   ;;  %v5238_v28 = vld [vmem:[%s7388_s0 + $0xe8] ss:$52 sps:$4 sm:$0xff]  }
  0x20   :  { %3101 = vmatpush1.bf16.msra.mxu0 %v5151_v31  ;;  %2529 = vmatprep.subr.bf16.mxu1 %v5152_v32  ;;  %v5239_v29 = vld [vmem:[%s7387_s1 + $0x440] ss:$8 sps:$4 sm:$0xff]   ;;  %v5244_v30 = vld [vmem:[%s7387_s1 + $0x454] ss:$8 sps:$4 sm:$0xff]   ;;  %v5268_v49 = vld [vmem:[%s7388_s0 + $0x1b8] ss:$52 sps:$4 sm:$0xff]  }
  0x21   :  { %3102 = vmatprep.subr.bf16.mxu0 %v5154_v33  ;;  %v5245_v31 = vld [vmem:[%s7388_s0 + $0x13c] ss:$52 sps:$4 sm:$0xff]   ;;  %v5247_v32 = vld [vmem:[%s7388_s0 + $0x154] ss:$52 sps:$4 sm:$0xff]   ;;  %v5267_v33 = vld [vmem:[%s7387_s1 + $0x144] ss:$8 sps:$4 sm:$0xff]  }
  0x22   :  { %v5269_v51 = vld [vmem:[%s7387_s1 + $0x480] ss:$8 sps:$4 sm:$0xff]   ;;  %vm7148_vm3 = vmor %vm4101_vm2, %vm4100_vm1  ;;  %vm4134_vm5 = vcmask 520196  }
  0x23   :  { %2530 = vmatpush1.bf16.msra.mxu1 %v5156_v34  ;;  %v5265_v34 = vld [vmem:[%s7387_s1 + $0x140] ss:$8 sps:$4 sm:$0xff]   ;;  %vm4135_vm6 = vmor %vm4134_vm5, %vm4133_vm4 }
  0x24   :  { %3103 = vmatpush1.bf16.msra.mxu0 %v5157_v35  ;;  %2531 = vmatprep.subr.bf16.mxu1 %v5158_v36  ;;  %v5242_v35 = vld [vmem:[%s7387_s1 + $0x450] ss:$8 sps:$4 sm:$0xff]   ;;  %v5282_v36 = vld [vmem:[%s7387_s1 + $0x154] ss:$8 sps:$4 sm:$0xff]  }
  0x25   :  { %3104 = vmatprep.subr.bf16.mxu0 %v5160_v37  ;;  %v5256_v37 = vld [vmem:[%s7387_s1 + $0x464] ss:$8 sps:$4 sm:$0xff]  }
  0x27   :  { %2532 = vmatpush1.bf16.msra.mxu1 %v5162_v38  ;;  %v5249_v38 = vld [vmem:[%s7388_s0 + $0x138] ss:$52 sps:$4 sm:$0xff]  }
  0x28   :  { %3105 = vmatpush1.bf16.msra.mxu0 %v5163_v39  ;;  %2533 = vmatprep.subr.bf16.mxu1 %v5164_v40  ;;  %v5253_v39 = vld [vmem:[%s7388_s0 + $0x150] ss:$52 sps:$4 sm:$0xff]   ;;  %v5254_v40 = vld [vmem:[%s7387_s1 + $0x460] ss:$8 sps:$4 sm:$0xff]  }
  0x29   :  { %3106 = vmatprep.subr.bf16.mxu0 %v5166_v41  ;;  %v5259_v41 = vld [vmem:[%s7387_s1 + $0x474] ss:$8 sps:$4 sm:$0xff]  }
  0x2b   :  { %2534 = vmatpush1.bf16.msra.mxu1 %v5168_v42  ;;  %v5260_v42 = vld [vmem:[%s7388_s0 + $0x1a4] ss:$52 sps:$4 sm:$0xff]  }
  0x2c   :  { %3107 = vmatpush1.bf16.msra.mxu0 %v5169_v43  ;;  %2535 = vmatprep.subr.bf16.mxu1 %v5170_v44  ;;  %v5262_v43 = vld [vmem:[%s7388_s0 + $0x1bc] ss:$52 sps:$4 sm:$0xff]  }
  0x2d   :  { %3108 = vmatprep.subr.bf16.mxu0 %v5172_v45  ;;  %v5280_v44 = vld [vmem:[%s7387_s1 + $0x150] ss:$8 sps:$4 sm:$0xff]   ;;  %v5297_v45 = vld [vmem:[%s7387_s1 + $0x164] ss:$8 sps:$4 sm:$0xff]  }
  0x2f   :  { %2536 = vmatpush1.bf16.msra.mxu1 %v5174_v46  ;;  %v5257_v46 = vld [vmem:[%s7387_s1 + $0x470] ss:$8 sps:$4 sm:$0xff]  }
  0x30   :  { %3109 = vmatpush1.bf16.msra.mxu0 %v5175_v47  ;;  %2537 = vmatprep.subr.bf16.mxu1 %v5176_v48  ;;  %v5264_v47 = vld [vmem:[%s7388_s0 + $0x1a0] ss:$52 sps:$4 sm:$0xff]   ;;  %v5271_v48 = vld [vmem:[%s7387_s1 + $0x484] ss:$8 sps:$4 sm:$0xff]  }
  0x31   :  { %3110 = vmatprep.subr.bf16.mxu0 %v5178_v50  ;;  %v5295_v50 = vld [vmem:[%s7387_s1 + $0x160] ss:$8 sps:$4 sm:$0xff]  }
  0x33   :  { %2538 = vmatpush1.bf16.msra.mxu1 %v5180_v52  ;;  %v5274_v52 = vld [vmem:[%s7387_s1 + $0x494] ss:$8 sps:$4 sm:$0xff]  }
  0x34   :  { %3111 = vmatpush1.bf16.msra.mxu0 %v5181_v53  ;;  %2539 = vmatprep.subr.bf16.mxu1 %v5182_v54  ;;  %v5275_v53 = vld [vmem:[%s7388_s0 + $0x20c] ss:$52 sps:$4 sm:$0xff]   ;;  %v5277_v54 = vld [vmem:[%s7388_s0 + $0x224] ss:$52 sps:$4 sm:$0xff]  }
  0x35   :  { %3112 = vmatprep.subr.bf16.mxu0 %v5184_v55  ;;  %v5312_v55 = vld [vmem:[%s7387_s1 + $0x174] ss:$8 sps:$4 sm:$0xff]  }
  0x37   :  { %2540 = vmatpush1.bf16.msra.mxu1 %v5186_v56  ;;  %v5272_v56 = vld [vmem:[%s7387_s1 + $0x490] ss:$8 sps:$4 sm:$0xff]  }
  0x38   :  { %3113 = vmatpush1.bf16.msra.mxu0 %v5187_v57  ;;  %2541 = vmatprep.subr.bf16.mxu1 %v5188_v58  ;;  %v5310_v57 = vld [vmem:[%s7387_s1 + $0x170] ss:$8 sps:$4 sm:$0xff]   ;;  %v5328_v58 = vld [vmem:[%s7387_s1 + $0x184] ss:$8 sps:$4 sm:$0xff]  }
  0x39   :  { %3114 = vmatprep.subr.bf16.mxu0 %v5190_v59  ;;  %v5286_v59 = vld [vmem:[%s7387_s1 + $0x4a4] ss:$8 sps:$4 sm:$0xff]  }
  0x3b   :  { %2542 = vmatpush1.bf16.msra.mxu1 %v5192_v60  ;;  %v5279_v60 = vld [vmem:[%s7388_s0 + $0x208] ss:$52 sps:$4 sm:$0xff]  }
  0x3c   :  { %3115 = vmatpush1.bf16.msra.mxu0 %v5193_v61  ;;  %2543 = vmatprep.subr.bf16.mxu1 %v5194_v62  ;;  %v5283_v61 = vld [vmem:[%s7388_s0 + $0x220] ss:$52 sps:$4 sm:$0xff]  }
  0x3d   :  { %3116 = vmatprep.subr.bf16.mxu0 %v5196_v63  ;;  %v5284_v62 = vld [vmem:[%s7387_s1 + $0x4a0] ss:$8 sps:$4 sm:$0xff]   ;;  %v5289_v63 = vld [vmem:[%s7387_s1 + $0x4b4] ss:$8 sps:$4 sm:$0xff]  }
  0x3f   :  { %2544 = vmatpush1.bf16.msra.mxu1 %v5198_v0  ;;  %v5290_v0 = vld [vmem:[%s7388_s0 + $0x274] ss:$52 sps:$4 sm:$0xff]  }
  0x40   :  { %3117 = vmatpush1.bf16.msra.mxu0 %v5199_v1  ;;  %2704 = vmatprep.subr.bf16.mxu1 %v5208_v2  ;;  %v5292_v1 = vld [vmem:[%s7388_s0 + $0x28c] ss:$52 sps:$4 sm:$0xff]  }
  0x41   :  { %3277 = vmatprep.subr.bf16.mxu0 %v5211_v3  ;;  %v5326_v2 = vld [vmem:[%s7387_s1 + $0x180] ss:$8 sps:$4 sm:$0xff]   ;;  %v5339_v3 = vld [vmem:[%s7387_s1 + $0x194] ss:$8 sps:$4 sm:$0xff]  }
  0x42   :  { %2546 = vmatmul.mubr.bf16.vlgmr.msra.gmra.mrb[0].mxu1 %v5200_v4  ;;  %v5287_v4 = vld [vmem:[%s7387_s1 + $0x4b0] ss:$8 sps:$4 sm:$0xff]  }
  0x43   :  { %3119 = vmatmul.mubr.bf16.vlgmr.msra.gmra.mrb[0].mxu0 %v5203_v5  ;;  %2705 = vmatpush1.bf16.msra.mxu1 %v5206_v6  ;;  %v5294_v5 = vld [vmem:[%s7388_s0 + $0x270] ss:$52 sps:$4 sm:$0xff]  }
  0x44   :  { %3278 = vmatpush1.bf16.msra.mxu0 %v5209_v7  ;;  %2555 = vmatprep.mubr.bf16.mxu1 %v5215_v9  ;;  %v5301_v6 = vld [vmem:[%s7387_s1 + $0x4c4] ss:$8 sps:$4 sm:$0xff]   ;;  %v5298_v7 = vld [vmem:[%s7388_s0 + $0x288] ss:$52 sps:$4 sm:$0xff]  }
  0x45   :  { %3279 = vmatprep.subr.bf16.mxu0 %v5214_v8  ;;  %3128 = vmatprep.mubr.bf16.mxu0 %v5217_v10  ;;  %v5337_v8 = vld [vmem:[%s7387_s1 + $0x190] ss:$8 sps:$4 sm:$0xff]   ;;  %v5299_v9 = vld [vmem:[%s7387_s1 + $0x4c0] ss:$8 sps:$4 sm:$0xff]   ;;  %v5304_v10 = vld [vmem:[%s7387_s1 + $0x4d4] ss:$8 sps:$4 sm:$0xff]  }
  0x46   :  { %2706 = vmatprep.subr.bf16.mxu1 %v5222_v11  ;;  %v5305_v11 = vld [vmem:[%s7388_s0 + $0x2dc] ss:$52 sps:$4 sm:$0xff]  }
  0x47   :  { %2707 = vmatpush1.bf16.msra.mxu1 %v5220_v13  ;;  %v5351_v13 = vld [vmem:[%s7387_s1 + $0x1a4] ss:$8 sps:$4 sm:$0xff]  }
  0x48   :  { %3280 = vmatpush1.bf16.msra.mxu0 %v5212_v12  ;;  %2708 = vmatprep.subr.bf16.mxu1 %v5237_v15  ;;  %v5307_v12 = vld [vmem:[%s7388_s0 + $0x2f4] ss:$52 sps:$4 sm:$0xff]  }
  0x49   :  { %3281 = vmatprep.subr.bf16.mxu0 %v5226_v14  ;;  %v5302_v14 = vld [vmem:[%s7387_s1 + $0x4d0] ss:$8 sps:$4 sm:$0xff]   ;;  %v5349_v15 = vld [vmem:[%s7387_s1 + $0x1a0] ss:$8 sps:$4 sm:$0xff]  }
  0x4a   :  { %2556 = vmatmul.mubr.bf16.gmra.mrb[4].mxu1 %v5219_v16  ;;  %v5363_v16 = vld [vmem:[%s7387_s1 + $0x1b4] ss:$8 sps:$4 sm:$0xff]  }
  0x4b   :  { %3129 = vmatmul.mubr.bf16.gmra.mrb[4].mxu0 %v5223_v17  ;;  %2565 = vmatprep.mubr.bf16.mxu1 %v5230_v20  ;;  %v5316_v17 = vld [vmem:[%s7387_s1 + $0x4e4] ss:$8 sps:$4 sm:$0xff]   ;;  %v5314_v20 = vld [vmem:[%s7387_s1 + $0x4e0] ss:$8 sps:$4 sm:$0xff]  }
  0x4c   :  { %3282 = vmatpush1.bf16.msra.mxu0 %v5224_v18  ;;  %3138 = vmatprep.mubr.bf16.mxu0 %v5232_v21  ;;  %v5309_v18 = vld [vmem:[%s7388_s0 + $0x2d8] ss:$52 sps:$4 sm:$0xff]   ;;  %v5319_v21 = vld [vmem:[%s7387_s1 + $0x4f4] ss:$8 sps:$4 sm:$0xff]  }
  0x4d   :  { %3283 = vmatprep.subr.bf16.mxu0 %v5229_v19  ;;  %2709 = vmatpush1.bf16.msra.mxu1 %v5235_v22  ;;  %v5313_v19 = vld [vmem:[%s7388_s0 + $0x2f0] ss:$52 sps:$4 sm:$0xff]  }
  0x4e   :  { %2710 = vmatprep.subr.bf16.mxu1 %v5252_v23  ;;  %v5320_v22 = vld [vmem:[%s7388_s0 + $0x344] ss:$52 sps:$4 sm:$0xff]  }
  0x4f   :  { %v5324_v23 = vld [vmem:[%s7388_s0 + $0x24] ss:$52 sps:$4 sm:$0xff]  }
  0x50   :  { %3284 = vmatpush1.bf16.msra.mxu0 %v5227_v24  ;;  %v5361_v24 = vld [vmem:[%s7387_s1 + $0x1b0] ss:$8 sps:$4 sm:$0xff]  }
  0x51   :  { %3285 = vmatprep.subr.bf16.mxu0 %v5241_v26  ;;  %2711 = vmatpush1.bf16.msra.mxu1 %v5250_v27  ;;  %v5317_v26 = vld [vmem:[%s7387_s1 + $0x4f0] ss:$8 sps:$4 sm:$0xff]   ;;  %v5322_v27 = vld [vmem:[%s7388_s0 + $0x20] ss:$52 sps:$4 sm:$0xff]  }
  0x52   :  { %2566 = vmatmul.mubr.bf16.gmra.mrb[8].mxu1 %v5234_v25  ;;  %2712 = vmatprep.subr.bf16.mxu1 %v5267_v33  ;;  %v5375_v25 = vld [vmem:[%s7387_s1 + $0x1c4] ss:$8 sps:$4 sm:$0xff]  }
  0x53   :  { %3139 = vmatmul.mubr.bf16.gmra.mrb[8].mxu0 %v5238_v28  ;;  %2575 = vmatprep.mubr.bf16.mxu1 %v5245_v31  ;;  %v5331_v28 = vld [vmem:[%s7387_s1 + $0x504] ss:$8 sps:$4 sm:$0xff]   ;;  %v5329_v31 = vld [vmem:[%s7387_s1 + $0x500] ss:$8 sps:$4 sm:$0xff]  }
  0x54   :  { %3286 = vmatpush1.bf16.msra.mxu0 %v5239_v29  ;;  %3148 = vmatprep.mubr.bf16.mxu0 %v5247_v32  ;;  %v5325_v29 = vld [vmem:[%s7388_s0 + $0x340] ss:$52 sps:$4 sm:$0xff]  }
  0x55   :  { %3287 = vmatprep.subr.bf16.mxu0 %v5244_v30  ;;  %2713 = vmatpush1.bf16.msra.mxu1 %v5265_v34  ;;  %v5373_v30 = vld [vmem:[%s7387_s1 + $0x1c0] ss:$8 sps:$4 sm:$0xff]   ;;  %v5343_v34 = vld [vmem:[%s7387_s1 + $0x514] ss:$8 sps:$4 sm:$0xff]  }
  0x56   :  { %2714 = vmatprep.subr.bf16.mxu1 %v5282_v36  ;;  %v5332_v32 = vld [vmem:[%s7388_s0 + $0x3ac] ss:$52 sps:$4 sm:$0xff]   ;;  %v5341_v36 = vld [vmem:[%s7387_s1 + $0x510] ss:$8 sps:$4 sm:$0xff]  }
  0x57   :  { %v5334_v33 = vld [vmem:[%s7388_s0 + $0x8c] ss:$52 sps:$4 sm:$0xff]  }
  0x58   :  { %3288 = vmatpush1.bf16.msra.mxu0 %v5242_v35  ;;  %v5387_v35 = vld [vmem:[%s7387_s1 + $0x1d4] ss:$8 sps:$4 sm:$0xff]  }
  0x59   :  { %3289 = vmatprep.subr.bf16.mxu0 %v5256_v37  ;;  %2715 = vmatpush1.bf16.msra.mxu1 %v5280_v44  ;;  %v5385_v37 = vld [vmem:[%s7387_s1 + $0x1d0] ss:$8 sps:$4 sm:$0xff]   ;;  %v5353_v44 = vld [vmem:[%s7387_s1 + $0x520] ss:$8 sps:$4 sm:$0xff]  }
  0x5a   :  { %2576 = vmatmul.mubr.bf16.gmra.mrb[12].mxu1 %v5249_v38  ;;  %2716 = vmatprep.subr.bf16.mxu1 %v5297_v45  ;;  %v5399_v38 = vld [vmem:[%s7387_s1 + $0x1e4] ss:$8 sps:$4 sm:$0xff]   ;;  %v5397_v45 = vld [vmem:[%s7387_s1 + $0x1e0] ss:$8 sps:$4 sm:$0xff]  }
  0x5b   :  { %3149 = vmatmul.mubr.bf16.gmra.mrb[12].mxu0 %v5253_v39  ;;  %2585 = vmatprep.mubr.bf16.mxu1 %v5260_v42  ;;  %v5355_v39 = vld [vmem:[%s7387_s1 + $0x524] ss:$8 sps:$4 sm:$0xff]   ;;  %v5344_v42 = vld [vmem:[%s7388_s0 + $0x414] ss:$52 sps:$4 sm:$0xff]  }
  0x5c   :  { %3290 = vmatpush1.bf16.msra.mxu0 %v5254_v40  ;;  %3158 = vmatprep.mubr.bf16.mxu0 %v5262_v43  ;;  %v5336_v40 = vld [vmem:[%s7388_s0 + $0x3a8] ss:$52 sps:$4 sm:$0xff]  }
  0x5d   :  { %3291 = vmatprep.subr.bf16.mxu0 %v5259_v41  ;;  %2717 = vmatpush1.bf16.msra.mxu1 %v5295_v50  ;;  %v5340_v41 = vld [vmem:[%s7388_s0 + $0x88] ss:$52 sps:$4 sm:$0xff]   ;;  %v5365_v50 = vld [vmem:[%s7387_s1 + $0x530] ss:$8 sps:$4 sm:$0xff]  }
  0x5e   :  { %2718 = vmatprep.subr.bf16.mxu1 %v5312_v55  ;;  %v5346_v43 = vld [vmem:[%s7388_s0 + $0xf4] ss:$52 sps:$4 sm:$0xff]   ;;  %v5358_v55 = vld [vmem:[%s7388_s0 + $0x15c] ss:$52 sps:$4 sm:$0xff]  }
  0x60   :  { %3292 = vmatpush1.bf16.msra.mxu0 %v5257_v46  ;;  %v5367_v46 = vld [vmem:[%s7387_s1 + $0x534] ss:$8 sps:$4 sm:$0xff]  }
  0x61   :  { %3293 = vmatprep.subr.bf16.mxu0 %v5271_v48  ;;  %2719 = vmatpush1.bf16.msra.mxu1 %v5310_v57  ;;  %v5348_v48 = vld [vmem:[%s7388_s0 + $0x410] ss:$52 sps:$4 sm:$0xff]   ;;  %v5391_v57 = vld [vmem:[%s7387_s1 + $0x554] ss:$8 sps:$4 sm:$0xff]  }
  0x62   :  { %2586 = vmatmul.mubr.bf16.gmra.mrb[16].mxu1 %v5264_v47  ;;  %2720 = vmatprep.subr.bf16.mxu1 %v5328_v58  ;;  %v5410_v47 = vld [vmem:[%s7387_s1 + $0x1f4] ss:$8 sps:$4 sm:$0xff]   ;;  %v5389_v58 = vld [vmem:[%s7387_s1 + $0x550] ss:$8 sps:$4 sm:$0xff]  }
  0x63   :  { %3159 = vmatmul.mubr.bf16.gmra.mrb[16].mxu0 %v5268_v49  ;;  %2595 = vmatprep.mubr.bf16.mxu1 %v5275_v53  ;;  %v5352_v49 = vld [vmem:[%s7388_s0 + $0xf0] ss:$52 sps:$4 sm:$0xff]  }
  0x64   :  { %3294 = vmatpush1.bf16.msra.mxu0 %v5269_v51  ;;  %3168 = vmatprep.mubr.bf16.mxu0 %v5277_v54  ;;  %v5408_v51 = vld [vmem:[%s7387_s1 + $0x1f0] ss:$8 sps:$4 sm:$0xff]   ;;  %v5422_v53 = vld [vmem:[%s7387_s1 + $0x204] ss:$8 sps:$4 sm:$0xff]  }
  0x65   :  { %3295 = vmatprep.subr.bf16.mxu0 %v5274_v52  ;;  %2721 = vmatpush1.bf16.msra.mxu1 %v5326_v2  ;;  %v5379_v52 = vld [vmem:[%s7387_s1 + $0x544] ss:$8 sps:$4 sm:$0xff]   ;;  %v5356_v54 = vld [vmem:[%s7388_s0 + $0x47c] ss:$52 sps:$4 sm:$0xff]   ;;  %v5372_v2 = vld [vmem:[%s7388_s0 + $0x4e0] ss:$52 sps:$4 sm:$0xff]  }
  0x66   :  { %2722 = vmatprep.subr.bf16.mxu1 %v5339_v3  ;;  %v5412_v3 = vld [vmem:[%s7387_s1 + $0x570] ss:$8 sps:$4 sm:$0xff]  }
  0x68   :  { %3296 = vmatpush1.bf16.msra.mxu0 %v5272_v56  ;;  %v5377_v56 = vld [vmem:[%s7387_s1 + $0x540] ss:$8 sps:$4 sm:$0xff]  }
  0x69   :  { %3297 = vmatprep.subr.bf16.mxu0 %v5286_v59  ;;  %2723 = vmatpush1.bf16.msra.mxu1 %v5337_v8  ;;  %v5360_v59 = vld [vmem:[%s7388_s0 + $0x478] ss:$52 sps:$4 sm:$0xff]   ;;  %v5424_v8 = vld [vmem:[%s7387_s1 + $0x580] ss:$8 sps:$4 sm:$0xff]  }
  0x6a   :  { %2596 = vmatmul.mubr.bf16.gmra.mrb[20].mxu1 %v5279_v60  ;;  %2724 = vmatprep.subr.bf16.mxu1 %v5351_v13  ;;  %v5403_v60 = vld [vmem:[%s7387_s1 + $0x564] ss:$8 sps:$4 sm:$0xff]   ;;  %v5388_v13 = vld [vmem:[%s7388_s0 + $0x228] ss:$52 sps:$4 sm:$0xff]  }
  0x6b   :  { %3169 = vmatmul.mubr.bf16.gmra.mrb[20].mxu0 %v5283_v61  ;;  %2605 = vmatprep.mubr.bf16.mxu1 %v5290_v0  ;;  %v5364_v61 = vld [vmem:[%s7388_s0 + $0x158] ss:$52 sps:$4 sm:$0xff]   ;;  %v5401_v0 = vld [vmem:[%s7387_s1 + $0x560] ss:$8 sps:$4 sm:$0xff]  }
  0x6c   :  { %3298 = vmatpush1.bf16.msra.mxu0 %v5284_v62  ;;  %3178 = vmatprep.mubr.bf16.mxu0 %v5292_v1  ;;  %v5368_v62 = vld [vmem:[%s7388_s0 + $0x4e4] ss:$52 sps:$4 sm:$0xff]   ;;  %v5414_v1 = vld [vmem:[%s7387_s1 + $0x574] ss:$8 sps:$4 sm:$0xff]  }
  0x6d   :  { %3299 = vmatprep.subr.bf16.mxu0 %v5289_v63  ;;  %2725 = vmatpush1.bf16.msra.mxu1 %v5349_v15  ;;  %v5370_v63 = vld [vmem:[%s7388_s0 + $0x1c4] ss:$52 sps:$4 sm:$0xff]   ;;  %v5394_v15 = vld [vmem:[%s7388_s0 + $0x294] ss:$52 sps:$4 sm:$0xff]  }
  0x6e   :  { %2726 = vmatprep.subr.bf16.mxu1 %v5363_v16  ;;  %v5448_v16 = vld [vmem:[%s7387_s1 + $0x5a0] ss:$8 sps:$4 sm:$0xff]  }
  0x70   :  { %3300 = vmatpush1.bf16.msra.mxu0 %v5287_v4  ;;  %v5376_v4 = vld [vmem:[%s7388_s0 + $0x1c0] ss:$52 sps:$4 sm:$0xff]  }
  0x71   :  { %3301 = vmatprep.subr.bf16.mxu0 %v5301_v6  ;;  %2727 = vmatpush1.bf16.msra.mxu1 %v5361_v24  ;;  %v5380_v6 = vld [vmem:[%s7388_s0 + $0x54c] ss:$52 sps:$4 sm:$0xff]   ;;  %v5405_v24 = vld [vmem:[%s7388_s0 + $0x2fc] ss:$52 sps:$4 sm:$0xff]  }
  0x72   :  { %2606 = vmatmul.mubr.bf16.gmra.mrb[24].mxu1 %v5294_v5  ;;  %2728 = vmatprep.subr.bf16.mxu1 %v5375_v25  ;;  %v5426_v5 = vld [vmem:[%s7387_s1 + $0x584] ss:$8 sps:$4 sm:$0xff]   ;;  %v5472_v25 = vld [vmem:[%s7387_s1 + $0x5c0] ss:$8 sps:$4 sm:$0xff]  }
  0x73   :  { %3179 = vmatmul.mubr.bf16.gmra.mrb[24].mxu0 %v5298_v7  ;;  %2615 = vmatprep.mubr.bf16.mxu1 %v5305_v11  ;;  %v5382_v7 = vld [vmem:[%s7388_s0 + $0x22c] ss:$52 sps:$4 sm:$0xff]   ;;  %v5384_v11 = vld [vmem:[%s7388_s0 + $0x548] ss:$52 sps:$4 sm:$0xff]  }
  0x74   :  { %3302 = vmatpush1.bf16.msra.mxu0 %v5299_v9  ;;  %3188 = vmatprep.mubr.bf16.mxu0 %v5307_v12  ;;  %v5438_v9 = vld [vmem:[%s7387_s1 + $0x594] ss:$8 sps:$4 sm:$0xff]   ;;  %v5450_v12 = vld [vmem:[%s7387_s1 + $0x5a4] ss:$8 sps:$4 sm:$0xff]  }
  0x75   :  { %3303 = vmatprep.subr.bf16.mxu0 %v5304_v10  ;;  %2729 = vmatpush1.bf16.msra.mxu1 %v5373_v30  ;;  %v5436_v10 = vld [vmem:[%s7387_s1 + $0x590] ss:$8 sps:$4 sm:$0xff]  }
  0x76   :  { %2730 = vmatprep.subr.bf16.mxu1 %v5387_v35  ;;  %v5411_v30 = vld [vmem:[%s7388_s0 + $0x2f8] ss:$52 sps:$4 sm:$0xff]   ;;  %v5415_v35 = vld [vmem:[%s7388_s0 + $0x8] ss:$52 sps:$4 sm:$0xff]  }
  0x78   :  { %3304 = vmatpush1.bf16.msra.mxu0 %v5302_v14  ;;  %v5392_v14 = vld [vmem:[%s7388_s0 + $0x5b4] ss:$52 sps:$4 sm:$0xff]  }
  0x79   :  { %3305 = vmatprep.subr.bf16.mxu0 %v5316_v17  ;;  %2731 = vmatpush1.bf16.msra.mxu1 %v5385_v37  ;;  %v5462_v17 = vld [vmem:[%s7387_s1 + $0x5b4] ss:$8 sps:$4 sm:$0xff]   ;;  %v5420_v37 = vld [vmem:[%s7387_s1 + $0x200] ss:$8 sps:$4 sm:$0xff]  }
  0x7a   :  { %2616 = vmatmul.mubr.bf16.gmra.mrb[28].mxu1 %v5309_v18  ;;  %2732 = vmatprep.subr.bf16.mxu1 %v5399_v38  ;;  %v225_v18 = vld [vmem:[%s7388_s0 + $0x618] sm:$0x11]  ;;  %v5521_v38 = vld [vmem:[%s7387_s1 + $0x604] ss:$8 sps:$4 sm:$0xff]  }
  0x7b   :  { %3189 = vmatmul.mubr.bf16.gmra.mrb[28].mxu0 %v5313_v19  ;;  %2625 = vmatprep.mubr.bf16.mxu1 %v5320_v22  ;;  %v5460_v19 = vld [vmem:[%s7387_s1 + $0x5b0] ss:$8 sps:$4 sm:$0xff]  }
  0x7c   :  { %3306 = vmatpush1.bf16.msra.mxu0 %v5314_v20  ;;  %3309 = vmatprep.mubr.bf16.mxu0 %v5324_v23  ;;  %v5396_v20 = vld [vmem:[%s7388_s0 + $0x5b0] ss:$52 sps:$4 sm:$0xff]   ;;  %v4337_v23 = vcombine.high %v225_v18, %v225_v18 }
  0x7d   :  { %3307 = vmatprep.subr.bf16.mxu0 %v5319_v21  ;;  %2733 = vmatpush1.bf16.msra.mxu1 %v5397_v45  ;;  %v5474_v21 = vld [vmem:[%s7387_s1 + $0x5c4] ss:$8 sps:$4 sm:$0xff]  }
  0x7e   :  { %2734 = vmatprep.subr.bf16.mxu1 %v5410_v47  ;;  %v5400_v22 = vld [vmem:[%s7388_s0 + $0x290] ss:$52 sps:$4 sm:$0xff]  }
  0x7f   :  { %v5431_v45 = vld [vmem:[%s7388_s0 + $0x70] ss:$52 sps:$4 sm:$0xff]  }
  0x80   :  { %3308 = vmatpush1.bf16.msra.mxu0 %v5317_v26  ;;  %v5486_v26 = vld [vmem:[%s7387_s1 + $0x5d4] ss:$8 sps:$4 sm:$0xff]  }
  0x81   :  { %3468 = vmatprep.subr.bf16.mxu0 %v5331_v28  ;;  %2735 = vmatpush1.bf16.msra.mxu1 %v5408_v51  ;;  %v5498_v28 = vld [vmem:[%s7387_s1 + $0x5e4] ss:$8 sps:$4 sm:$0xff]   ;;  %v5439_v47 = vld [vmem:[%s7388_s0 + $0xdc] ss:$52 sps:$4 sm:$0xff]  }
  0x82   :  { %2626 = vmatmul.mubr.bf16.gmra.mrb[32].mxu1 %v5325_v29  ;;  %2895 = vmatprep.subr.bf16.mxu1 %v5422_v53  ;;  %v4336_v29 = vcombine.low %v225_v18, %v225_v18  ;;  %v5443_v51 = vld [vmem:[%s7388_s0 + $0xd8] ss:$52 sps:$4 sm:$0xff]   ;;  %v5547_v18 = vld [vmem:[%s7387_s1 + $0x2b4] ss:$8 sps:$4 sm:$0xff]  }
  0x83   :  { %3310 = vmatmul.mubr.bf16.vlgmr.msra.gmra.mrb[0].mxu0 %v5322_v27  ;;  %2635 = vmatprep.mubr.bf16.mxu1 %v5332_v32  ;;  %v5484_v27 = vld [vmem:[%s7387_s1 + $0x5d0] ss:$8 sps:$4 sm:$0xff]  }
  0x84   :  { %3469 = vmatpush1.bf16.msra.mxu0 %v5329_v31  ;;  %3319 = vmatprep.mubr.bf16.mxu0 %v5334_v33  ;;  %v5417_v31 = vld [vmem:[%s7388_s0 + $0xc] ss:$52 sps:$4 sm:$0xff]   ;;  %v5418_v32 = vld [vmem:[%s7388_s0 + $0x364] ss:$52 sps:$4 sm:$0xff]  }
  0x85   :  { %3470 = vmatprep.subr.bf16.mxu0 %v5343_v34  ;;  %v5496_v33 = vld [vmem:[%s7387_s1 + $0x5e0] ss:$8 sps:$4 sm:$0xff]   ;;  %v5509_v34 = vld [vmem:[%s7387_s1 + $0x5f4] ss:$8 sps:$4 sm:$0xff]   ;;  %v5456_v53 = vld [vmem:[%s7387_s1 + $0x230] ss:$8 sps:$4 sm:$0xff]  }
  0x88   :  { %3471 = vmatpush1.bf16.msra.mxu0 %v5341_v36  ;;  %v5507_v36 = vld [vmem:[%s7387_s1 + $0x5f0] ss:$8 sps:$4 sm:$0xff]  }
  0x89   :  { %3472 = vmatprep.subr.bf16.mxu0 %v5355_v39  ;;  %v5423_v39 = vld [vmem:[%s7388_s0 + $0x360] ss:$52 sps:$4 sm:$0xff]  }
  0x8a   :  { %2636 = vmatmul.mubr.bf16.gmra.mrb[36].mxu1 %v5336_v40  ;;  %v5427_v40 = vld [vmem:[%s7388_s0 + $0x74] ss:$52 sps:$4 sm:$0xff]  }
  0x8b   :  { %3320 = vmatmul.mubr.bf16.gmra.mrb[4].mxu0 %v5340_v41  ;;  %2645 = vmatprep.mubr.bf16.mxu1 %v5344_v42  ;;  %v5429_v41 = vld [vmem:[%s7388_s0 + $0x3cc] ss:$52 sps:$4 sm:$0xff]   ;;  %v5434_v42 = vld [vmem:[%s7387_s1 + $0x214] ss:$8 sps:$4 sm:$0xff]  }
  0x8c   :  { %3329 = vmatprep.mubr.bf16.mxu0 %v5346_v43  ;;  %3473 = vmatpush1.bf16.msra.mxu0 %v5353_v44  ;;  %v5432_v43 = vld [vmem:[%s7387_s1 + $0x210] ss:$8 sps:$4 sm:$0xff]   ;;  %v5446_v44 = vld [vmem:[%s7387_s1 + $0x224] ss:$8 sps:$4 sm:$0xff]  }
  0x8d   :  { %3474 = vmatprep.subr.bf16.mxu0 %v5367_v46  ;;  %v5435_v46 = vld [vmem:[%s7388_s0 + $0x3c8] ss:$52 sps:$4 sm:$0xff]  }
  0x90   :  { %3475 = vmatpush1.bf16.msra.mxu0 %v5365_v50  ;;  %v5458_v50 = vld [vmem:[%s7387_s1 + $0x234] ss:$8 sps:$4 sm:$0xff]  }
  0x91   :  { %3476 = vmatprep.subr.bf16.mxu0 %v5379_v52  ;;  %v5447_v52 = vld [vmem:[%s7388_s0 + $0x430] ss:$52 sps:$4 sm:$0xff]  }
  0x92   :  { %2646 = vmatmul.mubr.bf16.gmra.mrb[40].mxu1 %v5348_v48  ;;  %v5441_v48 = vld [vmem:[%s7388_s0 + $0x434] ss:$52 sps:$4 sm:$0xff]  }
  0x93   :  { %3330 = vmatmul.mubr.bf16.gmra.mrb[8].mxu0 %v5352_v49  ;;  %2655 = vmatprep.mubr.bf16.mxu1 %v5356_v54  ;;  %v5444_v49 = vld [vmem:[%s7387_s1 + $0x220] ss:$8 sps:$4 sm:$0xff]   ;;  %v5470_v54 = vld [vmem:[%s7387_s1 + $0x244] ss:$8 sps:$4 sm:$0xff]  }
  0x94   :  { %3339 = vmatprep.mubr.bf16.mxu0 %v5358_v55  ;;  %3477 = vmatpush1.bf16.msra.mxu0 %v5377_v56  ;;  %v5451_v55 = vld [vmem:[%s7388_s0 + $0x144] ss:$52 sps:$4 sm:$0xff]   ;;  %v5453_v56 = vld [vmem:[%s7388_s0 + $0x49c] ss:$52 sps:$4 sm:$0xff]  }
  0x95   :  { %3478 = vmatprep.subr.bf16.mxu0 %v5391_v57  ;;  %v5468_v57 = vld [vmem:[%s7387_s1 + $0x240] ss:$8 sps:$4 sm:$0xff]  }
  0x98   :  { %3479 = vmatpush1.bf16.msra.mxu0 %v5389_v58  ;;  %v5482_v58 = vld [vmem:[%s7387_s1 + $0x254] ss:$8 sps:$4 sm:$0xff]  }
  0x99   :  { %3480 = vmatprep.subr.bf16.mxu0 %v5403_v60  ;;  %v5494_v60 = vld [vmem:[%s7387_s1 + $0x264] ss:$8 sps:$4 sm:$0xff]  }
  0x9a   :  { %2656 = vmatmul.mubr.bf16.gmra.mrb[44].mxu1 %v5360_v59  ;;  %v5480_v59 = vld [vmem:[%s7387_s1 + $0x250] ss:$8 sps:$4 sm:$0xff]  }
  0x9b   :  { %3340 = vmatmul.mubr.bf16.gmra.mrb[12].mxu0 %v5364_v61  ;;  %2665 = vmatprep.mubr.bf16.mxu1 %v5368_v62  ;;  %v5455_v61 = vld [vmem:[%s7388_s0 + $0x140] ss:$52 sps:$4 sm:$0xff]   ;;  %v5459_v62 = vld [vmem:[%s7388_s0 + $0x498] ss:$52 sps:$4 sm:$0xff]  }
  0x9c   :  { %3349 = vmatprep.mubr.bf16.mxu0 %v5370_v63  ;;  %3481 = vmatpush1.bf16.msra.mxu0 %v5401_v0  ;;  %v5463_v63 = vld [vmem:[%s7388_s0 + $0x1ac] ss:$52 sps:$4 sm:$0xff]   ;;  %v5465_v0 = vld [vmem:[%s7388_s0 + $0x504] ss:$52 sps:$4 sm:$0xff]  }
  0x9d   :  { %3482 = vmatprep.subr.bf16.mxu0 %v5414_v1  ;;  %v5492_v1 = vld [vmem:[%s7387_s1 + $0x260] ss:$8 sps:$4 sm:$0xff]  }
  0xa0   :  { %3483 = vmatpush1.bf16.msra.mxu0 %v5412_v3  ;;  %v5467_v3 = vld [vmem:[%s7388_s0 + $0x1a8] ss:$52 sps:$4 sm:$0xff]  }
  0xa1   :  { %3484 = vmatprep.subr.bf16.mxu0 %v5426_v5  ;;  %v5518_v5 = vld [vmem:[%s7387_s1 + $0x284] ss:$8 sps:$4 sm:$0xff]  }
  0xa2   :  { %2666 = vmatmul.mubr.bf16.gmra.mrb[48].mxu1 %v5372_v2  ;;  %v5505_v2 = vld [vmem:[%s7387_s1 + $0x274] ss:$8 sps:$4 sm:$0xff]  }
  0xa3   :  { %3350 = vmatmul.mubr.bf16.gmra.mrb[16].mxu0 %v5376_v4  ;;  %2675 = vmatprep.mubr.bf16.mxu1 %v5380_v6  ;;  %v5503_v4 = vld [vmem:[%s7387_s1 + $0x270] ss:$8 sps:$4 sm:$0xff]   ;;  %v5471_v6 = vld [vmem:[%s7388_s0 + $0x500] ss:$52 sps:$4 sm:$0xff]  }
  0xa4   :  { %3359 = vmatprep.mubr.bf16.mxu0 %v5382_v7  ;;  %3485 = vmatpush1.bf16.msra.mxu0 %v5424_v8  ;;  %v5475_v7 = vld [vmem:[%s7388_s0 + $0x214] ss:$52 sps:$4 sm:$0xff]   ;;  %v5477_v8 = vld [vmem:[%s7388_s0 + $0x56c] ss:$52 sps:$4 sm:$0xff]  }
  0xa5   :  { %3486 = vmatprep.subr.bf16.mxu0 %v5438_v9  ;;  %v5516_v9 = vld [vmem:[%s7387_s1 + $0x280] ss:$8 sps:$4 sm:$0xff]  }
  0xa8   :  { %3487 = vmatpush1.bf16.msra.mxu0 %v5436_v10  ;;  %v5529_v10 = vld [vmem:[%s7387_s1 + $0x294] ss:$8 sps:$4 sm:$0xff]  }
  0xa9   :  { %3488 = vmatprep.subr.bf16.mxu0 %v5450_v12  ;;  %v5483_v12 = vld [vmem:[%s7388_s0 + $0x568] ss:$52 sps:$4 sm:$0xff]  }
  0xaa   :  { %2676 = vmatmul.mubr.bf16.gmra.mrb[52].mxu1 %v5384_v11  ;;  %v5479_v11 = vld [vmem:[%s7388_s0 + $0x210] ss:$52 sps:$4 sm:$0xff]  }
  0xab   :  { %3360 = vmatmul.mubr.bf16.gmra.mrb[20].mxu0 %v5388_v13  ;;  %2685 = vmatprep.mubr.bf16.mxu1 %v5392_v14  ;;  %v5527_v13 = vld [vmem:[%s7387_s1 + $0x290] ss:$8 sps:$4 sm:$0xff]  }
  0xac   :  { %3369 = vmatprep.mubr.bf16.mxu0 %v5394_v15  ;;  %3489 = vmatpush1.bf16.msra.mxu0 %v5448_v16  ;;  %v5487_v14 = vld [vmem:[%s7388_s0 + $0x27c] ss:$52 sps:$4 sm:$0xff]   ;;  %v5489_v15 = vld [vmem:[%s7388_s0 + $0x5d4] ss:$52 sps:$4 sm:$0xff]   ;;  %v5538_v16 = vld [vmem:[%s7387_s1 + $0x2a4] ss:$8 sps:$4 sm:$0xff]  }
  0xad   :  { %3490 = vmatprep.subr.bf16.mxu0 %v5462_v17  ;;  %v5536_v17 = vld [vmem:[%s7387_s1 + $0x2a0] ss:$8 sps:$4 sm:$0xff]  }
  0xb0   :  { %3491 = vmatpush1.bf16.msra.mxu0 %v5460_v19  ;;  %v229_v19 = vld [vmem:[%s7388_s0 + $0x638] sm:$0x11] }
  0xb1   :  { %3492 = vmatprep.subr.bf16.mxu0 %v5474_v21  ;;  %v5556_v21 = vld [vmem:[%s7387_s1 + $0x2c4] ss:$8 sps:$4 sm:$0xff]  }
  0xb2   :  { %2686 = vmatmul.mubr.bf16.gmra.mrb[56].mxu1 %v5396_v20  ;;  %v5545_v20 = vld [vmem:[%s7387_s1 + $0x2b0] ss:$8 sps:$4 sm:$0xff]  }
  0xb3   :  { %3370 = vmatmul.mubr.bf16.gmra.mrb[24].mxu0 %v5400_v22  ;;  %2695 = vmatprep.mubr.bf16.mxu1 %v4337_v23  ;;  %v5491_v22 = vld [vmem:[%s7388_s0 + $0x278] ss:$52 sps:$4 sm:$0xff]   ;;  %v5495_v23 = vld [vmem:[%s7388_s0 + $0x5d0] ss:$52 sps:$4 sm:$0xff]  }
  0xb4   :  { %3379 = vmatprep.mubr.bf16.mxu0 %v5405_v24  ;;  %3493 = vmatpush1.bf16.msra.mxu0 %v5472_v25  ;;  %v5499_v24 = vld [vmem:[%s7388_s0 + $0x2e4] ss:$52 sps:$4 sm:$0xff]   ;;  %v5554_v25 = vld [vmem:[%s7387_s1 + $0x2c0] ss:$8 sps:$4 sm:$0xff]  }
  0xb5   :  { %3494 = vmatprep.subr.bf16.mxu0 %v5486_v26  ;;  %v4345_v26 = vcombine.high %v229_v19, %v229_v19 }
  0xb8   :  { %3495 = vmatpush1.bf16.msra.mxu0 %v5484_v27  ;;  %v5568_v27 = vld [vmem:[%s7387_s1 + $0x2d4] ss:$8 sps:$4 sm:$0xff]  }
  0xb9   :  { %3496 = vmatprep.subr.bf16.mxu0 %v5498_v28  ;;  %v5566_v28 = vld [vmem:[%s7387_s1 + $0x2d0] ss:$8 sps:$4 sm:$0xff]  }
  0xba   :  { %2696 = vmatmul.mubr.bf16.gmra.mrb[60].mxu1 %v4336_v29  ;;  %v5577_v29 = vld [vmem:[%s7387_s1 + $0x2e4] ss:$8 sps:$4 sm:$0xff]  }
  0xbb   :  { %3380 = vmatmul.mubr.bf16.gmra.mrb[28].mxu0 %v5411_v30  ;;  %2736 = vmatprep.mubr.bf16.mxu1 %v5417_v31  ;;  %v5502_v30 = vld [vmem:[%s7388_s0 + $0x2e0] ss:$52 sps:$4 sm:$0xff]  }
  0xbc   :  { %3389 = vmatprep.mubr.bf16.mxu0 %v5418_v32  ;;  %3497 = vmatpush1.bf16.msra.mxu0 %v5496_v33  ;;  %v5510_v31 = vld [vmem:[%s7388_s0 + $0x34c] ss:$52 sps:$4 sm:$0xff]   ;;  %v4344_v33 = vcombine.low %v229_v19, %v229_v19  ;;  %v5704_v19 = vld [vmem:[%s7387_s1 + $0x314] ss:$8 sps:$4 sm:$0xff]  }
  0xbd   :  { %3498 = vmatprep.subr.bf16.mxu0 %v5509_v34  ;;  %v5514_v32 = vld [vmem:[%s7388_s0 + $0x2c] ss:$52 sps:$4 sm:$0xff]  }
  0xbe   :  { %v5575_v34 = vld [vmem:[%s7387_s1 + $0x2e0] ss:$8 sps:$4 sm:$0xff]  }
  0xc0   :  { %3499 = vmatpush1.bf16.msra.mxu0 %v5507_v36  ;;  %v5583_v36 = vld [vmem:[%s7387_s1 + $0x2f0] ss:$8 sps:$4 sm:$0xff]  }
  0xc1   :  { %3659 = vmatprep.subr.bf16.mxu0 %v5521_v38  ;;  %v5515_v38 = vld [vmem:[%s7388_s0 + $0x348] ss:$52 sps:$4 sm:$0xff]  }
  0xc2   :  { %2737 = vmatmul.mubr.bf16.vlgmr.msra.gmra.mrb[0].mxu1 %v5415_v35  ;;  %v5585_v35 = vld [vmem:[%s7387_s1 + $0x2f4] ss:$8 sps:$4 sm:$0xff]  }
  0xc3   :  { %3390 = vmatmul.mubr.bf16.gmra.mrb[32].mxu0 %v5423_v39  ;;  %2896 = vmatpush1.bf16.msra.mxu1 %v5420_v37  ;;  %v5512_v37 = vld [vmem:[%s7388_s0 + $0x28] ss:$52 sps:$4 sm:$0xff]  }
  0xc4   :  { %2746 = vmatprep.mubr.bf16.mxu1 %v5427_v40  ;;  %3399 = vmatprep.mubr.bf16.mxu0 %v5429_v41  ;;  %v5519_v39 = vld [vmem:[%s7387_s1 + $0x600] ss:$8 sps:$4 sm:$0xff]  }
  0xc5   :  { %2897 = vmatprep.subr.bf16.mxu1 %v5434_v42  ;;  %v5522_v40 = vld [vmem:[%s7388_s0 + $0x3b4] ss:$52 sps:$4 sm:$0xff]  }
  0xc6   :  { %v5524_v41 = vld [vmem:[%s7388_s0 + $0x94] ss:$52 sps:$4 sm:$0xff]  }
  0xc7   :  { %2898 = vmatpush1.bf16.msra.mxu1 %v5432_v43  ;;  %v5560_v42 = vld [vmem:[%s7387_s1 + $0x614] ss:$8 sps:$4 sm:$0xff]   ;;  %v5702_v43 = vld [vmem:[%s7387_s1 + $0x304] ss:$8 sps:$4 sm:$0xff]  }
  0xc8   :  { %2899 = vmatprep.subr.bf16.mxu1 %v5446_v44  ;;  %v5558_v44 = vld [vmem:[%s7387_s1 + $0x610] ss:$8 sps:$4 sm:$0xff]  }
  0xca   :  { %2747 = vmatmul.mubr.bf16.gmra.mrb[4].mxu1 %v5431_v45  ;;  %v5595_v45 = vld [vmem:[%s7387_s1 + $0x624] ss:$8 sps:$4 sm:$0xff]  }
  0xcb   :  { %3400 = vmatmul.mubr.bf16.gmra.mrb[36].mxu0 %v5435_v46  ;;  %2756 = vmatprep.mubr.bf16.mxu1 %v5439_v47  ;;  %v5526_v46 = vld [vmem:[%s7388_s0 + $0x3b0] ss:$52 sps:$4 sm:$0xff]  }
  0xcc   :  { %3409 = vmatprep.mubr.bf16.mxu0 %v5441_v48  ;;  %2900 = vmatpush1.bf16.msra.mxu1 %v5444_v49  ;;  %v5530_v47 = vld [vmem:[%s7388_s0 + $0x90] ss:$52 sps:$4 sm:$0xff]  }
  0xcd   :  { %2901 = vmatprep.subr.bf16.mxu1 %v5458_v50  ;;  %v5531_v48 = vld [vmem:[%s7388_s0 + $0x41c] ss:$52 sps:$4 sm:$0xff]   ;;  %v5593_v50 = vld [vmem:[%s7387_s1 + $0x620] ss:$8 sps:$4 sm:$0xff]  }
  0xce   :  { %v5533_v49 = vld [vmem:[%s7388_s0 + $0xfc] ss:$52 sps:$4 sm:$0xff]  }
  0xd0   :  { %2902 = vmatpush1.bf16.msra.mxu1 %v5456_v53  ;;  %v5535_v53 = vld [vmem:[%s7388_s0 + $0x418] ss:$52 sps:$4 sm:$0xff]  }
  0xd1   :  { %2903 = vmatprep.subr.bf16.mxu1 %v5470_v54  ;;  %v5539_v54 = vld [vmem:[%s7388_s0 + $0xf8] ss:$52 sps:$4 sm:$0xff]  }
  0xd2   :  { %2757 = vmatmul.mubr.bf16.gmra.mrb[8].mxu1 %v5443_v51  ;;  %v5622_v51 = vld [vmem:[%s7387_s1 + $0x634] ss:$8 sps:$4 sm:$0xff]  }
  0xd3   :  { %3410 = vmatmul.mubr.bf16.gmra.mrb[40].mxu0 %v5447_v52  ;;  %2766 = vmatprep.mubr.bf16.mxu1 %v5451_v55  ;;  %v5620_v52 = vld [vmem:[%s7387_s1 + $0x630] ss:$8 sps:$4 sm:$0xff]  }
  0xd4   :  { %3419 = vmatprep.mubr.bf16.mxu0 %v5453_v56  ;;  %2904 = vmatpush1.bf16.msra.mxu1 %v5468_v57  ;;  %v5540_v55 = vld [vmem:[%s7388_s0 + $0x484] ss:$52 sps:$4 sm:$0xff]   ;;  %v5544_v57 = vld [vmem:[%s7388_s0 + $0x480] ss:$52 sps:$4 sm:$0xff]  }
  0xd5   :  { %2905 = vmatprep.subr.bf16.mxu1 %v5482_v58  ;;  %v5542_v56 = vld [vmem:[%s7388_s0 + $0x164] ss:$52 sps:$4 sm:$0xff]   ;;  %v5548_v58 = vld [vmem:[%s7388_s0 + $0x160] ss:$52 sps:$4 sm:$0xff]  }
  0xd8   :  { %2906 = vmatpush1.bf16.msra.mxu1 %v5480_v59  ;;  %v5549_v59 = vld [vmem:[%s7388_s0 + $0x4ec] ss:$52 sps:$4 sm:$0xff]  }
  0xd9   :  { %2907 = vmatprep.subr.bf16.mxu1 %v5494_v60  ;;  %v5551_v60 = vld [vmem:[%s7388_s0 + $0x1cc] ss:$52 sps:$4 sm:$0xff]  }
  0xda   :  { %2767 = vmatmul.mubr.bf16.gmra.mrb[12].mxu1 %v5455_v61  ;;  %v5553_v61 = vld [vmem:[%s7388_s0 + $0x4e8] ss:$52 sps:$4 sm:$0xff]  }
  0xdb   :  { %3420 = vmatmul.mubr.bf16.gmra.mrb[44].mxu0 %v5459_v62  ;;  %2776 = vmatprep.mubr.bf16.mxu1 %v5463_v63  ;;  %v5557_v62 = vld [vmem:[%s7388_s0 + $0x1c8] ss:$52 sps:$4 sm:$0xff]  }
  0xdc   :  { %3429 = vmatprep.mubr.bf16.mxu0 %v5465_v0  ;;  %2908 = vmatpush1.bf16.msra.mxu1 %v5492_v1  ;;  %v5561_v63 = vld [vmem:[%s7388_s0 + $0x554] ss:$52 sps:$4 sm:$0xff]   ;;  %v5565_v1 = vld [vmem:[%s7388_s0 + $0x550] ss:$52 sps:$4 sm:$0xff]  }
  0xdd   :  { %2909 = vmatprep.subr.bf16.mxu1 %v5505_v2  ;;  %v5563_v0 = vld [vmem:[%s7388_s0 + $0x234] ss:$52 sps:$4 sm:$0xff]   ;;  %v5569_v2 = vld [vmem:[%s7388_s0 + $0x230] ss:$52 sps:$4 sm:$0xff]  }
  0xe0   :  { %2910 = vmatpush1.bf16.msra.mxu1 %v5503_v4  ;;  %v5572_v4 = vld [vmem:[%s7388_s0 + $0x29c] ss:$52 sps:$4 sm:$0xff]  }
  0xe1   :  { %2911 = vmatprep.subr.bf16.mxu1 %v5518_v5  ;;  %v226_v5 = vld [vmem:[%s7388_s0 + $0x620] sm:$0x11] }
  0xe2   :  { %2777 = vmatmul.mubr.bf16.gmra.mrb[16].mxu1 %v5467_v3  ;;  %v5570_v3 = vld [vmem:[%s7388_s0 + $0x5bc] ss:$52 sps:$4 sm:$0xff]  }
  0xe3   :  { %3430 = vmatmul.mubr.bf16.gmra.mrb[48].mxu0 %v5471_v6  ;;  %2786 = vmatprep.mubr.bf16.mxu1 %v5475_v7  ;;  %v5574_v6 = vld [vmem:[%s7388_s0 + $0x5b8] ss:$52 sps:$4 sm:$0xff]  }
  0xe4   :  { %3439 = vmatprep.mubr.bf16.mxu0 %v5477_v8  ;;  %2912 = vmatpush1.bf16.msra.mxu1 %v5516_v9  ;;  %v5578_v7 = vld [vmem:[%s7388_s0 + $0x298] ss:$52 sps:$4 sm:$0xff]   ;;  %v4339_v8 = vcombine.high %v226_v5, %v226_v5 }
  0xe5   :  { %2913 = vmatprep.subr.bf16.mxu1 %v5529_v10  ;;  %v5580_v9 = vld [vmem:[%s7388_s0 + $0x304] ss:$52 sps:$4 sm:$0xff]   ;;  %v4338_v10 = vcombine.low %v226_v5, %v226_v5  ;;  %v5638_v5 = vld [vmem:[%s7388_s0 + $0x2e8] ss:$52 sps:$4 sm:$0xff]  }
  0xe8   :  { %2914 = vmatpush1.bf16.msra.mxu1 %v5527_v13  ;;  %v5590_v13 = vld [vmem:[%s7388_s0 + $0x36c] ss:$52 sps:$4 sm:$0xff]  }
  0xe9   :  { %2915 = vmatprep.subr.bf16.mxu1 %v5538_v16  ;;  %v5596_v16 = vld [vmem:[%s7388_s0 + $0x7c] ss:$52 sps:$4 sm:$0xff]  }
  0xea   :  { %2787 = vmatmul.mubr.bf16.gmra.mrb[20].mxu1 %v5479_v11  ;;  %v5586_v11 = vld [vmem:[%s7388_s0 + $0x300] ss:$52 sps:$4 sm:$0xff]  }
  0xeb   :  { %3440 = vmatmul.mubr.bf16.gmra.mrb[52].mxu0 %v5483_v12  ;;  %2796 = vmatprep.mubr.bf16.mxu1 %v5487_v14  ;;  %v5589_v12 = vld [vmem:[%s7388_s0 + $0x14] ss:$52 sps:$4 sm:$0xff]   ;;  %v5587_v14 = vld [vmem:[%s7388_s0 + $0x10] ss:$52 sps:$4 sm:$0xff]  }
  0xec   :  { %3449 = vmatprep.mubr.bf16.mxu0 %v5489_v15  ;;  %2916 = vmatpush1.bf16.msra.mxu1 %v5536_v17  ;;  %v5592_v15 = vld [vmem:[%s7388_s0 + $0x368] ss:$52 sps:$4 sm:$0xff]  }
  0xed   :  { %2917 = vmatprep.subr.bf16.mxu1 %v5547_v18  ;;  %v5598_v17 = vld [vmem:[%s7388_s0 + $0x3d4] ss:$52 sps:$4 sm:$0xff]  }
  0xee   :  { %v5703_v18 = vld [vmem:[%s7387_s1 + $0x300] ss:$8 sps:$4 sm:$0xff]  }
  0xf0   :  { %2918 = vmatpush1.bf16.msra.mxu1 %v5545_v20  ;;  %v5600_v20 = vld [vmem:[%s7388_s0 + $0x78] ss:$52 sps:$4 sm:$0xff]  }
  0xf1   :  { %2919 = vmatprep.subr.bf16.mxu1 %v5556_v21  ;;  %v5601_v21 = vld [vmem:[%s7388_s0 + $0x3d0] ss:$52 sps:$4 sm:$0xff]  }
  0xf2   :  { %2797 = vmatmul.mubr.bf16.gmra.mrb[24].mxu1 %v5491_v22  ;;  %v5705_v22 = vld [vmem:[%s7387_s1 + $0x310] ss:$8 sps:$4 sm:$0xff]  }
  0xf3   :  { %3450 = vmatmul.mubr.bf16.gmra.mrb[56].mxu0 %v5495_v23  ;;  %2806 = vmatprep.mubr.bf16.mxu1 %v5499_v24  ;;  %v5602_v23 = vld [vmem:[%s7388_s0 + $0xe4] ss:$52 sps:$4 sm:$0xff]   ;;  %v5604_v24 = vld [vmem:[%s7388_s0 + $0x43c] ss:$52 sps:$4 sm:$0xff]  }
  0xf4   :  { %3459 = vmatprep.mubr.bf16.mxu0 %v4345_v26  ;;  %2920 = vmatpush1.bf16.msra.mxu1 %v5554_v25  ;;  %v5706_v25 = vld [vmem:[%s7387_s1 + $0x324] ss:$8 sps:$4 sm:$0xff]   ;;  %v5707_v26 = vld [vmem:[%s7387_s1 + $0x320] ss:$8 sps:$4 sm:$0xff]  }
  0xf5   :  { %2921 = vmatprep.subr.bf16.mxu1 %v5568_v27  ;;  %v5708_v27 = vld [vmem:[%s7387_s1 + $0x334] ss:$8 sps:$4 sm:$0xff]  }
  0xf8   :  { %2922 = vmatpush1.bf16.msra.mxu1 %v5566_v28  ;;  %v5606_v28 = vld [vmem:[%s7388_s0 + $0xe0] ss:$52 sps:$4 sm:$0xff]  }
  0xf9   :  { %2923 = vmatprep.subr.bf16.mxu1 %v5577_v29  ;;  %v5607_v29 = vld [vmem:[%s7388_s0 + $0x438] ss:$52 sps:$4 sm:$0xff]  }
  0xfa   :  { %2807 = vmatmul.mubr.bf16.gmra.mrb[28].mxu1 %v5502_v30  ;;  %v5608_v30 = vld [vmem:[%s7388_s0 + $0x14c] ss:$52 sps:$4 sm:$0xff]  }
  0xfb   :  { %3460 = vmatmul.mubr.bf16.gmra.mrb[60].mxu0 %v4344_v33  ;;  %2816 = vmatprep.mubr.bf16.mxu1 %v5510_v31  ;;  %v5610_v31 = vld [vmem:[%s7388_s0 + $0x4a4] ss:$52 sps:$4 sm:$0xff]  }
  0xfc   :  { %3500 = vmatprep.mubr.bf16.mxu0 %v5514_v32  ;;  %2924 = vmatpush1.bf16.msra.mxu1 %v5575_v34  ;;  %v5709_v32 = vld [vmem:[%s7387_s1 + $0x330] ss:$8 sps:$4 sm:$0xff]   ;;  %v5710_v33 = vld [vmem:[%s7387_s1 + $0x344] ss:$8 sps:$4 sm:$0xff]   ;;  %v5711_v34 = vld [vmem:[%s7387_s1 + $0x340] ss:$8 sps:$4 sm:$0xff]  }
  0xfd   :  { %2925 = vmatprep.subr.bf16.mxu1 %v5585_v35  ;;  %v5712_v35 = vld [vmem:[%s7387_s1 + $0x354] ss:$8 sps:$4 sm:$0xff]  }
 0x100   :  { %2926 = vmatpush1.bf16.msra.mxu1 %v5583_v36  ;;  %v5612_v36 = vld [vmem:[%s7388_s0 + $0x148] ss:$52 sps:$4 sm:$0xff]  }
 0x101   :  { %4627 = vmatprep.subr.bf16.mxu1 %v5702_v43  ;;  %v5716_v43 = vld [vmem:[%s7387_s1 + $0x374] ss:$8 sps:$4 sm:$0xff]  }
 0x102   :  { %2817 = vmatmul.mubr.bf16.gmra.mrb[32].mxu1 %v5515_v38  ;;  %v5614_v38 = vld [vmem:[%s7388_s0 + $0x1b4] ss:$52 sps:$4 sm:$0xff]  }
 0x103   :  { %3501 = vmatmul.mubr.bf16.vlgmr.msra.gmra.mrb[0].mxu0 %v5512_v37  ;;  %2826 = vmatprep.mubr.bf16.mxu1 %v5522_v40  ;;  %v5613_v37 = vld [vmem:[%s7388_s0 + $0x4a0] ss:$52 sps:$4 sm:$0xff]   ;;  %v5713_v40 = vld [vmem:[%s7387_s1 + $0x350] ss:$8 sps:$4 sm:$0xff]  }
 0x104   :  { %3660 = vmatpush1.bf16.msra.mxu0 %v5519_v39  ;;  %3510 = vmatprep.mubr.bf16.mxu0 %v5524_v41  ;;  %v5616_v39 = vld [vmem:[%s7388_s0 + $0x50c] ss:$52 sps:$4 sm:$0xff]  }
 0x105   :  { %3661 = vmatprep.subr.bf16.mxu0 %v5560_v42  ;;  %v5714_v41 = vld [vmem:[%s7387_s1 + $0x364] ss:$8 sps:$4 sm:$0xff]   ;;  %v5715_v42 = vld [vmem:[%s7387_s1 + $0x360] ss:$8 sps:$4 sm:$0xff]  }
 0x108   :  { %3662 = vmatpush1.bf16.msra.mxu0 %v5558_v44  ;;  %v5618_v44 = vld [vmem:[%s7388_s0 + $0x1b0] ss:$52 sps:$4 sm:$0xff]  }
 0x109   :  { %3663 = vmatprep.subr.bf16.mxu0 %v5595_v45  ;;  %v5619_v45 = vld [vmem:[%s7388_s0 + $0x508] ss:$52 sps:$4 sm:$0xff]  }
 0x10a   :  { %2827 = vmatmul.mubr.bf16.gmra.mrb[36].mxu1 %v5526_v46  ;;  %v5623_v46 = vld [vmem:[%s7388_s0 + $0x21c] ss:$52 sps:$4 sm:$0xff]  }
 0x10b   :  { %3511 = vmatmul.mubr.bf16.gmra.mrb[4].mxu0 %v5530_v47  ;;  %2836 = vmatprep.mubr.bf16.mxu1 %v5531_v48  ;;  %v5625_v47 = vld [vmem:[%s7388_s0 + $0x574] ss:$52 sps:$4 sm:$0xff]   ;;  %v5717_v48 = vld [vmem:[%s7387_s1 + $0x370] ss:$8 sps:$4 sm:$0xff]  }
 0x10c   :  { %3520 = vmatprep.mubr.bf16.mxu0 %v5533_v49  ;;  %3664 = vmatpush1.bf16.msra.mxu0 %v5593_v50  ;;  %v5718_v49 = vld [vmem:[%s7387_s1 + $0x384] ss:$8 sps:$4 sm:$0xff]   ;;  %v5719_v50 = vld [vmem:[%s7387_s1 + $0x380] ss:$8 sps:$4 sm:$0xff]  }
 0x10d   :  { %3665 = vmatprep.subr.bf16.mxu0 %v5622_v51  ;;  %v5720_v51 = vld [vmem:[%s7387_s1 + $0x394] ss:$8 sps:$4 sm:$0xff]  }
 0x110   :  { %3666 = vmatpush1.bf16.msra.mxu0 %v5620_v52  ;;  %v5627_v52 = vld [vmem:[%s7388_s0 + $0x218] ss:$52 sps:$4 sm:$0xff]  }
 0x112   :  { %2837 = vmatmul.mubr.bf16.gmra.mrb[40].mxu1 %v5535_v53  ;;  %v5628_v53 = vld [vmem:[%s7388_s0 + $0x570] ss:$52 sps:$4 sm:$0xff]  }
 0x113   :  { %3521 = vmatmul.mubr.bf16.gmra.mrb[8].mxu0 %v5539_v54  ;;  %2846 = vmatprep.mubr.bf16.mxu1 %v5540_v55  ;;  %v5629_v54 = vld [vmem:[%s7388_s0 + $0x284] ss:$52 sps:$4 sm:$0xff]   ;;  %v5631_v55 = vld [vmem:[%s7388_s0 + $0x5dc] ss:$52 sps:$4 sm:$0xff]  }
 0x114   :  { %3530 = vmatprep.mubr.bf16.mxu0 %v5542_v56  ;;  %v5721_v56 = vld [vmem:[%s7387_s1 + $0x390] ss:$8 sps:$4 sm:$0xff]  }
 0x11a   :  { %2847 = vmatmul.mubr.bf16.gmra.mrb[44].mxu1 %v5544_v57  ;;  %v5722_v57 = vld [vmem:[%s7387_s1 + $0x3a4] ss:$8 sps:$4 sm:$0xff]  }
 0x11b   :  { %3531 = vmatmul.mubr.bf16.gmra.mrb[12].mxu0 %v5548_v58  ;;  %2856 = vmatprep.mubr.bf16.mxu1 %v5549_v59  ;;  %v230_v58 = vld [vmem:[%s7388_s0 + $0x640] sm:$0x11] }
 0x11c   :  { %3540 = vmatprep.mubr.bf16.mxu0 %v5551_v60  ;;  %v5723_v59 = vld [vmem:[%s7387_s1 + $0x3a0] ss:$8 sps:$4 sm:$0xff]   ;;  %v5724_v60 = vld [vmem:[%s7387_s1 + $0x3b4] ss:$8 sps:$4 sm:$0xff]  }
 0x122   :  { %2857 = vmatmul.mubr.bf16.gmra.mrb[48].mxu1 %v5553_v61  ;;  %v5633_v61 = vld [vmem:[%s7388_s0 + $0x280] ss:$52 sps:$4 sm:$0xff]  }
 0x123   :  { %3541 = vmatmul.mubr.bf16.gmra.mrb[16].mxu0 %v5557_v62  ;;  %2866 = vmatprep.mubr.bf16.mxu1 %v5561_v63  ;;  %v5634_v62 = vld [vmem:[%s7388_s0 + $0x5d8] ss:$52 sps:$4 sm:$0xff]  }
 0x124   :  { %3550 = vmatprep.mubr.bf16.mxu0 %v5563_v0  ;;  %v5635_v63 = vld [vmem:[%s7388_s0 + $0x2ec] ss:$52 sps:$4 sm:$0xff]   ;;  %v4347_v0 = vcombine.high %v230_v58, %v230_v58 }
 0x12a   :  { %2867 = vmatmul.mubr.bf16.gmra.mrb[52].mxu1 %v5565_v1  ;;  %v5725_v1 = vld [vmem:[%s7387_s1 + $0x3b0] ss:$8 sps:$4 sm:$0xff]  }
 0x12b   :  { %3551 = vmatmul.mubr.bf16.gmra.mrb[20].mxu0 %v5569_v2  ;;  %2876 = vmatprep.mubr.bf16.mxu1 %v5570_v3  ;;  %v5726_v2 = vld [vmem:[%s7387_s1 + $0x3c4] ss:$8 sps:$4 sm:$0xff]   ;;  %v5727_v3 = vld [vmem:[%s7387_s1 + $0x3c0] ss:$8 sps:$4 sm:$0xff]  }
 0x12c   :  { %3560 = vmatprep.mubr.bf16.mxu0 %v5572_v4  ;;  %v5728_v4 = vld [vmem:[%s7387_s1 + $0x3d4] ss:$8 sps:$4 sm:$0xff]  }
 0x132   :  { %2877 = vmatmul.mubr.bf16.gmra.mrb[56].mxu1 %v5574_v6  ;;  %v4346_v6 = vcombine.low %v230_v58, %v230_v58  ;;  %v5697_v58 = vld [vmem:[%s7388_s0 + $0x5c8] ss:$52 sps:$4 sm:$0xff]  }
 0x133   :  { %3561 = vmatmul.mubr.bf16.gmra.mrb[24].mxu0 %v5578_v7  ;;  %2886 = vmatprep.mubr.bf16.mxu1 %v4339_v8  ;;  %v5640_v7 = vld [vmem:[%s7388_s0 + $0x354] ss:$52 sps:$4 sm:$0xff]   ;;  %v5729_v8 = vld [vmem:[%s7387_s1 + $0x3d0] ss:$8 sps:$4 sm:$0xff]  }
 0x134   :  { %3570 = vmatprep.mubr.bf16.mxu0 %v5580_v9  ;;  %v5730_v9 = vld [vmem:[%s7387_s1 + $0x3e4] ss:$8 sps:$4 sm:$0xff]  }
 0x13a   :  { %2887 = vmatmul.mubr.bf16.gmra.mrb[60].mxu1 %v4338_v10  ;;  %v5734_v10 = vmov 0  }
 0x13b   :  { %3571 = vmatmul.mubr.bf16.gmra.mrb[28].mxu0 %v5586_v11  ;;  %2927 = vmatprep.mubr.bf16.mxu1 %v5589_v12  ;;  %v5731_v11 = vld [vmem:[%s7387_s1 + $0x3e0] ss:$8 sps:$4 sm:$0xff]   ;;  %v5732_v12 = vld [vmem:[%s7387_s1 + $0x3f4] ss:$8 sps:$4 sm:$0xff]  }
 0x13c   :  { %3580 = vmatprep.mubr.bf16.mxu0 %v5590_v13  ;;  %v5642_v13 = vld [vmem:[%s7388_s0 + $0x350] ss:$52 sps:$4 sm:$0xff]  }
 0x142   :  { %2928 = vmatmul.mubr.bf16.vlgmr.msra.gmra.mrb[0].mxu1 %v5587_v14  ;;  %v5643_v14 = vld [vmem:[%s7388_s0 + $0x30] ss:$52 sps:$4 sm:$0xff]  }
 0x143   :  { %3581 = vmatmul.mubr.bf16.gmra.mrb[32].mxu0 %v5592_v15  ;;  %4643 = vmatpush1.bf16.msra.mxu1 %v5703_v18  ;;  %v5644_v15 = vld [vmem:[%s7388_s0 + $0x3bc] ss:$52 sps:$4 sm:$0xff]   ;;  %v5647_v18 = vld [vmem:[%s7388_s0 + $0x98] ss:$52 sps:$4 sm:$0xff]  }
 0x144   :  { %2937 = vmatprep.mubr.bf16.mxu1 %v5596_v16  ;;  %3590 = vmatprep.mubr.bf16.mxu0 %v5598_v17  ;;  %v5733_v16 = vld [vmem:[%s7387_s1 + $0x3f0] ss:$8 sps:$4 sm:$0xff]  }
 0x145   :  { %4628 = vmatprep.subr.bf16.mxu1 %v5704_v19  ;;  %v5646_v17 = vld [vmem:[%s7388_s0 + $0x3b8] ss:$52 sps:$4 sm:$0xff]  }
 0x146   :  { %v5648_v19 = vld [vmem:[%s7388_s0 + $0x424] ss:$52 sps:$4 sm:$0xff]  }
 0x147   :  { %4644 = vmatpush1.bf16.msra.mxu1 %v5705_v22  ;;  %v5652_v22 = vld [vmem:[%s7388_s0 + $0x48c] ss:$52 sps:$4 sm:$0xff]  }
 0x148   :  { %4629 = vmatprep.subr.bf16.mxu1 %v5706_v25  ;;  %v5656_v25 = vld [vmem:[%s7388_s0 + $0x4f4] ss:$52 sps:$4 sm:$0xff]  }
 0x14a   :  { %2938 = vmatmul.mubr.bf16.gmra.mrb[4].mxu1 %v5600_v20  ;;  %v5650_v20 = vld [vmem:[%s7388_s0 + $0x420] ss:$52 sps:$4 sm:$0xff]  }
 0x14b   :  { %3591 = vmatmul.mubr.bf16.gmra.mrb[36].mxu0 %v5601_v21  ;;  %2947 = vmatprep.mubr.bf16.mxu1 %v5602_v23  ;;  %v5651_v21 = vld [vmem:[%s7388_s0 + $0x100] ss:$52 sps:$4 sm:$0xff]   ;;  %v5654_v23 = vld [vmem:[%s7388_s0 + $0x488] ss:$52 sps:$4 sm:$0xff]  }
 0x14c   :  { %3600 = vmatprep.mubr.bf16.mxu0 %v5604_v24  ;;  %4645 = vmatpush1.bf16.msra.mxu1 %v5707_v26  ;;  %v5655_v24 = vld [vmem:[%s7388_s0 + $0x168] ss:$52 sps:$4 sm:$0xff]   ;;  %v5658_v26 = vld [vmem:[%s7388_s0 + $0x4f0] ss:$52 sps:$4 sm:$0xff]  }
 0x14d   :  { %4630 = vmatprep.subr.bf16.mxu1 %v5708_v27  ;;  %v5659_v27 = vld [vmem:[%s7388_s0 + $0x1d0] ss:$52 sps:$4 sm:$0xff]  }
 0x150   :  { %4646 = vmatpush1.bf16.msra.mxu1 %v5709_v32  ;;  %v227_v32 = vld [vmem:[%s7388_s0 + $0x628] sm:$0x11] }
 0x151   :  { %4631 = vmatprep.subr.bf16.mxu1 %v5710_v33  ;;  %v5666_v33 = vld [vmem:[%s7388_s0 + $0x5c0] ss:$52 sps:$4 sm:$0xff]  }
 0x152   :  { %2948 = vmatmul.mubr.bf16.gmra.mrb[8].mxu1 %v5606_v28  ;;  %v5660_v28 = vld [vmem:[%s7388_s0 + $0x55c] ss:$52 sps:$4 sm:$0xff]  }
 0x153   :  { %3601 = vmatmul.mubr.bf16.gmra.mrb[40].mxu0 %v5607_v29  ;;  %2957 = vmatprep.mubr.bf16.mxu1 %v5608_v30  ;;  %v5662_v29 = vld [vmem:[%s7388_s0 + $0x558] ss:$52 sps:$4 sm:$0xff]  }
 0x154   :  { %3610 = vmatprep.mubr.bf16.mxu0 %v5610_v31  ;;  %4647 = vmatpush1.bf16.msra.mxu1 %v5711_v34  ;;  %v5663_v30 = vld [vmem:[%s7388_s0 + $0x238] ss:$52 sps:$4 sm:$0xff]   ;;  %v5667_v34 = vld [vmem:[%s7388_s0 + $0x2a0] ss:$52 sps:$4 sm:$0xff]  }
 0x155   :  { %4632 = vmatprep.subr.bf16.mxu1 %v5712_v35  ;;  %v5664_v31 = vld [vmem:[%s7388_s0 + $0x5c4] ss:$52 sps:$4 sm:$0xff]   ;;  %v4341_v35 = vcombine.high %v227_v32, %v227_v32 }
 0x158   :  { %4648 = vmatpush1.bf16.msra.mxu1 %v5713_v40  ;;  %v5674_v40 = vld [vmem:[%s7388_s0 + $0x370] ss:$52 sps:$4 sm:$0xff]  }
 0x159   :  { %4633 = vmatprep.subr.bf16.mxu1 %v5714_v41  ;;  %v5675_v41 = vld [vmem:[%s7388_s0 + $0x3c4] ss:$52 sps:$4 sm:$0xff]  }
 0x15a   :  { %2958 = vmatmul.mubr.bf16.gmra.mrb[12].mxu1 %v5612_v36  ;;  %v4340_v36 = vcombine.low %v227_v32, %v227_v32 }
 0x15b   :  { %3611 = vmatmul.mubr.bf16.gmra.mrb[44].mxu0 %v5613_v37  ;;  %2967 = vmatprep.mubr.bf16.mxu1 %v5614_v38  ;;  %v5670_v37 = vld [vmem:[%s7388_s0 + $0x308] ss:$52 sps:$4 sm:$0xff]  }
 0x15c   :  { %3620 = vmatprep.mubr.bf16.mxu0 %v5616_v39  ;;  %4649 = vmatpush1.bf16.msra.mxu1 %v5715_v42  ;;  %v5673_v38 = vld [vmem:[%s7388_s0 + $0x35c] ss:$52 sps:$4 sm:$0xff]   ;;  %v5671_v39 = vld [vmem:[%s7388_s0 + $0x358] ss:$52 sps:$4 sm:$0xff]   ;;  %v5677_v42 = vld [vmem:[%s7388_s0 + $0x3c0] ss:$52 sps:$4 sm:$0xff]  }
 0x15d   :  { %4634 = vmatprep.subr.bf16.mxu1 %v5716_v43  ;;  %v5678_v43 = vld [vmem:[%s7388_s0 + $0x3d8] ss:$52 sps:$4 sm:$0xff]  }
 0x160   :  { %4650 = vmatpush1.bf16.msra.mxu1 %v5717_v48  ;;  %v5685_v48 = vld [vmem:[%s7388_s0 + $0x490] ss:$52 sps:$4 sm:$0xff]  }
 0x161   :  { %4635 = vmatprep.subr.bf16.mxu1 %v5718_v49  ;;  %v5686_v49 = vld [vmem:[%s7388_s0 + $0x4a8] ss:$52 sps:$4 sm:$0xff]  }
 0x162   :  { %2968 = vmatmul.mubr.bf16.gmra.mrb[16].mxu1 %v5618_v44  ;;  %v5679_v44 = vld [vmem:[%s7388_s0 + $0x42c] ss:$52 sps:$4 sm:$0xff]  }
 0x163   :  { %3621 = vmatmul.mubr.bf16.gmra.mrb[48].mxu0 %v5619_v45  ;;  %2977 = vmatprep.mubr.bf16.mxu1 %v5623_v46  ;;  %v5681_v45 = vld [vmem:[%s7388_s0 + $0x428] ss:$52 sps:$4 sm:$0xff]   ;;  %v5682_v46 = vld [vmem:[%s7388_s0 + $0x440] ss:$52 sps:$4 sm:$0xff]  }
 0x164   :  { %3630 = vmatprep.mubr.bf16.mxu0 %v5625_v47  ;;  %4651 = vmatpush1.bf16.msra.mxu1 %v5719_v50  ;;  %v5683_v47 = vld [vmem:[%s7388_s0 + $0x494] ss:$52 sps:$4 sm:$0xff]   ;;  %v5687_v50 = vld [vmem:[%s7388_s0 + $0x4fc] ss:$52 sps:$4 sm:$0xff]  }
 0x165   :  { %4636 = vmatprep.subr.bf16.mxu1 %v5720_v51  ;;  %v5689_v51 = vld [vmem:[%s7388_s0 + $0x4f8] ss:$52 sps:$4 sm:$0xff]  }
 0x168   :  { %4652 = vmatpush1.bf16.msra.mxu1 %v5721_v56  ;;  %v5695_v56 = vld [vmem:[%s7388_s0 + $0x5cc] ss:$52 sps:$4 sm:$0xff]  }
 0x169   :  { %4637 = vmatprep.subr.bf16.mxu1 %v5722_v57  ;;  %v228_v57 = vld [vmem:[%s7388_s0 + $0x630] sm:$0x11] }
 0x16a   :  { %2978 = vmatmul.mubr.bf16.gmra.mrb[20].mxu1 %v5627_v52  ;;  %v5690_v52 = vld [vmem:[%s7388_s0 + $0x510] ss:$52 sps:$4 sm:$0xff]  }
 0x16b   :  { %3631 = vmatmul.mubr.bf16.gmra.mrb[52].mxu0 %v5628_v53  ;;  %2987 = vmatprep.mubr.bf16.mxu1 %v5629_v54  ;;  %v5691_v53 = vld [vmem:[%s7388_s0 + $0x564] ss:$52 sps:$4 sm:$0xff]   ;;  %v5693_v54 = vld [vmem:[%s7388_s0 + $0x560] ss:$52 sps:$4 sm:$0xff]  }
 0x16c   :  { %3640 = vmatprep.mubr.bf16.mxu0 %v5631_v55  ;;  %4653 = vmatpush1.bf16.msra.mxu1 %v5723_v59  ;;  %v5694_v55 = vld [vmem:[%s7388_s0 + $0x578] ss:$52 sps:$4 sm:$0xff]   ;;  %v5698_v59 = vld [vmem:[%s7388_s0 + $0x5e0] ss:$52 sps:$4 sm:$0xff]  }
 0x16d   :  { %4638 = vmatprep.subr.bf16.mxu1 %v5724_v60  ;;  %v4343_v60 = vcombine.high %v228_v57, %v228_v57 }
 0x170   :  { %4654 = vmatpush1.bf16.msra.mxu1 %v5725_v1 }
 0x171   :  { %4639 = vmatprep.subr.bf16.mxu1 %v5726_v2 }
 0x172   :  { %2988 = vmatmul.mubr.bf16.gmra.mrb[24].mxu1 %v5633_v61  ;;  %v4342_v61 = vcombine.low %v228_v57, %v228_v57 }
 0x173   :  { %3641 = vmatmul.mubr.bf16.gmra.mrb[56].mxu0 %v5634_v62  ;;  %2997 = vmatprep.mubr.bf16.mxu1 %v5635_v63  ;;  %v5701_v62 = vld [vmem:[%s7388_s0 + $0x648] ss:$0 sps:$4 sm:$0x11]  }
 0x174   :  { %3650 = vmatprep.mubr.bf16.mxu0 %v4347_v0  ;;  %4655 = vmatpush1.bf16.msra.mxu1 %v5727_v3 }
 0x175   :  { %4640 = vmatprep.subr.bf16.mxu1 %v5728_v4 }
 0x178   :  { %4656 = vmatpush1.bf16.msra.mxu1 %v5729_v8 }
 0x179   :  { %4641 = vmatprep.subr.bf16.mxu1 %v5730_v9 }
 0x17a   :  { %2998 = vmatmul.mubr.bf16.gmra.mrb[28].mxu1 %v5638_v5 }
 0x17b   :  { %3651 = vmatmul.mubr.bf16.gmra.mrb[60].mxu0 %v4346_v6  ;;  %3007 = vmatprep.mubr.bf16.mxu1 %v5640_v7 }
 0x17c   :  { %3691 = vmatprep.mubr.bf16.mxu0 %v5734_v10  ;;  %4657 = vmatpush1.bf16.msra.mxu1 %v5731_v11 }
 0x17d   :  { %4642 = vmatprep.subr.bf16.mxu1 %v5732_v12 }
 0x180   :  { %4658 = vmatpush1.bf16.msra.mxu1 %v5733_v16 }
 0x182   :  { %3008 = vmatmul.mubr.bf16.gmra.mrb[32].mxu1 %v5642_v13 }
 0x183   :  { %4549 = vmatmul.mubr.msk.bf16.vlgmr.msra.gmra.mrb[0].mxu0 %vm2464_vm0, %v5643_v14  ;;  %3017 = vmatprep.mubr.bf16.mxu1 %v5644_v15 }
 0x184   :  { %3701 = vmatprep.mubr.bf16.mxu0 %v5734_v10 }
 0x18a   :  { %3018 = vmatmul.mubr.bf16.gmra.mrb[36].mxu1 %v5646_v17 }
 0x18b   :  { %4550 = vmatmul.mubr.msk.bf16.gmra.mrb[4].mxu0 %vm2464_vm0, %v5647_v18  ;;  %3027 = vmatprep.mubr.bf16.mxu1 %v5648_v19 }
 0x18c   :  { %3711 = vmatprep.mubr.bf16.mxu0 %v5734_v10 }
 0x192   :  { %3028 = vmatmul.mubr.bf16.gmra.mrb[40].mxu1 %v5650_v20 }
 0x193   :  { %4551 = vmatmul.mubr.msk.bf16.gmra.mrb[8].mxu0 %vm2464_vm0, %v5651_v21  ;;  %3037 = vmatprep.mubr.bf16.mxu1 %v5652_v22 }
 0x194   :  { %3721 = vmatprep.mubr.bf16.mxu0 %v5734_v10 }
 0x19a   :  { %3038 = vmatmul.mubr.bf16.gmra.mrb[44].mxu1 %v5654_v23  ;;  %v434_v23 = vlaneseq }
 0x19b   :  { %4552 = vmatmul.mubr.msk.bf16.gmra.mrb[12].mxu0 %vm2464_vm0, %v5655_v24  ;;  %3047 = vmatprep.mubr.bf16.mxu1 %v5656_v25 }
 0x19c   :  { %3731 = vmatprep.mubr.bf16.mxu0 %v5734_v10 }
 0x1a2   :  { %3048 = vmatmul.mubr.bf16.gmra.mrb[48].mxu1 %v5658_v26 }
 0x1a3   :  { %4553 = vmatmul.mubr.msk.bf16.gmra.mrb[16].mxu0 %vm2464_vm0, %v5659_v27  ;;  %3057 = vmatprep.mubr.bf16.mxu1 %v5660_v28  ;;  %v435_v27 = vshrl.u32 %v434_v23, 7 }
 0x1a4   :  { %3741 = vmatprep.mubr.bf16.mxu0 %v5734_v10 }
 0x1aa   :  { %3058 = vmatmul.mubr.bf16.gmra.mrb[52].mxu1 %v5662_v29  ;;  %v436_v29 = vsub.s32 0, %v435_v27 }
 0x1ab   :  { %4554 = vmatmul.mubr.msk.bf16.gmra.mrb[20].mxu0 %vm2464_vm0, %v5663_v30  ;;  %3067 = vmatprep.mubr.bf16.mxu1 %v5664_v31  ;;  %v432_v30 = vld [vmem:[%s7389_s2] sm:$0x3]  ;;  %v440_v31 = vsub.s32 1, %v435_v27 }
 0x1ac   :  { %3751 = vmatprep.mubr.bf16.mxu0 %v5734_v10 }
 0x1b2   :  { %3068 = vmatmul.mubr.bf16.gmra.mrb[56].mxu1 %v5666_v33 }
 0x1b3   :  { %4555 = vmatmul.mubr.msk.bf16.gmra.mrb[24].mxu0 %vm2464_vm0, %v5667_v34  ;;  %3077 = vmatprep.mubr.bf16.mxu1 %v4341_v35  ;;  %v7138_v35 = vrot.slane %v432_v30, %v436_v29 }
 0x1b4   :  { %3761 = vmatprep.mubr.bf16.mxu0 %v5734_v10 }
 0x1ba   :  { %3078 = vmatmul.mubr.bf16.gmra.mrb[60].mxu1 %v4340_v36 }
 0x1bb   :  { %4556 = vmatmul.mubr.msk.bf16.gmra.mrb[28].mxu0 %vm2464_vm0, %v5670_v37  ;;  %3198 = vmatprep.mubr.bf16.mxu1 %v5673_v38  ;;  %v7142_v37 = vrot.slane %v432_v30, %v440_v31 }
 0x1bc   :  { %3771 = vmatprep.mubr.bf16.mxu0 %v5734_v10 }
 0x1c2   :  { %3199 = vmatmul.mubr.bf16.vlgmr.msra.gmra.mrb[32].mxu1 %v5671_v39 }
 0x1c3   :  { %4557 = vmatmul.mubr.msk.bf16.gmra.mrb[32].mxu0 %vm2464_vm0, %v5674_v40  ;;  %3208 = vmatprep.mubr.bf16.mxu1 %v5675_v41 }
 0x1c4   :  { %3781 = vmatprep.mubr.bf16.mxu0 %v5734_v10 }
 0x1ca   :  { %3209 = vmatmul.mubr.bf16.gmra.mrb[36].mxu1 %v5677_v42 }
 0x1cb   :  { %4558 = vmatmul.mubr.msk.bf16.gmra.mrb[36].mxu0 %vm2464_vm0, %v5678_v43  ;;  %3218 = vmatprep.mubr.bf16.mxu1 %v5679_v44 }
 0x1cc   :  { %3791 = vmatprep.mubr.bf16.mxu0 %v5734_v10 }
 0x1d2   :  { %3219 = vmatmul.mubr.bf16.gmra.mrb[40].mxu1 %v5681_v45 }
 0x1d3   :  { %4559 = vmatmul.mubr.msk.bf16.gmra.mrb[40].mxu0 %vm2464_vm0, %v5682_v46  ;;  %3228 = vmatprep.mubr.bf16.mxu1 %v5683_v47 }
 0x1d4   :  { %3801 = vmatprep.mubr.bf16.mxu0 %v5734_v10 }
 0x1da   :  { %3229 = vmatmul.mubr.bf16.gmra.mrb[44].mxu1 %v5685_v48 }
 0x1db   :  { %4560 = vmatmul.mubr.msk.bf16.gmra.mrb[44].mxu0 %vm2464_vm0, %v5686_v49  ;;  %3238 = vmatprep.mubr.bf16.mxu1 %v5687_v50 }
 0x1dc   :  { %3811 = vmatprep.mubr.bf16.mxu0 %v5734_v10 }
 0x1e2   :  { %3239 = vmatmul.mubr.bf16.gmra.mrb[48].mxu1 %v5689_v51 }
 0x1e3   :  { %4561 = vmatmul.mubr.msk.bf16.gmra.mrb[48].mxu0 %vm2464_vm0, %v5690_v52  ;;  %3248 = vmatprep.mubr.bf16.mxu1 %v5691_v53 }
 0x1e4   :  { %3821 = vmatprep.mubr.bf16.mxu0 %v5734_v10 }
 0x1ea   :  { %3249 = vmatmul.mubr.bf16.gmra.mrb[52].mxu1 %v5693_v54 }
 0x1eb   :  { %4562 = vmatmul.mubr.msk.bf16.gmra.mrb[52].mxu0 %vm2464_vm0, %v5694_v55  ;;  %3258 = vmatprep.mubr.bf16.mxu1 %v5695_v56 }
 0x1ec   :  { %3831 = vmatprep.mubr.bf16.mxu0 %v5734_v10 }
 0x1f2   :  { %3259 = vmatmul.mubr.bf16.gmra.mrb[56].mxu1 %v5697_v58 }
 0x1f3   :  { %4563 = vmatmul.mubr.msk.bf16.gmra.mrb[56].mxu0 %vm2464_vm0, %v5698_v59  ;;  %3268 = vmatprep.mubr.bf16.mxu1 %v4343_v60 }
 0x1f4   :  { %3841 = vmatprep.mubr.bf16.mxu0 %v5734_v10 }
 0x1fa   :  { %3269 = vmatmul.mubr.bf16.gmra.mrb[60].mxu1 %v4342_v61 }
 0x1fb   :  { %4564 = vmatmul.mubr.msk.bf16.gmra.mrb[60].mxu0 %vm2464_vm0, %v5701_v62 }
 0x215   :  { %v2929_v63 = vpop.f32.mrb[0].mxu1 }
 0x216   :  { %v2931_v0 = vpop.f32.mrb[1].mxu1  ;;  %v4659_v38 = vadd.f32 %v2929_v63, %v7138_v35 }
 0x217   :  { %v2933_v1 = vpop.f32.mrb[2].mxu1  ;;  %v4661_v39 = vadd.f32 %v2931_v0, %v7142_v37 }
 0x218   :  { %v2935_v2 = vpop.f32.mrb[3].mxu1  ;;  %v4663_v41 = vadd.f32 %v2933_v1, %v7138_v35 }
 0x219   :  { %v4665_v44 = vadd.f32 %v2935_v2, %v7142_v37 }
 0x21d   :  { %v2939_v3 = vpop.f32.mrb[4].mxu1 }
 0x21e   :  { %v2941_v4 = vpop.f32.mrb[5].mxu1  ;;  %v4667_v56 = vadd.f32 %v2939_v3, %v7138_v35 }
 0x21f   :  { %v2943_v5 = vpop.f32.mrb[6].mxu1  ;;  %v4669_v57 = vadd.f32 %v2941_v4, %v7142_v37 }
 0x220   :  { %v2945_v6 = vpop.f32.mrb[7].mxu1  ;;  %v4671_v60 = vadd.f32 %v2943_v5, %v7138_v35 }
 0x221   :  { %v4673_v63 = vadd.f32 %v2945_v6, %v7142_v37 }
 0x225   :  { %v7089_v7 = vpop.f32.mrb[8].mxu1 }
 0x226   :  { %v7091_v8 = vpop.f32.mrb[9].mxu1  ;;  %v4675_v31 = vadd.f32 %v7089_v7, %v7138_v35 }
 0x227   :  { %v7093_v9 = vpop.f32.mrb[10].mxu1  ;;  %v4677_v6 = vadd.f32 %v7091_v8, %v7142_v37 }
 0x228   :  { %v7095_v10 = vpop.f32.mrb[11].mxu1 }
 0x22d   :  { %v7097_v11 = vpop.f32.mrb[12].mxu1 }
 0x22e   :  { %v7099_v12 = vpop.f32.mrb[13].mxu1 }
 0x22f   :  { %v7101_v13 = vpop.f32.mrb[14].mxu1 }
 0x230   :  { %v7103_v14 = vpop.f32.mrb[15].mxu1 }
 0x235   :  { %v7105_v15 = vpop.f32.mrb[16].mxu1 }
 0x236   :  { %v7107_v16 = vpop.f32.mrb[17].mxu1 }
 0x237   :  { %v7109_v17 = vpop.f32.mrb[18].mxu1 }
 0x238   :  { %v7111_v18 = vpop.f32.mrb[19].mxu1 }
 0x23d   :  { %v7113_v19 = vpop.f32.mrb[20].mxu1 }
 0x23e   :  { %v7115_v20 = vpop.f32.mrb[21].mxu1 }
 0x23f   :  { %v7117_v21 = vpop.f32.mrb[22].mxu1 }
 0x240   :  { %v7119_v22 = vpop.f32.mrb[23].mxu1 }
 0x245   :  { %v7121_v24 = vpop.f32.mrb[24].mxu1 }
 0x246   :  { %v7123_v25 = vpop.f32.mrb[25].mxu1 }
 0x247   :  { %v7125_v26 = vpop.f32.mrb[26].mxu1 }
 0x248   :  { %v7127_v28 = vpop.f32.mrb[27].mxu1 }
 0x24d   :  { %v7132_v32 = vpop.f32.mrb[28].mxu1 }
 0x24e   :  { %v7134_v33 = vpop.f32.mrb[29].mxu1 }
 0x24f   :  { %v7136_v34 = vpop.f32.mrb[30].mxu1 }
 0x250   :  { %v7140_v36 = vpop.f32.mrb[31].mxu1 }
 0x256   :  { %v3693_v40 = vpop.f32.mrb[0].mxu0 }
 0x257   :  { %v4660_v42 = vadd.f32 %v4659_v38, %v3693_v40  ;;  %v3695_v43 = vpop.f32.mrb[1].mxu0  ;;  %v4679_v40 = vadd.f32 %v7093_v9, %v7138_v35 }
 0x258   :  { %v4662_v45 = vadd.f32 %v4661_v39, %v3695_v43  ;;  %v3697_v46 = vpop.f32.mrb[2].mxu0  ;;  %v4681_v43 = vadd.f32 %v7095_v10, %v7142_v37  ;;  %v4685_v10 = vadd.f32 %v7099_v12, %v7142_v37 }
 0x259   :  { %v3850_v47 = vmax.f32 %v4660_v42, 0.0  ;;  %v4664_v48 = vadd.f32 %v4663_v41, %v3697_v46  ;;  %v3699_v49 = vpop.f32.mrb[3].mxu0 }
 0x25a   :  { %v3851_v50 = vmax.f32 %v4662_v45, 0.0  ;;  %v4666_v51 = vadd.f32 %v4665_v44, %v3699_v49 }
 0x25b   :  { %v3852_v53 = vmax.f32 %v4664_v48, 0.0 }
 0x25c   :  { %v4596_v54 = vpack.c.bf16 %v3851_v50, %v3850_v47  ;;  %v3853_v55 = vmax.f32 %v4666_v51, 0.0  ;;  %v4683_v51 = vadd.f32 %v7097_v11, %v7138_v35 }
 0x25e   :  { %4103 = vst.msk [vmem:[%s7390_s3] sm:$0xff] %vm7148_vm3, %v4596_v54  ;;  %v4597_v58 = vpack.c.bf16 %v3853_v55, %v3852_v53  ;;  %v3703_v59 = vpop.f32.mrb[4].mxu0  ;;  %v4687_v55 = vadd.f32 %v7101_v13, %v7138_v35 }
 0x25f   :  { %v4668_v61 = vadd.f32 %v4667_v56, %v3703_v59  ;;  %v3705_v62 = vpop.f32.mrb[5].mxu0 }
 0x260   :  { %4104 = vst.msk [vmem:[%s7390_s3 + $0x8] sm:$0xff] %vm7148_vm3, %v4597_v58  ;;  %v4670_v0 = vadd.f32 %v4669_v57, %v3705_v62  ;;  %v3707_v1 = vpop.f32.mrb[6].mxu0  ;;  %v4689_v58 = vadd.f32 %v7103_v14, %v7142_v37  ;;  %v4693_v14 = vadd.f32 %v7107_v16, %v7142_v37 }
 0x261   :  { %v3854_v2 = vmax.f32 %v4668_v61, 0.0  ;;  %v4672_v3 = vadd.f32 %v4671_v60, %v3707_v1  ;;  %v3709_v4 = vpop.f32.mrb[7].mxu0 }
 0x262   :  { %v3855_v23 = vmax.f32 %v4670_v0, 0.0  ;;  %v4674_v27 = vadd.f32 %v4673_v63, %v3709_v4 }
 0x263   :  { %v3856_v29 = vmax.f32 %v4672_v3, 0.0 }
 0x264   :  { %v4598_v30 = vpack.c.bf16 %v3855_v23, %v3854_v2  ;;  %v3857_v5 = vmax.f32 %v4674_v27, 0.0  ;;  %v4691_v2 = vadd.f32 %v7105_v15, %v7138_v35  ;;  %v4695_v23 = vadd.f32 %v7109_v17, %v7138_v35 }
 0x266   :  { %4105 = vst.msk [vmem:[%s7390_s3 + $0x10] sm:$0xff] %vm7148_vm3, %v4598_v30  ;;  %v4599_v38 = vpack.c.bf16 %v3857_v5, %v3856_v29  ;;  %v3713_v39 = vpop.f32.mrb[8].mxu0  ;;  %v4697_v30 = vadd.f32 %v7111_v18, %v7142_v37  ;;  %v4701_v18 = vadd.f32 %v7115_v20, %v7142_v37 }
 0x267   :  { %v4676_v41 = vadd.f32 %v4675_v31, %v3713_v39  ;;  %v3715_v42 = vpop.f32.mrb[9].mxu0 }
 0x268   :  { %4106 = vst.msk [vmem:[%s7390_s3 + $0x18] sm:$0xff] %vm7148_vm3, %v4599_v38  ;;  %v4678_v7 = vadd.f32 %v4677_v6, %v3715_v42  ;;  %v3717_v8 = vpop.f32.mrb[10].mxu0  ;;  %v4699_v42 = vadd.f32 %v7113_v19, %v7138_v35 }
 0x269   :  { %v3858_v44 = vmax.f32 %v4676_v41, 0.0  ;;  %v4680_v45 = vadd.f32 %v4679_v40, %v3717_v8  ;;  %v3719_v46 = vpop.f32.mrb[11].mxu0  ;;  %v4703_v8 = vadd.f32 %v7117_v21, %v7138_v35 }
 0x26a   :  { %v3859_v47 = vmax.f32 %v4678_v7, 0.0  ;;  %v4682_v48 = vadd.f32 %v4681_v43, %v3719_v46  ;;  %v4705_v46 = vadd.f32 %v7119_v22, %v7142_v37  ;;  %v4709_v22 = vadd.f32 %v7123_v25, %v7142_v37 }
 0x26b   :  { %v3860_v49 = vmax.f32 %v4680_v45, 0.0 }
 0x26c   :  { %v4600_v9 = vpack.c.bf16 %v3859_v47, %v3858_v44  ;;  %v3861_v50 = vmax.f32 %v4682_v48, 0.0 }
 0x26e   :  { %4107 = vst.msk [vmem:[%s7390_s3 + $0x20] sm:$0xff] %vm7148_vm3, %v4600_v9  ;;  %v4601_v53 = vpack.c.bf16 %v3861_v50, %v3860_v49  ;;  %v3723_v54 = vpop.f32.mrb[12].mxu0 }
 0x26f   :  { %v4684_v56 = vadd.f32 %v4683_v51, %v3723_v54  ;;  %v3725_v57 = vpop.f32.mrb[13].mxu0 }
 0x270   :  { %4108 = vst.msk [vmem:[%s7390_s3 + $0x28] sm:$0xff] %vm7148_vm3, %v4601_v53  ;;  %v4686_v11 = vadd.f32 %v4685_v10, %v3725_v57  ;;  %v3727_v12 = vpop.f32.mrb[14].mxu0  ;;  %v4707_v53 = vadd.f32 %v7121_v24, %v7138_v35 }
 0x271   :  { %v3862_v59 = vmax.f32 %v4684_v56, 0.0  ;;  %v4688_v60 = vadd.f32 %v4687_v55, %v3727_v12  ;;  %v3729_v61 = vpop.f32.mrb[15].mxu0  ;;  %v4711_v56 = vadd.f32 %v7125_v26, %v7138_v35 }
 0x272   :  { %v3863_v62 = vmax.f32 %v4686_v11, 0.0  ;;  %v4690_v63 = vadd.f32 %v4689_v58, %v3729_v61  ;;  %v4713_v11 = vadd.f32 %v7127_v28, %v7142_v37  ;;  %v4717_v28 = vadd.f32 %v7134_v33, %v7142_v37 }
 0x273   :  { %v3864_v0 = vmax.f32 %v4688_v60, 0.0 }
 0x274   :  { %v4602_v13 = vpack.c.bf16 %v3863_v62, %v3862_v59  ;;  %v3865_v1 = vmax.f32 %v4690_v63, 0.0 }
 0x276   :  { %4109 = vst.msk [vmem:[%s7390_s3 + $0x30] sm:$0xff] %vm7148_vm3, %v4602_v13  ;;  %v4603_v3 = vpack.c.bf16 %v3865_v1, %v3864_v0  ;;  %v3733_v4 = vpop.f32.mrb[16].mxu0  ;;  %v4715_v13 = vadd.f32 %v7132_v32, %v7138_v35 }
 0x277   :  { %v4692_v27 = vadd.f32 %v4691_v2, %v3733_v4  ;;  %v3735_v29 = vpop.f32.mrb[17].mxu0 }
 0x278   :  { %4110 = vst.msk [vmem:[%s7390_s3 + $0x38] sm:$0xff] %vm7148_vm3, %v4603_v3  ;;  %v4694_v15 = vadd.f32 %v4693_v14, %v3735_v29  ;;  %v3737_v16 = vpop.f32.mrb[18].mxu0  ;;  %v4719_v14 = vadd.f32 %v7136_v34, %v7138_v35 }
 0x279   :  { %v3866_v5 = vmax.f32 %v4692_v27, 0.0  ;;  %v4696_v31 = vadd.f32 %v4695_v23, %v3737_v16  ;;  %v3739_v6 = vpop.f32.mrb[19].mxu0  ;;  %v4721_v23 = vadd.f32 %v7140_v36, %v7142_v37 }
 0x27a   :  { %v3867_v38 = vmax.f32 %v4694_v15, 0.0  ;;  %v4698_v39 = vadd.f32 %v4697_v30, %v3739_v6 }
 0x27b   :  { %v3868_v40 = vmax.f32 %v4696_v31, 0.0 }
 0x27c   :  { %v4604_v17 = vpack.c.bf16 %v3867_v38, %v3866_v5  ;;  %v3869_v41 = vmax.f32 %v4698_v39, 0.0 }
 0x27e   :  { %4111 = vst.msk [vmem:[%s7390_s3 + $0x40] sm:$0xff] %vm7148_vm3, %v4604_v17  ;;  %v4605_v43 = vpack.c.bf16 %v3869_v41, %v3868_v40  ;;  %v3743_v7 = vpop.f32.mrb[20].mxu0 }
 0x27f   :  { %v4700_v44 = vadd.f32 %v4699_v42, %v3743_v7  ;;  %v3745_v45 = vpop.f32.mrb[21].mxu0 }
 0x280   :  { %4112 = vst.msk [vmem:[%s7390_s3 + $0x48] sm:$0xff] %vm7148_vm3, %v4605_v43  ;;  %v4702_v19 = vadd.f32 %v4701_v18, %v3745_v45  ;;  %v3747_v20 = vpop.f32.mrb[22].mxu0 }
 0x281   :  { %v3870_v47 = vmax.f32 %v4700_v44, 0.0  ;;  %v4704_v48 = vadd.f32 %v4703_v8, %v3747_v20  ;;  %v3749_v49 = vpop.f32.mrb[23].mxu0 }
 0x282   :  { %v3871_v9 = vmax.f32 %v4702_v19, 0.0  ;;  %v4706_v50 = vadd.f32 %v4705_v46, %v3749_v49 }
 0x283   :  { %v3872_v51 = vmax.f32 %v4704_v48, 0.0 }
 0x284   :  { %v4606_v21 = vpack.c.bf16 %v3871_v9, %v3870_v47  ;;  %v3873_v10 = vmax.f32 %v4706_v50, 0.0 }
 0x286   :  { %4113 = vst.msk [vmem:[%s7390_s3 + $0x50] sm:$0xff] %vm7148_vm3, %v4606_v21  ;;  %v4607_v54 = vpack.c.bf16 %v3873_v10, %v3872_v51  ;;  %v3753_v55 = vpop.f32.mrb[24].mxu0 }
 0x287   :  { %v4708_v57 = vadd.f32 %v4707_v53, %v3753_v55  ;;  %v3755_v58 = vpop.f32.mrb[25].mxu0 }
 0x288   :  { %4114 = vst.msk [vmem:[%s7390_s3 + $0x58] sm:$0xff] %vm7148_vm3, %v4607_v54  ;;  %v4710_v24 = vadd.f32 %v4709_v22, %v3755_v58  ;;  %v3757_v25 = vpop.f32.mrb[26].mxu0 }
 0x289   :  { %v3874_v12 = vmax.f32 %v4708_v57, 0.0  ;;  %v4712_v59 = vadd.f32 %v4711_v56, %v3757_v25  ;;  %v3759_v60 = vpop.f32.mrb[27].mxu0 }
 0x28a   :  { %v3875_v61 = vmax.f32 %v4710_v24, 0.0  ;;  %v4714_v62 = vadd.f32 %v4713_v11, %v3759_v60 }
 0x28b   :  { %v3876_v63 = vmax.f32 %v4712_v59, 0.0 }
 0x28c   :  { %v4608_v26 = vpack.c.bf16 %v3875_v61, %v3874_v12  ;;  %v3877_v0 = vmax.f32 %v4714_v62, 0.0 }
 0x28e   :  { %4115 = vst.msk [vmem:[%s7390_s3 + $0x60] sm:$0xff] %vm7148_vm3, %v4608_v26  ;;  %v4609_v1 = vpack.c.bf16 %v3877_v0, %v3876_v63  ;;  %v3763_v2 = vpop.f32.mrb[28].mxu0 }
 0x28f   :  { %v4716_v3 = vadd.f32 %v4715_v13, %v3763_v2  ;;  %v3765_v4 = vpop.f32.mrb[29].mxu0 }
 0x290   :  { %4116 = vst.msk [vmem:[%s7390_s3 + $0x68] sm:$0xff] %vm7148_vm3, %v4609_v1  ;;  %v4718_v32 = vadd.f32 %v4717_v28, %v3765_v4  ;;  %v3767_v33 = vpop.f32.mrb[30].mxu0 }
 0x291   :  { %v3878_v27 = vmax.f32 %v4716_v3, 0.0  ;;  %v4720_v29 = vadd.f32 %v4719_v14, %v3767_v33  ;;  %v3769_v30 = vpop.f32.mrb[31].mxu0 }
 0x292   :  { %v3879_v15 = vmax.f32 %v4718_v32, 0.0  ;;  %v4722_v16 = vadd.f32 %v4721_v23, %v3769_v30 }
 0x293   :  { %v3880_v5 = vmax.f32 %v4720_v29, 0.0 }
 0x294   :  { %v4610_v34 = vpack.c.bf16 %v3879_v15, %v3878_v27  ;;  %v3881_v31 = vmax.f32 %v4722_v16, 0.0 }
 0x295   :  { %v3200_v6 = vpop.f32.mrb[32].mxu1 }
 0x296   :  { %4117 = vst.msk [vmem:[%s7390_s3 + $0x70] sm:$0xff] %vm7148_vm3, %v4610_v34  ;;  %v4611_v36 = vpack.c.bf16 %v3881_v31, %v3880_v5  ;;  %v3773_v38 = vpop.f32.mrb[32].mxu0  ;;  %v4723_v39 = vadd.f32 %v3200_v6, %v7138_v35  ;;  %v3202_v40 = vpop.f32.mrb[33].mxu1 }
 0x297   :  { %v3775_v17 = vpop.f32.mrb[33].mxu0  ;;  %v4725_v41 = vadd.f32 %v3202_v40, %v7142_v37  ;;  %v3204_v42 = vpop.f32.mrb[34].mxu1 }
 0x298   :  { %4118 = vst.msk [vmem:[%s7390_s3 + $0x78] sm:$0xff] %vm7148_vm3, %v4611_v36  ;;  %v3777_v18 = vpop.f32.mrb[34].mxu0  ;;  %v4724_v43 = vadd.f32 %v4723_v39, %v3773_v38  ;;  %v4727_v7 = vadd.f32 %v3204_v42, %v7138_v35  ;;  %v3206_v8 = vpop.f32.mrb[35].mxu1 }
 0x299   :  { %v3779_v44 = vpop.f32.mrb[35].mxu0  ;;  %v4726_v45 = vadd.f32 %v4725_v41, %v3775_v17  ;;  %v4729_v46 = vadd.f32 %v3206_v8, %v7142_v37 }
 0x29a   :  { %v3882_v19 = vmax.f32 %v4724_v43, 0.0  ;;  %v4728_v20 = vadd.f32 %v4727_v7, %v3777_v18 }
 0x29b   :  { %v3883_v47 = vmax.f32 %v4726_v45, 0.0  ;;  %v4730_v48 = vadd.f32 %v4729_v46, %v3779_v44 }
 0x29c   :  { %v3884_v49 = vmax.f32 %v4728_v20, 0.0 }
 0x29d   :  { %v4612_v9 = vpack.c.bf16 %v3883_v47, %v3882_v19  ;;  %v3885_v50 = vmax.f32 %v4730_v48, 0.0  ;;  %v3210_v51 = vpop.f32.mrb[36].mxu1 }
 0x29e   :  { %v3783_v21 = vpop.f32.mrb[36].mxu0  ;;  %v4731_v10 = vadd.f32 %v3210_v51, %v7138_v35  ;;  %v3212_v53 = vpop.f32.mrb[37].mxu1 }
 0x29f   :  { %v3785_v22 = vpop.f32.mrb[37].mxu0  ;;  %4119 = vst.msk [vmem:[%s7390_s3 + $0x80] sm:$0xff] %vm7148_vm3, %v4612_v9  ;;  %v4613_v54 = vpack.c.bf16 %v3885_v50, %v3884_v49  ;;  %v4733_v55 = vadd.f32 %v3212_v53, %v7142_v37  ;;  %v3214_v56 = vpop.f32.mrb[38].mxu1 }
 0x2a0   :  { %v3787_v57 = vpop.f32.mrb[38].mxu0  ;;  %v4732_v58 = vadd.f32 %v4731_v10, %v3783_v21  ;;  %v4735_v11 = vadd.f32 %v3214_v56, %v7138_v35  ;;  %v3216_v24 = vpop.f32.mrb[39].mxu1 }
 0x2a1   :  { %v3789_v25 = vpop.f32.mrb[39].mxu0  ;;  %4120 = vst.msk [vmem:[%s7390_s3 + $0x88] sm:$0xff] %vm7148_vm3, %v4613_v54  ;;  %v4734_v12 = vadd.f32 %v4733_v55, %v3785_v22  ;;  %v4737_v59 = vadd.f32 %v3216_v24, %v7142_v37 }
 0x2a2   :  { %v3886_v60 = vmax.f32 %v4732_v58, 0.0  ;;  %v4736_v61 = vadd.f32 %v4735_v11, %v3787_v57 }
 0x2a3   :  { %v3887_v62 = vmax.f32 %v4734_v12, 0.0  ;;  %v4738_v63 = vadd.f32 %v4737_v59, %v3789_v25 }
 0x2a4   :  { %v3888_v26 = vmax.f32 %v4736_v61, 0.0 }
 0x2a5   :  { %v4614_v0 = vpack.c.bf16 %v3887_v62, %v3886_v60  ;;  %v3889_v13 = vmax.f32 %v4738_v63, 0.0  ;;  %v3220_v28 = vpop.f32.mrb[40].mxu1 }
 0x2a6   :  { %v3793_v1 = vpop.f32.mrb[40].mxu0  ;;  %v4739_v2 = vadd.f32 %v3220_v28, %v7138_v35  ;;  %v3222_v14 = vpop.f32.mrb[41].mxu1 }
 0x2a7   :  { %v3795_v3 = vpop.f32.mrb[41].mxu0  ;;  %4121 = vst.msk [vmem:[%s7390_s3 + $0x90] sm:$0xff] %vm7148_vm3, %v4614_v0  ;;  %v4615_v4 = vpack.c.bf16 %v3889_v13, %v3888_v26  ;;  %v4741_v23 = vadd.f32 %v3222_v14, %v7142_v37  ;;  %v3224_v32 = vpop.f32.mrb[42].mxu1 }
 0x2a8   :  { %v3797_v33 = vpop.f32.mrb[42].mxu0  ;;  %v4740_v27 = vadd.f32 %v4739_v2, %v3793_v1  ;;  %v4743_v29 = vadd.f32 %v3224_v32, %v7138_v35  ;;  %v3226_v30 = vpop.f32.mrb[43].mxu1 }
 0x2a9   :  { %v3799_v15 = vpop.f32.mrb[43].mxu0  ;;  %4122 = vst.msk [vmem:[%s7390_s3 + $0x98] sm:$0xff] %vm7148_vm3, %v4615_v4  ;;  %v4742_v16 = vadd.f32 %v4741_v23, %v3795_v3  ;;  %v4745_v5 = vadd.f32 %v3226_v30, %v7142_v37 }
 0x2aa   :  { %v3890_v34 = vmax.f32 %v4740_v27, 0.0  ;;  %v4744_v31 = vadd.f32 %v4743_v29, %v3797_v33 }
 0x2ab   :  { %v3891_v36 = vmax.f32 %v4742_v16, 0.0  ;;  %v4746_v6 = vadd.f32 %v4745_v5, %v3799_v15 }
 0x2ac   :  { %v3892_v38 = vmax.f32 %v4744_v31, 0.0 }
 0x2ad   :  { %v4616_v39 = vpack.c.bf16 %v3891_v36, %v3890_v34  ;;  %v3893_v40 = vmax.f32 %v4746_v6, 0.0  ;;  %v3230_v17 = vpop.f32.mrb[44].mxu1 }
 0x2ae   :  { %v3803_v41 = vpop.f32.mrb[44].mxu0  ;;  %v4747_v42 = vadd.f32 %v3230_v17, %v7138_v35  ;;  %v3232_v18 = vpop.f32.mrb[45].mxu1 }
 0x2af   :  { %v3805_v43 = vpop.f32.mrb[45].mxu0  ;;  %4123 = vst.msk [vmem:[%s7390_s3 + $0xa0] sm:$0xff] %vm7148_vm3, %v4616_v39  ;;  %v4617_v7 = vpack.c.bf16 %v3893_v40, %v3892_v38  ;;  %v4749_v8 = vadd.f32 %v3232_v18, %v7142_v37  ;;  %v3234_v44 = vpop.f32.mrb[46].mxu1 }
 0x2b0   :  { %v3807_v45 = vpop.f32.mrb[46].mxu0  ;;  %v4748_v46 = vadd.f32 %v4747_v42, %v3803_v41  ;;  %v4751_v19 = vadd.f32 %v3234_v44, %v7138_v35  ;;  %v3236_v20 = vpop.f32.mrb[47].mxu1 }
 0x2b1   :  { %v3809_v47 = vpop.f32.mrb[47].mxu0  ;;  %4124 = vst.msk [vmem:[%s7390_s3 + $0xa8] sm:$0xff] %vm7148_vm3, %v4617_v7  ;;  %v4750_v48 = vadd.f32 %v4749_v8, %v3805_v43  ;;  %v4753_v49 = vadd.f32 %v3236_v20, %v7142_v37 }
 0x2b2   :  { %v3894_v9 = vmax.f32 %v4748_v46, 0.0  ;;  %v4752_v50 = vadd.f32 %v4751_v19, %v3807_v45 }
 0x2b3   :  { %v3895_v51 = vmax.f32 %v4750_v48, 0.0  ;;  %v4754_v21 = vadd.f32 %v4753_v49, %v3809_v47 }
 0x2b4   :  { %v3896_v10 = vmax.f32 %v4752_v50, 0.0 }
 0x2b5   :  { %v4618_v53 = vpack.c.bf16 %v3895_v51, %v3894_v9  ;;  %v3897_v22 = vmax.f32 %v4754_v21, 0.0  ;;  %v3240_v54 = vpop.f32.mrb[48].mxu1 }
 0x2b6   :  { %v3813_v55 = vpop.f32.mrb[48].mxu0  ;;  %v4755_v56 = vadd.f32 %v3240_v54, %v7138_v35  ;;  %v3242_v57 = vpop.f32.mrb[49].mxu1 }
 0x2b7   :  { %v3815_v58 = vpop.f32.mrb[49].mxu0  ;;  %4125 = vst.msk [vmem:[%s7390_s3 + $0xb0] sm:$0xff] %vm7148_vm3, %v4618_v53  ;;  %v4619_v11 = vpack.c.bf16 %v3897_v22, %v3896_v10  ;;  %v4757_v24 = vadd.f32 %v3242_v57, %v7142_v37  ;;  %v3244_v25 = vpop.f32.mrb[50].mxu1 }
 0x2b8   :  { %v3817_v12 = vpop.f32.mrb[50].mxu0  ;;  %v4756_v59 = vadd.f32 %v4755_v56, %v3813_v55  ;;  %v4759_v60 = vadd.f32 %v3244_v25, %v7138_v35  ;;  %v3246_v61 = vpop.f32.mrb[51].mxu1 }
 0x2b9   :  { %v3819_v62 = vpop.f32.mrb[51].mxu0  ;;  %4126 = vst.msk [vmem:[%s7390_s3 + $0xb8] sm:$0xff] %vm7148_vm3, %v4619_v11  ;;  %v4758_v63 = vadd.f32 %v4757_v24, %v3815_v58  ;;  %v4761_v26 = vadd.f32 %v3246_v61, %v7142_v37 }
 0x2ba   :  { %v3898_v0 = vmax.f32 %v4756_v59, 0.0  ;;  %v4760_v13 = vadd.f32 %v4759_v60, %v3817_v12 }
 0x2bb   :  { %v3899_v28 = vmax.f32 %v4758_v63, 0.0  ;;  %v4762_v1 = vadd.f32 %v4761_v26, %v3819_v62 }
 0x2bc   :  { %v3900_v2 = vmax.f32 %v4760_v13, 0.0 }
 0x2bd   :  { %v4620_v14 = vpack.c.bf16 %v3899_v28, %v3898_v0  ;;  %v3901_v3 = vmax.f32 %v4762_v1, 0.0  ;;  %v3250_v4 = vpop.f32.mrb[52].mxu1 }
 0x2be   :  { %v3823_v23 = vpop.f32.mrb[52].mxu0  ;;  %v4763_v32 = vadd.f32 %v3250_v4, %v7138_v35  ;;  %v3252_v33 = vpop.f32.mrb[53].mxu1 }
 0x2bf   :  { %v3825_v27 = vpop.f32.mrb[53].mxu0  ;;  %4127 = vst.msk [vmem:[%s7390_s3 + $0xc0] sm:$0xff] %vm7148_vm3, %v4620_v14  ;;  %v4621_v29 = vpack.c.bf16 %v3901_v3, %v3900_v2  ;;  %v4765_v30 = vadd.f32 %v3252_v33, %v7142_v37  ;;  %v3254_v15 = vpop.f32.mrb[54].mxu1 }
 0x2c0   :  { %v3827_v16 = vpop.f32.mrb[54].mxu0  ;;  %v4764_v5 = vadd.f32 %v4763_v32, %v3823_v23  ;;  %v4767_v34 = vadd.f32 %v3254_v15, %v7138_v35  ;;  %v3256_v31 = vpop.f32.mrb[55].mxu1 }
 0x2c1   :  { %v3829_v36 = vpop.f32.mrb[55].mxu0  ;;  %4128 = vst.msk [vmem:[%s7390_s3 + $0xc8] sm:$0xff] %vm7148_vm3, %v4621_v29  ;;  %v4766_v6 = vadd.f32 %v4765_v30, %v3825_v27  ;;  %v4769_v38 = vadd.f32 %v3256_v31, %v7142_v37 }
 0x2c2   :  { %v3902_v39 = vmax.f32 %v4764_v5, 0.0  ;;  %v4768_v40 = vadd.f32 %v4767_v34, %v3827_v16 }
 0x2c3   :  { %v3903_v17 = vmax.f32 %v4766_v6, 0.0  ;;  %v4770_v41 = vadd.f32 %v4769_v38, %v3829_v36 }
 0x2c4   :  { %v3904_v42 = vmax.f32 %v4768_v40, 0.0 }
 0x2c5   :  { %v4622_v18 = vpack.c.bf16 %v3903_v17, %v3902_v39  ;;  %v3905_v43 = vmax.f32 %v4770_v41, 0.0  ;;  %v3260_v7 = vpop.f32.mrb[56].mxu1 }
 0x2c6   :  { %v3833_v8 = vpop.f32.mrb[56].mxu0  ;;  %v4771_v44 = vadd.f32 %v3260_v7, %v7138_v35  ;;  %v3262_v45 = vpop.f32.mrb[57].mxu1 }
 0x2c7   :  { %v3835_v46 = vpop.f32.mrb[57].mxu0  ;;  %4129 = vst.msk [vmem:[%s7390_s3 + $0xd0] sm:$0xff] %vm7148_vm3, %v4622_v18  ;;  %v4623_v19 = vpack.c.bf16 %v3905_v43, %v3904_v42  ;;  %v4773_v20 = vadd.f32 %v3262_v45, %v7142_v37  ;;  %v3264_v47 = vpop.f32.mrb[58].mxu1 }
 0x2c8   :  { %v3837_v48 = vpop.f32.mrb[58].mxu0  ;;  %v4772_v49 = vadd.f32 %v4771_v44, %v3833_v8  ;;  %v4775_v9 = vadd.f32 %v3264_v47, %v7138_v35  ;;  %v3266_v50 = vpop.f32.mrb[59].mxu1 }
 0x2c9   :  { %v3839_v51 = vpop.f32.mrb[59].mxu0  ;;  %4130 = vst.msk [vmem:[%s7390_s3 + $0xd8] sm:$0xff] %vm7148_vm3, %v4623_v19  ;;  %v4774_v21 = vadd.f32 %v4773_v20, %v3835_v46  ;;  %v4777_v10 = vadd.f32 %v3266_v50, %v7142_v37 }
 0x2ca   :  { %v3906_v53 = vmax.f32 %v4772_v49, 0.0  ;;  %v4776_v22 = vadd.f32 %v4775_v9, %v3837_v48 }
 0x2cb   :  { %v3907_v54 = vmax.f32 %v4774_v21, 0.0  ;;  %v4778_v55 = vadd.f32 %v4777_v10, %v3839_v51 }
 0x2cc   :  { %v3908_v56 = vmax.f32 %v4776_v22, 0.0 }
 0x2cd   :  { %v4624_v57 = vpack.c.bf16 %v3907_v54, %v3906_v53  ;;  %v3909_v58 = vmax.f32 %v4778_v55, 0.0  ;;  %v3270_v11 = vpop.f32.mrb[60].mxu1 }
 0x2ce   :  { %v3843_v24 = vpop.f32.mrb[60].mxu0  ;;  %v4779_v25 = vadd.f32 %v3270_v11, %v7138_v35  ;;  %v3272_v12 = vpop.f32.mrb[61].mxu1 }
 0x2cf   :  { %v3845_v59 = vpop.f32.mrb[61].mxu0  ;;  %4131 = vst.msk [vmem:[%s7390_s3 + $0xe0] sm:$0xff] %vm7148_vm3, %v4624_v57  ;;  %v4625_v60 = vpack.c.bf16 %v3909_v58, %v3908_v56  ;;  %v4781_v61 = vadd.f32 %v3272_v12, %v7142_v37  ;;  %v3274_v62 = vpop.f32.mrb[62].mxu1 }
 0x2d0   :  { %v3847_v63 = vpop.f32.mrb[62].mxu0  ;;  %v4780_v26 = vadd.f32 %v4779_v25, %v3843_v24  ;;  %v3275_v0 = vpop.f32.mrb[63].mxu1 }
 0x2d1   :  { %v3848_v13 = vpop.f32.mrb[63].mxu0  ;;  %4132 = vst.msk [vmem:[%s7390_s3 + $0xe8] sm:$0xff] %vm7148_vm3, %v4625_v60  ;;  %v4782_v35 = vadd.f32 %v4781_v61, %v3845_v59 }
 0x2d2   :  { %v3910_v28 = vmax.f32 %v4780_v26, 0.0 }
 0x2d3   :  { %v3911_v1 = vmax.f32 %v4782_v35, 0.0 }
 0x2d5   :  { %v4626_v2 = vpack.c.bf16 %v3911_v1, %v3910_v28 }
 0x2d7   :  { %4136 = vst.msk [vmem:[%s7390_s3 + $0xf0] sm:$0x11] %vm4135_vm6, %v4626_v2 }

// kernel: alexnet_restoration_forward.8
= control target key start
LH: loop header
LB: loop body
LE: loop exit
PB: predicated region body
PF: predicated region fallthrough
CT: control target
= control target key end

     0   :  { %vm2496_vm0 = vcmask 523264   ;;  %s6379_s1 = inlined_call_operand.vmem [shape: bf16[1728,384], index: 1, kind: input, shape index: {}]   ;;  %s6380_s0 = inlined_call_operand.vmem [shape: bf16[50,1728], index: 0, kind: input, shape index: {}]   ;;  %s6381_s2 = inlined_call_operand.vmem [shape: f32[1,384], index: 2, kind: input, shape index: {}]   ;;  %s6382_s3 = inlined_call_operand.vmem [shape: bf16[50,384], index: 3, kind: output, shape index: {}]  }
   0x1   :  { %v4353_v0 = vld [vmem:[%s6379_s1 + $0x4] ss:$12 sps:$4 sm:$0xff]   ;;  %v4357_v2 = vld [vmem:[%s6379_s1] ss:$12 sps:$4 sm:$0xff]   ;;  %v4359_v4 = vld [vmem:[%s6379_s1 + $0x1c] ss:$12 sps:$4 sm:$0xff]  }
   0x2   :  { %v4355_v1 = vld [vmem:[%s6379_s1 + $0x184] ss:$12 sps:$4 sm:$0xff]   ;;  %2509 = vmatprep.subr.bf16.mxu1 %v4353_v0  ;;  %v4358_v3 = vld [vmem:[%s6379_s1 + $0x180] ss:$12 sps:$4 sm:$0xff]   ;;  %v4361_v5 = vld [vmem:[%s6379_s1 + $0x19c] ss:$12 sps:$4 sm:$0xff]  }
   0x3   :  { %2580 = vmatprep.subr.bf16.mxu0 %v4355_v1  ;;  %2510 = vmatpush1.bf16.msra.mxu1 %v4357_v2  ;;  %v4363_v6 = vld [vmem:[%s6379_s1 + $0x18] ss:$12 sps:$4 sm:$0xff]   ;;  %v4365_v8 = vld [vmem:[%s6379_s1 + $0x34] ss:$12 sps:$4 sm:$0xff]   ;;  %v4369_v10 = vld [vmem:[%s6379_s1 + $0x30] ss:$12 sps:$4 sm:$0xff]  }
   0x4   :  { %2581 = vmatpush1.bf16.msra.mxu0 %v4358_v3  ;;  %2511 = vmatprep.subr.bf16.mxu1 %v4359_v4  ;;  %v4364_v7 = vld [vmem:[%s6379_s1 + $0x198] ss:$12 sps:$4 sm:$0xff]   ;;  %v4367_v9 = vld [vmem:[%s6379_s1 + $0x1b4] ss:$12 sps:$4 sm:$0xff]   ;;  %v4370_v11 = vld [vmem:[%s6379_s1 + $0x1b0] ss:$12 sps:$4 sm:$0xff]  }
   0x5   :  { %2582 = vmatprep.subr.bf16.mxu0 %v4361_v5  ;;  %v4371_v12 = vld [vmem:[%s6379_s1 + $0x4c] ss:$12 sps:$4 sm:$0xff]   ;;  %v4375_v14 = vld [vmem:[%s6379_s1 + $0x48] ss:$12 sps:$4 sm:$0xff]   ;;  %v4377_v16 = vld [vmem:[%s6379_s1 + $0x64] ss:$12 sps:$4 sm:$0xff]  }
   0x6   :  { %v4373_v13 = vld [vmem:[%s6379_s1 + $0x1cc] ss:$12 sps:$4 sm:$0xff]   ;;  %v4376_v15 = vld [vmem:[%s6379_s1 + $0x1c8] ss:$12 sps:$4 sm:$0xff]   ;;  %v4379_v17 = vld [vmem:[%s6379_s1 + $0x1e4] ss:$12 sps:$4 sm:$0xff]  }
   0x7   :  { %2512 = vmatpush1.bf16.msra.mxu1 %v4363_v6  ;;  %v4381_v18 = vld [vmem:[%s6379_s1 + $0x60] ss:$12 sps:$4 sm:$0xff]   ;;  %v4383_v20 = vld [vmem:[%s6379_s1 + $0x7c] ss:$12 sps:$4 sm:$0xff]   ;;  %v4387_v22 = vld [vmem:[%s6379_s1 + $0x78] ss:$12 sps:$4 sm:$0xff]  }
   0x8   :  { %2583 = vmatpush1.bf16.msra.mxu0 %v4364_v7  ;;  %2513 = vmatprep.subr.bf16.mxu1 %v4365_v8  ;;  %v4382_v19 = vld [vmem:[%s6379_s1 + $0x1e0] ss:$12 sps:$4 sm:$0xff]   ;;  %v4385_v21 = vld [vmem:[%s6379_s1 + $0x1fc] ss:$12 sps:$4 sm:$0xff]   ;;  %v4388_v23 = vld [vmem:[%s6379_s1 + $0x1f8] ss:$12 sps:$4 sm:$0xff]  }
   0x9   :  { %2584 = vmatprep.subr.bf16.mxu0 %v4367_v9  ;;  %v4389_v24 = vld [vmem:[%s6379_s1 + $0x94] ss:$12 sps:$4 sm:$0xff]   ;;  %v4393_v26 = vld [vmem:[%s6379_s1 + $0x90] ss:$12 sps:$4 sm:$0xff]   ;;  %v4395_v28 = vld [vmem:[%s6379_s1 + $0xac] ss:$12 sps:$4 sm:$0xff]  }
   0xa   :  { %v4391_v25 = vld [vmem:[%s6379_s1 + $0x214] ss:$12 sps:$4 sm:$0xff]   ;;  %v4394_v27 = vld [vmem:[%s6379_s1 + $0x210] ss:$12 sps:$4 sm:$0xff]   ;;  %v4397_v29 = vld [vmem:[%s6379_s1 + $0x22c] ss:$12 sps:$4 sm:$0xff]  }
   0xb   :  { %2514 = vmatpush1.bf16.msra.mxu1 %v4369_v10  ;;  %v4399_v30 = vld [vmem:[%s6379_s1 + $0xa8] ss:$12 sps:$4 sm:$0xff]   ;;  %v4401_v32 = vld [vmem:[%s6379_s1 + $0xc4] ss:$12 sps:$4 sm:$0xff]   ;;  %v4405_v34 = vld [vmem:[%s6379_s1 + $0xc0] ss:$12 sps:$4 sm:$0xff]  }
   0xc   :  { %2585 = vmatpush1.bf16.msra.mxu0 %v4370_v11  ;;  %2515 = vmatprep.subr.bf16.mxu1 %v4371_v12  ;;  %v4400_v31 = vld [vmem:[%s6379_s1 + $0x228] ss:$12 sps:$4 sm:$0xff]   ;;  %v4403_v33 = vld [vmem:[%s6379_s1 + $0x244] ss:$12 sps:$4 sm:$0xff]   ;;  %v4406_v35 = vld [vmem:[%s6379_s1 + $0x240] ss:$12 sps:$4 sm:$0xff]  }
   0xd   :  { %2586 = vmatprep.subr.bf16.mxu0 %v4373_v13  ;;  %v4407_v36 = vld [vmem:[%s6379_s1 + $0xdc] ss:$12 sps:$4 sm:$0xff]   ;;  %v4411_v38 = vld [vmem:[%s6379_s1 + $0xd8] ss:$12 sps:$4 sm:$0xff]   ;;  %v4413_v40 = vld [vmem:[%s6379_s1 + $0xf4] ss:$12 sps:$4 sm:$0xff]  }
   0xe   :  { %v4409_v37 = vld [vmem:[%s6379_s1 + $0x25c] ss:$12 sps:$4 sm:$0xff]   ;;  %v4412_v39 = vld [vmem:[%s6379_s1 + $0x258] ss:$12 sps:$4 sm:$0xff]   ;;  %v4415_v41 = vld [vmem:[%s6379_s1 + $0x274] ss:$12 sps:$4 sm:$0xff]  }
   0xf   :  { %2516 = vmatpush1.bf16.msra.mxu1 %v4375_v14  ;;  %v4417_v42 = vld [vmem:[%s6379_s1 + $0xf0] ss:$12 sps:$4 sm:$0xff]   ;;  %v4419_v44 = vld [vmem:[%s6379_s1 + $0x10c] ss:$12 sps:$4 sm:$0xff]   ;;  %v4423_v46 = vld [vmem:[%s6379_s1 + $0x108] ss:$12 sps:$4 sm:$0xff]  }
  0x10   :  { %2587 = vmatpush1.bf16.msra.mxu0 %v4376_v15  ;;  %2517 = vmatprep.subr.bf16.mxu1 %v4377_v16  ;;  %v4418_v43 = vld [vmem:[%s6379_s1 + $0x270] ss:$12 sps:$4 sm:$0xff]   ;;  %v4421_v45 = vld [vmem:[%s6379_s1 + $0x28c] ss:$12 sps:$4 sm:$0xff]   ;;  %v4424_v47 = vld [vmem:[%s6379_s1 + $0x288] ss:$12 sps:$4 sm:$0xff]  }
  0x11   :  { %2588 = vmatprep.subr.bf16.mxu0 %v4379_v17  ;;  %v4425_v48 = vld [vmem:[%s6379_s1 + $0x124] ss:$12 sps:$4 sm:$0xff]   ;;  %v4429_v52 = vld [vmem:[%s6379_s1 + $0x120] ss:$12 sps:$4 sm:$0xff]   ;;  %v4431_v54 = vld [vmem:[%s6379_s1 + $0x13c] ss:$12 sps:$4 sm:$0xff]  }
  0x12   :  { %v5040_v49 = vld [vmem:[%s6380_s0 + $0x4] ss:$56 sps:$4 sm:$0xff]   ;;  %v4430_v53 = vld [vmem:[%s6379_s1 + $0x2a0] ss:$12 sps:$4 sm:$0xff]   ;;  %v4447_v0 = vld [vmem:[%s6379_s1 + $0x168] ss:$12 sps:$4 sm:$0xff]  }
  0x13   :  { %2518 = vmatpush1.bf16.msra.mxu1 %v4381_v18  ;;  %v4427_v50 = vld [vmem:[%s6379_s1 + $0x2a4] ss:$12 sps:$4 sm:$0xff]   ;;  %2541 = vmatprep.mubr.bf16.mxu1 %v5040_v49  ;;  %v4433_v55 = vld [vmem:[%s6379_s1 + $0x2bc] ss:$12 sps:$4 sm:$0xff]   ;;  %v4437_v58 = vld [vmem:[%s6379_s1 + $0x154] ss:$12 sps:$4 sm:$0xff]  }
  0x14   :  { %2589 = vmatpush1.bf16.msra.mxu0 %v4382_v19  ;;  %2519 = vmatprep.subr.bf16.mxu1 %v4383_v20  ;;  %v4454_v51 = vld [vmem:[%s6380_s0 + $0xc] ss:$56 sps:$4 sm:$0xff]   ;;  %v4439_v59 = vld [vmem:[%s6379_s1 + $0x2d4] ss:$12 sps:$4 sm:$0xff]   ;;  %v4441_v60 = vld [vmem:[%s6379_s1 + $0x150] ss:$12 sps:$4 sm:$0xff]  }
  0x15   :  { %2590 = vmatprep.subr.bf16.mxu0 %v4385_v21  ;;  %2612 = vmatprep.mubr.bf16.mxu0 %v4454_v51  ;;  %v4435_v56 = vld [vmem:[%s6379_s1 + $0x138] ss:$12 sps:$4 sm:$0xff]   ;;  %v4442_v61 = vld [vmem:[%s6379_s1 + $0x2d0] ss:$12 sps:$4 sm:$0xff]   ;;  %v4448_v1 = vld [vmem:[%s6379_s1 + $0x2e8] ss:$12 sps:$4 sm:$0xff]  }
  0x16   :  { %v4436_v57 = vld [vmem:[%s6379_s1 + $0x2b8] ss:$12 sps:$4 sm:$0xff]   ;;  %v5105_v5 = vld [vmem:[%s6380_s0 + $0x8] ss:$56 sps:$4 sm:$0xff]   ;;  %v5122_v10 = vld [vmem:[%s6380_s0 + $0x74] ss:$56 sps:$4 sm:$0xff]  }
  0x17   :  { %2520 = vmatpush1.bf16.msra.mxu1 %v4387_v22  ;;  %v4443_v62 = vld [vmem:[%s6379_s1 + $0x16c] ss:$12 sps:$4 sm:$0xff]   ;;  %v4457_v2 = vld [vmem:[%s6379_s1 + $0x304] ss:$12 sps:$4 sm:$0xff]   ;;  %v4463_v8 = vld [vmem:[%s6379_s1 + $0x31c] ss:$12 sps:$4 sm:$0xff]  }
  0x18   :  { %2591 = vmatpush1.bf16.msra.mxu0 %v4388_v23  ;;  %2521 = vmatprep.subr.bf16.mxu1 %v4389_v24  ;;  %v4445_v63 = vld [vmem:[%s6379_s1 + $0x2ec] ss:$12 sps:$4 sm:$0xff]   ;;  %v4460_v3 = vld [vmem:[%s6379_s1 + $0x904] ss:$12 sps:$4 sm:$0xff]   ;;  %v4466_v9 = vld [vmem:[%s6379_s1 + $0x91c] ss:$12 sps:$4 sm:$0xff]  }
  0x19   :  { %2592 = vmatprep.subr.bf16.mxu0 %v4391_v25  ;;  %v5100_v4 = vld [vmem:[%s6380_s0] ss:$56 sps:$4 sm:$0xff]   ;;  %v4467_v15 = vld [vmem:[%s6379_s1 + $0x330] ss:$12 sps:$4 sm:$0xff]   ;;  %v4473_v20 = vld [vmem:[%s6379_s1 + $0x348] ss:$12 sps:$4 sm:$0xff]  }
  0x1a   :  { %v4455_v6 = vld [vmem:[%s6379_s1 + $0x300] ss:$12 sps:$4 sm:$0xff]   ;;  %v4461_v11 = vld [vmem:[%s6379_s1 + $0x318] ss:$12 sps:$4 sm:$0xff]   ;;  %v4470_v16 = vld [vmem:[%s6379_s1 + $0x930] ss:$12 sps:$4 sm:$0xff]  }
  0x1b   :  { %2522 = vmatpush1.bf16.msra.mxu1 %v4393_v26  ;;  %v4458_v7 = vld [vmem:[%s6379_s1 + $0x900] ss:$12 sps:$4 sm:$0xff]   ;;  %v4464_v12 = vld [vmem:[%s6379_s1 + $0x918] ss:$12 sps:$4 sm:$0xff]   ;;  %v5148_v17 = vld [vmem:[%s6380_s0 + $0x70] ss:$56 sps:$4 sm:$0xff]  }
  0x1c   :  { %2593 = vmatpush1.bf16.msra.mxu0 %v4394_v27  ;;  %2523 = vmatprep.subr.bf16.mxu1 %v4395_v28  ;;  %v4469_v13 = vld [vmem:[%s6379_s1 + $0x334] ss:$12 sps:$4 sm:$0xff]   ;;  %v4475_v18 = vld [vmem:[%s6379_s1 + $0x34c] ss:$12 sps:$4 sm:$0xff]   ;;  %v5165_v22 = vld [vmem:[%s6380_s0 + $0xe4] ss:$56 sps:$4 sm:$0xff]  }
  0x1d   :  { %2594 = vmatprep.subr.bf16.mxu0 %v4397_v29  ;;  %v4472_v14 = vld [vmem:[%s6379_s1 + $0x934] ss:$12 sps:$4 sm:$0xff]   ;;  %v4478_v19 = vld [vmem:[%s6379_s1 + $0x94c] ss:$12 sps:$4 sm:$0xff]   ;;  %v4481_v24 = vld [vmem:[%s6379_s1 + $0x364] ss:$12 sps:$4 sm:$0xff]  }
  0x1e   :  { %v4476_v21 = vld [vmem:[%s6379_s1 + $0x948] ss:$12 sps:$4 sm:$0xff]   ;;  %v4484_v25 = vld [vmem:[%s6379_s1 + $0x964] ss:$12 sps:$4 sm:$0xff]   ;;  %v4479_v26 = vld [vmem:[%s6379_s1 + $0x360] ss:$12 sps:$4 sm:$0xff]  }
  0x1f   :  { %2524 = vmatpush1.bf16.msra.mxu1 %v4399_v30  ;;  %v5171_v23 = vld [vmem:[%s6380_s0 + $0x7c] ss:$56 sps:$4 sm:$0xff]   ;;  %v5186_v27 = vld [vmem:[%s6380_s0 + $0xe0] ss:$56 sps:$4 sm:$0xff]   ;;  %v4514_v51 = vld [vmem:[%s6379_s1 + $0x9c4] ss:$12 sps:$4 sm:$0xff]  }
  0x20   :  { %2595 = vmatpush1.bf16.msra.mxu0 %v4400_v31  ;;  %2525 = vmatprep.subr.bf16.mxu1 %v4401_v32  ;;  %v5192_v28 = vld [vmem:[%s6380_s0 + $0x78] ss:$56 sps:$4 sm:$0xff]   ;;  %v4482_v30 = vld [vmem:[%s6379_s1 + $0x960] ss:$12 sps:$4 sm:$0xff]   ;;  %v4487_v31 = vld [vmem:[%s6379_s1 + $0x37c] ss:$12 sps:$4 sm:$0xff]  }
  0x21   :  { %2596 = vmatprep.subr.bf16.mxu0 %v4403_v33  ;;  %v57_v29 = vld [vmem:[%s6380_s0 + $0x150] sm:$0x11]  ;;  %v4490_v32 = vld [vmem:[%s6379_s1 + $0x97c] ss:$12 sps:$4 sm:$0xff]   ;;  %v4485_v33 = vld [vmem:[%s6379_s1 + $0x378] ss:$12 sps:$4 sm:$0xff]  }
  0x23   :  { %2526 = vmatpush1.bf16.msra.mxu1 %v4405_v34  ;;  %v4488_v34 = vld [vmem:[%s6379_s1 + $0x978] ss:$12 sps:$4 sm:$0xff]  }
  0x24   :  { %2597 = vmatpush1.bf16.msra.mxu0 %v4406_v35  ;;  %2527 = vmatprep.subr.bf16.mxu1 %v4407_v36  ;;  %v5212_v35 = vcombine.high %v57_v29, %v57_v29  ;;  %v5219_v36 = vld [vmem:[%s6380_s0 + $0xec] ss:$56 sps:$4 sm:$0xff]  }
  0x25   :  { %2598 = vmatprep.subr.bf16.mxu0 %v4409_v37  ;;  %v4496_v37 = vld [vmem:[%s6379_s1 + $0x394] ss:$12 sps:$4 sm:$0xff]  }
  0x27   :  { %2528 = vmatpush1.bf16.msra.mxu1 %v4411_v38  ;;  %v4499_v38 = vld [vmem:[%s6379_s1 + $0x994] ss:$12 sps:$4 sm:$0xff]  }
  0x28   :  { %2599 = vmatpush1.bf16.msra.mxu0 %v4412_v39  ;;  %2529 = vmatprep.subr.bf16.mxu1 %v4413_v40  ;;  %v5232_v39 = vld [vmem:[%s6380_s0 + $0xe8] ss:$56 sps:$4 sm:$0xff]   ;;  %v4494_v40 = vld [vmem:[%s6379_s1 + $0x390] ss:$12 sps:$4 sm:$0xff]  }
  0x29   :  { %2600 = vmatprep.subr.bf16.mxu0 %v4415_v41  ;;  %v5237_v41 = vcombine.low %v57_v29, %v57_v29  ;;  %v4567_v29 = vld [vmem:[%s6379_s1 + $0x110] ss:$12 sps:$4 sm:$0xff]  }
  0x2b   :  { %2530 = vmatpush1.bf16.msra.mxu1 %v4417_v42  ;;  %v4497_v42 = vld [vmem:[%s6379_s1 + $0x990] ss:$12 sps:$4 sm:$0xff]  }
  0x2c   :  { %2601 = vmatpush1.bf16.msra.mxu0 %v4418_v43  ;;  %2531 = vmatprep.subr.bf16.mxu1 %v4419_v44  ;;  %v4502_v43 = vld [vmem:[%s6379_s1 + $0x3ac] ss:$12 sps:$4 sm:$0xff]  }
  0x2d   :  { %2602 = vmatprep.subr.bf16.mxu0 %v4421_v45  ;;  %v4505_v44 = vld [vmem:[%s6379_s1 + $0x9ac] ss:$12 sps:$4 sm:$0xff]   ;;  %v4500_v45 = vld [vmem:[%s6379_s1 + $0x3a8] ss:$12 sps:$4 sm:$0xff]  }
  0x2f   :  { %2532 = vmatpush1.bf16.msra.mxu1 %v4423_v46  ;;  %v4540_v46 = vld [vmem:[%s6380_s0 + $0x34] ss:$56 sps:$4 sm:$0xff]  }
  0x30   :  { %2603 = vmatpush1.bf16.msra.mxu0 %v4424_v47  ;;  %2533 = vmatprep.subr.bf16.mxu1 %v4425_v48  ;;  %v4503_v47 = vld [vmem:[%s6379_s1 + $0x9a8] ss:$12 sps:$4 sm:$0xff]   ;;  %v58_v48 = vld [vmem:[%s6380_s0 + $0x158] sm:$0x11] }
  0x31   :  { %2604 = vmatprep.subr.bf16.mxu0 %v4427_v50  ;;  %v4511_v50 = vld [vmem:[%s6379_s1 + $0x3c4] ss:$12 sps:$4 sm:$0xff]  }
  0x33   :  { %2534 = vmatpush1.bf16.msra.mxu1 %v4429_v52  ;;  %v5268_v52 = vcombine.high %v58_v48, %v58_v48 }
  0x34   :  { %2605 = vmatpush1.bf16.msra.mxu0 %v4430_v53  ;;  %2535 = vmatprep.subr.bf16.mxu1 %v4431_v54  ;;  %v4509_v53 = vld [vmem:[%s6379_s1 + $0x3c0] ss:$12 sps:$4 sm:$0xff]   ;;  %v5274_v54 = vcombine.low %v58_v48, %v58_v48 }
  0x35   :  { %2606 = vmatprep.subr.bf16.mxu0 %v4433_v55  ;;  %v4512_v55 = vld [vmem:[%s6379_s1 + $0x9c0] ss:$12 sps:$4 sm:$0xff]  }
  0x36   :  { %v4584_v48 = vld [vmem:[%s6379_s1 + $0x80] ss:$12 sps:$4 sm:$0xff]  }
  0x37   :  { %2536 = vmatpush1.bf16.msra.mxu1 %v4435_v56  ;;  %v4517_v56 = vld [vmem:[%s6379_s1 + $0x3dc] ss:$12 sps:$4 sm:$0xff]  }
  0x38   :  { %2607 = vmatpush1.bf16.msra.mxu0 %v4436_v57  ;;  %2537 = vmatprep.subr.bf16.mxu1 %v4437_v58  ;;  %v4520_v57 = vld [vmem:[%s6379_s1 + $0x9dc] ss:$12 sps:$4 sm:$0xff]   ;;  %v4515_v58 = vld [vmem:[%s6379_s1 + $0x3d8] ss:$12 sps:$4 sm:$0xff]  }
  0x39   :  { %2608 = vmatprep.subr.bf16.mxu0 %v4439_v59  ;;  %v4518_v59 = vld [vmem:[%s6379_s1 + $0x9d8] ss:$12 sps:$4 sm:$0xff]  }
  0x3b   :  { %2538 = vmatpush1.bf16.msra.mxu1 %v4441_v60  ;;  %v4527_v60 = vld [vmem:[%s6379_s1 + $0x3f4] ss:$12 sps:$4 sm:$0xff]  }
  0x3c   :  { %2609 = vmatpush1.bf16.msra.mxu0 %v4442_v61  ;;  %2539 = vmatprep.subr.bf16.mxu1 %v4443_v62  ;;  %v4530_v61 = vld [vmem:[%s6379_s1 + $0x9f4] ss:$12 sps:$4 sm:$0xff]  }
  0x3d   :  { %2610 = vmatprep.subr.bf16.mxu0 %v4445_v63  ;;  %v5302_v62 = vld [vmem:[%s6380_s0 + $0x14] ss:$56 sps:$4 sm:$0xff]   ;;  %v4525_v63 = vld [vmem:[%s6379_s1 + $0x3f0] ss:$12 sps:$4 sm:$0xff]  }
  0x3f   :  { %2540 = vmatpush1.bf16.msra.mxu1 %v4447_v0  ;;  %v4528_v0 = vld [vmem:[%s6379_s1 + $0x9f0] ss:$12 sps:$4 sm:$0xff]  }
  0x40   :  { %2611 = vmatpush1.bf16.msra.mxu0 %v4448_v1  ;;  %2935 = vmatprep.subr.bf16.mxu1 %v4460_v3  ;;  %v4534_v1 = vld [vmem:[%s6379_s1 + $0x40c] ss:$12 sps:$4 sm:$0xff]   ;;  %v4532_v3 = vld [vmem:[%s6379_s1 + $0x408] ss:$12 sps:$4 sm:$0xff]  }
  0x41   :  { %2651 = vmatprep.subr.bf16.mxu0 %v4457_v2  ;;  %v4537_v2 = vld [vmem:[%s6379_s1 + $0xa0c] ss:$12 sps:$4 sm:$0xff]  }
  0x42   :  { %2542 = vmatmul.mubr.bf16.vlgmr.msra.gmra.mrb[0].mxu1 %v5100_v4 }
  0x43   :  { %2613 = vmatmul.mubr.bf16.vlgmr.msra.gmra.mrb[0].mxu0 %v5105_v5  ;;  %2936 = vmatpush1.bf16.msra.mxu1 %v4458_v7  ;;  %v4545_v7 = vld [vmem:[%s6379_s1 + $0x424] ss:$12 sps:$4 sm:$0xff]  }
  0x44   :  { %2652 = vmatpush1.bf16.msra.mxu0 %v4455_v6  ;;  %2937 = vmatprep.subr.bf16.mxu1 %v4466_v9  ;;  %v4535_v6 = vld [vmem:[%s6379_s1 + $0xa08] ss:$12 sps:$4 sm:$0xff]  }
  0x45   :  { %2653 = vmatprep.subr.bf16.mxu0 %v4463_v8  ;;  %2551 = vmatprep.mubr.bf16.mxu1 %v5122_v10  ;;  %v4546_v8 = vld [vmem:[%s6379_s1 + $0xc8] ss:$12 sps:$4 sm:$0xff]  }
  0x46   :  { %2622 = vmatprep.mubr.bf16.mxu0 %v5171_v23  ;;  %v4538_v9 = vld [vmem:[%s6380_s0 + $0x30] ss:$56 sps:$4 sm:$0xff]  }
  0x47   :  { %2938 = vmatpush1.bf16.msra.mxu1 %v4464_v12  ;;  %v4548_v12 = vld [vmem:[%s6379_s1 + $0x8] ss:$12 sps:$4 sm:$0xff]  }
  0x48   :  { %2654 = vmatpush1.bf16.msra.mxu0 %v4461_v11  ;;  %2939 = vmatprep.subr.bf16.mxu1 %v4472_v14  ;;  %v4543_v11 = vld [vmem:[%s6379_s1 + $0x420] ss:$12 sps:$4 sm:$0xff]  }
  0x49   :  { %2655 = vmatprep.subr.bf16.mxu0 %v4469_v13  ;;  %v4551_v13 = vld [vmem:[%s6379_s1 + $0x43c] ss:$12 sps:$4 sm:$0xff]   ;;  %v4552_v14 = vld [vmem:[%s6379_s1 + $0xe0] ss:$12 sps:$4 sm:$0xff]  }
  0x4a   :  { %2552 = vmatmul.mubr.bf16.gmra.mrb[4].mxu1 %v5148_v17 }
  0x4b   :  { %2940 = vmatpush1.bf16.msra.mxu1 %v4470_v16  ;;  %2561 = vmatprep.mubr.bf16.mxu1 %v5165_v22  ;;  %v4549_v16 = vld [vmem:[%s6379_s1 + $0x438] ss:$12 sps:$4 sm:$0xff]  }
  0x4c   :  { %2656 = vmatpush1.bf16.msra.mxu0 %v4467_v15  ;;  %2941 = vmatprep.subr.bf16.mxu1 %v4478_v19  ;;  %v4554_v15 = vld [vmem:[%s6380_s0 + $0xa4] ss:$56 sps:$4 sm:$0xff]   ;;  %v4559_v19 = vld [vmem:[%s6379_s1 + $0x454] ss:$12 sps:$4 sm:$0xff]  }
  0x4d   :  { %2657 = vmatprep.subr.bf16.mxu0 %v4475_v18  ;;  %2623 = vmatmul.mubr.bf16.gmra.mrb[4].mxu0 %v5192_v28  ;;  %v4553_v18 = vld [vmem:[%s6379_s1 + $0x20] ss:$12 sps:$4 sm:$0xff]  }
  0x4e   :  { %2632 = vmatprep.mubr.bf16.mxu0 %v5219_v36 }
  0x4f   :  { %2942 = vmatpush1.bf16.msra.mxu1 %v4476_v21  ;;  %v4557_v21 = vld [vmem:[%s6379_s1 + $0x450] ss:$12 sps:$4 sm:$0xff]  }
  0x50   :  { %2658 = vmatpush1.bf16.msra.mxu0 %v4473_v20  ;;  %2943 = vmatprep.subr.bf16.mxu1 %v4484_v25  ;;  %v4561_v20 = vld [vmem:[%s6379_s1 + $0xf8] ss:$12 sps:$4 sm:$0xff]  }
  0x51   :  { %2659 = vmatprep.subr.bf16.mxu0 %v4481_v24  ;;  %v4560_v24 = vld [vmem:[%s6380_s0 + $0xa0] ss:$56 sps:$4 sm:$0xff]  }
  0x52   :  { %2562 = vmatmul.mubr.bf16.gmra.mrb[8].mxu1 %v5186_v27  ;;  %v4563_v25 = vld [vmem:[%s6379_s1 + $0x38] ss:$12 sps:$4 sm:$0xff]  }
  0x53   :  { %2944 = vmatpush1.bf16.msra.mxu1 %v4482_v30  ;;  %2571 = vmatprep.mubr.bf16.mxu1 %v5212_v35  ;;  %v4569_v30 = vld [vmem:[%s6380_s0 + $0x114] ss:$56 sps:$4 sm:$0xff]  }
  0x54   :  { %2660 = vmatpush1.bf16.msra.mxu0 %v4479_v26  ;;  %2945 = vmatprep.subr.bf16.mxu1 %v4490_v32  ;;  %v4566_v26 = vld [vmem:[%s6379_s1 + $0x46c] ss:$12 sps:$4 sm:$0xff]   ;;  %v4568_v32 = vld [vmem:[%s6379_s1 + $0x50] ss:$12 sps:$4 sm:$0xff]  }
  0x55   :  { %2661 = vmatprep.subr.bf16.mxu0 %v4487_v31  ;;  %2633 = vmatmul.mubr.bf16.gmra.mrb[8].mxu0 %v5232_v39  ;;  %v4564_v31 = vld [vmem:[%s6379_s1 + $0x468] ss:$12 sps:$4 sm:$0xff]  }
  0x56   :  { %2642 = vmatprep.mubr.bf16.mxu0 %v5268_v52 }
  0x57   :  { %2946 = vmatpush1.bf16.msra.mxu1 %v4488_v34  ;;  %v5390_v34 = vld [vmem:[%s6380_s0 + $0x10] ss:$56 sps:$4 sm:$0xff]  }
  0x58   :  { %2662 = vmatpush1.bf16.msra.mxu0 %v4485_v33  ;;  %2947 = vmatprep.subr.bf16.mxu1 %v4499_v38  ;;  %v4576_v33 = vld [vmem:[%s6379_s1 + $0x484] ss:$12 sps:$4 sm:$0xff]   ;;  %v4574_v38 = vld [vmem:[%s6379_s1 + $0x480] ss:$12 sps:$4 sm:$0xff]  }
  0x59   :  { %2663 = vmatprep.subr.bf16.mxu0 %v4496_v37  ;;  %v4578_v37 = vld [vmem:[%s6379_s1 + $0x128] ss:$12 sps:$4 sm:$0xff]  }
  0x5a   :  { %2572 = vmatmul.mubr.bf16.gmra.mrb[12].mxu1 %v5237_v41 }
  0x5b   :  { %2948 = vmatpush1.bf16.msra.mxu1 %v4497_v42  ;;  %3946 = vmatprep.mubr.msk.bf16.mxu1 %vm2496_vm0, %v4540_v46  ;;  %v4579_v42 = vld [vmem:[%s6379_s1 + $0x68] ss:$12 sps:$4 sm:$0xff]  }
  0x5c   :  { %2664 = vmatpush1.bf16.msra.mxu0 %v4494_v40  ;;  %2949 = vmatprep.subr.bf16.mxu1 %v4505_v44  ;;  %v4577_v40 = vld [vmem:[%s6380_s0 + $0x110] ss:$56 sps:$4 sm:$0xff]  }
  0x5d   :  { %2665 = vmatprep.subr.bf16.mxu0 %v4502_v43  ;;  %2643 = vmatmul.mubr.bf16.gmra.mrb[12].mxu0 %v5274_v54  ;;  %v63_v43 = vld [vmem:[%s6380_s0 + $0x180] sm:$0x11]  ;;  %v4582_v44 = vld [vmem:[%s6379_s1 + $0x49c] ss:$12 sps:$4 sm:$0xff]  }
  0x5e   :  { %2683 = vmatprep.mubr.bf16.mxu0 %v5302_v62  ;;  %v5414_v46 = vcombine.high %v63_v43, %v63_v43 }
  0x5f   :  { %2950 = vmatpush1.bf16.msra.mxu1 %v4503_v47  ;;  %v4580_v47 = vld [vmem:[%s6379_s1 + $0x498] ss:$12 sps:$4 sm:$0xff]  }
  0x60   :  { %2666 = vmatpush1.bf16.msra.mxu0 %v4500_v45  ;;  %2951 = vmatprep.subr.bf16.mxu1 %v4514_v51  ;;  %v4583_v45 = vld [vmem:[%s6379_s1 + $0x140] ss:$12 sps:$4 sm:$0xff]   ;;  %v4590_v51 = vld [vmem:[%s6379_s1 + $0x158] ss:$12 sps:$4 sm:$0xff]  }
  0x61   :  { %2667 = vmatprep.subr.bf16.mxu0 %v4511_v50  ;;  %v4588_v50 = vld [vmem:[%s6379_s1 + $0x4b4] ss:$12 sps:$4 sm:$0xff]  }
  0x63   :  { %2952 = vmatpush1.bf16.msra.mxu1 %v4512_v55  ;;  %v5434_v55 = vcombine.low %v63_v43, %v63_v43  ;;  %v4639_v43 = vld [vmem:[%s6379_s1 + $0x230] ss:$12 sps:$4 sm:$0xff]  }
  0x64   :  { %2668 = vmatpush1.bf16.msra.mxu0 %v4509_v53  ;;  %2953 = vmatprep.subr.bf16.mxu1 %v4520_v57  ;;  %v4586_v53 = vld [vmem:[%s6379_s1 + $0x4b0] ss:$12 sps:$4 sm:$0xff]  }
  0x65   :  { %2669 = vmatprep.subr.bf16.mxu0 %v4517_v56  ;;  %v4591_v56 = vld [vmem:[%s6379_s1 + $0x98] ss:$12 sps:$4 sm:$0xff]  }
  0x66   :  { %v5442_v57 = vld [vmem:[%s6380_s0 + $0x84] ss:$56 sps:$4 sm:$0xff]  }
  0x67   :  { %2954 = vmatpush1.bf16.msra.mxu1 %v4518_v59  ;;  %v4595_v59 = vld [vmem:[%s6379_s1 + $0x170] ss:$12 sps:$4 sm:$0xff]  }
  0x68   :  { %2670 = vmatpush1.bf16.msra.mxu0 %v4515_v58  ;;  %2955 = vmatprep.subr.bf16.mxu1 %v4530_v61  ;;  %v4594_v58 = vld [vmem:[%s6379_s1 + $0x4cc] ss:$12 sps:$4 sm:$0xff]  }
  0x69   :  { %2671 = vmatprep.subr.bf16.mxu0 %v4527_v60  ;;  %v4592_v60 = vld [vmem:[%s6379_s1 + $0x4c8] ss:$12 sps:$4 sm:$0xff]   ;;  %v5458_v61 = vld [vmem:[%s6380_s0 + $0x80] ss:$56 sps:$4 sm:$0xff]  }
  0x6b   :  { %2956 = vmatpush1.bf16.msra.mxu1 %v4528_v0  ;;  %v4599_v0 = vld [vmem:[%s6379_s1 + $0x4e4] ss:$12 sps:$4 sm:$0xff]  }
  0x6c   :  { %2672 = vmatpush1.bf16.msra.mxu0 %v4525_v63  ;;  %2957 = vmatprep.subr.bf16.mxu1 %v4537_v2  ;;  %v4596_v63 = vld [vmem:[%s6379_s1 + $0xb0] ss:$12 sps:$4 sm:$0xff]   ;;  %v4597_v2 = vld [vmem:[%s6379_s1 + $0x4e0] ss:$12 sps:$4 sm:$0xff]  }
  0x6d   :  { %2673 = vmatprep.subr.bf16.mxu0 %v4534_v1  ;;  %v4600_v1 = vld [vmem:[%s6379_s1 + $0x248] ss:$12 sps:$4 sm:$0xff]  }
  0x6f   :  { %2958 = vmatpush1.bf16.msra.mxu1 %v4535_v6  ;;  %v5480_v6 = vld [vmem:[%s6380_s0 + $0xf4] ss:$56 sps:$4 sm:$0xff]  }
  0x70   :  { %2674 = vmatpush1.bf16.msra.mxu0 %v4532_v3  ;;  %3982 = vmatprep.subr.bf16.mxu1 %v4546_v8  ;;  %v4601_v3 = vld [vmem:[%s6379_s1 + $0x188] ss:$12 sps:$4 sm:$0xff]   ;;  %v4602_v8 = vld [vmem:[%s6379_s1 + $0x4f8] ss:$12 sps:$4 sm:$0xff]  }
  0x71   :  { %2675 = vmatprep.subr.bf16.mxu0 %v4545_v7  ;;  %v4605_v7 = vld [vmem:[%s6379_s1 + $0x260] ss:$12 sps:$4 sm:$0xff]  }
  0x72   :  { %2968 = vmatmul.mubr.bf16.vlgmr.msra.gmra.mrb[16].mxu1 %v4538_v9  ;;  %v5496_v9 = vld [vmem:[%s6380_s0 + $0xf0] ss:$56 sps:$4 sm:$0xff]  }
  0x73   :  { %3983 = vmatpush3.bf16.msra.mxu1 %v4548_v12  ;;  %3947 = vmatprep.mubr.msk.bf16.mxu1 %vm2496_vm0, %v4554_v15  ;;  %v4609_v12 = vld [vmem:[%s6379_s1 + $0x514] ss:$12 sps:$4 sm:$0xff]  }
  0x74   :  { %2676 = vmatpush1.bf16.msra.mxu0 %v4543_v11  ;;  %3984 = vmatprep.subr.bf16.mxu1 %v4552_v14  ;;  %v4606_v11 = vld [vmem:[%s6379_s1 + $0x1a0] ss:$12 sps:$4 sm:$0xff]   ;;  %v4611_v14 = vld [vmem:[%s6379_s1 + $0x1b8] ss:$12 sps:$4 sm:$0xff]  }
  0x75   :  { %2677 = vmatprep.subr.bf16.mxu0 %v4551_v13  ;;  %v4607_v13 = vld [vmem:[%s6379_s1 + $0x510] ss:$12 sps:$4 sm:$0xff]   ;;  %v59_v15 = vld [vmem:[%s6380_s0 + $0x160] sm:$0x11] }
  0x77   :  { %3985 = vmatpush3.bf16.msra.mxu1 %v4553_v18  ;;  %v4615_v18 = vld [vmem:[%s6379_s1 + $0x290] ss:$12 sps:$4 sm:$0xff]  }
  0x78   :  { %2678 = vmatpush1.bf16.msra.mxu0 %v4549_v16  ;;  %3986 = vmatprep.subr.bf16.mxu1 %v4561_v20  ;;  %v5521_v16 = vcombine.high %v59_v15, %v59_v15  ;;  %v4612_v20 = vld [vmem:[%s6379_s1 + $0x528] ss:$12 sps:$4 sm:$0xff]  }
  0x79   :  { %2679 = vmatprep.subr.bf16.mxu0 %v4559_v19  ;;  %v5527_v19 = vcombine.low %v59_v15, %v59_v15  ;;  %v4682_v15 = vld [vmem:[%s6379_s1 + $0x398] ss:$12 sps:$4 sm:$0xff]  }
  0x7a   :  { %2978 = vmatmul.mubr.bf16.gmra.mrb[20].mxu1 %v4560_v24  ;;  %v4619_v24 = vld [vmem:[%s6379_s1 + $0x544] ss:$12 sps:$4 sm:$0xff]  }
  0x7b   :  { %3987 = vmatpush3.bf16.msra.mxu1 %v4563_v25  ;;  %3948 = vmatprep.mubr.msk.bf16.mxu1 %vm2496_vm0, %v4569_v30  ;;  %v4617_v25 = vld [vmem:[%s6379_s1 + $0x540] ss:$12 sps:$4 sm:$0xff]  }
  0x7c   :  { %2680 = vmatpush1.bf16.msra.mxu0 %v4557_v21  ;;  %3988 = vmatprep.subr.bf16.mxu1 %v4567_v29  ;;  %v4616_v21 = vld [vmem:[%s6379_s1 + $0x1d0] ss:$12 sps:$4 sm:$0xff]   ;;  %v4625_v30 = vld [vmem:[%s6379_s1 + $0x2c0] ss:$12 sps:$4 sm:$0xff]  }
  0x7d   :  { %2681 = vmatprep.subr.bf16.mxu0 %v4566_v26  ;;  %v4621_v26 = vld [vmem:[%s6379_s1 + $0x1e8] ss:$12 sps:$4 sm:$0xff]  }
  0x7e   :  { %v5553_v29 = vld [vmem:[%s6380_s0 + $0x1c] ss:$56 sps:$4 sm:$0xff]  }
  0x7f   :  { %3989 = vmatpush3.bf16.msra.mxu1 %v4568_v32  ;;  %v4626_v32 = vld [vmem:[%s6379_s1 + $0x200] ss:$12 sps:$4 sm:$0xff]  }
  0x80   :  { %2682 = vmatpush1.bf16.msra.mxu0 %v4564_v31  ;;  %3990 = vmatprep.subr.bf16.mxu1 %v4578_v37  ;;  %v4622_v31 = vld [vmem:[%s6379_s1 + $0x558] ss:$12 sps:$4 sm:$0xff]   ;;  %v4629_v37 = vld [vmem:[%s6379_s1 + $0x570] ss:$12 sps:$4 sm:$0xff]  }
  0x81   :  { %2722 = vmatprep.subr.bf16.mxu0 %v4576_v33  ;;  %v4631_v33 = vld [vmem:[%s6379_s1 + $0x574] ss:$12 sps:$4 sm:$0xff]  }
  0x82   :  { %2988 = vmatmul.mubr.bf16.gmra.mrb[24].mxu1 %v4577_v40  ;;  %v4637_v40 = vld [vmem:[%s6379_s1 + $0x58c] ss:$12 sps:$4 sm:$0xff]  }
  0x83   :  { %2684 = vmatmul.mubr.bf16.vlgmr.msra.gmra.mrb[0].mxu0 %v5390_v34  ;;  %3991 = vmatpush3.bf16.msra.mxu1 %v4579_v42  ;;  %v4635_v42 = vld [vmem:[%s6379_s1 + $0x588] ss:$12 sps:$4 sm:$0xff]  }
  0x84   :  { %2723 = vmatpush1.bf16.msra.mxu0 %v4574_v38  ;;  %3992 = vmatprep.subr.bf16.mxu1 %v4583_v45  ;;  %v4634_v38 = vld [vmem:[%s6379_s1 + $0x218] ss:$12 sps:$4 sm:$0xff]   ;;  %v4645_v45 = vld [vmem:[%s6379_s1 + $0x3c8] ss:$12 sps:$4 sm:$0xff]  }
  0x85   :  { %2724 = vmatprep.subr.bf16.mxu0 %v4582_v44  ;;  %3949 = vmatprep.mubr.msk.bf16.mxu1 %vm2496_vm0, %v5414_v46  ;;  %v4644_v44 = vld [vmem:[%s6379_s1 + $0x5a4] ss:$12 sps:$4 sm:$0xff]  }
  0x86   :  { %2693 = vmatprep.mubr.bf16.mxu0 %v5442_v57 }
  0x87   :  { %3993 = vmatpush3.bf16.msra.mxu1 %v4584_v48  ;;  %v4647_v48 = vld [vmem:[%s6379_s1 + $0x308] ss:$12 sps:$4 sm:$0xff]  }
  0x88   :  { %2725 = vmatpush1.bf16.msra.mxu0 %v4580_v47  ;;  %3994 = vmatprep.subr.bf16.mxu1 %v4590_v51  ;;  %v4642_v47 = vld [vmem:[%s6379_s1 + $0x5a0] ss:$12 sps:$4 sm:$0xff]  }
  0x89   :  { %2726 = vmatprep.subr.bf16.mxu0 %v4588_v50  ;;  %v4650_v50 = vld [vmem:[%s6379_s1 + $0x5bc] ss:$12 sps:$4 sm:$0xff]   ;;  %v4651_v51 = vld [vmem:[%s6379_s1 + $0x3e0] ss:$12 sps:$4 sm:$0xff]  }
  0x8a   :  { %2998 = vmatmul.mubr.bf16.gmra.mrb[28].mxu1 %v5434_v55 }
  0x8b   :  { %3995 = vmatpush3.bf16.msra.mxu1 %v4591_v56  ;;  %3038 = vmatprep.mubr.bf16.mxu1 %v5040_v49  ;;  %v4604_v49 = vld [vmem:[%s6379_s1 + $0x4fc] ss:$12 sps:$4 sm:$0xff]   ;;  %v4652_v56 = vld [vmem:[%s6379_s1 + $0x320] ss:$12 sps:$4 sm:$0xff]  }
  0x8c   :  { %2727 = vmatpush1.bf16.msra.mxu0 %v4586_v53  ;;  %3996 = vmatprep.subr.bf16.mxu1 %v4595_v59  ;;  %v4648_v53 = vld [vmem:[%s6379_s1 + $0x5b8] ss:$12 sps:$4 sm:$0xff]  }
  0x8d   :  { %2728 = vmatprep.subr.bf16.mxu0 %v4594_v58  ;;  %2694 = vmatmul.mubr.bf16.gmra.mrb[4].mxu0 %v5458_v61  ;;  %v4656_v58 = vld [vmem:[%s6379_s1 + $0x5d4] ss:$12 sps:$4 sm:$0xff]   ;;  %v4657_v59 = vld [vmem:[%s6379_s1 + $0x3f8] ss:$12 sps:$4 sm:$0xff]  }
  0x8e   :  { %2703 = vmatprep.mubr.bf16.mxu0 %v5480_v6 }
  0x8f   :  { %3997 = vmatpush3.bf16.msra.mxu1 %v4596_v63  ;;  %v4662_v63 = vld [vmem:[%s6379_s1 + $0x5ec] ss:$12 sps:$4 sm:$0xff]  }
  0x90   :  { %2729 = vmatpush1.bf16.msra.mxu0 %v4592_v60  ;;  %4022 = vmatprep.subr.bf16.mxu1 %v4600_v1  ;;  %v4659_v60 = vld [vmem:[%s6379_s1 + $0x338] ss:$12 sps:$4 sm:$0xff]   ;;  %v4664_v1 = vld [vmem:[%s6379_s1 + $0x350] ss:$12 sps:$4 sm:$0xff]  }
  0x91   :  { %2730 = vmatprep.subr.bf16.mxu0 %v4599_v0  ;;  %v4660_v0 = vld [vmem:[%s6379_s1 + $0x5e8] ss:$12 sps:$4 sm:$0xff]  }
  0x92   :  { %3039 = vmatmul.mubr.bf16.vlgmr.msra.gmra.mrb[32].mxu1 %v5100_v4  ;;  %v4610_v4 = vld [vmem:[%s6379_s1 + $0x278] ss:$12 sps:$4 sm:$0xff]  }
  0x93   :  { %4023 = vmatpush3.bf16.msra.mxu1 %v4601_v3  ;;  %3046 = vmatprep.mubr.bf16.mxu1 %v5122_v10  ;;  %v4614_v10 = vld [vmem:[%s6379_s1 + $0x52c] ss:$12 sps:$4 sm:$0xff]   ;;  %v4671_v3 = vld [vmem:[%s6379_s1 + $0x428] ss:$12 sps:$4 sm:$0xff]  }
  0x94   :  { %2731 = vmatpush1.bf16.msra.mxu0 %v4597_v2  ;;  %4024 = vmatprep.subr.bf16.mxu1 %v4605_v7  ;;  %v4670_v2 = vld [vmem:[%s6379_s1 + $0x604] ss:$12 sps:$4 sm:$0xff]   ;;  %v4672_v7 = vld [vmem:[%s6379_s1 + $0x368] ss:$12 sps:$4 sm:$0xff]  }
  0x95   :  { %2732 = vmatprep.subr.bf16.mxu0 %v4604_v49  ;;  %2704 = vmatmul.mubr.bf16.gmra.mrb[8].mxu0 %v5496_v9  ;;  %v4668_v49 = vld [vmem:[%s6379_s1 + $0x600] ss:$12 sps:$4 sm:$0xff]  }
  0x96   :  { %2713 = vmatprep.mubr.bf16.mxu0 %v5521_v16 }
  0x97   :  { %4025 = vmatpush3.bf16.msra.mxu1 %v4606_v11  ;;  %v5676_v11 = vld [vmem:[%s6380_s0 + $0x8c] ss:$56 sps:$4 sm:$0xff]  }
  0x98   :  { %2733 = vmatpush1.bf16.msra.mxu0 %v4602_v8  ;;  %4026 = vmatprep.subr.bf16.mxu1 %v4610_v4  ;;  %v4675_v8 = vld [vmem:[%s6379_s1 + $0x61c] ss:$12 sps:$4 sm:$0xff]   ;;  %v4677_v4 = vld [vmem:[%s6379_s1 + $0x380] ss:$12 sps:$4 sm:$0xff]  }
  0x99   :  { %2734 = vmatprep.subr.bf16.mxu0 %v4609_v12  ;;  %v4673_v12 = vld [vmem:[%s6379_s1 + $0x618] ss:$12 sps:$4 sm:$0xff]  }
  0x9a   :  { %3047 = vmatmul.mubr.bf16.gmra.mrb[36].mxu1 %v5148_v17  ;;  %v4620_v17 = vld [vmem:[%s6379_s1 + $0x2a8] ss:$12 sps:$4 sm:$0xff]  }
  0x9b   :  { %4027 = vmatpush3.bf16.msra.mxu1 %v4611_v14  ;;  %3054 = vmatprep.mubr.bf16.mxu1 %v5165_v22  ;;  %v4624_v22 = vld [vmem:[%s6379_s1 + $0x55c] ss:$12 sps:$4 sm:$0xff]  }
  0x9c   :  { %2735 = vmatpush1.bf16.msra.mxu0 %v4607_v13  ;;  %4028 = vmatprep.subr.bf16.mxu1 %v4615_v18  ;;  %v4680_v13 = vld [vmem:[%s6379_s1 + $0x634] ss:$12 sps:$4 sm:$0xff]   ;;  %v4678_v14 = vld [vmem:[%s6379_s1 + $0x630] ss:$12 sps:$4 sm:$0xff]  }
  0x9d   :  { %2736 = vmatprep.subr.bf16.mxu0 %v4614_v10  ;;  %2714 = vmatmul.mubr.bf16.gmra.mrb[12].mxu0 %v5527_v19  ;;  %v5703_v10 = vld [vmem:[%s6380_s0 + $0x88] ss:$56 sps:$4 sm:$0xff]   ;;  %v4686_v18 = vld [vmem:[%s6379_s1 + $0x470] ss:$12 sps:$4 sm:$0xff]  }
  0x9e   :  { %2754 = vmatprep.mubr.bf16.mxu0 %v5553_v29 }
  0x9f   :  { %4029 = vmatpush3.bf16.msra.mxu1 %v4616_v21  ;;  %v4683_v21 = vld [vmem:[%s6379_s1 + $0x648] ss:$12 sps:$4 sm:$0xff]  }
  0xa0   :  { %2737 = vmatpush1.bf16.msra.mxu0 %v4612_v20  ;;  %4030 = vmatprep.subr.bf16.mxu1 %v4620_v17  ;;  %v5714_v20 = vld [vmem:[%s6380_s0 + $0xfc] ss:$56 sps:$4 sm:$0xff]   ;;  %v4690_v17 = vld [vmem:[%s6379_s1 + $0x664] ss:$12 sps:$4 sm:$0xff]  }
  0xa1   :  { %2738 = vmatprep.subr.bf16.mxu0 %v4619_v24  ;;  %v4687_v24 = vld [vmem:[%s6379_s1 + $0x3b0] ss:$12 sps:$4 sm:$0xff]  }
  0xa2   :  { %3055 = vmatmul.mubr.bf16.gmra.mrb[40].mxu1 %v5186_v27  ;;  %v4632_v27 = vld [vmem:[%s6379_s1 + $0x2d8] ss:$12 sps:$4 sm:$0xff]  }
  0xa3   :  { %4031 = vmatpush3.bf16.msra.mxu1 %v4621_v26  ;;  %3062 = vmatprep.mubr.bf16.mxu1 %v5212_v35  ;;  %v4638_v35 = vld [vmem:[%s6379_s1 + $0x2f0] ss:$12 sps:$4 sm:$0xff]   ;;  %v4692_v26 = vld [vmem:[%s6379_s1 + $0x488] ss:$12 sps:$4 sm:$0xff]  }
  0xa4   :  { %2739 = vmatpush1.bf16.msra.mxu0 %v4617_v25  ;;  %4032 = vmatprep.subr.bf16.mxu1 %v4625_v30  ;;  %v4688_v25 = vld [vmem:[%s6379_s1 + $0x660] ss:$12 sps:$4 sm:$0xff]  }
  0xa5   :  { %2740 = vmatprep.subr.bf16.mxu0 %v4624_v22  ;;  %v5741_v22 = vld [vmem:[%s6380_s0 + $0xf8] ss:$56 sps:$4 sm:$0xff]   ;;  %v4696_v30 = vld [vmem:[%s6379_s1 + $0x560] ss:$12 sps:$4 sm:$0xff]  }
  0xa7   :  { %4033 = vmatpush3.bf16.msra.mxu1 %v4626_v32  ;;  %v4693_v32 = vld [vmem:[%s6379_s1 + $0x678] ss:$12 sps:$4 sm:$0xff]  }
  0xa8   :  { %2741 = vmatpush1.bf16.msra.mxu0 %v4622_v31  ;;  %4034 = vmatprep.subr.bf16.mxu1 %v4632_v27  ;;  %v60_v31 = vld [vmem:[%s6380_s0 + $0x168] sm:$0x11] }
  0xa9   :  { %2742 = vmatprep.subr.bf16.mxu0 %v4631_v33  ;;  %v5755_v33 = vcombine.high %v60_v31, %v60_v31  ;;  %v4697_v27 = vld [vmem:[%s6379_s1 + $0x4a0] ss:$12 sps:$4 sm:$0xff]  }
  0xaa   :  { %3063 = vmatmul.mubr.bf16.gmra.mrb[44].mxu1 %v5237_v41  ;;  %v4862_v41 = vld [vmem:[%s6380_s0 + $0xc] ss:$56 sps:$4 sm:$0xff]  }
  0xab   :  { %4035 = vmatpush3.bf16.msra.mxu1 %v4634_v38  ;;  %3102 = vmatprep.mubr.bf16.mxu1 %v4862_v41  ;;  %v4701_v38 = vld [vmem:[%s6379_s1 + $0x578] ss:$12 sps:$4 sm:$0xff]  }
  0xac   :  { %2743 = vmatpush1.bf16.msra.mxu0 %v4629_v37  ;;  %4036 = vmatprep.subr.bf16.mxu1 %v4638_v35  ;;  %v4700_v37 = vld [vmem:[%s6379_s1 + $0x694] ss:$12 sps:$4 sm:$0xff]   ;;  %v4702_v35 = vld [vmem:[%s6379_s1 + $0x4b8] ss:$12 sps:$4 sm:$0xff]  }
  0xad   :  { %2744 = vmatprep.subr.bf16.mxu0 %v4637_v40  ;;  %v5773_v40 = vcombine.low %v60_v31, %v60_v31  ;;  %v4710_v41 = vld [vmem:[%s6379_s1 + $0x6c4] ss:$12 sps:$4 sm:$0xff]  }
  0xae   :  { %v4794_v31 = vld [vmem:[%s6380_s0 + $0x90] ss:$56 sps:$4 sm:$0xff]  }
  0xaf   :  { %4037 = vmatpush3.bf16.msra.mxu1 %v4639_v43  ;;  %v4703_v43 = vld [vmem:[%s6379_s1 + $0x6a8] ss:$12 sps:$4 sm:$0xff]  }
  0xb0   :  { %2745 = vmatpush1.bf16.msra.mxu0 %v4635_v42  ;;  %4062 = vmatprep.subr.bf16.mxu1 %v4645_v45  ;;  %v4706_v42 = vld [vmem:[%s6379_s1 + $0x590] ss:$12 sps:$4 sm:$0xff]  }
  0xb1   :  { %2746 = vmatprep.subr.bf16.mxu0 %v4644_v44  ;;  %v5790_v44 = vld [vmem:[%s6380_s0 + $0x24] ss:$56 sps:$4 sm:$0xff]  }
  0xb2   :  { %3103 = vmatmul.mubr.bf16.vlgmr.msra.gmra.mrb[48].mxu1 %v5105_v5  ;;  %v4654_v5 = vld [vmem:[%s6379_s1 + $0x5d0] ss:$12 sps:$4 sm:$0xff]  }
  0xb3   :  { %4063 = vmatpush3.bf16.msra.mxu1 %v4647_v48  ;;  %3110 = vmatprep.mubr.bf16.mxu1 %v5171_v23  ;;  %v4663_v23 = vld [vmem:[%s6379_s1 + $0x410] ss:$12 sps:$4 sm:$0xff]   ;;  %v4712_v48 = vld [vmem:[%s6379_s1 + $0x4e8] ss:$12 sps:$4 sm:$0xff]  }
  0xb4   :  { %2747 = vmatpush1.bf16.msra.mxu0 %v4642_v47  ;;  %4064 = vmatprep.subr.bf16.mxu1 %v4651_v51  ;;  %v4707_v45 = vld [vmem:[%s6379_s1 + $0x4d0] ss:$12 sps:$4 sm:$0xff]   ;;  %v4711_v47 = vld [vmem:[%s6379_s1 + $0x5a8] ss:$12 sps:$4 sm:$0xff]   ;;  %v4713_v51 = vld [vmem:[%s6379_s1 + $0x6d8] ss:$12 sps:$4 sm:$0xff]  }
  0xb5   :  { %2748 = vmatprep.subr.bf16.mxu0 %v4650_v50  ;;  %v4715_v50 = vld [vmem:[%s6379_s1 + $0x6dc] ss:$12 sps:$4 sm:$0xff]  }
  0xb7   :  { %4065 = vmatpush3.bf16.msra.mxu1 %v4652_v56  ;;  %v4722_v56 = vld [vmem:[%s6379_s1 + $0x6f4] ss:$12 sps:$4 sm:$0xff]  }
  0xb8   :  { %2749 = vmatpush1.bf16.msra.mxu0 %v4648_v53  ;;  %4066 = vmatprep.subr.bf16.mxu1 %v4657_v59  ;;  %v4717_v53 = vld [vmem:[%s6379_s1 + $0x500] ss:$12 sps:$4 sm:$0xff]   ;;  %v4725_v59 = vld [vmem:[%s6379_s1 + $0x518] ss:$12 sps:$4 sm:$0xff]  }
  0xb9   :  { %2750 = vmatprep.subr.bf16.mxu0 %v4656_v58  ;;  %v4720_v58 = vld [vmem:[%s6379_s1 + $0x6f0] ss:$12 sps:$4 sm:$0xff]  }
  0xba   :  { %3111 = vmatmul.mubr.bf16.gmra.mrb[52].mxu1 %v5192_v28  ;;  %v5655_v28 = vld [vmem:[%s6380_s0 + $0x18] ss:$56 sps:$4 sm:$0xff]  }
  0xbb   :  { %4067 = vmatpush3.bf16.msra.mxu1 %v4659_v60  ;;  %3118 = vmatprep.mubr.bf16.mxu1 %v5219_v36  ;;  %v4676_v36 = vld [vmem:[%s6379_s1 + $0x440] ss:$12 sps:$4 sm:$0xff]   ;;  %v4726_v60 = vld [vmem:[%s6379_s1 + $0x708] ss:$12 sps:$4 sm:$0xff]  }
  0xbc   :  { %2751 = vmatpush1.bf16.msra.mxu0 %v4654_v5  ;;  %4068 = vmatprep.subr.bf16.mxu1 %v4663_v23  ;;  %v4728_v5 = vld [vmem:[%s6379_s1 + $0x70c] ss:$12 sps:$4 sm:$0xff]   ;;  %v4735_v23 = vld [vmem:[%s6379_s1 + $0x724] ss:$12 sps:$4 sm:$0xff]  }
  0xbd   :  { %2752 = vmatprep.subr.bf16.mxu0 %v4662_v63  ;;  %v4730_v63 = vld [vmem:[%s6379_s1 + $0x530] ss:$12 sps:$4 sm:$0xff]  }
  0xbf   :  { %4069 = vmatpush3.bf16.msra.mxu1 %v4664_v1  ;;  %v4738_v1 = vld [vmem:[%s6379_s1 + $0x608] ss:$12 sps:$4 sm:$0xff]  }
  0xc0   :  { %2753 = vmatpush1.bf16.msra.mxu0 %v4660_v0  ;;  %4070 = vmatprep.subr.bf16.mxu1 %v4671_v3  ;;  %v4733_v0 = vld [vmem:[%s6379_s1 + $0x720] ss:$12 sps:$4 sm:$0xff]   ;;  %v4739_v3 = vld [vmem:[%s6379_s1 + $0x738] ss:$12 sps:$4 sm:$0xff]  }
  0xc1   :  { %2793 = vmatprep.subr.bf16.mxu0 %v4670_v2  ;;  %v4741_v2 = vld [vmem:[%s6379_s1 + $0x73c] ss:$12 sps:$4 sm:$0xff]  }
  0xc2   :  { %3119 = vmatmul.mubr.bf16.gmra.mrb[56].mxu1 %v5232_v39  ;;  %v4681_v39 = vld [vmem:[%s6379_s1 + $0x458] ss:$12 sps:$4 sm:$0xff]  }
  0xc3   :  { %2755 = vmatmul.mubr.bf16.vlgmr.msra.gmra.mrb[0].mxu0 %v5655_v28  ;;  %4071 = vmatpush3.bf16.msra.mxu1 %v4672_v7  ;;  %v4747_v7 = vld [vmem:[%s6379_s1 + $0x754] ss:$12 sps:$4 sm:$0xff]  }
  0xc4   :  { %2794 = vmatpush1.bf16.msra.mxu0 %v4668_v49  ;;  %4072 = vmatprep.subr.bf16.mxu1 %v4676_v36  ;;  %v4743_v49 = vld [vmem:[%s6379_s1 + $0x620] ss:$12 sps:$4 sm:$0xff]   ;;  %v4750_v36 = vld [vmem:[%s6379_s1 + $0x638] ss:$12 sps:$4 sm:$0xff]  }
  0xc5   :  { %2795 = vmatprep.subr.bf16.mxu0 %v4675_v8  ;;  %3126 = vmatprep.mubr.bf16.mxu1 %v5268_v52  ;;  %v4685_v52 = vld [vmem:[%s6379_s1 + $0x64c] ss:$12 sps:$4 sm:$0xff]   ;;  %v4745_v8 = vld [vmem:[%s6379_s1 + $0x750] ss:$12 sps:$4 sm:$0xff]  }
  0xc6   :  { %2764 = vmatprep.mubr.bf16.mxu0 %v5676_v11 }
  0xc7   :  { %4073 = vmatpush3.bf16.msra.mxu1 %v4677_v4  ;;  %v4751_v4 = vld [vmem:[%s6379_s1 + $0x768] ss:$12 sps:$4 sm:$0xff]  }
  0xc8   :  { %2796 = vmatpush1.bf16.msra.mxu0 %v4673_v12  ;;  %4074 = vmatprep.subr.bf16.mxu1 %v4681_v39  ;;  %v4753_v12 = vld [vmem:[%s6379_s1 + $0x76c] ss:$12 sps:$4 sm:$0xff]   ;;  %v4761_v39 = vld [vmem:[%s6379_s1 + $0x784] ss:$12 sps:$4 sm:$0xff]  }
  0xc9   :  { %2797 = vmatprep.subr.bf16.mxu0 %v4680_v13  ;;  %v4755_v13 = vld [vmem:[%s6379_s1 + $0x650] ss:$12 sps:$4 sm:$0xff]  }
  0xca   :  { %3127 = vmatmul.mubr.bf16.gmra.mrb[60].mxu1 %v5274_v54  ;;  %v4691_v54 = vld [vmem:[%s6379_s1 + $0x548] ss:$12 sps:$4 sm:$0xff]  }
  0xcb   :  { %2765 = vmatmul.mubr.bf16.gmra.mrb[4].mxu0 %v5703_v10  ;;  %4075 = vmatpush3.bf16.msra.mxu1 %v4682_v15  ;;  %v4756_v15 = vld [vmem:[%s6380_s0 + $0x20] ss:$56 sps:$4 sm:$0xff]  }
  0xcc   :  { %2798 = vmatpush1.bf16.msra.mxu0 %v4678_v14  ;;  %4076 = vmatprep.subr.bf16.mxu1 %v4686_v18  ;;  %v4762_v14 = vld [vmem:[%s6379_s1 + $0x728] ss:$12 sps:$4 sm:$0xff]  }
  0xcd   :  { %2799 = vmatprep.subr.bf16.mxu0 %v4685_v52  ;;  %3166 = vmatprep.mubr.bf16.mxu1 %v5302_v62  ;;  %v4695_v62 = vld [vmem:[%s6379_s1 + $0x67c] ss:$12 sps:$4 sm:$0xff]  }
  0xce   :  { %2774 = vmatprep.mubr.bf16.mxu0 %v5714_v20  ;;  %v4763_v52 = vld [vmem:[%s6379_s1 + $0x668] ss:$12 sps:$4 sm:$0xff]  }
  0xcf   :  { %4077 = vmatpush3.bf16.msra.mxu1 %v4687_v24  ;;  %v4766_v18 = vld [vmem:[%s6379_s1 + $0x79c] ss:$12 sps:$4 sm:$0xff]   ;;  %v4768_v24 = vld [vmem:[%s6379_s1 + $0x680] ss:$12 sps:$4 sm:$0xff]  }
  0xd0   :  { %2800 = vmatpush1.bf16.msra.mxu0 %v4683_v21  ;;  %4102 = vmatprep.subr.bf16.mxu1 %v4691_v54  ;;  %v4764_v21 = vld [vmem:[%s6379_s1 + $0x798] ss:$12 sps:$4 sm:$0xff]   ;;  %v4789_v54 = vld [vmem:[%s6380_s0 + $0x94] ss:$56 sps:$4 sm:$0xff]  }
  0xd1   :  { %2801 = vmatprep.subr.bf16.mxu0 %v4690_v17  ;;  %v4771_v17 = vld [vmem:[%s6379_s1 + $0x7b4] ss:$12 sps:$4 sm:$0xff]  }
  0xd2   :  { %3167 = vmatmul.mubr.bf16.vlgmr.msra.gmra.mrb[64].mxu1 %v5390_v34  ;;  %v4698_v34 = vld [vmem:[%s6379_s1 + $0x690] ss:$12 sps:$4 sm:$0xff]  }
  0xd3   :  { %2775 = vmatmul.mubr.bf16.gmra.mrb[8].mxu0 %v5741_v22  ;;  %4103 = vmatpush3.bf16.msra.mxu1 %v4692_v26  ;;  %v4769_v26 = vld [vmem:[%s6379_s1 + $0x7b0] ss:$12 sps:$4 sm:$0xff]  }
  0xd4   :  { %2802 = vmatpush1.bf16.msra.mxu0 %v4688_v25  ;;  %4104 = vmatprep.subr.bf16.mxu1 %v4696_v30  ;;  %v4772_v25 = vld [vmem:[%s6379_s1 + $0x758] ss:$12 sps:$4 sm:$0xff]   ;;  %v4777_v30 = vld [vmem:[%s6379_s1 + $0x770] ss:$12 sps:$4 sm:$0xff]  }
  0xd5   :  { %2803 = vmatprep.subr.bf16.mxu0 %v4695_v62  ;;  %3174 = vmatprep.mubr.bf16.mxu1 %v5442_v57  ;;  %v4705_v57 = vld [vmem:[%s6379_s1 + $0x6ac] ss:$12 sps:$4 sm:$0xff]  }
  0xd6   :  { %2784 = vmatprep.mubr.bf16.mxu0 %v5755_v33  ;;  %v4776_v62 = vld [vmem:[%s6379_s1 + $0x7cc] ss:$12 sps:$4 sm:$0xff]  }
  0xd7   :  { %4105 = vmatpush3.bf16.msra.mxu1 %v4697_v27  ;;  %v4802_v27 = vld [vmem:[%s6380_s0 + $0x104] ss:$56 sps:$4 sm:$0xff]  }
  0xd8   :  { %2804 = vmatpush1.bf16.msra.mxu0 %v4693_v32  ;;  %4106 = vmatprep.subr.bf16.mxu1 %v4701_v38  ;;  %v4774_v32 = vld [vmem:[%s6379_s1 + $0x7c8] ss:$12 sps:$4 sm:$0xff]  }
  0xd9   :  { %2805 = vmatprep.subr.bf16.mxu0 %v4700_v37  ;;  %v4781_v37 = vld [vmem:[%s6379_s1 + $0x7e4] ss:$12 sps:$4 sm:$0xff]   ;;  %v4782_v38 = vld [vmem:[%s6379_s1 + $0x848] ss:$12 sps:$4 sm:$0xff]  }
  0xda   :  { %3175 = vmatmul.mubr.bf16.gmra.mrb[68].mxu1 %v5458_v61  ;;  %v4708_v61 = vld [vmem:[%s6379_s1 + $0x6c0] ss:$12 sps:$4 sm:$0xff]  }
  0xdb   :  { %2785 = vmatmul.mubr.bf16.gmra.mrb[12].mxu0 %v5773_v40  ;;  %4107 = vmatpush3.bf16.msra.mxu1 %v4702_v35  ;;  %v4786_v35 = vld [vmem:[%s6379_s1 + $0x7fc] ss:$12 sps:$4 sm:$0xff]  }
  0xdc   :  { %2806 = vmatpush1.bf16.msra.mxu0 %v4698_v34  ;;  %4108 = vmatprep.subr.bf16.mxu1 %v4706_v42  ;;  %v4779_v34 = vld [vmem:[%s6379_s1 + $0x7e0] ss:$12 sps:$4 sm:$0xff]  }
  0xdd   :  { %2807 = vmatprep.subr.bf16.mxu0 %v4705_v57  ;;  %3182 = vmatprep.mubr.bf16.mxu1 %v5480_v6  ;;  %v4716_v6 = vld [vmem:[%s6379_s1 + $0x5c0] ss:$12 sps:$4 sm:$0xff]  }
  0xde   :  { %2825 = vmatprep.mubr.bf16.mxu0 %v5790_v44  ;;  %v4787_v57 = vld [vmem:[%s6379_s1 + $0x860] ss:$12 sps:$4 sm:$0xff]  }
  0xdf   :  { %4109 = vmatpush3.bf16.msra.mxu1 %v4707_v45  ;;  %v4807_v42 = vld [vmem:[%s6380_s0 + $0x100] ss:$56 sps:$4 sm:$0xff]  }
  0xe0   :  { %2808 = vmatpush1.bf16.msra.mxu0 %v4703_v43  ;;  %4110 = vmatprep.subr.bf16.mxu1 %v4711_v47  ;;  %v61_v43 = vld [vmem:[%s6380_s0 + $0x170] sm:$0x11]  ;;  %v4788_v45 = vld [vmem:[%s6379_s1 + $0x7a0] ss:$12 sps:$4 sm:$0xff]  }
  0xe1   :  { %2809 = vmatprep.subr.bf16.mxu0 %v4710_v41  ;;  %v4793_v41 = vld [vmem:[%s6379_s1 + $0x814] ss:$12 sps:$4 sm:$0xff]   ;;  %v3617_v47 = vcombine.high %v61_v43, %v61_v43 }
  0xe2   :  { %3183 = vmatmul.mubr.bf16.gmra.mrb[72].mxu1 %v5496_v9  ;;  %v4723_v9 = vld [vmem:[%s6379_s1 + $0x5d8] ss:$12 sps:$4 sm:$0xff]  }
  0xe3   :  { %4111 = vmatpush3.bf16.msra.mxu1 %v4712_v48  ;;  %3190 = vmatprep.mubr.bf16.mxu1 %v5521_v16  ;;  %v4729_v16 = vld [vmem:[%s6379_s1 + $0x5f0] ss:$12 sps:$4 sm:$0xff]  }
  0xe4   :  { %2810 = vmatpush1.bf16.msra.mxu0 %v4708_v61  ;;  %4112 = vmatprep.subr.bf16.mxu1 %v4716_v6  ;;  %v4795_v61 = vld [vmem:[%s6379_s1 + $0x878] ss:$12 sps:$4 sm:$0xff]  }
  0xe5   :  { %2811 = vmatprep.subr.bf16.mxu0 %v4715_v50  ;;  %v4791_v50 = vld [vmem:[%s6379_s1 + $0x810] ss:$12 sps:$4 sm:$0xff]   ;;  %v4796_v6 = vld [vmem:[%s6379_s1 + $0x7b8] ss:$12 sps:$4 sm:$0xff]  }
  0xe7   :  { %4113 = vmatpush3.bf16.msra.mxu1 %v4717_v53 }
  0xe8   :  { %2812 = vmatpush1.bf16.msra.mxu0 %v4713_v51  ;;  %4114 = vmatprep.subr.bf16.mxu1 %v4723_v9 }
  0xe9   :  { %2813 = vmatprep.subr.bf16.mxu0 %v4722_v56  ;;  %v4799_v56 = vld [vmem:[%s6379_s1 + $0x82c] ss:$12 sps:$4 sm:$0xff]  }
  0xea   :  { %3191 = vmatmul.mubr.bf16.gmra.mrb[76].mxu1 %v5527_v19  ;;  %v4736_v19 = vld [vmem:[%s6379_s1 + $0x6c8] ss:$12 sps:$4 sm:$0xff]  }
  0xeb   :  { %4115 = vmatpush3.bf16.msra.mxu1 %v4725_v59  ;;  %3230 = vmatprep.mubr.bf16.mxu1 %v5553_v29  ;;  %v4742_v29 = vld [vmem:[%s6379_s1 + $0x6e0] ss:$12 sps:$4 sm:$0xff]   ;;  %v3616_v59 = vcombine.low %v61_v43, %v61_v43  ;;  %v4848_v43 = vld [vmem:[%s6379_s1 + $0x950] ss:$12 sps:$4 sm:$0xff]  }
  0xec   :  { %2814 = vmatpush1.bf16.msra.mxu0 %v4720_v58  ;;  %4116 = vmatprep.subr.bf16.mxu1 %v4729_v16  ;;  %v4800_v58 = vld [vmem:[%s6379_s1 + $0x890] ss:$12 sps:$4 sm:$0xff]  }
  0xed   :  { %2815 = vmatprep.subr.bf16.mxu0 %v4728_v5  ;;  %v4797_v5 = vld [vmem:[%s6379_s1 + $0x828] ss:$12 sps:$4 sm:$0xff]   ;;  %v4801_v16 = vld [vmem:[%s6379_s1 + $0x7d0] ss:$12 sps:$4 sm:$0xff]  }
  0xef   :  { %4117 = vmatpush3.bf16.msra.mxu1 %v4730_v63  ;;  %v4806_v63 = vld [vmem:[%s6379_s1 + $0x844] ss:$12 sps:$4 sm:$0xff]  }
  0xf0   :  { %2816 = vmatpush1.bf16.msra.mxu0 %v4726_v60  ;;  %4142 = vmatprep.subr.bf16.mxu1 %v4736_v19  ;;  %v4829_v60 = vld [vmem:[%s6380_s0 + $0x2c] ss:$56 sps:$4 sm:$0xff]  }
  0xf1   :  { %2817 = vmatprep.subr.bf16.mxu0 %v4735_v23  ;;  %v4808_v23 = vld [vmem:[%s6379_s1 + $0x8a8] ss:$12 sps:$4 sm:$0xff]  }
  0xf2   :  { %3231 = vmatmul.mubr.bf16.vlgmr.msra.gmra.mrb[80].mxu1 %v5655_v28  ;;  %v4748_v28 = vld [vmem:[%s6379_s1 + $0x6f8] ss:$12 sps:$4 sm:$0xff]  }
  0xf3   :  { %4143 = vmatpush3.bf16.msra.mxu1 %v4738_v1  ;;  %3238 = vmatprep.mubr.bf16.mxu1 %v5676_v11  ;;  %v4754_v11 = vld [vmem:[%s6379_s1 + $0x710] ss:$12 sps:$4 sm:$0xff]   ;;  %v4804_v1 = vld [vmem:[%s6379_s1 + $0x840] ss:$12 sps:$4 sm:$0xff]  }
  0xf4   :  { %2818 = vmatpush1.bf16.msra.mxu0 %v4733_v0  ;;  %4144 = vmatprep.subr.bf16.mxu1 %v4742_v29 }
  0xf5   :  { %2819 = vmatprep.subr.bf16.mxu0 %v4741_v2  ;;  %v4809_v2 = vld [vmem:[%s6379_s1 + $0x7e8] ss:$12 sps:$4 sm:$0xff]  }
  0xf7   :  { %4145 = vmatpush3.bf16.msra.mxu1 %v4743_v49  ;;  %v4813_v49 = vld [vmem:[%s6379_s1 + $0x8c0] ss:$12 sps:$4 sm:$0xff]  }
  0xf8   :  { %2820 = vmatpush1.bf16.msra.mxu0 %v4739_v3  ;;  %4146 = vmatprep.subr.bf16.mxu1 %v4748_v28  ;;  %v4812_v3 = vld [vmem:[%s6379_s1 + $0x85c] ss:$12 sps:$4 sm:$0xff]   ;;  %v4810_v28 = vld [vmem:[%s6379_s1 + $0x858] ss:$12 sps:$4 sm:$0xff]  }
  0xf9   :  { %2821 = vmatprep.subr.bf16.mxu0 %v4747_v7 }
  0xfa   :  { %3239 = vmatmul.mubr.bf16.gmra.mrb[84].mxu1 %v5703_v10  ;;  %v4759_v10 = vld [vmem:[%s6379_s1 + $0x780] ss:$12 sps:$4 sm:$0xff]  }
  0xfb   :  { %4147 = vmatpush3.bf16.msra.mxu1 %v4750_v36  ;;  %3246 = vmatprep.mubr.bf16.mxu1 %v5714_v20  ;;  %v4767_v20 = vld [vmem:[%s6379_s1 + $0x740] ss:$12 sps:$4 sm:$0xff]  }
  0xfc   :  { %2822 = vmatpush1.bf16.msra.mxu0 %v4745_v8  ;;  %4148 = vmatprep.subr.bf16.mxu1 %v4754_v11  ;;  %v4814_v8 = vld [vmem:[%s6379_s1 + $0x800] ss:$12 sps:$4 sm:$0xff]  }
  0xfd   :  { %2823 = vmatprep.subr.bf16.mxu0 %v4753_v12  ;;  %v4818_v36 = vld [vmem:[%s6379_s1 + $0x874] ss:$12 sps:$4 sm:$0xff]   ;;  %v4820_v12 = vld [vmem:[%s6379_s1 + $0x8d8] ss:$12 sps:$4 sm:$0xff]  }
  0xff   :  { %4149 = vmatpush3.bf16.msra.mxu1 %v4755_v13  ;;  %v4816_v13 = vld [vmem:[%s6379_s1 + $0x870] ss:$12 sps:$4 sm:$0xff]  }
 0x100   :  { %2824 = vmatpush1.bf16.msra.mxu0 %v4751_v4  ;;  %4150 = vmatprep.subr.bf16.mxu1 %v4762_v14 }
 0x101   :  { %2864 = vmatprep.subr.bf16.mxu0 %v4761_v39  ;;  %v4821_v39 = vld [vmem:[%s6379_s1 + $0x818] ss:$12 sps:$4 sm:$0xff]  }
 0x102   :  { %3247 = vmatmul.mubr.bf16.gmra.mrb[88].mxu1 %v5741_v22  ;;  %v4773_v22 = vld [vmem:[%s6379_s1 + $0x698] ss:$12 sps:$4 sm:$0xff]  }
 0x103   :  { %2826 = vmatmul.mubr.bf16.vlgmr.msra.gmra.mrb[0].mxu0 %v4756_v15  ;;  %4151 = vmatpush3.bf16.msra.mxu1 %v4763_v52 }
 0x104   :  { %2865 = vmatpush1.bf16.msra.mxu0 %v4759_v10  ;;  %4152 = vmatprep.subr.bf16.mxu1 %v4767_v20  ;;  %v4825_v10 = vld [vmem:[%s6379_s1 + $0x8f0] ss:$12 sps:$4 sm:$0xff]  }
 0x105   :  { %2866 = vmatprep.subr.bf16.mxu0 %v4766_v18  ;;  %3254 = vmatprep.mubr.bf16.mxu1 %v5755_v33  ;;  %v4778_v33 = vld [vmem:[%s6379_s1 + $0x6b0] ss:$12 sps:$4 sm:$0xff]   ;;  %v4822_v18 = vld [vmem:[%s6379_s1 + $0x888] ss:$12 sps:$4 sm:$0xff]  }
 0x106   :  { %2835 = vmatprep.mubr.bf16.mxu0 %v4789_v54  ;;  %v4826_v20 = vld [vmem:[%s6379_s1 + $0x830] ss:$12 sps:$4 sm:$0xff]  }
 0x107   :  { %4153 = vmatpush3.bf16.msra.mxu1 %v4768_v24 }
 0x108   :  { %2867 = vmatpush1.bf16.msra.mxu0 %v4764_v21  ;;  %4154 = vmatprep.subr.bf16.mxu1 %v4772_v25  ;;  %v4832_v21 = vld [vmem:[%s6379_s1 + $0x8a4] ss:$12 sps:$4 sm:$0xff]   ;;  %v4830_v25 = vld [vmem:[%s6379_s1 + $0x8a0] ss:$12 sps:$4 sm:$0xff]  }
 0x109   :  { %2868 = vmatprep.subr.bf16.mxu0 %v4771_v17  ;;  %v4827_v17 = vld [vmem:[%s6380_s0 + $0x28] ss:$56 sps:$4 sm:$0xff]  }
 0x10a   :  { %3255 = vmatmul.mubr.bf16.gmra.mrb[92].mxu1 %v5773_v40  ;;  %v4783_v40 = vld [vmem:[%s6379_s1 + $0x788] ss:$12 sps:$4 sm:$0xff]  }
 0x10b   :  { %2836 = vmatmul.mubr.bf16.gmra.mrb[4].mxu0 %v4794_v31  ;;  %4155 = vmatpush3.bf16.msra.mxu1 %v4773_v22 }
 0x10c   :  { %2869 = vmatpush1.bf16.msra.mxu0 %v4769_v26  ;;  %4156 = vmatprep.subr.bf16.mxu1 %v4777_v30  ;;  %v4833_v26 = vld [vmem:[%s6379_s1 + $0x908] ss:$12 sps:$4 sm:$0xff]  }
 0x10d   :  { %2870 = vmatprep.subr.bf16.mxu0 %v4776_v62  ;;  %3294 = vmatprep.mubr.bf16.mxu1 %v5790_v44  ;;  %v4784_v44 = vld [vmem:[%s6379_s1 + $0x7f8] ss:$12 sps:$4 sm:$0xff]   ;;  %v4869_v62 = vmov 0   ;;  %v4836_v30 = vld [vmem:[%s6379_s1 + $0x8bc] ss:$12 sps:$4 sm:$0xff]  }
 0x10e   :  { %2845 = vmatprep.mubr.bf16.mxu0 %v4802_v27 }
 0x10f   :  { %4157 = vmatpush3.bf16.msra.mxu1 %v4778_v33  ;;  %v4834_v33 = vld [vmem:[%s6379_s1 + $0x8b8] ss:$12 sps:$4 sm:$0xff]  }
 0x110   :  { %2871 = vmatpush1.bf16.msra.mxu0 %v4774_v32  ;;  %4182 = vmatprep.subr.bf16.mxu1 %v4782_v38  ;;  %v4838_v32 = vld [vmem:[%s6380_s0 + $0x9c] ss:$56 sps:$4 sm:$0xff]   ;;  %v4843_v38 = vld [vmem:[%s6380_s0 + $0x98] ss:$56 sps:$4 sm:$0xff]  }
 0x111   :  { %2872 = vmatprep.subr.bf16.mxu0 %v4781_v37  ;;  %v4842_v37 = vld [vmem:[%s6379_s1 + $0x8d4] ss:$12 sps:$4 sm:$0xff]  }
 0x112   :  { %3295 = vmatmul.mubr.bf16.vlgmr.msra.gmra.mrb[96].mxu1 %v4756_v15  ;;  %v4824_v15 = vld [vmem:[%s6379_s1 + $0x88c] ss:$12 sps:$4 sm:$0xff]  }
 0x113   :  { %2846 = vmatmul.mubr.bf16.gmra.mrb[8].mxu0 %v4807_v42  ;;  %4183 = vmatpush3.bf16.msra.mxu1 %v4783_v40  ;;  %v4844_v40 = vld [vmem:[%s6379_s1 + $0x938] ss:$12 sps:$4 sm:$0xff]  }
 0x114   :  { %2873 = vmatpush1.bf16.msra.mxu0 %v4779_v34  ;;  %4184 = vmatprep.subr.bf16.mxu1 %v4787_v57  ;;  %v4840_v34 = vld [vmem:[%s6379_s1 + $0x8d0] ss:$12 sps:$4 sm:$0xff]   ;;  %v4849_v57 = vld [vmem:[%s6380_s0 + $0x10c] ss:$56 sps:$4 sm:$0xff]  }
 0x115   :  { %2874 = vmatprep.subr.bf16.mxu0 %v4786_v35  ;;  %v6003_v48 = vpop.f32.mrb[0].mxu1  ;;  %3302 = vmatprep.mubr.bf16.mxu1 %v4789_v54  ;;  %v4847_v35 = vld [vmem:[%s6379_s1 + $0x8ec] ss:$12 sps:$4 sm:$0xff]  }
 0x116   :  { %2855 = vmatprep.mubr.bf16.mxu0 %v3617_v47  ;;  %v6011_v51 = vpop.f32.mrb[1].mxu1 }
 0x117   :  { %v6013_v53 = vpop.f32.mrb[2].mxu1  ;;  %4185 = vmatpush3.bf16.msra.mxu1 %v4788_v45  ;;  %v62_v45 = vld [vmem:[%s6380_s0 + $0x178] sm:$0x11] }
 0x118   :  { %2875 = vmatpush1.bf16.msra.mxu0 %v4784_v44  ;;  %v6018_v9 = vpop.f32.mrb[3].mxu1  ;;  %4186 = vmatprep.subr.bf16.mxu1 %v4795_v61  ;;  %v4851_v44 = vld [vmem:[%s6380_s0 + $0x108] ss:$56 sps:$4 sm:$0xff]  }
 0x119   :  { %2876 = vmatprep.subr.bf16.mxu0 %v4793_v41  ;;  %v4852_v41 = vld [vmem:[%s6379_s1 + $0x968] ss:$12 sps:$4 sm:$0xff]   ;;  %v4853_v61 = vld [vmem:[%s6379_s1 + $0x980] ss:$12 sps:$4 sm:$0xff]  }
 0x11a   :  { %3303 = vmatmul.mubr.bf16.gmra.mrb[100].mxu1 %v4794_v31 }
 0x11b   :  { %2856 = vmatmul.mubr.bf16.gmra.mrb[12].mxu0 %v3616_v59  ;;  %4187 = vmatpush3.bf16.msra.mxu1 %v4796_v6 }
 0x11c   :  { %2877 = vmatpush1.bf16.msra.mxu0 %v4791_v50  ;;  %4188 = vmatprep.subr.bf16.mxu1 %v4800_v58 }
 0x11d   :  { %2878 = vmatprep.subr.bf16.mxu0 %v4799_v56  ;;  %3310 = vmatprep.mubr.bf16.mxu1 %v4802_v27  ;;  %v6038_v19 = vpop.f32.mrb[4].mxu1  ;;  %v4837_v27 = vld [vmem:[%s6379_s1 + $0x920] ss:$12 sps:$4 sm:$0xff]   ;;  %v3618_v56 = vcombine.low %v62_v45, %v62_v45 }
 0x11e   :  { %2896 = vmatprep.mubr.bf16.mxu0 %v4829_v60  ;;  %v6040_v0 = vpop.f32.mrb[5].mxu1 }
 0x11f   :  { %4189 = vmatpush3.bf16.msra.mxu1 %v4801_v16  ;;  %v6048_v29 = vpop.f32.mrb[6].mxu1  ;;  %v4857_v16 = vld [vmem:[%s6379_s1 + $0x9b0] ss:$12 sps:$4 sm:$0xff]  }
 0x120   :  { %2879 = vmatpush1.bf16.msra.mxu0 %v4797_v5  ;;  %4190 = vmatprep.subr.bf16.mxu1 %v4808_v23  ;;  %v6056_v7 = vpop.f32.mrb[7].mxu1 }
 0x121   :  { %2880 = vmatprep.subr.bf16.mxu0 %v4806_v63  ;;  %v4863_v63 = vld [vmem:[%s6380_s0 + $0xa4] ss:$56 sps:$4 sm:$0xff]  }
 0x122   :  { %3311 = vmatmul.mubr.bf16.gmra.mrb[104].mxu1 %v4807_v42  ;;  %v4845_v42 = vld [vmem:[%s6379_s1 + $0x8e8] ss:$12 sps:$4 sm:$0xff]  }
 0x123   :  { %4191 = vmatpush3.bf16.msra.mxu1 %v4809_v2  ;;  %3318 = vmatprep.mubr.bf16.mxu1 %v3617_v47  ;;  %v3619_v47 = vcombine.high %v62_v45, %v62_v45  ;;  %v4858_v2 = vld [vmem:[%s6379_s1 + $0x9c8] ss:$12 sps:$4 sm:$0xff]  }
 0x124   :  { %2881 = vmatpush1.bf16.msra.mxu0 %v4804_v1  ;;  %4192 = vmatprep.subr.bf16.mxu1 %v4813_v49  ;;  %v4859_v49 = vld [vmem:[%s6379_s1 + $0x9e0] ss:$12 sps:$4 sm:$0xff]  }
 0x125   :  { %2882 = vmatprep.subr.bf16.mxu0 %v4812_v3  ;;  %v6070_v11 = vpop.f32.mrb[8].mxu1 }
 0x126   :  { %v6072_v4 = vpop.f32.mrb[9].mxu1 }
 0x127   :  { %4193 = vmatpush3.bf16.msra.mxu1 %v4814_v8  ;;  %v6080_v14 = vpop.f32.mrb[10].mxu1 }
 0x128   :  { %2883 = vmatpush1.bf16.msra.mxu0 %v4810_v28  ;;  %4194 = vmatprep.subr.bf16.mxu1 %v4820_v12  ;;  %v6088_v52 = vpop.f32.mrb[11].mxu1  ;;  %v4860_v12 = vld [vmem:[%s6379_s1 + $0x9f8] ss:$12 sps:$4 sm:$0xff]  }
 0x129   :  { %2884 = vmatprep.subr.bf16.mxu0 %v4818_v36 }
 0x12a   :  { %3319 = vmatmul.mubr.bf16.gmra.mrb[108].mxu1 %v3616_v59  ;;  %v4856_v59 = vld [vmem:[%s6379_s1 + $0x998] ss:$12 sps:$4 sm:$0xff]  }
 0x12b   :  { %4195 = vmatpush3.bf16.msra.mxu1 %v4821_v39  ;;  %3358 = vmatprep.mubr.bf16.mxu1 %v4829_v60  ;;  %v4861_v39 = vld [vmem:[%s6379_s1 + $0xa10] ss:$12 sps:$4 sm:$0xff]  }
 0x12c   :  { %2885 = vmatpush1.bf16.msra.mxu0 %v4816_v13  ;;  %4196 = vmatprep.subr.bf16.mxu1 %v4825_v10  ;;  %v4864_v10 = vld [vmem:[%s6380_s0 + $0x34] ss:$56 sps:$4 sm:$0xff]  }
 0x12d   :  { %2886 = vmatprep.subr.bf16.mxu0 %v4824_v15  ;;  %v6099_v24 = vpop.f32.mrb[12].mxu1 }
 0x12e   :  { %v6104_v54 = vpop.f32.mrb[13].mxu1 }
 0x12f   :  { %4197 = vmatpush3.bf16.msra.mxu1 %v4826_v20  ;;  %v2577_v22 = vpop.f32.mrb[14].mxu1 }
 0x130   :  { %2887 = vmatpush1.bf16.msra.mxu0 %v4822_v18  ;;  %4222 = vmatprep.subr.bf16.mxu1 %v4869_v62  ;;  %v2578_v31 = vpop.f32.mrb[15].mxu1 }
 0x131   :  { %2888 = vmatprep.subr.bf16.mxu0 %v4832_v21 }
 0x132   :  { %3359 = vmatmul.mubr.bf16.vlgmr.msra.gmra.mrb[112].mxu1 %v4827_v17 }
 0x133   :  { %4234 = vmatpush1.bf16.msra.mxu1 %v4833_v26  ;;  %3366 = vmatprep.mubr.bf16.mxu1 %v4838_v32 }
 0x134   :  { %2889 = vmatpush1.bf16.msra.mxu0 %v4830_v25  ;;  %4223 = vmatprep.subr.bf16.mxu1 %v4869_v62  ;;  %v4866_v25 = vld [vmem:[%s6380_s0 + $0x114] ss:$56 sps:$4 sm:$0xff]  }
 0x135   :  { %2890 = vmatprep.subr.bf16.mxu0 %v4836_v30 }
 0x137   :  { %4235 = vmatpush1.bf16.msra.mxu1 %v4837_v27 }
 0x138   :  { %2891 = vmatpush1.bf16.msra.mxu0 %v4834_v33  ;;  %4224 = vmatprep.subr.bf16.mxu1 %v4869_v62 }
 0x139   :  { %2892 = vmatprep.subr.bf16.mxu0 %v4842_v37 }
 0x13a   :  { %3367 = vmatmul.mubr.bf16.gmra.mrb[116].mxu1 %v4843_v38 }
 0x13b   :  { %4236 = vmatpush1.bf16.msra.mxu1 %v4844_v40  ;;  %3374 = vmatprep.mubr.bf16.mxu1 %v4849_v57 }
 0x13c   :  { %2893 = vmatpush1.bf16.msra.mxu0 %v4840_v34  ;;  %4225 = vmatprep.subr.bf16.mxu1 %v4869_v62 }
 0x13d   :  { %2894 = vmatprep.subr.bf16.mxu0 %v4847_v35 }
 0x13f   :  { %4237 = vmatpush1.bf16.msra.mxu1 %v4848_v43 }
 0x140   :  { %2895 = vmatpush1.bf16.msra.mxu0 %v4845_v42  ;;  %4226 = vmatprep.subr.bf16.mxu1 %v4869_v62  ;;  %v4868_v42 = vld [vmem:[%s6380_s0 + $0x30] ss:$56 sps:$4 sm:$0xff]  }
 0x141   :  { %3390 = vmatprep.subr.bf16.mxu0 %v4869_v62 }
 0x142   :  { %3375 = vmatmul.mubr.bf16.gmra.mrb[120].mxu1 %v4851_v44 }
 0x143   :  { %2897 = vmatmul.mubr.bf16.vlgmr.msra.gmra.mrb[0].mxu0 %v4827_v17  ;;  %4238 = vmatpush1.bf16.msra.mxu1 %v4852_v41  ;;  %v4865_v17 = vld [vmem:[%s6380_s0 + $0xa0] ss:$56 sps:$4 sm:$0xff]  }
 0x144   :  { %3391 = vmatpush1.bf16.msra.mxu0 %v4833_v26  ;;  %4227 = vmatprep.subr.bf16.mxu1 %v4869_v62 }
 0x145   :  { %3392 = vmatprep.subr.bf16.mxu0 %v4869_v62  ;;  %v6168_v50 = vpop.f32.mrb[16].mxu1  ;;  %2906 = vmatprep.mubr.bf16.mxu0 %v4838_v32 }
 0x146   :  { %3382 = vmatprep.mubr.bf16.mxu1 %v3619_v47  ;;  %v6170_v6 = vpop.f32.mrb[17].mxu1 }
 0x147   :  { %v6172_v58 = vpop.f32.mrb[18].mxu1  ;;  %4239 = vmatpush1.bf16.msra.mxu1 %v4853_v61 }
 0x148   :  { %3393 = vmatpush1.bf16.msra.mxu0 %v4837_v27  ;;  %v6177_v5 = vpop.f32.mrb[19].mxu1  ;;  %4228 = vmatprep.subr.bf16.mxu1 %v4869_v62  ;;  %v4867_v27 = vld [vmem:[%s6380_s0 + $0x110] ss:$56 sps:$4 sm:$0xff]  }
 0x149   :  { %3394 = vmatprep.subr.bf16.mxu0 %v4869_v62 }
 0x14a   :  { %3383 = vmatmul.mubr.bf16.gmra.mrb[124].mxu1 %v3618_v56 }
 0x14b   :  { %2907 = vmatmul.mubr.bf16.gmra.mrb[4].mxu0 %v4843_v38  ;;  %4240 = vmatpush1.bf16.msra.mxu1 %v4856_v59 }
 0x14c   :  { %3395 = vmatpush1.bf16.msra.mxu0 %v4844_v40  ;;  %4229 = vmatprep.subr.bf16.mxu1 %v4869_v62 }
 0x14d   :  { %3396 = vmatprep.subr.bf16.mxu0 %v4869_v62  ;;  %v6186_v60 = vpop.f32.mrb[20].mxu1  ;;  %2916 = vmatprep.mubr.bf16.mxu0 %v4849_v57 }
 0x14e   :  { %3951 = vmatprep.mubr.msk.bf16.mxu1 %vm2496_vm0, %v4863_v63  ;;  %v6192_v23 = vpop.f32.mrb[21].mxu1 }
 0x14f   :  { %v6194_v1 = vpop.f32.mrb[22].mxu1  ;;  %4241 = vmatpush1.bf16.msra.mxu1 %v4857_v16 }
 0x150   :  { %3397 = vmatpush1.bf16.msra.mxu0 %v4848_v43  ;;  %v6199_v3 = vpop.f32.mrb[23].mxu1  ;;  %4230 = vmatprep.subr.bf16.mxu1 %v4869_v62 }
 0x151   :  { %3398 = vmatprep.subr.bf16.mxu0 %v4869_v62 }
 0x153   :  { %2917 = vmatmul.mubr.bf16.gmra.mrb[8].mxu0 %v4851_v44  ;;  %4242 = vmatpush1.bf16.msra.mxu1 %v4858_v2 }
 0x154   :  { %3399 = vmatpush1.bf16.msra.mxu0 %v4852_v41  ;;  %4231 = vmatprep.subr.bf16.mxu1 %v4869_v62 }
 0x155   :  { %3400 = vmatprep.subr.bf16.mxu0 %v4869_v62  ;;  %v6208_v28 = vpop.f32.mrb[24].mxu1  ;;  %2926 = vmatprep.mubr.bf16.mxu0 %v3619_v47 }
 0x156   :  { %v6210_v8 = vpop.f32.mrb[25].mxu1 }
 0x157   :  { %v6212_v36 = vpop.f32.mrb[26].mxu1  ;;  %4243 = vmatpush1.bf16.msra.mxu1 %v4859_v49 }
 0x158   :  { %3401 = vmatpush1.bf16.msra.mxu0 %v4853_v61  ;;  %v6217_v13 = vpop.f32.mrb[27].mxu1  ;;  %4232 = vmatprep.subr.bf16.mxu1 %v4869_v62 }
 0x159   :  { %3402 = vmatprep.subr.bf16.mxu0 %v4869_v62 }
 0x15b   :  { %2927 = vmatmul.mubr.bf16.gmra.mrb[12].mxu0 %v3618_v56  ;;  %4244 = vmatpush1.bf16.msra.mxu1 %v4860_v12 }
 0x15c   :  { %3403 = vmatpush1.bf16.msra.mxu0 %v4856_v59  ;;  %4233 = vmatprep.subr.bf16.mxu1 %v4869_v62 }
 0x15d   :  { %3404 = vmatprep.subr.bf16.mxu0 %v4869_v62  ;;  %v6226_v15 = vpop.f32.mrb[28].mxu1  ;;  %3950 = vmatprep.mubr.msk.bf16.mxu0 %vm2496_vm0, %v4864_v10 }
 0x15e   :  { %v6232_v18 = vpop.f32.mrb[29].mxu1 }
 0x15f   :  { %v3003_v20 = vpop.f32.mrb[30].mxu1  ;;  %4245 = vmatpush1.bf16.msra.mxu1 %v4861_v39 }
 0x160   :  { %3405 = vmatpush1.bf16.msra.mxu0 %v4857_v16  ;;  %v3004_v21 = vpop.f32.mrb[31].mxu1 }
 0x161   :  { %3406 = vmatprep.subr.bf16.mxu0 %v4869_v62 }
 0x162   :  { %3431 = vmatmul.mubr.bf16.vlgmr.msra.gmra.mrb[128].mxu1 %v4865_v17 }
 0x163   :  { %3952 = vmatprep.mubr.msk.bf16.mxu1 %vm2496_vm0, %v4866_v25 }
 0x164   :  { %3407 = vmatpush1.bf16.msra.mxu0 %v4858_v2 }
 0x165   :  { %3408 = vmatprep.subr.bf16.mxu0 %v4869_v62  ;;  %v3998_v26 = vpop.f32.mrb[32].mxu1 }
 0x166   :  { %v3999_v22 = vpop.f32.mrb[33].mxu1 }
 0x167   :  { %v4000_v30 = vadd.f32 %v3999_v22, %v3998_v26  ;;  %v4001_v31 = vpop.f32.mrb[34].mxu1 }
 0x168   :  { %3409 = vmatpush1.bf16.msra.mxu0 %v4859_v49  ;;  %v4002_v32 = vpop.f32.mrb[35].mxu1 }
 0x169   :  { %3410 = vmatprep.subr.bf16.mxu0 %v4869_v62  ;;  %v4003_v33 = vadd.f32 %v4002_v32, %v4001_v31 }
 0x16a   :  { %3439 = vmatmul.mubr.bf16.gmra.mrb[132].mxu1 %v4867_v27 }
 0x16b   :  { %3953 = vmatprep.mubr.msk.bf16.mxu1 %vm2496_vm0, %v5414_v46 }
 0x16c   :  { %3411 = vmatpush1.bf16.msra.mxu0 %v4860_v12 }
 0x16d   :  { %3412 = vmatprep.subr.bf16.mxu0 %v4869_v62  ;;  %v4004_v37 = vpop.f32.mrb[36].mxu1  ;;  %v498_v62 = vlaneseq }
 0x16e   :  { %v4005_v38 = vpop.f32.mrb[37].mxu1 }
 0x16f   :  { %v4006_v34 = vadd.f32 %v4005_v38, %v4004_v37  ;;  %v4007_v40 = vpop.f32.mrb[38].mxu1  ;;  %v6254_v61 = vshrl.u32 %v498_v62, 7 }
 0x170   :  { %3413 = vmatpush1.bf16.msra.mxu0 %v4861_v39  ;;  %v4008_v35 = vpop.f32.mrb[39].mxu1 }
 0x171   :  { %v4009_v57 = vadd.f32 %v4008_v35, %v4007_v40  ;;  %v508_v16 = vsub.s32 2, %v6254_v61 }
 0x172   :  { %3447 = vmatmul.mubr.bf16.gmra.mrb[136].mxu1 %v5434_v55  ;;  %v6260_v55 = vld [vmem:[%s6381_s2] sm:$0x7] }
 0x173   :  { %3423 = vmatmul.mubr.bf16.vlgmr.msra.gmra.mrb[16].mxu0 %v4868_v42  ;;  %v509_v12 = vrot.slane %v6260_v55, %v508_v16 }
 0x175   :  { %v4010_v43 = vpop.f32.mrb[40].mxu1  ;;  %v3041_v20 = vadd.f32 %v4000_v30, %v509_v12  ;;  %v3044_v26 = vadd.f32 %v4003_v33, %v509_v12  ;;  %v3049_v38 = vadd.f32 %v4006_v34, %v509_v12 }
 0x176   :  { %v4011_v44 = vpop.f32.mrb[41].mxu1 }
 0x177   :  { %v4012_v45 = vadd.f32 %v4011_v44, %v4010_v43  ;;  %v4013_v46 = vpop.f32.mrb[42].mxu1  ;;  %v3052_v43 = vadd.f32 %v4009_v57, %v509_v12 }
 0x178   :  { %v4014_v41 = vpop.f32.mrb[43].mxu1 }
 0x179   :  { %v4015_v47 = vadd.f32 %v4014_v41, %v4013_v46  ;;  %v3057_v30 = vadd.f32 %v4012_v45, %v509_v12 }
 0x17b   :  { %v3060_v33 = vadd.f32 %v4015_v47, %v509_v12 }
 0x17d   :  { %v4016_v56 = vpop.f32.mrb[44].mxu1 }
 0x17e   :  { %v4017_v59 = vpop.f32.mrb[45].mxu1 }
 0x17f   :  { %v4018_v63 = vadd.f32 %v4017_v59, %v4016_v56  ;;  %v4019_v2 = vpop.f32.mrb[46].mxu1 }
 0x180   :  { %v4020_v49 = vpop.f32.mrb[47].mxu1 }
 0x181   :  { %v3065_v34 = vadd.f32 %v4018_v63, %v509_v12 }
 0x185   :  { %v4038_v39 = vpop.f32.mrb[48].mxu1 }
 0x186   :  { %v4039_v10 = vpop.f32.mrb[49].mxu1 }
 0x187   :  { %v4040_v21 = vadd.f32 %v4039_v10, %v4038_v39  ;;  %v4041_v17 = vpop.f32.mrb[50].mxu1 }
 0x188   :  { %v4042_v25 = vpop.f32.mrb[51].mxu1 }
 0x189   :  { %v3105_v22 = vadd.f32 %v4040_v21, %v3041_v20  ;;  %v4043_v31 = vadd.f32 %v4042_v25, %v4041_v17 }
 0x18b   :  { %v3108_v32 = vadd.f32 %v4043_v31, %v3044_v26 }
 0x18d   :  { %v4044_v27 = vpop.f32.mrb[52].mxu1 }
 0x18e   :  { %v4045_v37 = vpop.f32.mrb[53].mxu1 }
 0x18f   :  { %v4046_v40 = vadd.f32 %v4045_v37, %v4044_v27  ;;  %v4047_v35 = vpop.f32.mrb[54].mxu1 }
 0x190   :  { %v4048_v42 = vpop.f32.mrb[55].mxu1 }
 0x191   :  { %v3113_v44 = vadd.f32 %v4046_v40, %v3049_v38  ;;  %v4049_v46 = vadd.f32 %v4048_v42, %v4047_v35 }
 0x193   :  { %v3116_v41 = vadd.f32 %v4049_v46, %v3052_v43 }
 0x195   :  { %v4050_v62 = vpop.f32.mrb[56].mxu1 }
 0x196   :  { %v4051_v56 = vpop.f32.mrb[57].mxu1 }
 0x197   :  { %v4052_v59 = vadd.f32 %v4051_v56, %v4050_v62  ;;  %v4053_v16 = vpop.f32.mrb[58].mxu1 }
 0x198   :  { %v4054_v2 = vpop.f32.mrb[59].mxu1 }
 0x199   :  { %v3121_v49 = vadd.f32 %v4052_v59, %v3057_v30  ;;  %v4055_v39 = vadd.f32 %v4054_v2, %v4053_v16 }
 0x19b   :  { %v3124_v10 = vadd.f32 %v4055_v39, %v3060_v33 }
 0x19d   :  { %v4056_v20 = vpop.f32.mrb[60].mxu1 }
 0x19e   :  { %v4057_v21 = vpop.f32.mrb[61].mxu1 }
 0x19f   :  { %v4058_v17 = vadd.f32 %v4057_v21, %v4056_v20  ;;  %v4059_v25 = vpop.f32.mrb[62].mxu1 }
 0x1a0   :  { %v4060_v26 = vpop.f32.mrb[63].mxu1 }
 0x1a1   :  { %v3129_v57 = vadd.f32 %v4058_v17, %v3065_v34 }
 0x1a5   :  { %v4078_v31 = vpop.f32.mrb[64].mxu1 }
 0x1a6   :  { %v4079_v27 = vpop.f32.mrb[65].mxu1 }
 0x1a7   :  { %v4080_v37 = vadd.f32 %v4079_v27, %v4078_v31  ;;  %v4081_v38 = vpop.f32.mrb[66].mxu1 }
 0x1a8   :  { %v4082_v40 = vpop.f32.mrb[67].mxu1 }
 0x1a9   :  { %v3169_v45 = vadd.f32 %v4080_v37, %v3105_v22  ;;  %v4083_v35 = vadd.f32 %v4082_v40, %v4081_v38 }
 0x1ab   :  { %v3172_v42 = vadd.f32 %v4083_v35, %v3108_v32 }
 0x1ad   :  { %v4084_v43 = vpop.f32.mrb[68].mxu1 }
 0x1ae   :  { %v4085_v47 = vpop.f32.mrb[69].mxu1 }
 0x1af   :  { %v4086_v46 = vadd.f32 %v4085_v47, %v4084_v43  ;;  %v4087_v62 = vpop.f32.mrb[70].mxu1 }
 0x1b0   :  { %v4088_v56 = vpop.f32.mrb[71].mxu1 }
 0x1b1   :  { %v3177_v30 = vadd.f32 %v4086_v46, %v3113_v44  ;;  %v4089_v59 = vadd.f32 %v4088_v56, %v4087_v62 }
 0x1b3   :  { %v3180_v63 = vadd.f32 %v4089_v59, %v3116_v41 }
 0x1b5   :  { %v4090_v12 = vpop.f32.mrb[72].mxu1 }
 0x1b6   :  { %v4091_v16 = vpop.f32.mrb[73].mxu1 }
 0x1b7   :  { %v4092_v2 = vadd.f32 %v4091_v16, %v4090_v12  ;;  %v4093_v33 = vpop.f32.mrb[74].mxu1 }
 0x1b8   :  { %v4094_v39 = vpop.f32.mrb[75].mxu1 }
 0x1b9   :  { %v3185_v20 = vadd.f32 %v4092_v2, %v3121_v49  ;;  %v4095_v21 = vadd.f32 %v4094_v39, %v4093_v33 }
 0x1bb   :  { %v3188_v34 = vadd.f32 %v4095_v21, %v3124_v10 }
 0x1bd   :  { %v4096_v17 = vpop.f32.mrb[76].mxu1 }
 0x1be   :  { %v4097_v22 = vpop.f32.mrb[77].mxu1 }
 0x1bf   :  { %v4098_v25 = vadd.f32 %v4097_v22, %v4096_v17  ;;  %v4099_v32 = vpop.f32.mrb[78].mxu1 }
 0x1c0   :  { %v4100_v26 = vpop.f32.mrb[79].mxu1 }
 0x1c1   :  { %v3193_v31 = vadd.f32 %v4098_v25, %v3129_v57 }
 0x1c5   :  { %v4118_v27 = vpop.f32.mrb[80].mxu1 }
 0x1c6   :  { %v4119_v37 = vpop.f32.mrb[81].mxu1 }
 0x1c7   :  { %v4120_v38 = vadd.f32 %v4119_v37, %v4118_v27  ;;  %v4121_v44 = vpop.f32.mrb[82].mxu1 }
 0x1c8   :  { %v4122_v40 = vpop.f32.mrb[83].mxu1 }
 0x1c9   :  { %v3233_v41 = vadd.f32 %v4120_v38, %v3169_v45  ;;  %v4123_v35 = vadd.f32 %v4122_v40, %v4121_v44 }
 0x1cb   :  { %v3236_v43 = vadd.f32 %v4123_v35, %v3172_v42 }
 0x1cd   :  { %v4124_v47 = vpop.f32.mrb[84].mxu1 }
 0x1ce   :  { %v4125_v46 = vpop.f32.mrb[85].mxu1 }
 0x1cf   :  { %v4126_v62 = vadd.f32 %v4125_v46, %v4124_v47  ;;  %v4127_v49 = vpop.f32.mrb[86].mxu1 }
 0x1d0   :  { %v4128_v56 = vpop.f32.mrb[87].mxu1 }
 0x1d1   :  { %v3241_v10 = vadd.f32 %v4126_v62, %v3177_v30  ;;  %v4129_v59 = vadd.f32 %v4128_v56, %v4127_v49 }
 0x1d3   :  { %v3244_v12 = vadd.f32 %v4129_v59, %v3180_v63 }
 0x1d5   :  { %v4130_v16 = vpop.f32.mrb[88].mxu1 }
 0x1d6   :  { %v4131_v2 = vpop.f32.mrb[89].mxu1 }
 0x1d7   :  { %v4132_v33 = vadd.f32 %v4131_v2, %v4130_v16  ;;  %v4133_v57 = vpop.f32.mrb[90].mxu1 }
 0x1d8   :  { %v4134_v39 = vpop.f32.mrb[91].mxu1 }
 0x1d9   :  { %v3249_v21 = vadd.f32 %v4132_v33, %v3185_v20  ;;  %v4135_v17 = vadd.f32 %v4134_v39, %v4133_v57 }
 0x1db   :  { %v3252_v22 = vadd.f32 %v4135_v17, %v3188_v34 }
 0x1dd   :  { %v4136_v25 = vpop.f32.mrb[92].mxu1 }
 0x1de   :  { %v4137_v45 = vpop.f32.mrb[93].mxu1 }
 0x1df   :  { %v4138_v32 = vadd.f32 %v4137_v45, %v4136_v25  ;;  %v4139_v42 = vpop.f32.mrb[94].mxu1 }
 0x1e0   :  { %v4140_v26 = vpop.f32.mrb[95].mxu1 }
 0x1e1   :  { %v3257_v27 = vadd.f32 %v4138_v32, %v3193_v31 }
 0x1e5   :  { %v4158_v37 = vpop.f32.mrb[96].mxu1 }
 0x1e6   :  { %v4159_v38 = vpop.f32.mrb[97].mxu1 }
 0x1e7   :  { %v4160_v44 = vadd.f32 %v4159_v38, %v4158_v37  ;;  %v4161_v30 = vpop.f32.mrb[98].mxu1 }
 0x1e8   :  { %v4162_v40 = vpop.f32.mrb[99].mxu1 }
 0x1e9   :  { %v3297_v63 = vadd.f32 %v4160_v44, %v3233_v41  ;;  %v4163_v35 = vadd.f32 %v4162_v40, %v4161_v30 }
 0x1eb   :  { %v3300_v47 = vadd.f32 %v4163_v35, %v3236_v43 }
 0x1ed   :  { %v4164_v46 = vpop.f32.mrb[100].mxu1 }
 0x1ee   :  { %v4165_v62 = vpop.f32.mrb[101].mxu1 }
 0x1ef   :  { %v4166_v49 = vadd.f32 %v4165_v62, %v4164_v46  ;;  %v4167_v20 = vpop.f32.mrb[102].mxu1 }
 0x1f0   :  { %v4168_v56 = vpop.f32.mrb[103].mxu1 }
 0x1f1   :  { %v3305_v34 = vadd.f32 %v4166_v49, %v3241_v10  ;;  %v4169_v59 = vadd.f32 %v4168_v56, %v4167_v20 }
 0x1f3   :  { %v3308_v16 = vadd.f32 %v4169_v59, %v3244_v12 }
 0x1f5   :  { %v4170_v2 = vpop.f32.mrb[104].mxu1 }
 0x1f6   :  { %v4171_v33 = vpop.f32.mrb[105].mxu1 }
 0x1f7   :  { %v4172_v57 = vadd.f32 %v4171_v33, %v4170_v2  ;;  %v4173_v31 = vpop.f32.mrb[106].mxu1 }
 0x1f8   :  { %v4174_v39 = vpop.f32.mrb[107].mxu1 }
 0x1f9   :  { %v3313_v17 = vadd.f32 %v4172_v57, %v3249_v21  ;;  %v4175_v25 = vadd.f32 %v4174_v39, %v4173_v31  ;;  %v500_v21 = vsub.s32 0, %v6254_v61 }
 0x1fb   :  { %v3316_v45 = vadd.f32 %v4175_v25, %v3252_v22  ;;  %v504_v22 = vsub.s32 1, %v6254_v61 }
 0x1fd   :  { %v4176_v32 = vpop.f32.mrb[108].mxu1  ;;  %v6275_v2 = vrot.slane %v6260_v55, %v504_v22 }
 0x1fe   :  { %v4177_v41 = vpop.f32.mrb[109].mxu1 }
 0x1ff   :  { %v4178_v42 = vadd.f32 %v4177_v41, %v4176_v32  ;;  %v4179_v43 = vpop.f32.mrb[110].mxu1  ;;  %v2546_v61 = vadd.f32 %v6011_v51, %v6275_v2 }
 0x200   :  { %v4180_v26 = vpop.f32.mrb[111].mxu1 }
 0x201   :  { %v6263_v37 = vadd.f32 %v4178_v42, %v3257_v27  ;;  %v6272_v27 = vrot.slane %v6260_v55, %v500_v21 }
 0x203   :  { %v2544_v57 = vadd.f32 %v6003_v48, %v6272_v27  ;;  %v2548_v25 = vadd.f32 %v6013_v53, %v6272_v27 }
 0x205   :  { %v4198_v38 = vpop.f32.mrb[112].mxu1 }
 0x206   :  { %v4199_v44 = vpop.f32.mrb[113].mxu1 }
 0x207   :  { %v4200_v10 = vadd.f32 %v4199_v44, %v4198_v38  ;;  %v4201_v30 = vpop.f32.mrb[114].mxu1 }
 0x208   :  { %v4202_v12 = vpop.f32.mrb[115].mxu1 }
 0x209   :  { %v4203_v40 = vadd.f32 %v4202_v12, %v4201_v30  ;;  %v6265_v35 = vadd.f32 %v4200_v10, %v3297_v63 }
 0x20b   :  { %v6267_v46 = vadd.f32 %v4203_v40, %v3300_v47 }
 0x20d   :  { %v4204_v62 = vpop.f32.mrb[116].mxu1 }
 0x20e   :  { %v4205_v49 = vpop.f32.mrb[117].mxu1 }
 0x20f   :  { %v4206_v20 = vadd.f32 %v4205_v49, %v4204_v62  ;;  %v4207_v56 = vpop.f32.mrb[118].mxu1 }
 0x210   :  { %v4208_v59 = vpop.f32.mrb[119].mxu1 }
 0x211   :  { %v4209_v33 = vadd.f32 %v4208_v59, %v4207_v56  ;;  %v6277_v63 = vadd.f32 %v4206_v20, %v3305_v34  ;;  %v2550_v34 = vadd.f32 %v6018_v9, %v6275_v2  ;;  %v2556_v20 = vadd.f32 %v6040_v0, %v6275_v2 }
 0x213   :  { %v6279_v47 = vadd.f32 %v4209_v33, %v3308_v16  ;;  %v2558_v33 = vadd.f32 %v6048_v29, %v6272_v27 }
 0x215   :  { %v4210_v39 = vpop.f32.mrb[120].mxu1 }
 0x216   :  { %v2898_v31 = vpop.f32.mrb[0].mxu0  ;;  %v4211_v55 = vpop.f32.mrb[121].mxu1 }
 0x217   :  { %v4247_v32 = vadd.f32 %v2898_v31, %v2544_v57  ;;  %v2900_v41 = vpop.f32.mrb[1].mxu0  ;;  %v4212_v16 = vadd.f32 %v4211_v55, %v4210_v39  ;;  %v4213_v26 = vpop.f32.mrb[122].mxu1 }
 0x218   :  { %v4250_v42 = vadd.f32 %v2900_v41, %v2546_v61  ;;  %v2902_v43 = vpop.f32.mrb[2].mxu0  ;;  %v4214_v51 = vpop.f32.mrb[123].mxu1 }
 0x219   :  { %v4248_v48 = vadd.f32 %v4247_v32, %v6168_v50  ;;  %v4253_v38 = vadd.f32 %v2902_v43, %v2548_v25  ;;  %v2904_v44 = vpop.f32.mrb[3].mxu0  ;;  %v4215_v12 = vadd.f32 %v4214_v51, %v4213_v26  ;;  %v6291_v53 = vadd.f32 %v4212_v16, %v3313_v17 }
 0x21a   :  { %v4251_v10 = vadd.f32 %v4250_v42, %v6170_v6  ;;  %v4256_v30 = vadd.f32 %v2904_v44, %v2550_v34  ;;  %v2554_v50 = vadd.f32 %v6038_v19, %v6272_v27 }
 0x21b   :  { %v3454_v40 = vmax.f32 %v4248_v48, 0.0  ;;  %v4254_v21 = vadd.f32 %v4253_v38, %v6172_v58  ;;  %v6295_v62 = vadd.f32 %v4215_v12, %v3316_v45  ;;  %v2566_v38 = vadd.f32 %v6072_v4, %v6275_v2 }
 0x21c   :  { %v3455_v22 = vmax.f32 %v4251_v10, 0.0  ;;  %v4257_v9 = vadd.f32 %v4256_v30, %v6177_v5  ;;  %v2560_v5 = vadd.f32 %v6056_v7, %v6275_v2 }
 0x21d   :  { %v3457_v49 = vmax.f32 %v4254_v21, 0.0  ;;  %v4216_v17 = vpop.f32.mrb[124].mxu1 }
 0x21e   :  { %v3968_v6 = vpack.c.bf16 %v3455_v22, %v3454_v40  ;;  %v3458_v56 = vmax.f32 %v4257_v9, 0.0  ;;  %v2908_v59 = vpop.f32.mrb[4].mxu0  ;;  %v4217_v61 = vpop.f32.mrb[125].mxu1 }
 0x21f   :  { %v4259_v58 = vadd.f32 %v2908_v59, %v2554_v50  ;;  %v2910_v57 = vpop.f32.mrb[5].mxu0  ;;  %v4218_v0 = vadd.f32 %v4217_v61, %v4216_v17  ;;  %v4219_v39 = vpop.f32.mrb[126].mxu1 }
 0x220   :  { %3548 = vst [vmem:[%s6382_s3] sm:$0xff] %v3968_v6  ;;  %v3970_v19 = vpack.c.bf16 %v3458_v56, %v3457_v49  ;;  %v4262_v45 = vadd.f32 %v2910_v57, %v2556_v20  ;;  %v2912_v31 = vpop.f32.mrb[6].mxu0  ;;  %v4220_v29 = vpop.f32.mrb[127].mxu1  ;;  %v2574_v20 = vadd.f32 %v6099_v24, %v6272_v27 }
 0x221   :  { %v4260_v25 = vadd.f32 %v4259_v58, %v6186_v60  ;;  %v4265_v32 = vadd.f32 %v2912_v31, %v2558_v33  ;;  %v2914_v41 = vpop.f32.mrb[7].mxu0  ;;  %v6314_v34 = vadd.f32 %v4218_v0, %v6263_v37  ;;  %v2564_v60 = vadd.f32 %v6070_v11, %v6272_v27 }
 0x222   :  { %3550 = vst [vmem:[%s6382_s3 + $0xc] sm:$0xff] %v3970_v19  ;;  %v4263_v7 = vadd.f32 %v4262_v45, %v6192_v23  ;;  %v4268_v55 = vadd.f32 %v2914_v41, %v2560_v5  ;;  %v2568_v37 = vadd.f32 %v6080_v14, %v6272_v27 }
 0x223   :  { %v3460_v42 = vmax.f32 %v4260_v25, 0.0  ;;  %v4266_v16 = vadd.f32 %v4265_v32, %v6194_v1  ;;  %v2570_v1 = vadd.f32 %v6088_v52, %v6275_v2 }
 0x224   :  { %v3461_v43 = vmax.f32 %v4263_v7, 0.0  ;;  %v4269_v26 = vadd.f32 %v4268_v55, %v6199_v3 }
 0x225   :  { %v3463_v48 = vmax.f32 %v4266_v16, 0.0 }
 0x226   :  { %v3972_v44 = vpack.c.bf16 %v3461_v43, %v3460_v42  ;;  %v3464_v51 = vmax.f32 %v4269_v26, 0.0  ;;  %v2918_v23 = vpop.f32.mrb[8].mxu0 }
 0x227   :  { %v4271_v10 = vadd.f32 %v2918_v23, %v2564_v60  ;;  %v2920_v30 = vpop.f32.mrb[9].mxu0 }
 0x228   :  { %3552 = vst [vmem:[%s6382_s3 + $0x18] sm:$0xff] %v3972_v44  ;;  %v3974_v11 = vpack.c.bf16 %v3464_v51, %v3463_v48  ;;  %v4274_v3 = vadd.f32 %v2920_v30, %v2566_v38  ;;  %v2922_v12 = vpop.f32.mrb[10].mxu0 }
 0x229   :  { %v4272_v4 = vadd.f32 %v4271_v10, %v6208_v28  ;;  %v4277_v40 = vadd.f32 %v2922_v12, %v2568_v37  ;;  %v2924_v21 = vpop.f32.mrb[11].mxu0  ;;  %v2576_v28 = vadd.f32 %v6104_v54, %v6275_v2 }
 0x22a   :  { %3554 = vst [vmem:[%s6382_s3 + $0x24] sm:$0xff] %v3974_v11  ;;  %v4275_v14 = vadd.f32 %v4274_v3, %v6210_v8  ;;  %v4280_v22 = vadd.f32 %v2924_v21, %v2570_v1 }
 0x22b   :  { %v3466_v9 = vmax.f32 %v4272_v4, 0.0  ;;  %v4278_v52 = vadd.f32 %v4277_v40, %v6212_v36 }
 0x22c   :  { %v3467_v50 = vmax.f32 %v4275_v14, 0.0  ;;  %v4281_v49 = vadd.f32 %v4280_v22, %v6217_v13 }
 0x22d   :  { %v3469_v6 = vmax.f32 %v4278_v52, 0.0 }
 0x22e   :  { %v3976_v56 = vpack.c.bf16 %v3467_v50, %v3466_v9  ;;  %v3470_v59 = vmax.f32 %v4281_v49, 0.0  ;;  %v2928_v17 = vpop.f32.mrb[12].mxu0 }
 0x22f   :  { %v4283_v33 = vadd.f32 %v2928_v17, %v2574_v20  ;;  %v2930_v58 = vpop.f32.mrb[13].mxu0 }
 0x230   :  { %3556 = vst [vmem:[%s6382_s3 + $0x30] sm:$0xff] %v3976_v56  ;;  %v3978_v8 = vpack.c.bf16 %v3470_v59, %v3469_v6  ;;  %v4286_v36 = vadd.f32 %v2930_v58, %v2576_v28  ;;  %v2932_v57 = vpop.f32.mrb[14].mxu0 }
 0x231   :  { %v4284_v13 = vadd.f32 %v4283_v33, %v6226_v15  ;;  %v2933_v61 = vpop.f32.mrb[15].mxu0 }
 0x232   :  { %3558 = vst [vmem:[%s6382_s3 + $0x3c] sm:$0xff] %v3978_v8  ;;  %v4287_v24 = vadd.f32 %v4286_v36, %v6232_v18 }
 0x233   :  { %v3472_v54 = vmax.f32 %v4284_v13, 0.0 }
 0x234   :  { %v3473_v27 = vmax.f32 %v4287_v24, 0.0 }
 0x235   :  { %v3432_v5 = vpop.f32.mrb[128].mxu1 }
 0x236   :  { %v3980_v2 = vpack.c.bf16 %v3473_v27, %v3472_v54  ;;  %v3433_v19 = vadd.f32 %v3432_v5, %v6277_v63  ;;  %v3434_v45 = vpop.f32.mrb[129].mxu1 }
 0x237   :  { %v3435_v0 = vpop.f32.mrb[130].mxu1 }
 0x238   :  { %3560 = vst [vmem:[%s6382_s3 + $0x48] sm:$0x11] %v3980_v2  ;;  %v3462_v15 = vmax.f32 %v3433_v19, 0.0  ;;  %v3436_v31 = vadd.f32 %v3435_v0, %v6279_v47  ;;  %v3437_v39 = vpop.f32.mrb[131].mxu1 }
 0x23a   :  { %v3973_v25 = vpack.c.bf16 %v3462_v15, %v3462_v15  ;;  %v3465_v32 = vmax.f32 %v3436_v31, 0.0 }
 0x23c   :  { %3553 = vst [vmem:[%s6382_s3 + $0x20] sm:$0xf] %v3973_v25  ;;  %v3975_v18 = vpack.c.bf16 %v3465_v32, %v3465_v32 }
 0x23d   :  { %v3440_v41 = vpop.f32.mrb[132].mxu1 }
 0x23e   :  { %3555 = vst [vmem:[%s6382_s3 + $0x2c] sm:$0xf] %v3975_v18  ;;  %v3441_v63 = vadd.f32 %v3440_v41, %v6291_v53  ;;  %v3442_v29 = vpop.f32.mrb[133].mxu1 }
 0x23f   :  { %v3443_v7 = vpop.f32.mrb[134].mxu1 }
 0x240   :  { %v3468_v55 = vmax.f32 %v3441_v63, 0.0  ;;  %v3444_v47 = vadd.f32 %v3443_v7, %v6295_v62  ;;  %v3445_v42 = vpop.f32.mrb[135].mxu1 }
 0x242   :  { %v3977_v16 = vpack.c.bf16 %v3468_v55, %v3468_v55  ;;  %v3471_v43 = vmax.f32 %v3444_v47, 0.0 }
 0x244   :  { %3557 = vst [vmem:[%s6382_s3 + $0x38] sm:$0xf] %v3977_v16  ;;  %v3979_v26 = vpack.c.bf16 %v3471_v43, %v3471_v43 }
 0x245   :  { %v3448_v48 = vpop.f32.mrb[136].mxu1 }
 0x246   :  { %v3424_v60 = vpop.f32.mrb[16].mxu0  ;;  %3559 = vst [vmem:[%s6382_s3 + $0x44] sm:$0xf] %v3979_v26  ;;  %v3449_v38 = vadd.f32 %v3448_v48, %v6314_v34  ;;  %v3450_v62 = vpop.f32.mrb[137].mxu1 }
 0x247   :  { %v3425_v53 = vadd.f32 %v3424_v60, %v6265_v35  ;;  %v3426_v44 = vpop.f32.mrb[17].mxu0  ;;  %v3451_v23 = vpop.f32.mrb[138].mxu1 }
 0x248   :  { %v3427_v51 = vpop.f32.mrb[18].mxu0  ;;  %v3474_v10 = vmax.f32 %v3449_v38, 0.0  ;;  %v3452_v11 = vpop.f32.mrb[139].mxu1 }
 0x249   :  { %v3456_v37 = vmax.f32 %v3425_v53, 0.0  ;;  %v3428_v30 = vadd.f32 %v3427_v51, %v6267_v46  ;;  %v3429_v1 = vpop.f32.mrb[19].mxu0 }
 0x24a   :  { %v3981_v12 = vpack.c.bf16 %v3474_v10, %v3474_v10 }
 0x24b   :  { %v3969_v3 = vpack.c.bf16 %v3456_v37, %v3456_v37  ;;  %v3459_v4 = vmax.f32 %v3428_v30, 0.0 }
 0x24c   :  { %3561 = vst [vmem:[%s6382_s3 + $0x50] sm:$0x1] %v3981_v12 }
 0x24d   :  { %3549 = vst [vmem:[%s6382_s3 + $0x8] sm:$0xf] %v3969_v3  ;;  %v3971_v35 = vpack.c.bf16 %v3459_v4, %v3459_v4 }
 0x24f   :  { %3551 = vst [vmem:[%s6382_s3 + $0x14] sm:$0xf] %v3971_v35 }

// kernel: alexnet_restoration_forward.9
= control target key start
LH: loop header
LB: loop body
LE: loop exit
PB: predicated region body
PF: predicated region fallthrough
CT: control target
= control target key end

     0   :  { %s7503_s1 = inlined_call_operand.vmem [shape: bf16[3456,256], index: 1, kind: input, shape index: {}]   ;;  %s7504_s0 = inlined_call_operand.vmem [shape: bf16[50,3456], index: 0, kind: input, shape index: {}]   ;;  %s7505_s2 = inlined_call_operand.vmem [shape: f32[1,256], index: 2, kind: input, shape index: {}]   ;;  %s7506_s3 = inlined_call_operand.vmem [shape: bf16[50,256], index: 3, kind: output, shape index: {}]  }
   0x1   :  { %v5058_v0 = vld [vmem:[%s7503_s1 + $0x4] ss:$8 sps:$4 sm:$0xff]   ;;  %v5062_v2 = vld [vmem:[%s7503_s1] ss:$8 sps:$4 sm:$0xff]   ;;  %v5064_v4 = vld [vmem:[%s7503_s1 + $0x14] ss:$8 sps:$4 sm:$0xff]  }
   0x2   :  { %v5060_v1 = vld [vmem:[%s7503_s1 + $0x704] ss:$8 sps:$4 sm:$0xff]   ;;  %3220 = vmatprep.subr.bf16.mxu1 %v5058_v0  ;;  %v5063_v3 = vld [vmem:[%s7503_s1 + $0x700] ss:$8 sps:$4 sm:$0xff]   ;;  %v5066_v5 = vld [vmem:[%s7503_s1 + $0x714] ss:$8 sps:$4 sm:$0xff]  }
   0x3   :  { %3717 = vmatprep.subr.bf16.mxu0 %v5060_v1  ;;  %3221 = vmatpush1.bf16.msra.mxu1 %v5062_v2  ;;  %v5068_v6 = vld [vmem:[%s7503_s1 + $0x10] ss:$8 sps:$4 sm:$0xff]   ;;  %v5070_v8 = vld [vmem:[%s7503_s1 + $0x24] ss:$8 sps:$4 sm:$0xff]   ;;  %v5074_v10 = vld [vmem:[%s7503_s1 + $0x20] ss:$8 sps:$4 sm:$0xff]  }
   0x4   :  { %3718 = vmatpush1.bf16.msra.mxu0 %v5063_v3  ;;  %3222 = vmatprep.subr.bf16.mxu1 %v5064_v4  ;;  %v5069_v7 = vld [vmem:[%s7503_s1 + $0x710] ss:$8 sps:$4 sm:$0xff]   ;;  %v5072_v9 = vld [vmem:[%s7503_s1 + $0x724] ss:$8 sps:$4 sm:$0xff]   ;;  %v5075_v11 = vld [vmem:[%s7503_s1 + $0x720] ss:$8 sps:$4 sm:$0xff]  }
   0x5   :  { %3719 = vmatprep.subr.bf16.mxu0 %v5066_v5  ;;  %v5076_v12 = vld [vmem:[%s7503_s1 + $0x34] ss:$8 sps:$4 sm:$0xff]   ;;  %v5080_v14 = vld [vmem:[%s7503_s1 + $0x30] ss:$8 sps:$4 sm:$0xff]   ;;  %v5082_v16 = vld [vmem:[%s7503_s1 + $0x44] ss:$8 sps:$4 sm:$0xff]  }
   0x6   :  { %v5078_v13 = vld [vmem:[%s7503_s1 + $0x734] ss:$8 sps:$4 sm:$0xff]   ;;  %v5081_v15 = vld [vmem:[%s7503_s1 + $0x730] ss:$8 sps:$4 sm:$0xff]   ;;  %v5084_v17 = vld [vmem:[%s7503_s1 + $0x744] ss:$8 sps:$4 sm:$0xff]  }
   0x7   :  { %3223 = vmatpush1.bf16.msra.mxu1 %v5068_v6  ;;  %v5086_v18 = vld [vmem:[%s7503_s1 + $0x40] ss:$8 sps:$4 sm:$0xff]   ;;  %v5088_v20 = vld [vmem:[%s7503_s1 + $0x54] ss:$8 sps:$4 sm:$0xff]   ;;  %v5092_v22 = vld [vmem:[%s7503_s1 + $0x50] ss:$8 sps:$4 sm:$0xff]  }
   0x8   :  { %3720 = vmatpush1.bf16.msra.mxu0 %v5069_v7  ;;  %3224 = vmatprep.subr.bf16.mxu1 %v5070_v8  ;;  %v5087_v19 = vld [vmem:[%s7503_s1 + $0x740] ss:$8 sps:$4 sm:$0xff]   ;;  %v5090_v21 = vld [vmem:[%s7503_s1 + $0x754] ss:$8 sps:$4 sm:$0xff]   ;;  %v5093_v23 = vld [vmem:[%s7503_s1 + $0x750] ss:$8 sps:$4 sm:$0xff]  }
   0x9   :  { %3721 = vmatprep.subr.bf16.mxu0 %v5072_v9  ;;  %v5094_v24 = vld [vmem:[%s7503_s1 + $0x64] ss:$8 sps:$4 sm:$0xff]   ;;  %v5098_v26 = vld [vmem:[%s7503_s1 + $0x60] ss:$8 sps:$4 sm:$0xff]   ;;  %v5100_v28 = vld [vmem:[%s7503_s1 + $0x74] ss:$8 sps:$4 sm:$0xff]  }
   0xa   :  { %v5096_v25 = vld [vmem:[%s7503_s1 + $0x764] ss:$8 sps:$4 sm:$0xff]   ;;  %v5099_v27 = vld [vmem:[%s7503_s1 + $0x760] ss:$8 sps:$4 sm:$0xff]   ;;  %v5102_v29 = vld [vmem:[%s7503_s1 + $0x774] ss:$8 sps:$4 sm:$0xff]  }
   0xb   :  { %3225 = vmatpush1.bf16.msra.mxu1 %v5074_v10  ;;  %v5104_v30 = vld [vmem:[%s7503_s1 + $0x70] ss:$8 sps:$4 sm:$0xff]   ;;  %v5106_v32 = vld [vmem:[%s7503_s1 + $0x84] ss:$8 sps:$4 sm:$0xff]   ;;  %v5110_v34 = vld [vmem:[%s7503_s1 + $0x80] ss:$8 sps:$4 sm:$0xff]  }
   0xc   :  { %3722 = vmatpush1.bf16.msra.mxu0 %v5075_v11  ;;  %3226 = vmatprep.subr.bf16.mxu1 %v5076_v12  ;;  %v5105_v31 = vld [vmem:[%s7503_s1 + $0x770] ss:$8 sps:$4 sm:$0xff]   ;;  %v5108_v33 = vld [vmem:[%s7503_s1 + $0x784] ss:$8 sps:$4 sm:$0xff]   ;;  %v5111_v35 = vld [vmem:[%s7503_s1 + $0x780] ss:$8 sps:$4 sm:$0xff]  }
   0xd   :  { %3723 = vmatprep.subr.bf16.mxu0 %v5078_v13  ;;  %v5112_v36 = vld [vmem:[%s7503_s1 + $0x94] ss:$8 sps:$4 sm:$0xff]   ;;  %v5116_v38 = vld [vmem:[%s7503_s1 + $0x90] ss:$8 sps:$4 sm:$0xff]   ;;  %v5118_v40 = vld [vmem:[%s7503_s1 + $0xa4] ss:$8 sps:$4 sm:$0xff]  }
   0xe   :  { %v5114_v37 = vld [vmem:[%s7503_s1 + $0x794] ss:$8 sps:$4 sm:$0xff]   ;;  %v5117_v39 = vld [vmem:[%s7503_s1 + $0x790] ss:$8 sps:$4 sm:$0xff]   ;;  %v5120_v41 = vld [vmem:[%s7503_s1 + $0x7a4] ss:$8 sps:$4 sm:$0xff]  }
   0xf   :  { %3227 = vmatpush1.bf16.msra.mxu1 %v5080_v14  ;;  %v5122_v42 = vld [vmem:[%s7503_s1 + $0xa0] ss:$8 sps:$4 sm:$0xff]   ;;  %v5124_v44 = vld [vmem:[%s7503_s1 + $0xb4] ss:$8 sps:$4 sm:$0xff]   ;;  %v5128_v46 = vld [vmem:[%s7503_s1 + $0xb0] ss:$8 sps:$4 sm:$0xff]  }
  0x10   :  { %3724 = vmatpush1.bf16.msra.mxu0 %v5081_v15  ;;  %3228 = vmatprep.subr.bf16.mxu1 %v5082_v16  ;;  %v5123_v43 = vld [vmem:[%s7503_s1 + $0x7a0] ss:$8 sps:$4 sm:$0xff]   ;;  %v5126_v45 = vld [vmem:[%s7503_s1 + $0x7b4] ss:$8 sps:$4 sm:$0xff]   ;;  %v5129_v47 = vld [vmem:[%s7503_s1 + $0x7b0] ss:$8 sps:$4 sm:$0xff]  }
  0x11   :  { %3725 = vmatprep.subr.bf16.mxu0 %v5084_v17  ;;  %v5156_v48 = vld [vmem:[%s7504_s0 + $0x4] ss:$108 sps:$4 sm:$0xff]   ;;  %v5162_v51 = vld [vmem:[%s7504_s0 + $0x3c] ss:$108 sps:$4 sm:$0xff]   ;;  %v5154_v4 = vld [vmem:[%s7504_s0] ss:$108 sps:$4 sm:$0xff]  }
  0x12   :  { %v5130_v49 = vld [vmem:[%s7503_s1 + $0xc4] ss:$8 sps:$4 sm:$0xff]   ;;  %3252 = vmatprep.mubr.bf16.mxu1 %v5156_v48  ;;  %v5134_v52 = vld [vmem:[%s7503_s1 + $0xc0] ss:$8 sps:$4 sm:$0xff]   ;;  %v5136_v54 = vld [vmem:[%s7503_s1 + $0xd4] ss:$8 sps:$4 sm:$0xff]   ;;  %3749 = vmatprep.mubr.bf16.mxu0 %v5162_v51 }
  0x13   :  { %3229 = vmatpush1.bf16.msra.mxu1 %v5086_v18  ;;  %v5132_v50 = vld [vmem:[%s7503_s1 + $0x7c4] ss:$8 sps:$4 sm:$0xff]   ;;  %v5135_v53 = vld [vmem:[%s7503_s1 + $0x7c0] ss:$8 sps:$4 sm:$0xff]   ;;  %v5138_v55 = vld [vmem:[%s7503_s1 + $0x7d4] ss:$8 sps:$4 sm:$0xff]  }
  0x14   :  { %3726 = vmatpush1.bf16.msra.mxu0 %v5087_v19  ;;  %3230 = vmatprep.subr.bf16.mxu1 %v5088_v20  ;;  %v5140_v56 = vld [vmem:[%s7503_s1 + $0xd0] ss:$8 sps:$4 sm:$0xff]   ;;  %v5142_v58 = vld [vmem:[%s7503_s1 + $0xe4] ss:$8 sps:$4 sm:$0xff]   ;;  %v5146_v60 = vld [vmem:[%s7503_s1 + $0xe0] ss:$8 sps:$4 sm:$0xff]  }
  0x15   :  { %3727 = vmatprep.subr.bf16.mxu0 %v5090_v21  ;;  %v5141_v57 = vld [vmem:[%s7503_s1 + $0x7d0] ss:$8 sps:$4 sm:$0xff]   ;;  %v5144_v59 = vld [vmem:[%s7503_s1 + $0x7e4] ss:$8 sps:$4 sm:$0xff]   ;;  %v5147_v61 = vld [vmem:[%s7503_s1 + $0x7e0] ss:$8 sps:$4 sm:$0xff]  }
  0x16   :  { %v5148_v62 = vld [vmem:[%s7503_s1 + $0xf4] ss:$8 sps:$4 sm:$0xff]   ;;  %v5152_v0 = vld [vmem:[%s7503_s1 + $0xf0] ss:$8 sps:$4 sm:$0xff]   ;;  %v5159_v2 = vld [vmem:[%s7503_s1 + $0x104] ss:$8 sps:$4 sm:$0xff]  }
  0x17   :  { %3231 = vmatpush1.bf16.msra.mxu1 %v5092_v22  ;;  %v5150_v63 = vld [vmem:[%s7503_s1 + $0x7f4] ss:$8 sps:$4 sm:$0xff]   ;;  %v5153_v1 = vld [vmem:[%s7503_s1 + $0x7f0] ss:$8 sps:$4 sm:$0xff]   ;;  %v5165_v3 = vld [vmem:[%s7503_s1 + $0x804] ss:$8 sps:$4 sm:$0xff]  }
  0x18   :  { %3728 = vmatpush1.bf16.msra.mxu0 %v5093_v23  ;;  %3232 = vmatprep.subr.bf16.mxu1 %v5094_v24  ;;  %v5157_v5 = vld [vmem:[%s7503_s1 + $0x100] ss:$8 sps:$4 sm:$0xff]   ;;  %v5160_v6 = vld [vmem:[%s7504_s0 + $0x38] ss:$108 sps:$4 sm:$0xff]   ;;  %v5168_v8 = vld [vmem:[%s7503_s1 + $0x114] ss:$8 sps:$4 sm:$0xff]  }
  0x19   :  { %3729 = vmatprep.subr.bf16.mxu0 %v5096_v25  ;;  %v5163_v7 = vld [vmem:[%s7503_s1 + $0x800] ss:$8 sps:$4 sm:$0xff]   ;;  %v5171_v9 = vld [vmem:[%s7503_s1 + $0x814] ss:$8 sps:$4 sm:$0xff]   ;;  %v5166_v10 = vld [vmem:[%s7503_s1 + $0x110] ss:$8 sps:$4 sm:$0xff]  }
  0x1a   :  { %v5169_v11 = vld [vmem:[%s7503_s1 + $0x810] ss:$8 sps:$4 sm:$0xff]   ;;  %v5174_v12 = vld [vmem:[%s7503_s1 + $0x124] ss:$8 sps:$4 sm:$0xff]   ;;  %v5172_v14 = vld [vmem:[%s7503_s1 + $0x120] ss:$8 sps:$4 sm:$0xff]  }
  0x1b   :  { %3233 = vmatpush1.bf16.msra.mxu1 %v5098_v26  ;;  %v5177_v13 = vld [vmem:[%s7503_s1 + $0x824] ss:$8 sps:$4 sm:$0xff]   ;;  %v5175_v15 = vld [vmem:[%s7503_s1 + $0x820] ss:$8 sps:$4 sm:$0xff]   ;;  %v5180_v16 = vld [vmem:[%s7503_s1 + $0x134] ss:$8 sps:$4 sm:$0xff]  }
  0x1c   :  { %3730 = vmatpush1.bf16.msra.mxu0 %v5099_v27  ;;  %3234 = vmatprep.subr.bf16.mxu1 %v5100_v28  ;;  %v5220_v17 = vld [vmem:[%s7504_s0 + $0xdc] ss:$108 sps:$4 sm:$0xff]   ;;  %v5178_v19 = vld [vmem:[%s7503_s1 + $0x130] ss:$8 sps:$4 sm:$0xff]   ;;  %v5225_v21 = vld [vmem:[%s7504_s0 + $0x114] ss:$108 sps:$4 sm:$0xff]  }
  0x1d   :  { %3731 = vmatprep.subr.bf16.mxu0 %v5102_v29  ;;  %v5183_v18 = vld [vmem:[%s7503_s1 + $0x834] ss:$8 sps:$4 sm:$0xff]   ;;  %v5181_v20 = vld [vmem:[%s7503_s1 + $0x830] ss:$8 sps:$4 sm:$0xff]   ;;  %v5186_v22 = vld [vmem:[%s7503_s1 + $0x144] ss:$8 sps:$4 sm:$0xff]  }
  0x1e   :  { %v5189_v23 = vld [vmem:[%s7503_s1 + $0x844] ss:$8 sps:$4 sm:$0xff]   ;;  %v5231_v25 = vld [vmem:[%s7504_s0 + $0x110] ss:$108 sps:$4 sm:$0xff]   ;;  %v5184_v26 = vld [vmem:[%s7503_s1 + $0x140] ss:$8 sps:$4 sm:$0xff]  }
  0x1f   :  { %3235 = vmatpush1.bf16.msra.mxu1 %v5104_v30  ;;  %v5230_v24 = vld [vmem:[%s7504_s0 + $0xd8] ss:$108 sps:$4 sm:$0xff]   ;;  %v5187_v27 = vld [vmem:[%s7503_s1 + $0x840] ss:$8 sps:$4 sm:$0xff]   ;;  %v5192_v28 = vld [vmem:[%s7503_s1 + $0x154] ss:$8 sps:$4 sm:$0xff]  }
  0x20   :  { %3732 = vmatpush1.bf16.msra.mxu0 %v5105_v31  ;;  %3236 = vmatprep.subr.bf16.mxu1 %v5106_v32  ;;  %v5238_v29 = vld [vmem:[%s7504_s0 + $0x1b4] ss:$108 sps:$4 sm:$0xff]   ;;  %v5190_v31 = vld [vmem:[%s7503_s1 + $0x150] ss:$8 sps:$4 sm:$0xff]   ;;  %v5213_v51 = vld [vmem:[%s7503_s1 + $0x884] ss:$8 sps:$4 sm:$0xff]  }
  0x21   :  { %3733 = vmatprep.subr.bf16.mxu0 %v5108_v33  ;;  %v5195_v30 = vld [vmem:[%s7503_s1 + $0x854] ss:$8 sps:$4 sm:$0xff]   ;;  %v5193_v32 = vld [vmem:[%s7503_s1 + $0x850] ss:$8 sps:$4 sm:$0xff]  }
  0x22   :  { %v5243_v33 = vld [vmem:[%s7504_s0 + $0x1ec] ss:$108 sps:$4 sm:$0xff]  }
  0x23   :  { %3237 = vmatpush1.bf16.msra.mxu1 %v5110_v34  ;;  %v5198_v34 = vld [vmem:[%s7503_s1 + $0x164] ss:$8 sps:$4 sm:$0xff]   ;;  %v5202_v48 = vld [vmem:[%s7503_s1 + $0x170] ss:$8 sps:$4 sm:$0xff]  }
  0x24   :  { %3734 = vmatpush1.bf16.msra.mxu0 %v5111_v35  ;;  %3238 = vmatprep.subr.bf16.mxu1 %v5112_v36  ;;  %v5201_v35 = vld [vmem:[%s7503_s1 + $0x864] ss:$8 sps:$4 sm:$0xff]   ;;  %v5248_v36 = vld [vmem:[%s7504_s0 + $0x1b0] ss:$108 sps:$4 sm:$0xff]  }
  0x25   :  { %3735 = vmatprep.subr.bf16.mxu0 %v5114_v37  ;;  %v5249_v37 = vld [vmem:[%s7504_s0 + $0x1e8] ss:$108 sps:$4 sm:$0xff]  }
  0x27   :  { %3239 = vmatpush1.bf16.msra.mxu1 %v5116_v38  ;;  %v5196_v38 = vld [vmem:[%s7503_s1 + $0x160] ss:$8 sps:$4 sm:$0xff]  }
  0x28   :  { %3736 = vmatpush1.bf16.msra.mxu0 %v5117_v39  ;;  %3240 = vmatprep.subr.bf16.mxu1 %v5118_v40  ;;  %v5199_v39 = vld [vmem:[%s7503_s1 + $0x860] ss:$8 sps:$4 sm:$0xff]  }
  0x29   :  { %3737 = vmatprep.subr.bf16.mxu0 %v5120_v41  ;;  %v99_v40 = vld [vmem:[%s7504_s0 + $0x288] sm:$0x11]  ;;  %v5204_v41 = vld [vmem:[%s7503_s1 + $0x174] ss:$8 sps:$4 sm:$0xff]  }
  0x2b   :  { %3241 = vmatpush1.bf16.msra.mxu1 %v5122_v42  ;;  %v5207_v42 = vld [vmem:[%s7503_s1 + $0x874] ss:$8 sps:$4 sm:$0xff]  }
  0x2c   :  { %3738 = vmatpush1.bf16.msra.mxu0 %v5123_v43  ;;  %3242 = vmatprep.subr.bf16.mxu1 %v5124_v44  ;;  %v4365_v43 = vcombine.high %v99_v40, %v99_v40  ;;  %v106_v44 = vld [vmem:[%s7504_s0 + $0x2c0] sm:$0x11] }
  0x2d   :  { %3739 = vmatprep.subr.bf16.mxu0 %v5126_v45  ;;  %v4379_v45 = vcombine.high %v106_v44, %v106_v44 }
  0x2f   :  { %3243 = vmatpush1.bf16.msra.mxu1 %v5128_v46  ;;  %v4364_v46 = vcombine.low %v99_v40, %v99_v40  ;;  %v5356_v40 = vld [vmem:[%s7504_s0 + $0x1bc] ss:$108 sps:$4 sm:$0xff]  }
  0x30   :  { %3740 = vmatpush1.bf16.msra.mxu0 %v5129_v47  ;;  %3244 = vmatprep.subr.bf16.mxu1 %v5130_v49  ;;  %v4378_v47 = vcombine.low %v106_v44, %v106_v44  ;;  %v5205_v49 = vld [vmem:[%s7503_s1 + $0x870] ss:$8 sps:$4 sm:$0xff]   ;;  %v5304_v44 = vld [vmem:[%s7503_s1 + $0x244] ss:$8 sps:$4 sm:$0xff]  }
  0x31   :  { %3741 = vmatprep.subr.bf16.mxu0 %v5132_v50  ;;  %v5210_v50 = vld [vmem:[%s7503_s1 + $0x184] ss:$8 sps:$4 sm:$0xff]  }
  0x33   :  { %3245 = vmatpush1.bf16.msra.mxu1 %v5134_v52  ;;  %v5208_v52 = vld [vmem:[%s7503_s1 + $0x180] ss:$8 sps:$4 sm:$0xff]  }
  0x34   :  { %3742 = vmatpush1.bf16.msra.mxu0 %v5135_v53  ;;  %3246 = vmatprep.subr.bf16.mxu1 %v5136_v54  ;;  %v5274_v53 = vld [vmem:[%s7504_s0 + $0xc] ss:$108 sps:$4 sm:$0xff]   ;;  %v5211_v54 = vld [vmem:[%s7503_s1 + $0x880] ss:$8 sps:$4 sm:$0xff]  }
  0x35   :  { %3743 = vmatprep.subr.bf16.mxu0 %v5138_v55  ;;  %v5216_v55 = vld [vmem:[%s7503_s1 + $0x194] ss:$8 sps:$4 sm:$0xff]  }
  0x37   :  { %3247 = vmatpush1.bf16.msra.mxu1 %v5140_v56  ;;  %v5219_v56 = vld [vmem:[%s7503_s1 + $0x894] ss:$8 sps:$4 sm:$0xff]  }
  0x38   :  { %3744 = vmatpush1.bf16.msra.mxu0 %v5141_v57  ;;  %3248 = vmatprep.subr.bf16.mxu1 %v5142_v58  ;;  %v5280_v57 = vld [vmem:[%s7504_s0 + $0x44] ss:$108 sps:$4 sm:$0xff]  }
  0x39   :  { %3745 = vmatprep.subr.bf16.mxu0 %v5144_v59  ;;  %v5214_v58 = vld [vmem:[%s7503_s1 + $0x190] ss:$8 sps:$4 sm:$0xff]  }
  0x3a   :  { %v5217_v59 = vld [vmem:[%s7503_s1 + $0x890] ss:$8 sps:$4 sm:$0xff]  }
  0x3b   :  { %3249 = vmatpush1.bf16.msra.mxu1 %v5146_v60  ;;  %v5224_v60 = vld [vmem:[%s7503_s1 + $0x1a4] ss:$8 sps:$4 sm:$0xff]  }
  0x3c   :  { %3746 = vmatpush1.bf16.msra.mxu0 %v5147_v61  ;;  %3250 = vmatprep.subr.bf16.mxu1 %v5148_v62  ;;  %v5229_v61 = vld [vmem:[%s7503_s1 + $0x8a4] ss:$8 sps:$4 sm:$0xff]   ;;  %v5222_v62 = vld [vmem:[%s7503_s1 + $0x1a0] ss:$8 sps:$4 sm:$0xff]  }
  0x3d   :  { %3747 = vmatprep.subr.bf16.mxu0 %v5150_v63  ;;  %v5227_v63 = vld [vmem:[%s7503_s1 + $0x8a0] ss:$8 sps:$4 sm:$0xff]  }
  0x3f   :  { %3251 = vmatpush1.bf16.msra.mxu1 %v5152_v0  ;;  %v5234_v0 = vld [vmem:[%s7503_s1 + $0x1b4] ss:$8 sps:$4 sm:$0xff]  }
  0x40   :  { %3748 = vmatpush1.bf16.msra.mxu0 %v5153_v1  ;;  %3291 = vmatprep.subr.bf16.mxu1 %v5159_v2  ;;  %v5237_v1 = vld [vmem:[%s7503_s1 + $0x8b4] ss:$8 sps:$4 sm:$0xff]   ;;  %v5232_v2 = vld [vmem:[%s7503_s1 + $0x1b0] ss:$8 sps:$4 sm:$0xff]  }
  0x41   :  { %3788 = vmatprep.subr.bf16.mxu0 %v5165_v3  ;;  %v5235_v3 = vld [vmem:[%s7503_s1 + $0x8b0] ss:$8 sps:$4 sm:$0xff]  }
  0x42   :  { %3253 = vmatmul.mubr.bf16.vlgmr.msra.gmra.mrb[0].mxu1 %v5154_v4  ;;  %v5242_v4 = vld [vmem:[%s7503_s1 + $0x1c4] ss:$8 sps:$4 sm:$0xff]  }
  0x43   :  { %3750 = vmatmul.mubr.bf16.vlgmr.msra.gmra.mrb[0].mxu0 %v5160_v6  ;;  %3292 = vmatpush1.bf16.msra.mxu1 %v5157_v5  ;;  %v5247_v5 = vld [vmem:[%s7503_s1 + $0x8c4] ss:$8 sps:$4 sm:$0xff]   ;;  %v5240_v6 = vld [vmem:[%s7503_s1 + $0x1c0] ss:$8 sps:$4 sm:$0xff]  }
  0x44   :  { %3789 = vmatpush1.bf16.msra.mxu0 %v5163_v7  ;;  %3293 = vmatprep.subr.bf16.mxu1 %v5168_v8  ;;  %v5245_v7 = vld [vmem:[%s7503_s1 + $0x8c0] ss:$8 sps:$4 sm:$0xff]   ;;  %v5252_v8 = vld [vmem:[%s7503_s1 + $0x1d4] ss:$8 sps:$4 sm:$0xff]  }
  0x45   :  { %3790 = vmatprep.subr.bf16.mxu0 %v5171_v9  ;;  %3262 = vmatprep.mubr.bf16.mxu1 %v5220_v17  ;;  %v5255_v9 = vld [vmem:[%s7503_s1 + $0x8d4] ss:$8 sps:$4 sm:$0xff]  }
  0x46   :  { %3759 = vmatprep.mubr.bf16.mxu0 %v5225_v21  ;;  %v5271_v17 = vld [vmem:[%s7503_s1 + $0x8f4] ss:$8 sps:$4 sm:$0xff]   ;;  %v5283_v21 = vld [vmem:[%s7503_s1 + $0x904] ss:$8 sps:$4 sm:$0xff]  }
  0x47   :  { %3294 = vmatpush1.bf16.msra.mxu1 %v5166_v10  ;;  %v5250_v10 = vld [vmem:[%s7503_s1 + $0x1d0] ss:$8 sps:$4 sm:$0xff]  }
  0x48   :  { %3791 = vmatpush1.bf16.msra.mxu0 %v5169_v11  ;;  %3295 = vmatprep.subr.bf16.mxu1 %v5174_v12  ;;  %v5253_v11 = vld [vmem:[%s7503_s1 + $0x8d0] ss:$8 sps:$4 sm:$0xff]   ;;  %v5259_v12 = vld [vmem:[%s7503_s1 + $0x1e4] ss:$8 sps:$4 sm:$0xff]  }
  0x49   :  { %3792 = vmatprep.subr.bf16.mxu0 %v5177_v13  ;;  %v5263_v13 = vld [vmem:[%s7503_s1 + $0x8e4] ss:$8 sps:$4 sm:$0xff]  }
  0x4a   :  { %3263 = vmatmul.mubr.bf16.gmra.mrb[4].mxu1 %v5230_v24  ;;  %v5278_v24 = vld [vmem:[%s7504_s0 + $0x40] ss:$108 sps:$4 sm:$0xff]  }
  0x4b   :  { %3296 = vmatpush1.bf16.msra.mxu1 %v5172_v14  ;;  %3760 = vmatmul.mubr.bf16.gmra.mrb[4].mxu0 %v5231_v25  ;;  %v5257_v14 = vld [vmem:[%s7503_s1 + $0x1e0] ss:$8 sps:$4 sm:$0xff]  }
  0x4c   :  { %3793 = vmatpush1.bf16.msra.mxu0 %v5175_v15  ;;  %3297 = vmatprep.subr.bf16.mxu1 %v5180_v16  ;;  %v5261_v15 = vld [vmem:[%s7503_s1 + $0x8e0] ss:$8 sps:$4 sm:$0xff]   ;;  %v5268_v16 = vld [vmem:[%s7503_s1 + $0x1f4] ss:$8 sps:$4 sm:$0xff]  }
  0x4d   :  { %3794 = vmatprep.subr.bf16.mxu0 %v5183_v18  ;;  %3272 = vmatprep.mubr.bf16.mxu1 %v5238_v29  ;;  %v5266_v18 = vld [vmem:[%s7503_s1 + $0x1f0] ss:$8 sps:$4 sm:$0xff]   ;;  %v5281_v25 = vld [vmem:[%s7503_s1 + $0x900] ss:$8 sps:$4 sm:$0xff]  }
  0x4e   :  { %3769 = vmatprep.mubr.bf16.mxu0 %v5243_v33  ;;  %v5343_v29 = vld [vmem:[%s7504_s0 + $0x11c] ss:$108 sps:$4 sm:$0xff]   ;;  %v5295_v33 = vld [vmem:[%s7503_s1 + $0x924] ss:$8 sps:$4 sm:$0xff]  }
  0x4f   :  { %3298 = vmatpush1.bf16.msra.mxu1 %v5178_v19  ;;  %v5269_v19 = vld [vmem:[%s7503_s1 + $0x8f0] ss:$8 sps:$4 sm:$0xff]  }
  0x50   :  { %3795 = vmatpush1.bf16.msra.mxu0 %v5181_v20  ;;  %3299 = vmatprep.subr.bf16.mxu1 %v5186_v22  ;;  %v5277_v20 = vld [vmem:[%s7503_s1 + $0x204] ss:$8 sps:$4 sm:$0xff]   ;;  %v5272_v22 = vld [vmem:[%s7504_s0 + $0x8] ss:$108 sps:$4 sm:$0xff]  }
  0x51   :  { %3796 = vmatprep.subr.bf16.mxu0 %v5189_v23  ;;  %v5275_v23 = vld [vmem:[%s7503_s1 + $0x200] ss:$8 sps:$4 sm:$0xff]  }
  0x52   :  { %3273 = vmatmul.mubr.bf16.gmra.mrb[8].mxu1 %v5248_v36  ;;  %v5349_v36 = vld [vmem:[%s7504_s0 + $0x118] ss:$108 sps:$4 sm:$0xff]  }
  0x53   :  { %3300 = vmatpush1.bf16.msra.mxu1 %v5184_v26  ;;  %3770 = vmatmul.mubr.bf16.gmra.mrb[8].mxu0 %v5249_v37  ;;  %v5286_v26 = vld [vmem:[%s7503_s1 + $0x214] ss:$8 sps:$4 sm:$0xff]   ;;  %v5293_v37 = vld [vmem:[%s7503_s1 + $0x920] ss:$8 sps:$4 sm:$0xff]  }
  0x54   :  { %3797 = vmatpush1.bf16.msra.mxu0 %v5187_v27  ;;  %3301 = vmatprep.subr.bf16.mxu1 %v5192_v28  ;;  %v5289_v27 = vld [vmem:[%s7503_s1 + $0x914] ss:$8 sps:$4 sm:$0xff]   ;;  %v5338_v28 = vld [vmem:[%s7504_s0 + $0xe4] ss:$108 sps:$4 sm:$0xff]  }
  0x55   :  { %3798 = vmatprep.subr.bf16.mxu0 %v5195_v30  ;;  %3282 = vmatprep.mubr.bf16.mxu1 %v4365_v43  ;;  %v5284_v30 = vld [vmem:[%s7503_s1 + $0x210] ss:$8 sps:$4 sm:$0xff]  }
  0x56   :  { %3779 = vmatprep.mubr.bf16.mxu0 %v4379_v45  ;;  %v5299_v43 = vld [vmem:[%s7503_s1 + $0x930] ss:$8 sps:$4 sm:$0xff]   ;;  %v5307_v45 = vld [vmem:[%s7503_s1 + $0x944] ss:$8 sps:$4 sm:$0xff]  }
  0x57   :  { %3302 = vmatpush1.bf16.msra.mxu1 %v5190_v31  ;;  %v5287_v31 = vld [vmem:[%s7503_s1 + $0x910] ss:$8 sps:$4 sm:$0xff]  }
  0x58   :  { %3799 = vmatpush1.bf16.msra.mxu0 %v5193_v32  ;;  %3303 = vmatprep.subr.bf16.mxu1 %v5198_v34  ;;  %v5292_v32 = vld [vmem:[%s7503_s1 + $0x224] ss:$8 sps:$4 sm:$0xff]   ;;  %v5290_v34 = vld [vmem:[%s7503_s1 + $0x220] ss:$8 sps:$4 sm:$0xff]  }
  0x59   :  { %3800 = vmatprep.subr.bf16.mxu0 %v5201_v35  ;;  %v5348_v35 = vld [vmem:[%s7504_s0 + $0xe0] ss:$108 sps:$4 sm:$0xff]  }
  0x5a   :  { %3283 = vmatmul.mubr.bf16.gmra.mrb[12].mxu1 %v4364_v46  ;;  %v5302_v46 = vld [vmem:[%s7503_s1 + $0x240] ss:$8 sps:$4 sm:$0xff]  }
  0x5b   :  { %3304 = vmatpush1.bf16.msra.mxu1 %v5196_v38  ;;  %3780 = vmatmul.mubr.bf16.gmra.mrb[12].mxu0 %v4378_v47  ;;  %v5298_v38 = vld [vmem:[%s7503_s1 + $0x234] ss:$8 sps:$4 sm:$0xff]   ;;  %v5305_v47 = vld [vmem:[%s7503_s1 + $0x940] ss:$8 sps:$4 sm:$0xff]  }
  0x5c   :  { %3801 = vmatpush1.bf16.msra.mxu0 %v5199_v39  ;;  %3305 = vmatprep.subr.bf16.mxu1 %v5204_v41  ;;  %v5301_v39 = vld [vmem:[%s7503_s1 + $0x934] ss:$8 sps:$4 sm:$0xff]  }
  0x5d   :  { %3802 = vmatprep.subr.bf16.mxu0 %v5207_v42  ;;  %3323 = vmatprep.mubr.bf16.mxu1 %v5274_v53  ;;  %v5361_v41 = vld [vmem:[%s7504_s0 + $0x1f4] ss:$108 sps:$4 sm:$0xff]   ;;  %v5296_v42 = vld [vmem:[%s7503_s1 + $0x230] ss:$8 sps:$4 sm:$0xff]  }
  0x5e   :  { %3820 = vmatprep.mubr.bf16.mxu0 %v5280_v57  ;;  %v5313_v53 = vld [vmem:[%s7503_s1 + $0x954] ss:$8 sps:$4 sm:$0xff]   ;;  %v5311_v57 = vld [vmem:[%s7503_s1 + $0x950] ss:$8 sps:$4 sm:$0xff]  }
  0x5f   :  { %3306 = vmatpush1.bf16.msra.mxu1 %v5202_v48  ;;  %v5366_v48 = vld [vmem:[%s7504_s0 + $0x1b8] ss:$108 sps:$4 sm:$0xff]  }
  0x60   :  { %3803 = vmatpush1.bf16.msra.mxu0 %v5205_v49  ;;  %3307 = vmatprep.subr.bf16.mxu1 %v5210_v50  ;;  %v5367_v49 = vld [vmem:[%s7504_s0 + $0x1f0] ss:$108 sps:$4 sm:$0xff]  }
  0x61   :  { %3804 = vmatprep.subr.bf16.mxu0 %v5213_v51  ;;  %v100_v50 = vld [vmem:[%s7504_s0 + $0x290] sm:$0x11]  ;;  %v107_v51 = vld [vmem:[%s7504_s0 + $0x2c8] sm:$0x11] }
  0x63   :  { %3308 = vmatpush1.bf16.msra.mxu1 %v5208_v52  ;;  %v5310_v52 = vld [vmem:[%s7503_s1 + $0x254] ss:$8 sps:$4 sm:$0xff]  }
  0x64   :  { %3805 = vmatpush1.bf16.msra.mxu0 %v5211_v54  ;;  %3309 = vmatprep.subr.bf16.mxu1 %v5216_v55  ;;  %v4367_v54 = vcombine.high %v100_v50, %v100_v50  ;;  %v4381_v55 = vcombine.high %v107_v51, %v107_v51 }
  0x65   :  { %3806 = vmatprep.subr.bf16.mxu0 %v5219_v56  ;;  %v5308_v56 = vld [vmem:[%s7503_s1 + $0x250] ss:$8 sps:$4 sm:$0xff]  }
  0x67   :  { %3310 = vmatpush1.bf16.msra.mxu1 %v5214_v58  ;;  %v5316_v58 = vld [vmem:[%s7503_s1 + $0x264] ss:$8 sps:$4 sm:$0xff]  }
  0x68   :  { %3807 = vmatpush1.bf16.msra.mxu0 %v5217_v59  ;;  %3311 = vmatprep.subr.bf16.mxu1 %v5224_v60  ;;  %v5319_v59 = vld [vmem:[%s7503_s1 + $0x964] ss:$8 sps:$4 sm:$0xff]   ;;  %v5314_v60 = vld [vmem:[%s7503_s1 + $0x260] ss:$8 sps:$4 sm:$0xff]  }
  0x69   :  { %3808 = vmatprep.subr.bf16.mxu0 %v5229_v61  ;;  %v5317_v61 = vld [vmem:[%s7503_s1 + $0x960] ss:$8 sps:$4 sm:$0xff]  }
  0x6b   :  { %3312 = vmatpush1.bf16.msra.mxu1 %v5222_v62  ;;  %v4366_v62 = vcombine.low %v100_v50, %v100_v50  ;;  %v5410_v50 = vld [vmem:[%s7503_s1 + $0x324] ss:$8 sps:$4 sm:$0xff]  }
  0x6c   :  { %3809 = vmatpush1.bf16.msra.mxu0 %v5227_v63  ;;  %3313 = vmatprep.subr.bf16.mxu1 %v5234_v0  ;;  %v4380_v63 = vcombine.low %v107_v51, %v107_v51  ;;  %v5322_v0 = vld [vmem:[%s7503_s1 + $0x274] ss:$8 sps:$4 sm:$0xff]   ;;  %v5413_v51 = vld [vmem:[%s7503_s1 + $0xa24] ss:$8 sps:$4 sm:$0xff]  }
  0x6d   :  { %3810 = vmatprep.subr.bf16.mxu0 %v5237_v1  ;;  %v5325_v1 = vld [vmem:[%s7503_s1 + $0x974] ss:$8 sps:$4 sm:$0xff]  }
  0x6f   :  { %3314 = vmatpush1.bf16.msra.mxu1 %v5232_v2  ;;  %v5392_v2 = vld [vmem:[%s7504_s0 + $0x14] ss:$108 sps:$4 sm:$0xff]  }
  0x70   :  { %3811 = vmatpush1.bf16.msra.mxu0 %v5235_v3  ;;  %3315 = vmatprep.subr.bf16.mxu1 %v5242_v4  ;;  %v5398_v3 = vld [vmem:[%s7504_s0 + $0x4c] ss:$108 sps:$4 sm:$0xff]  }
  0x71   :  { %3812 = vmatprep.subr.bf16.mxu0 %v5247_v5  ;;  %v5320_v4 = vld [vmem:[%s7503_s1 + $0x270] ss:$8 sps:$4 sm:$0xff]  }
  0x72   :  { %v5323_v5 = vld [vmem:[%s7503_s1 + $0x970] ss:$8 sps:$4 sm:$0xff]  }
  0x73   :  { %3316 = vmatpush1.bf16.msra.mxu1 %v5240_v6  ;;  %v5328_v6 = vld [vmem:[%s7503_s1 + $0x284] ss:$8 sps:$4 sm:$0xff]  }
  0x74   :  { %3813 = vmatpush1.bf16.msra.mxu0 %v5245_v7  ;;  %3317 = vmatprep.subr.bf16.mxu1 %v5252_v8  ;;  %v5331_v7 = vld [vmem:[%s7503_s1 + $0x984] ss:$8 sps:$4 sm:$0xff]   ;;  %v5326_v8 = vld [vmem:[%s7503_s1 + $0x280] ss:$8 sps:$4 sm:$0xff]  }
  0x75   :  { %3814 = vmatprep.subr.bf16.mxu0 %v5255_v9  ;;  %v5329_v9 = vld [vmem:[%s7503_s1 + $0x980] ss:$8 sps:$4 sm:$0xff]  }
  0x77   :  { %3318 = vmatpush1.bf16.msra.mxu1 %v5250_v10  ;;  %v5334_v10 = vld [vmem:[%s7503_s1 + $0x294] ss:$8 sps:$4 sm:$0xff]  }
  0x78   :  { %3815 = vmatpush1.bf16.msra.mxu0 %v5253_v11  ;;  %3319 = vmatprep.subr.bf16.mxu1 %v5259_v12  ;;  %v5337_v11 = vld [vmem:[%s7503_s1 + $0x994] ss:$8 sps:$4 sm:$0xff]   ;;  %v5332_v12 = vld [vmem:[%s7503_s1 + $0x290] ss:$8 sps:$4 sm:$0xff]  }
  0x79   :  { %3816 = vmatprep.subr.bf16.mxu0 %v5263_v13  ;;  %v5335_v13 = vld [vmem:[%s7503_s1 + $0x990] ss:$8 sps:$4 sm:$0xff]  }
  0x7b   :  { %3320 = vmatpush1.bf16.msra.mxu1 %v5257_v14  ;;  %v5342_v14 = vld [vmem:[%s7503_s1 + $0x2a4] ss:$8 sps:$4 sm:$0xff]  }
  0x7c   :  { %3817 = vmatpush1.bf16.msra.mxu0 %v5261_v15  ;;  %3321 = vmatprep.subr.bf16.mxu1 %v5268_v16  ;;  %v5347_v15 = vld [vmem:[%s7503_s1 + $0x9a4] ss:$8 sps:$4 sm:$0xff]   ;;  %v5340_v16 = vld [vmem:[%s7503_s1 + $0x2a0] ss:$8 sps:$4 sm:$0xff]  }
  0x7d   :  { %3818 = vmatprep.subr.bf16.mxu0 %v5271_v17  ;;  %v5345_v17 = vld [vmem:[%s7503_s1 + $0x9a0] ss:$8 sps:$4 sm:$0xff]  }
  0x7f   :  { %3322 = vmatpush1.bf16.msra.mxu1 %v5266_v18  ;;  %v5352_v18 = vld [vmem:[%s7503_s1 + $0x2b4] ss:$8 sps:$4 sm:$0xff]  }
  0x80   :  { %3819 = vmatpush1.bf16.msra.mxu0 %v5269_v19  ;;  %3362 = vmatprep.subr.bf16.mxu1 %v5277_v20  ;;  %v5355_v19 = vld [vmem:[%s7503_s1 + $0x9b4] ss:$8 sps:$4 sm:$0xff]   ;;  %v5350_v20 = vld [vmem:[%s7503_s1 + $0x2b0] ss:$8 sps:$4 sm:$0xff]  }
  0x81   :  { %3859 = vmatprep.subr.bf16.mxu0 %v5283_v21  ;;  %v5353_v21 = vld [vmem:[%s7503_s1 + $0x9b0] ss:$8 sps:$4 sm:$0xff]  }
  0x82   :  { %3324 = vmatmul.mubr.bf16.vlgmr.msra.gmra.mrb[0].mxu1 %v5272_v22  ;;  %v5360_v22 = vld [vmem:[%s7503_s1 + $0x2c4] ss:$8 sps:$4 sm:$0xff]  }
  0x83   :  { %3821 = vmatmul.mubr.bf16.vlgmr.msra.gmra.mrb[0].mxu0 %v5278_v24  ;;  %3363 = vmatpush1.bf16.msra.mxu1 %v5275_v23  ;;  %v5365_v23 = vld [vmem:[%s7503_s1 + $0x9c4] ss:$8 sps:$4 sm:$0xff]   ;;  %v5358_v24 = vld [vmem:[%s7503_s1 + $0x2c0] ss:$8 sps:$4 sm:$0xff]  }
  0x84   :  { %3860 = vmatpush1.bf16.msra.mxu0 %v5281_v25  ;;  %3364 = vmatprep.subr.bf16.mxu1 %v5286_v26  ;;  %v5363_v25 = vld [vmem:[%s7503_s1 + $0x9c0] ss:$8 sps:$4 sm:$0xff]   ;;  %v5370_v26 = vld [vmem:[%s7503_s1 + $0x2d4] ss:$8 sps:$4 sm:$0xff]  }
  0x85   :  { %3861 = vmatprep.subr.bf16.mxu0 %v5289_v27  ;;  %3333 = vmatprep.mubr.bf16.mxu1 %v5338_v28  ;;  %v5373_v27 = vld [vmem:[%s7503_s1 + $0x9d4] ss:$8 sps:$4 sm:$0xff]   ;;  %v5368_v28 = vld [vmem:[%s7503_s1 + $0x2d0] ss:$8 sps:$4 sm:$0xff]  }
  0x86   :  { %3830 = vmatprep.mubr.bf16.mxu0 %v5343_v29  ;;  %v5371_v29 = vld [vmem:[%s7503_s1 + $0x9d0] ss:$8 sps:$4 sm:$0xff]  }
  0x87   :  { %3365 = vmatpush1.bf16.msra.mxu1 %v5284_v30  ;;  %v5377_v30 = vld [vmem:[%s7503_s1 + $0x2e4] ss:$8 sps:$4 sm:$0xff]  }
  0x88   :  { %3862 = vmatpush1.bf16.msra.mxu0 %v5287_v31  ;;  %3366 = vmatprep.subr.bf16.mxu1 %v5292_v32  ;;  %v5381_v31 = vld [vmem:[%s7503_s1 + $0x9e4] ss:$8 sps:$4 sm:$0xff]   ;;  %v5375_v32 = vld [vmem:[%s7503_s1 + $0x2e0] ss:$8 sps:$4 sm:$0xff]  }
  0x89   :  { %3863 = vmatprep.subr.bf16.mxu0 %v5295_v33  ;;  %v5379_v33 = vld [vmem:[%s7503_s1 + $0x9e0] ss:$8 sps:$4 sm:$0xff]  }
  0x8a   :  { %3334 = vmatmul.mubr.bf16.gmra.mrb[4].mxu1 %v5348_v35  ;;  %v5389_v35 = vld [vmem:[%s7503_s1 + $0x9f4] ss:$8 sps:$4 sm:$0xff]  }
  0x8b   :  { %3831 = vmatmul.mubr.bf16.gmra.mrb[4].mxu0 %v5349_v36  ;;  %3367 = vmatpush1.bf16.msra.mxu1 %v5290_v34  ;;  %v5386_v34 = vld [vmem:[%s7503_s1 + $0x2f4] ss:$8 sps:$4 sm:$0xff]   ;;  %v5384_v36 = vld [vmem:[%s7503_s1 + $0x2f0] ss:$8 sps:$4 sm:$0xff]  }
  0x8c   :  { %3864 = vmatpush1.bf16.msra.mxu0 %v5293_v37  ;;  %3368 = vmatprep.subr.bf16.mxu1 %v5298_v38  ;;  %v5387_v37 = vld [vmem:[%s7503_s1 + $0x9f0] ss:$8 sps:$4 sm:$0xff]   ;;  %v5395_v38 = vld [vmem:[%s7503_s1 + $0x304] ss:$8 sps:$4 sm:$0xff]  }
  0x8d   :  { %3865 = vmatprep.subr.bf16.mxu0 %v5301_v39  ;;  %3343 = vmatprep.mubr.bf16.mxu1 %v5356_v40  ;;  %v5401_v39 = vld [vmem:[%s7503_s1 + $0xa04] ss:$8 sps:$4 sm:$0xff]   ;;  %v5390_v40 = vld [vmem:[%s7504_s0 + $0x10] ss:$108 sps:$4 sm:$0xff]  }
  0x8e   :  { %3840 = vmatprep.mubr.bf16.mxu0 %v5361_v41  ;;  %v5393_v41 = vld [vmem:[%s7503_s1 + $0x300] ss:$8 sps:$4 sm:$0xff]  }
  0x8f   :  { %3369 = vmatpush1.bf16.msra.mxu1 %v5296_v42  ;;  %v5396_v42 = vld [vmem:[%s7504_s0 + $0x48] ss:$108 sps:$4 sm:$0xff]  }
  0x90   :  { %3866 = vmatpush1.bf16.msra.mxu0 %v5299_v43  ;;  %3370 = vmatprep.subr.bf16.mxu1 %v5304_v44  ;;  %v5399_v43 = vld [vmem:[%s7503_s1 + $0xa00] ss:$8 sps:$4 sm:$0xff]   ;;  %v5404_v44 = vld [vmem:[%s7503_s1 + $0x314] ss:$8 sps:$4 sm:$0xff]  }
  0x91   :  { %3867 = vmatprep.subr.bf16.mxu0 %v5307_v45  ;;  %v5407_v45 = vld [vmem:[%s7503_s1 + $0xa14] ss:$8 sps:$4 sm:$0xff]  }
  0x92   :  { %3344 = vmatmul.mubr.bf16.gmra.mrb[8].mxu1 %v5366_v48  ;;  %v5402_v48 = vld [vmem:[%s7503_s1 + $0x310] ss:$8 sps:$4 sm:$0xff]  }
  0x93   :  { %3841 = vmatmul.mubr.bf16.gmra.mrb[8].mxu0 %v5367_v49  ;;  %3371 = vmatpush1.bf16.msra.mxu1 %v5302_v46  ;;  %v5456_v46 = vld [vmem:[%s7504_s0 + $0xec] ss:$108 sps:$4 sm:$0xff]  }
  0x94   :  { %3868 = vmatpush1.bf16.msra.mxu0 %v5305_v47  ;;  %3372 = vmatprep.subr.bf16.mxu1 %v5310_v52  ;;  %v5461_v47 = vld [vmem:[%s7504_s0 + $0x124] ss:$108 sps:$4 sm:$0xff]   ;;  %v5408_v52 = vld [vmem:[%s7503_s1 + $0x320] ss:$8 sps:$4 sm:$0xff]  }
  0x95   :  { %3869 = vmatprep.subr.bf16.mxu0 %v5313_v53  ;;  %3353 = vmatprep.mubr.bf16.mxu1 %v4367_v54  ;;  %v5405_v49 = vld [vmem:[%s7503_s1 + $0xa10] ss:$8 sps:$4 sm:$0xff]   ;;  %v5466_v53 = vld [vmem:[%s7504_s0 + $0xe8] ss:$108 sps:$4 sm:$0xff]   ;;  %v5467_v54 = vld [vmem:[%s7504_s0 + $0x120] ss:$108 sps:$4 sm:$0xff]  }
  0x96   :  { %3850 = vmatprep.mubr.bf16.mxu0 %v4381_v55  ;;  %v5411_v55 = vld [vmem:[%s7503_s1 + $0xa20] ss:$8 sps:$4 sm:$0xff]  }
  0x97   :  { %3373 = vmatpush1.bf16.msra.mxu1 %v5308_v56  ;;  %v5416_v56 = vld [vmem:[%s7503_s1 + $0x334] ss:$8 sps:$4 sm:$0xff]  }
  0x98   :  { %3870 = vmatpush1.bf16.msra.mxu0 %v5311_v57  ;;  %3374 = vmatprep.subr.bf16.mxu1 %v5316_v58  ;;  %v5419_v57 = vld [vmem:[%s7503_s1 + $0xa34] ss:$8 sps:$4 sm:$0xff]   ;;  %v5474_v58 = vld [vmem:[%s7504_s0 + $0x1c4] ss:$108 sps:$4 sm:$0xff]  }
  0x99   :  { %3871 = vmatprep.subr.bf16.mxu0 %v5319_v59  ;;  %v5414_v59 = vld [vmem:[%s7503_s1 + $0x330] ss:$8 sps:$4 sm:$0xff]  }
  0x9a   :  { %3354 = vmatmul.mubr.bf16.gmra.mrb[12].mxu1 %v4366_v62  ;;  %v5422_v62 = vld [vmem:[%s7503_s1 + $0x344] ss:$8 sps:$4 sm:$0xff]  }
  0x9b   :  { %3851 = vmatmul.mubr.bf16.gmra.mrb[12].mxu0 %v4380_v63  ;;  %3375 = vmatpush1.bf16.msra.mxu1 %v5314_v60  ;;  %v5479_v60 = vld [vmem:[%s7504_s0 + $0x1fc] ss:$108 sps:$4 sm:$0xff]   ;;  %v5425_v63 = vld [vmem:[%s7503_s1 + $0xa44] ss:$8 sps:$4 sm:$0xff]  }
  0x9c   :  { %3872 = vmatpush1.bf16.msra.mxu0 %v5317_v61  ;;  %3376 = vmatprep.subr.bf16.mxu1 %v5322_v0  ;;  %v5417_v61 = vld [vmem:[%s7503_s1 + $0xa30] ss:$8 sps:$4 sm:$0xff]   ;;  %v5484_v0 = vld [vmem:[%s7504_s0 + $0x1c0] ss:$108 sps:$4 sm:$0xff]  }
  0x9d   :  { %3873 = vmatprep.subr.bf16.mxu0 %v5325_v1  ;;  %3394 = vmatprep.mubr.bf16.mxu1 %v5392_v2  ;;  %v5485_v1 = vld [vmem:[%s7504_s0 + $0x1f8] ss:$108 sps:$4 sm:$0xff]  }
  0x9e   :  { %3891 = vmatprep.mubr.bf16.mxu0 %v5398_v3  ;;  %v101_v2 = vld [vmem:[%s7504_s0 + $0x298] sm:$0x11]  ;;  %v108_v3 = vld [vmem:[%s7504_s0 + $0x2d0] sm:$0x11] }
  0x9f   :  { %3377 = vmatpush1.bf16.msra.mxu1 %v5320_v4  ;;  %v5420_v4 = vld [vmem:[%s7503_s1 + $0x340] ss:$8 sps:$4 sm:$0xff]  }
  0xa0   :  { %3874 = vmatpush1.bf16.msra.mxu0 %v5323_v5  ;;  %3378 = vmatprep.subr.bf16.mxu1 %v5328_v6  ;;  %v5423_v5 = vld [vmem:[%s7503_s1 + $0xa40] ss:$8 sps:$4 sm:$0xff]   ;;  %v5428_v6 = vld [vmem:[%s7503_s1 + $0x354] ss:$8 sps:$4 sm:$0xff]  }
  0xa1   :  { %3875 = vmatprep.subr.bf16.mxu0 %v5331_v7  ;;  %v5431_v7 = vld [vmem:[%s7503_s1 + $0xa54] ss:$8 sps:$4 sm:$0xff]  }
  0xa3   :  { %3379 = vmatpush1.bf16.msra.mxu1 %v5326_v8  ;;  %v4369_v8 = vcombine.high %v101_v2, %v101_v2 }
  0xa4   :  { %3876 = vmatpush1.bf16.msra.mxu0 %v5329_v9  ;;  %3380 = vmatprep.subr.bf16.mxu1 %v5334_v10  ;;  %v4383_v9 = vcombine.high %v108_v3, %v108_v3  ;;  %v5426_v10 = vld [vmem:[%s7503_s1 + $0x350] ss:$8 sps:$4 sm:$0xff]  }
  0xa5   :  { %3877 = vmatprep.subr.bf16.mxu0 %v5337_v11  ;;  %v5429_v11 = vld [vmem:[%s7503_s1 + $0xa50] ss:$8 sps:$4 sm:$0xff]  }
  0xa7   :  { %3381 = vmatpush1.bf16.msra.mxu1 %v5332_v12  ;;  %v5434_v12 = vld [vmem:[%s7503_s1 + $0x364] ss:$8 sps:$4 sm:$0xff]  }
  0xa8   :  { %3878 = vmatpush1.bf16.msra.mxu0 %v5335_v13  ;;  %3382 = vmatprep.subr.bf16.mxu1 %v5342_v14  ;;  %v5437_v13 = vld [vmem:[%s7503_s1 + $0xa64] ss:$8 sps:$4 sm:$0xff]   ;;  %v5432_v14 = vld [vmem:[%s7503_s1 + $0x360] ss:$8 sps:$4 sm:$0xff]  }
  0xa9   :  { %3879 = vmatprep.subr.bf16.mxu0 %v5347_v15  ;;  %v4368_v15 = vcombine.low %v101_v2, %v101_v2  ;;  %v5520_v2 = vld [vmem:[%s7503_s1 + $0x410] ss:$8 sps:$4 sm:$0xff]  }
  0xab   :  { %3383 = vmatpush1.bf16.msra.mxu1 %v5340_v16  ;;  %v4382_v16 = vcombine.low %v108_v3, %v108_v3  ;;  %v5523_v3 = vld [vmem:[%s7503_s1 + $0xb10] ss:$8 sps:$4 sm:$0xff]  }
  0xac   :  { %3880 = vmatpush1.bf16.msra.mxu0 %v5345_v17  ;;  %3384 = vmatprep.subr.bf16.mxu1 %v5352_v18  ;;  %v5435_v17 = vld [vmem:[%s7503_s1 + $0xa60] ss:$8 sps:$4 sm:$0xff]   ;;  %v5440_v18 = vld [vmem:[%s7503_s1 + $0x374] ss:$8 sps:$4 sm:$0xff]  }
  0xad   :  { %3881 = vmatprep.subr.bf16.mxu0 %v5355_v19  ;;  %v5443_v19 = vld [vmem:[%s7503_s1 + $0xa74] ss:$8 sps:$4 sm:$0xff]  }
  0xaf   :  { %3385 = vmatpush1.bf16.msra.mxu1 %v5350_v20  ;;  %v5510_v20 = vld [vmem:[%s7504_s0 + $0x1c] ss:$108 sps:$4 sm:$0xff]  }
  0xb0   :  { %3882 = vmatpush1.bf16.msra.mxu0 %v5353_v21  ;;  %3386 = vmatprep.subr.bf16.mxu1 %v5360_v22  ;;  %v5516_v21 = vld [vmem:[%s7504_s0 + $0x54] ss:$108 sps:$4 sm:$0xff]   ;;  %v5438_v22 = vld [vmem:[%s7503_s1 + $0x370] ss:$8 sps:$4 sm:$0xff]  }
  0xb1   :  { %3883 = vmatprep.subr.bf16.mxu0 %v5365_v23  ;;  %v5441_v23 = vld [vmem:[%s7503_s1 + $0xa70] ss:$8 sps:$4 sm:$0xff]  }
  0xb3   :  { %3387 = vmatpush1.bf16.msra.mxu1 %v5358_v24  ;;  %v5446_v24 = vld [vmem:[%s7503_s1 + $0x384] ss:$8 sps:$4 sm:$0xff]  }
  0xb4   :  { %3884 = vmatpush1.bf16.msra.mxu0 %v5363_v25  ;;  %3388 = vmatprep.subr.bf16.mxu1 %v5370_v26  ;;  %v5449_v25 = vld [vmem:[%s7503_s1 + $0xa84] ss:$8 sps:$4 sm:$0xff]   ;;  %v5444_v26 = vld [vmem:[%s7503_s1 + $0x380] ss:$8 sps:$4 sm:$0xff]  }
  0xb5   :  { %3885 = vmatprep.subr.bf16.mxu0 %v5373_v27  ;;  %v5447_v27 = vld [vmem:[%s7503_s1 + $0xa80] ss:$8 sps:$4 sm:$0xff]  }
  0xb7   :  { %3389 = vmatpush1.bf16.msra.mxu1 %v5368_v28  ;;  %v5452_v28 = vld [vmem:[%s7503_s1 + $0x394] ss:$8 sps:$4 sm:$0xff]  }
  0xb8   :  { %3886 = vmatpush1.bf16.msra.mxu0 %v5371_v29  ;;  %3390 = vmatprep.subr.bf16.mxu1 %v5377_v30  ;;  %v5455_v29 = vld [vmem:[%s7503_s1 + $0xa94] ss:$8 sps:$4 sm:$0xff]   ;;  %v5450_v30 = vld [vmem:[%s7503_s1 + $0x390] ss:$8 sps:$4 sm:$0xff]  }
  0xb9   :  { %3887 = vmatprep.subr.bf16.mxu0 %v5381_v31  ;;  %v5453_v31 = vld [vmem:[%s7503_s1 + $0xa90] ss:$8 sps:$4 sm:$0xff]  }
  0xbb   :  { %3391 = vmatpush1.bf16.msra.mxu1 %v5375_v32  ;;  %v5460_v32 = vld [vmem:[%s7503_s1 + $0x3a4] ss:$8 sps:$4 sm:$0xff]  }
  0xbc   :  { %3888 = vmatpush1.bf16.msra.mxu0 %v5379_v33  ;;  %3392 = vmatprep.subr.bf16.mxu1 %v5386_v34  ;;  %v5465_v33 = vld [vmem:[%s7503_s1 + $0xaa4] ss:$8 sps:$4 sm:$0xff]   ;;  %v5458_v34 = vld [vmem:[%s7503_s1 + $0x3a0] ss:$8 sps:$4 sm:$0xff]  }
  0xbd   :  { %3889 = vmatprep.subr.bf16.mxu0 %v5389_v35  ;;  %v5463_v35 = vld [vmem:[%s7503_s1 + $0xaa0] ss:$8 sps:$4 sm:$0xff]  }
  0xbf   :  { %3393 = vmatpush1.bf16.msra.mxu1 %v5384_v36  ;;  %v5470_v36 = vld [vmem:[%s7503_s1 + $0x3b4] ss:$8 sps:$4 sm:$0xff]  }
  0xc0   :  { %3890 = vmatpush1.bf16.msra.mxu0 %v5387_v37  ;;  %3433 = vmatprep.subr.bf16.mxu1 %v5395_v38  ;;  %v5473_v37 = vld [vmem:[%s7503_s1 + $0xab4] ss:$8 sps:$4 sm:$0xff]   ;;  %v5468_v38 = vld [vmem:[%s7503_s1 + $0x3b0] ss:$8 sps:$4 sm:$0xff]  }
  0xc1   :  { %3930 = vmatprep.subr.bf16.mxu0 %v5401_v39  ;;  %v5471_v39 = vld [vmem:[%s7503_s1 + $0xab0] ss:$8 sps:$4 sm:$0xff]  }
  0xc2   :  { %3395 = vmatmul.mubr.bf16.vlgmr.msra.gmra.mrb[0].mxu1 %v5390_v40  ;;  %v5478_v40 = vld [vmem:[%s7503_s1 + $0x3c4] ss:$8 sps:$4 sm:$0xff]  }
  0xc3   :  { %3892 = vmatmul.mubr.bf16.vlgmr.msra.gmra.mrb[0].mxu0 %v5396_v42  ;;  %3434 = vmatpush1.bf16.msra.mxu1 %v5393_v41  ;;  %v5483_v41 = vld [vmem:[%s7503_s1 + $0xac4] ss:$8 sps:$4 sm:$0xff]   ;;  %v5476_v42 = vld [vmem:[%s7503_s1 + $0x3c0] ss:$8 sps:$4 sm:$0xff]  }
  0xc4   :  { %3931 = vmatpush1.bf16.msra.mxu0 %v5399_v43  ;;  %3435 = vmatprep.subr.bf16.mxu1 %v5404_v44  ;;  %v5481_v43 = vld [vmem:[%s7503_s1 + $0xac0] ss:$8 sps:$4 sm:$0xff]   ;;  %v5488_v44 = vld [vmem:[%s7503_s1 + $0x3d4] ss:$8 sps:$4 sm:$0xff]  }
  0xc5   :  { %3932 = vmatprep.subr.bf16.mxu0 %v5407_v45  ;;  %3404 = vmatprep.mubr.bf16.mxu1 %v5456_v46  ;;  %v5491_v45 = vld [vmem:[%s7503_s1 + $0xad4] ss:$8 sps:$4 sm:$0xff]   ;;  %v5486_v46 = vld [vmem:[%s7503_s1 + $0x3d0] ss:$8 sps:$4 sm:$0xff]  }
  0xc6   :  { %3901 = vmatprep.mubr.bf16.mxu0 %v5461_v47  ;;  %v5489_v47 = vld [vmem:[%s7503_s1 + $0xad0] ss:$8 sps:$4 sm:$0xff]  }
  0xc7   :  { %3436 = vmatpush1.bf16.msra.mxu1 %v5402_v48  ;;  %v5495_v48 = vld [vmem:[%s7503_s1 + $0x3e4] ss:$8 sps:$4 sm:$0xff]  }
  0xc8   :  { %3933 = vmatpush1.bf16.msra.mxu0 %v5405_v49  ;;  %3437 = vmatprep.subr.bf16.mxu1 %v5410_v50  ;;  %v5499_v49 = vld [vmem:[%s7503_s1 + $0xae4] ss:$8 sps:$4 sm:$0xff]   ;;  %v5493_v50 = vld [vmem:[%s7503_s1 + $0x3e0] ss:$8 sps:$4 sm:$0xff]  }
  0xc9   :  { %3934 = vmatprep.subr.bf16.mxu0 %v5413_v51  ;;  %v5497_v51 = vld [vmem:[%s7503_s1 + $0xae0] ss:$8 sps:$4 sm:$0xff]  }
  0xca   :  { %3405 = vmatmul.mubr.bf16.gmra.mrb[4].mxu1 %v5466_v53  ;;  %v5507_v53 = vld [vmem:[%s7503_s1 + $0xaf4] ss:$8 sps:$4 sm:$0xff]  }
  0xcb   :  { %3902 = vmatmul.mubr.bf16.gmra.mrb[4].mxu0 %v5467_v54  ;;  %3438 = vmatpush1.bf16.msra.mxu1 %v5408_v52  ;;  %v5504_v52 = vld [vmem:[%s7503_s1 + $0x3f4] ss:$8 sps:$4 sm:$0xff]   ;;  %v5502_v54 = vld [vmem:[%s7503_s1 + $0x3f0] ss:$8 sps:$4 sm:$0xff]  }
  0xcc   :  { %3935 = vmatpush1.bf16.msra.mxu0 %v5411_v55  ;;  %3439 = vmatprep.subr.bf16.mxu1 %v5416_v56  ;;  %v5505_v55 = vld [vmem:[%s7503_s1 + $0xaf0] ss:$8 sps:$4 sm:$0xff]   ;;  %v5513_v56 = vld [vmem:[%s7503_s1 + $0x404] ss:$8 sps:$4 sm:$0xff]  }
  0xcd   :  { %3936 = vmatprep.subr.bf16.mxu0 %v5419_v57  ;;  %3414 = vmatprep.mubr.bf16.mxu1 %v5474_v58  ;;  %v5519_v57 = vld [vmem:[%s7503_s1 + $0xb04] ss:$8 sps:$4 sm:$0xff]  }
  0xce   :  { %3911 = vmatprep.mubr.bf16.mxu0 %v5479_v60  ;;  %v5508_v58 = vld [vmem:[%s7504_s0 + $0x18] ss:$108 sps:$4 sm:$0xff]   ;;  %v5514_v60 = vld [vmem:[%s7504_s0 + $0x50] ss:$108 sps:$4 sm:$0xff]  }
  0xcf   :  { %3440 = vmatpush1.bf16.msra.mxu1 %v5414_v59  ;;  %v5511_v59 = vld [vmem:[%s7503_s1 + $0x400] ss:$8 sps:$4 sm:$0xff]  }
  0xd0   :  { %3937 = vmatpush1.bf16.msra.mxu0 %v5417_v61  ;;  %3441 = vmatprep.subr.bf16.mxu1 %v5422_v62  ;;  %v5517_v61 = vld [vmem:[%s7503_s1 + $0xb00] ss:$8 sps:$4 sm:$0xff]   ;;  %v5522_v62 = vld [vmem:[%s7503_s1 + $0x414] ss:$8 sps:$4 sm:$0xff]  }
  0xd1   :  { %3938 = vmatprep.subr.bf16.mxu0 %v5425_v63  ;;  %v5525_v63 = vld [vmem:[%s7503_s1 + $0xb14] ss:$8 sps:$4 sm:$0xff]  }
  0xd2   :  { %3415 = vmatmul.mubr.bf16.gmra.mrb[8].mxu1 %v5484_v0  ;;  %v5574_v0 = vld [vmem:[%s7504_s0 + $0xf4] ss:$108 sps:$4 sm:$0xff]  }
  0xd3   :  { %3912 = vmatmul.mubr.bf16.gmra.mrb[8].mxu0 %v5485_v1  ;;  %3442 = vmatpush1.bf16.msra.mxu1 %v5420_v4  ;;  %v5579_v1 = vld [vmem:[%s7504_s0 + $0x12c] ss:$108 sps:$4 sm:$0xff]  }
  0xd4   :  { %3939 = vmatpush1.bf16.msra.mxu0 %v5423_v5  ;;  %3443 = vmatprep.subr.bf16.mxu1 %v5428_v6  ;;  %v5528_v4 = vld [vmem:[%s7503_s1 + $0x424] ss:$8 sps:$4 sm:$0xff]   ;;  %v5526_v6 = vld [vmem:[%s7503_s1 + $0x420] ss:$8 sps:$4 sm:$0xff]  }
  0xd5   :  { %3940 = vmatprep.subr.bf16.mxu0 %v5431_v7  ;;  %3424 = vmatprep.mubr.bf16.mxu1 %v4369_v8  ;;  %v5531_v5 = vld [vmem:[%s7503_s1 + $0xb24] ss:$8 sps:$4 sm:$0xff]   ;;  %v5529_v7 = vld [vmem:[%s7503_s1 + $0xb20] ss:$8 sps:$4 sm:$0xff]   ;;  %v5584_v8 = vld [vmem:[%s7504_s0 + $0xf0] ss:$108 sps:$4 sm:$0xff]  }
  0xd6   :  { %3921 = vmatprep.mubr.bf16.mxu0 %v4383_v9  ;;  %v5585_v9 = vld [vmem:[%s7504_s0 + $0x128] ss:$108 sps:$4 sm:$0xff]  }
  0xd7   :  { %3444 = vmatpush1.bf16.msra.mxu1 %v5426_v10  ;;  %v5534_v10 = vld [vmem:[%s7503_s1 + $0x434] ss:$8 sps:$4 sm:$0xff]  }
  0xd8   :  { %3941 = vmatpush1.bf16.msra.mxu0 %v5429_v11  ;;  %3445 = vmatprep.subr.bf16.mxu1 %v5434_v12  ;;  %v5537_v11 = vld [vmem:[%s7503_s1 + $0xb34] ss:$8 sps:$4 sm:$0xff]   ;;  %v5592_v12 = vld [vmem:[%s7504_s0 + $0x1cc] ss:$108 sps:$4 sm:$0xff]  }
  0xd9   :  { %3942 = vmatprep.subr.bf16.mxu0 %v5437_v13  ;;  %v5597_v13 = vld [vmem:[%s7504_s0 + $0x204] ss:$108 sps:$4 sm:$0xff]  }
  0xda   :  { %3425 = vmatmul.mubr.bf16.gmra.mrb[12].mxu1 %v4368_v15  ;;  %v5535_v15 = vld [vmem:[%s7503_s1 + $0xb30] ss:$8 sps:$4 sm:$0xff]  }
  0xdb   :  { %3922 = vmatmul.mubr.bf16.gmra.mrb[12].mxu0 %v4382_v16  ;;  %3446 = vmatpush1.bf16.msra.mxu1 %v5432_v14  ;;  %v5532_v14 = vld [vmem:[%s7503_s1 + $0x430] ss:$8 sps:$4 sm:$0xff]   ;;  %v5540_v16 = vld [vmem:[%s7503_s1 + $0x444] ss:$8 sps:$4 sm:$0xff]  }
  0xdc   :  { %3943 = vmatpush1.bf16.msra.mxu0 %v5435_v17  ;;  %3447 = vmatprep.subr.bf16.mxu1 %v5440_v18  ;;  %v5543_v17 = vld [vmem:[%s7503_s1 + $0xb44] ss:$8 sps:$4 sm:$0xff]   ;;  %v5538_v18 = vld [vmem:[%s7503_s1 + $0x440] ss:$8 sps:$4 sm:$0xff]  }
  0xdd   :  { %3944 = vmatprep.subr.bf16.mxu0 %v5443_v19  ;;  %3465 = vmatprep.mubr.bf16.mxu1 %v5510_v20  ;;  %v5541_v19 = vld [vmem:[%s7503_s1 + $0xb40] ss:$8 sps:$4 sm:$0xff]  }
  0xde   :  { %3962 = vmatprep.mubr.bf16.mxu0 %v5516_v21  ;;  %v5602_v20 = vld [vmem:[%s7504_s0 + $0x1c8] ss:$108 sps:$4 sm:$0xff]   ;;  %v5603_v21 = vld [vmem:[%s7504_s0 + $0x200] ss:$108 sps:$4 sm:$0xff]  }
  0xdf   :  { %3448 = vmatpush1.bf16.msra.mxu1 %v5438_v22  ;;  %v102_v22 = vld [vmem:[%s7504_s0 + $0x2a0] sm:$0x11] }
  0xe0   :  { %3945 = vmatpush1.bf16.msra.mxu0 %v5441_v23  ;;  %3449 = vmatprep.subr.bf16.mxu1 %v5446_v24  ;;  %v109_v23 = vld [vmem:[%s7504_s0 + $0x2d8] sm:$0x11] }
  0xe1   :  { %3946 = vmatprep.subr.bf16.mxu0 %v5449_v25  ;;  %v5546_v24 = vld [vmem:[%s7503_s1 + $0x454] ss:$8 sps:$4 sm:$0xff]  }
  0xe2   :  { %v5549_v25 = vld [vmem:[%s7503_s1 + $0xb54] ss:$8 sps:$4 sm:$0xff]  }
  0xe3   :  { %3450 = vmatpush1.bf16.msra.mxu1 %v5444_v26  ;;  %v4371_v26 = vcombine.high %v102_v22, %v102_v22 }
  0xe4   :  { %3947 = vmatpush1.bf16.msra.mxu0 %v5447_v27  ;;  %3451 = vmatprep.subr.bf16.mxu1 %v5452_v28  ;;  %v4385_v27 = vcombine.high %v109_v23, %v109_v23  ;;  %v5544_v28 = vld [vmem:[%s7503_s1 + $0x450] ss:$8 sps:$4 sm:$0xff]  }
  0xe5   :  { %3948 = vmatprep.subr.bf16.mxu0 %v5455_v29  ;;  %v5547_v29 = vld [vmem:[%s7503_s1 + $0xb50] ss:$8 sps:$4 sm:$0xff]  }
  0xe7   :  { %3452 = vmatpush1.bf16.msra.mxu1 %v5450_v30  ;;  %v5552_v30 = vld [vmem:[%s7503_s1 + $0x464] ss:$8 sps:$4 sm:$0xff]  }
  0xe8   :  { %3949 = vmatpush1.bf16.msra.mxu0 %v5453_v31  ;;  %3453 = vmatprep.subr.bf16.mxu1 %v5460_v32  ;;  %v5555_v31 = vld [vmem:[%s7503_s1 + $0xb64] ss:$8 sps:$4 sm:$0xff]   ;;  %v4370_v32 = vcombine.low %v102_v22, %v102_v22 }
  0xe9   :  { %3950 = vmatprep.subr.bf16.mxu0 %v5465_v33  ;;  %v4384_v33 = vcombine.low %v109_v23, %v109_v23  ;;  %v5646_v22 = vld [vmem:[%s7503_s1 + $0x524] ss:$8 sps:$4 sm:$0xff]  }
  0xea   :  { %v5649_v23 = vld [vmem:[%s7503_s1 + $0xc24] ss:$8 sps:$4 sm:$0xff]  }
  0xeb   :  { %3454 = vmatpush1.bf16.msra.mxu1 %v5458_v34  ;;  %v5550_v34 = vld [vmem:[%s7503_s1 + $0x460] ss:$8 sps:$4 sm:$0xff]  }
  0xec   :  { %3951 = vmatpush1.bf16.msra.mxu0 %v5463_v35  ;;  %3455 = vmatprep.subr.bf16.mxu1 %v5470_v36  ;;  %v5553_v35 = vld [vmem:[%s7503_s1 + $0xb60] ss:$8 sps:$4 sm:$0xff]   ;;  %v5558_v36 = vld [vmem:[%s7503_s1 + $0x474] ss:$8 sps:$4 sm:$0xff]  }
  0xed   :  { %3952 = vmatprep.subr.bf16.mxu0 %v5473_v37  ;;  %v5561_v37 = vld [vmem:[%s7503_s1 + $0xb74] ss:$8 sps:$4 sm:$0xff]  }
  0xef   :  { %3456 = vmatpush1.bf16.msra.mxu1 %v5468_v38  ;;  %v5628_v38 = vld [vmem:[%s7504_s0 + $0x24] ss:$108 sps:$4 sm:$0xff]  }
  0xf0   :  { %3953 = vmatpush1.bf16.msra.mxu0 %v5471_v39  ;;  %3457 = vmatprep.subr.bf16.mxu1 %v5478_v40  ;;  %v5634_v39 = vld [vmem:[%s7504_s0 + $0x5c] ss:$108 sps:$4 sm:$0xff]   ;;  %v5556_v40 = vld [vmem:[%s7503_s1 + $0x470] ss:$8 sps:$4 sm:$0xff]  }
  0xf1   :  { %3954 = vmatprep.subr.bf16.mxu0 %v5483_v41  ;;  %v5559_v41 = vld [vmem:[%s7503_s1 + $0xb70] ss:$8 sps:$4 sm:$0xff]  }
  0xf3   :  { %3458 = vmatpush1.bf16.msra.mxu1 %v5476_v42  ;;  %v5564_v42 = vld [vmem:[%s7503_s1 + $0x484] ss:$8 sps:$4 sm:$0xff]  }
  0xf4   :  { %3955 = vmatpush1.bf16.msra.mxu0 %v5481_v43  ;;  %3459 = vmatprep.subr.bf16.mxu1 %v5488_v44  ;;  %v5567_v43 = vld [vmem:[%s7503_s1 + $0xb84] ss:$8 sps:$4 sm:$0xff]   ;;  %v5562_v44 = vld [vmem:[%s7503_s1 + $0x480] ss:$8 sps:$4 sm:$0xff]  }
  0xf5   :  { %3956 = vmatprep.subr.bf16.mxu0 %v5491_v45  ;;  %v5565_v45 = vld [vmem:[%s7503_s1 + $0xb80] ss:$8 sps:$4 sm:$0xff]  }
  0xf7   :  { %3460 = vmatpush1.bf16.msra.mxu1 %v5486_v46  ;;  %v5570_v46 = vld [vmem:[%s7503_s1 + $0x494] ss:$8 sps:$4 sm:$0xff]  }
  0xf8   :  { %3957 = vmatpush1.bf16.msra.mxu0 %v5489_v47  ;;  %3461 = vmatprep.subr.bf16.mxu1 %v5495_v48  ;;  %v5573_v47 = vld [vmem:[%s7503_s1 + $0xb94] ss:$8 sps:$4 sm:$0xff]   ;;  %v5568_v48 = vld [vmem:[%s7503_s1 + $0x490] ss:$8 sps:$4 sm:$0xff]  }
  0xf9   :  { %3958 = vmatprep.subr.bf16.mxu0 %v5499_v49  ;;  %v5571_v49 = vld [vmem:[%s7503_s1 + $0xb90] ss:$8 sps:$4 sm:$0xff]  }
  0xfb   :  { %3462 = vmatpush1.bf16.msra.mxu1 %v5493_v50  ;;  %v5578_v50 = vld [vmem:[%s7503_s1 + $0x4a4] ss:$8 sps:$4 sm:$0xff]  }
  0xfc   :  { %3959 = vmatpush1.bf16.msra.mxu0 %v5497_v51  ;;  %3463 = vmatprep.subr.bf16.mxu1 %v5504_v52  ;;  %v5583_v51 = vld [vmem:[%s7503_s1 + $0xba4] ss:$8 sps:$4 sm:$0xff]   ;;  %v5576_v52 = vld [vmem:[%s7503_s1 + $0x4a0] ss:$8 sps:$4 sm:$0xff]  }
  0xfd   :  { %3960 = vmatprep.subr.bf16.mxu0 %v5507_v53  ;;  %v5581_v53 = vld [vmem:[%s7503_s1 + $0xba0] ss:$8 sps:$4 sm:$0xff]  }
  0xff   :  { %3464 = vmatpush1.bf16.msra.mxu1 %v5502_v54  ;;  %v5588_v54 = vld [vmem:[%s7503_s1 + $0x4b4] ss:$8 sps:$4 sm:$0xff]  }
 0x100   :  { %3961 = vmatpush1.bf16.msra.mxu0 %v5505_v55  ;;  %3504 = vmatprep.subr.bf16.mxu1 %v5513_v56  ;;  %v5591_v55 = vld [vmem:[%s7503_s1 + $0xbb4] ss:$8 sps:$4 sm:$0xff]   ;;  %v5586_v56 = vld [vmem:[%s7503_s1 + $0x4b0] ss:$8 sps:$4 sm:$0xff]  }
 0x101   :  { %4001 = vmatprep.subr.bf16.mxu0 %v5519_v57  ;;  %v5589_v57 = vld [vmem:[%s7503_s1 + $0xbb0] ss:$8 sps:$4 sm:$0xff]  }
 0x102   :  { %3466 = vmatmul.mubr.bf16.vlgmr.msra.gmra.mrb[0].mxu1 %v5508_v58  ;;  %v5596_v58 = vld [vmem:[%s7503_s1 + $0x4c4] ss:$8 sps:$4 sm:$0xff]  }
 0x103   :  { %3963 = vmatmul.mubr.bf16.vlgmr.msra.gmra.mrb[0].mxu0 %v5514_v60  ;;  %3505 = vmatpush1.bf16.msra.mxu1 %v5511_v59  ;;  %v5601_v59 = vld [vmem:[%s7503_s1 + $0xbc4] ss:$8 sps:$4 sm:$0xff]   ;;  %v5594_v60 = vld [vmem:[%s7503_s1 + $0x4c0] ss:$8 sps:$4 sm:$0xff]  }
 0x104   :  { %4002 = vmatpush1.bf16.msra.mxu0 %v5517_v61  ;;  %3506 = vmatprep.subr.bf16.mxu1 %v5522_v62  ;;  %v5599_v61 = vld [vmem:[%s7503_s1 + $0xbc0] ss:$8 sps:$4 sm:$0xff]   ;;  %v5606_v62 = vld [vmem:[%s7503_s1 + $0x4d4] ss:$8 sps:$4 sm:$0xff]  }
 0x105   :  { %4003 = vmatprep.subr.bf16.mxu0 %v5525_v63  ;;  %3475 = vmatprep.mubr.bf16.mxu1 %v5574_v0  ;;  %v5609_v63 = vld [vmem:[%s7503_s1 + $0xbd4] ss:$8 sps:$4 sm:$0xff]   ;;  %v5604_v0 = vld [vmem:[%s7503_s1 + $0x4d0] ss:$8 sps:$4 sm:$0xff]  }
 0x106   :  { %3972 = vmatprep.mubr.bf16.mxu0 %v5579_v1  ;;  %v5607_v1 = vld [vmem:[%s7503_s1 + $0xbd0] ss:$8 sps:$4 sm:$0xff]  }
 0x107   :  { %3507 = vmatpush1.bf16.msra.mxu1 %v5520_v2  ;;  %v5613_v2 = vld [vmem:[%s7503_s1 + $0x4e4] ss:$8 sps:$4 sm:$0xff]  }
 0x108   :  { %4004 = vmatpush1.bf16.msra.mxu0 %v5523_v3  ;;  %3508 = vmatprep.subr.bf16.mxu1 %v5528_v4  ;;  %v5617_v3 = vld [vmem:[%s7503_s1 + $0xbe4] ss:$8 sps:$4 sm:$0xff]   ;;  %v5611_v4 = vld [vmem:[%s7503_s1 + $0x4e0] ss:$8 sps:$4 sm:$0xff]  }
 0x109   :  { %4005 = vmatprep.subr.bf16.mxu0 %v5531_v5  ;;  %v5615_v5 = vld [vmem:[%s7503_s1 + $0xbe0] ss:$8 sps:$4 sm:$0xff]  }
 0x10a   :  { %3476 = vmatmul.mubr.bf16.gmra.mrb[4].mxu1 %v5584_v8  ;;  %v5620_v8 = vld [vmem:[%s7503_s1 + $0x4f0] ss:$8 sps:$4 sm:$0xff]  }
 0x10b   :  { %3973 = vmatmul.mubr.bf16.gmra.mrb[4].mxu0 %v5585_v9  ;;  %3509 = vmatpush1.bf16.msra.mxu1 %v5526_v6  ;;  %v5622_v6 = vld [vmem:[%s7503_s1 + $0x4f4] ss:$8 sps:$4 sm:$0xff]   ;;  %v5623_v9 = vld [vmem:[%s7503_s1 + $0xbf0] ss:$8 sps:$4 sm:$0xff]  }
 0x10c   :  { %4006 = vmatpush1.bf16.msra.mxu0 %v5529_v7  ;;  %3510 = vmatprep.subr.bf16.mxu1 %v5534_v10  ;;  %v5625_v7 = vld [vmem:[%s7503_s1 + $0xbf4] ss:$8 sps:$4 sm:$0xff]   ;;  %v5626_v10 = vld [vmem:[%s7504_s0 + $0x20] ss:$108 sps:$4 sm:$0xff]  }
 0x10d   :  { %4007 = vmatprep.subr.bf16.mxu0 %v5537_v11  ;;  %3485 = vmatprep.mubr.bf16.mxu1 %v5592_v12  ;;  %v5631_v11 = vld [vmem:[%s7503_s1 + $0x504] ss:$8 sps:$4 sm:$0xff]  }
 0x10e   :  { %3982 = vmatprep.mubr.bf16.mxu0 %v5597_v13  ;;  %v5637_v12 = vld [vmem:[%s7503_s1 + $0xc04] ss:$8 sps:$4 sm:$0xff]   ;;  %v5629_v13 = vld [vmem:[%s7503_s1 + $0x500] ss:$8 sps:$4 sm:$0xff]  }
 0x10f   :  { %3511 = vmatpush1.bf16.msra.mxu1 %v5532_v14  ;;  %v5632_v14 = vld [vmem:[%s7504_s0 + $0x58] ss:$108 sps:$4 sm:$0xff]  }
 0x110   :  { %4008 = vmatpush1.bf16.msra.mxu0 %v5535_v15  ;;  %3512 = vmatprep.subr.bf16.mxu1 %v5540_v16  ;;  %v5635_v15 = vld [vmem:[%s7503_s1 + $0xc00] ss:$8 sps:$4 sm:$0xff]   ;;  %v5640_v16 = vld [vmem:[%s7503_s1 + $0x514] ss:$8 sps:$4 sm:$0xff]  }
 0x111   :  { %4009 = vmatprep.subr.bf16.mxu0 %v5543_v17  ;;  %v5643_v17 = vld [vmem:[%s7503_s1 + $0xc14] ss:$8 sps:$4 sm:$0xff]  }
 0x112   :  { %3486 = vmatmul.mubr.bf16.gmra.mrb[8].mxu1 %v5602_v20  ;;  %v5638_v20 = vld [vmem:[%s7503_s1 + $0x510] ss:$8 sps:$4 sm:$0xff]  }
 0x113   :  { %3983 = vmatmul.mubr.bf16.gmra.mrb[8].mxu0 %v5603_v21  ;;  %3513 = vmatpush1.bf16.msra.mxu1 %v5538_v18  ;;  %v5692_v18 = vld [vmem:[%s7504_s0 + $0x134] ss:$108 sps:$4 sm:$0xff]   ;;  %v5641_v21 = vld [vmem:[%s7503_s1 + $0xc10] ss:$8 sps:$4 sm:$0xff]  }
 0x114   :  { %4010 = vmatpush1.bf16.msra.mxu0 %v5541_v19  ;;  %3514 = vmatprep.subr.bf16.mxu1 %v5546_v24  ;;  %v5694_v19 = vld [vmem:[%s7504_s0 + $0xfc] ss:$108 sps:$4 sm:$0xff]  }
 0x115   :  { %4011 = vmatprep.subr.bf16.mxu0 %v5549_v25  ;;  %3495 = vmatprep.mubr.bf16.mxu1 %v4371_v26  ;;  %v5644_v24 = vld [vmem:[%s7503_s1 + $0x520] ss:$8 sps:$4 sm:$0xff]   ;;  %v5699_v26 = vld [vmem:[%s7504_s0 + $0x130] ss:$108 sps:$4 sm:$0xff]  }
 0x116   :  { %3992 = vmatprep.mubr.bf16.mxu0 %v4385_v27  ;;  %v5647_v25 = vld [vmem:[%s7503_s1 + $0xc20] ss:$8 sps:$4 sm:$0xff]   ;;  %v5703_v27 = vld [vmem:[%s7504_s0 + $0xf8] ss:$108 sps:$4 sm:$0xff]  }
 0x117   :  { %3515 = vmatpush1.bf16.msra.mxu1 %v5544_v28  ;;  %v5652_v28 = vld [vmem:[%s7503_s1 + $0x534] ss:$8 sps:$4 sm:$0xff]  }
 0x118   :  { %4012 = vmatpush1.bf16.msra.mxu0 %v5547_v29  ;;  %3516 = vmatprep.subr.bf16.mxu1 %v5552_v30  ;;  %v5655_v29 = vld [vmem:[%s7503_s1 + $0xc34] ss:$8 sps:$4 sm:$0xff]   ;;  %v5710_v30 = vld [vmem:[%s7504_s0 + $0x20c] ss:$108 sps:$4 sm:$0xff]  }
 0x119   :  { %4013 = vmatprep.subr.bf16.mxu0 %v5555_v31  ;;  %v5650_v31 = vld [vmem:[%s7503_s1 + $0x530] ss:$8 sps:$4 sm:$0xff]  }
 0x11a   :  { %3496 = vmatmul.mubr.bf16.gmra.mrb[12].mxu1 %v4370_v32  ;;  %v5712_v32 = vld [vmem:[%s7504_s0 + $0x1d4] ss:$108 sps:$4 sm:$0xff]  }
 0x11b   :  { %3993 = vmatmul.mubr.bf16.gmra.mrb[12].mxu0 %v4384_v33  ;;  %3517 = vmatpush1.bf16.msra.mxu1 %v5550_v34  ;;  %v5653_v33 = vld [vmem:[%s7503_s1 + $0xc30] ss:$8 sps:$4 sm:$0xff]   ;;  %v5658_v34 = vld [vmem:[%s7503_s1 + $0x544] ss:$8 sps:$4 sm:$0xff]  }
 0x11c   :  { %4014 = vmatpush1.bf16.msra.mxu0 %v5553_v35  ;;  %3518 = vmatprep.subr.bf16.mxu1 %v5558_v36  ;;  %v5661_v35 = vld [vmem:[%s7503_s1 + $0xc44] ss:$8 sps:$4 sm:$0xff]   ;;  %v5717_v36 = vld [vmem:[%s7504_s0 + $0x208] ss:$108 sps:$4 sm:$0xff]  }
 0x11d   :  { %4015 = vmatprep.subr.bf16.mxu0 %v5561_v37  ;;  %3536 = vmatprep.mubr.bf16.mxu1 %v5628_v38  ;;  %v5656_v37 = vld [vmem:[%s7503_s1 + $0x540] ss:$8 sps:$4 sm:$0xff]   ;;  %v5721_v38 = vld [vmem:[%s7504_s0 + $0x1d0] ss:$108 sps:$4 sm:$0xff]  }
 0x11e   :  { %4033 = vmatprep.mubr.bf16.mxu0 %v5634_v39  ;;  %v110_v39 = vld [vmem:[%s7504_s0 + $0x2e0] sm:$0x11] }
 0x11f   :  { %3519 = vmatpush1.bf16.msra.mxu1 %v5556_v40  ;;  %v103_v40 = vld [vmem:[%s7504_s0 + $0x2a8] sm:$0x11] }
 0x120   :  { %4016 = vmatpush1.bf16.msra.mxu0 %v5559_v41  ;;  %3520 = vmatprep.subr.bf16.mxu1 %v5564_v42  ;;  %v5659_v41 = vld [vmem:[%s7503_s1 + $0xc40] ss:$8 sps:$4 sm:$0xff]   ;;  %v5664_v42 = vld [vmem:[%s7503_s1 + $0x554] ss:$8 sps:$4 sm:$0xff]  }
 0x121   :  { %4017 = vmatprep.subr.bf16.mxu0 %v5567_v43  ;;  %v5667_v43 = vld [vmem:[%s7503_s1 + $0xc54] ss:$8 sps:$4 sm:$0xff]  }
 0x123   :  { %3521 = vmatpush1.bf16.msra.mxu1 %v5562_v44  ;;  %v4387_v44 = vcombine.high %v110_v39, %v110_v39 }
 0x124   :  { %4018 = vmatpush1.bf16.msra.mxu0 %v5565_v45  ;;  %3522 = vmatprep.subr.bf16.mxu1 %v5570_v46  ;;  %v4373_v45 = vcombine.high %v103_v40, %v103_v40  ;;  %v5662_v46 = vld [vmem:[%s7503_s1 + $0x550] ss:$8 sps:$4 sm:$0xff]  }
 0x125   :  { %4019 = vmatprep.subr.bf16.mxu0 %v5573_v47  ;;  %v5665_v47 = vld [vmem:[%s7503_s1 + $0xc50] ss:$8 sps:$4 sm:$0xff]  }
 0x127   :  { %3523 = vmatpush1.bf16.msra.mxu1 %v5568_v48  ;;  %v5670_v48 = vld [vmem:[%s7503_s1 + $0x564] ss:$8 sps:$4 sm:$0xff]  }
 0x128   :  { %4020 = vmatpush1.bf16.msra.mxu0 %v5571_v49  ;;  %3524 = vmatprep.subr.bf16.mxu1 %v5578_v50  ;;  %v5673_v49 = vld [vmem:[%s7503_s1 + $0xc64] ss:$8 sps:$4 sm:$0xff]   ;;  %v5668_v50 = vld [vmem:[%s7503_s1 + $0x560] ss:$8 sps:$4 sm:$0xff]  }
 0x129   :  { %4021 = vmatprep.subr.bf16.mxu0 %v5583_v51  ;;  %v5671_v51 = vld [vmem:[%s7503_s1 + $0xc60] ss:$8 sps:$4 sm:$0xff]  }
 0x12b   :  { %3525 = vmatpush1.bf16.msra.mxu1 %v5576_v52  ;;  %v4386_v52 = vcombine.low %v110_v39, %v110_v39  ;;  %v5759_v39 = vld [vmem:[%s7503_s1 + $0xd10] ss:$8 sps:$4 sm:$0xff]  }
 0x12c   :  { %4022 = vmatpush1.bf16.msra.mxu0 %v5581_v53  ;;  %3526 = vmatprep.subr.bf16.mxu1 %v5588_v54  ;;  %v4372_v53 = vcombine.low %v103_v40, %v103_v40  ;;  %v5676_v54 = vld [vmem:[%s7503_s1 + $0x574] ss:$8 sps:$4 sm:$0xff]   ;;  %v5766_v40 = vld [vmem:[%s7503_s1 + $0x624] ss:$8 sps:$4 sm:$0xff]  }
 0x12d   :  { %4023 = vmatprep.subr.bf16.mxu0 %v5591_v55  ;;  %v5679_v55 = vld [vmem:[%s7503_s1 + $0xc74] ss:$8 sps:$4 sm:$0xff]  }
 0x12f   :  { %3527 = vmatpush1.bf16.msra.mxu1 %v5586_v56  ;;  %v5746_v56 = vld [vmem:[%s7504_s0 + $0x64] ss:$108 sps:$4 sm:$0xff]  }
 0x130   :  { %4024 = vmatpush1.bf16.msra.mxu0 %v5589_v57  ;;  %3528 = vmatprep.subr.bf16.mxu1 %v5596_v58  ;;  %v5749_v57 = vld [vmem:[%s7504_s0 + $0x2c] ss:$108 sps:$4 sm:$0xff]  }
 0x131   :  { %4025 = vmatprep.subr.bf16.mxu0 %v5601_v59  ;;  %v5674_v58 = vld [vmem:[%s7503_s1 + $0x570] ss:$8 sps:$4 sm:$0xff]  }
 0x132   :  { %v5677_v59 = vld [vmem:[%s7503_s1 + $0xc70] ss:$8 sps:$4 sm:$0xff]  }
 0x133   :  { %3529 = vmatpush1.bf16.msra.mxu1 %v5594_v60  ;;  %v5682_v60 = vld [vmem:[%s7503_s1 + $0x584] ss:$8 sps:$4 sm:$0xff]  }
 0x134   :  { %4026 = vmatpush1.bf16.msra.mxu0 %v5599_v61  ;;  %3530 = vmatprep.subr.bf16.mxu1 %v5606_v62  ;;  %v5685_v61 = vld [vmem:[%s7503_s1 + $0xc84] ss:$8 sps:$4 sm:$0xff]   ;;  %v5680_v62 = vld [vmem:[%s7503_s1 + $0x580] ss:$8 sps:$4 sm:$0xff]  }
 0x135   :  { %4027 = vmatprep.subr.bf16.mxu0 %v5609_v63  ;;  %v5683_v63 = vld [vmem:[%s7503_s1 + $0xc80] ss:$8 sps:$4 sm:$0xff]  }
 0x137   :  { %3531 = vmatpush1.bf16.msra.mxu1 %v5604_v0  ;;  %v5688_v0 = vld [vmem:[%s7503_s1 + $0x594] ss:$8 sps:$4 sm:$0xff]  }
 0x138   :  { %4028 = vmatpush1.bf16.msra.mxu0 %v5607_v1  ;;  %3532 = vmatprep.subr.bf16.mxu1 %v5613_v2  ;;  %v5691_v1 = vld [vmem:[%s7503_s1 + $0xc94] ss:$8 sps:$4 sm:$0xff]   ;;  %v5686_v2 = vld [vmem:[%s7503_s1 + $0x590] ss:$8 sps:$4 sm:$0xff]  }
 0x139   :  { %4029 = vmatprep.subr.bf16.mxu0 %v5617_v3  ;;  %v5689_v3 = vld [vmem:[%s7503_s1 + $0xc90] ss:$8 sps:$4 sm:$0xff]  }
 0x13b   :  { %3533 = vmatpush1.bf16.msra.mxu1 %v5611_v4  ;;  %v5698_v4 = vld [vmem:[%s7503_s1 + $0x5a4] ss:$8 sps:$4 sm:$0xff]  }
 0x13c   :  { %4030 = vmatpush1.bf16.msra.mxu0 %v5615_v5  ;;  %3534 = vmatprep.subr.bf16.mxu1 %v5622_v6  ;;  %v5702_v5 = vld [vmem:[%s7503_s1 + $0xca4] ss:$8 sps:$4 sm:$0xff]   ;;  %v5696_v6 = vld [vmem:[%s7503_s1 + $0x5a0] ss:$8 sps:$4 sm:$0xff]  }
 0x13d   :  { %4031 = vmatprep.subr.bf16.mxu0 %v5625_v7  ;;  %v5700_v7 = vld [vmem:[%s7503_s1 + $0xca0] ss:$8 sps:$4 sm:$0xff]  }
 0x13f   :  { %3535 = vmatpush1.bf16.msra.mxu1 %v5620_v8  ;;  %v5706_v8 = vld [vmem:[%s7503_s1 + $0x5b4] ss:$8 sps:$4 sm:$0xff]  }
 0x140   :  { %4032 = vmatpush1.bf16.msra.mxu0 %v5623_v9  ;;  %3575 = vmatprep.subr.bf16.mxu1 %v5631_v11  ;;  %v5709_v9 = vld [vmem:[%s7503_s1 + $0xcb4] ss:$8 sps:$4 sm:$0xff]   ;;  %v5707_v11 = vld [vmem:[%s7503_s1 + $0xcb0] ss:$8 sps:$4 sm:$0xff]  }
 0x141   :  { %4072 = vmatprep.subr.bf16.mxu0 %v5637_v12  ;;  %v5716_v12 = vld [vmem:[%s7503_s1 + $0x5c4] ss:$8 sps:$4 sm:$0xff]  }
 0x142   :  { %3537 = vmatmul.mubr.bf16.vlgmr.msra.gmra.mrb[0].mxu1 %v5626_v10  ;;  %v5704_v10 = vld [vmem:[%s7503_s1 + $0x5b0] ss:$8 sps:$4 sm:$0xff]  }
 0x143   :  { %4034 = vmatmul.mubr.bf16.vlgmr.msra.gmra.mrb[0].mxu0 %v5632_v14  ;;  %3576 = vmatpush1.bf16.msra.mxu1 %v5629_v13  ;;  %v5720_v13 = vld [vmem:[%s7503_s1 + $0xcc4] ss:$8 sps:$4 sm:$0xff]   ;;  %v5714_v14 = vld [vmem:[%s7503_s1 + $0x5c0] ss:$8 sps:$4 sm:$0xff]  }
 0x144   :  { %4073 = vmatpush1.bf16.msra.mxu0 %v5635_v15  ;;  %3577 = vmatprep.subr.bf16.mxu1 %v5640_v16  ;;  %v5718_v15 = vld [vmem:[%s7503_s1 + $0xcc0] ss:$8 sps:$4 sm:$0xff]   ;;  %v5724_v16 = vld [vmem:[%s7503_s1 + $0x5d4] ss:$8 sps:$4 sm:$0xff]  }
 0x145   :  { %4074 = vmatprep.subr.bf16.mxu0 %v5643_v17  ;;  %4043 = vmatprep.mubr.bf16.mxu0 %v5692_v18  ;;  %v5727_v17 = vld [vmem:[%s7503_s1 + $0xcd4] ss:$8 sps:$4 sm:$0xff]   ;;  %v5722_v18 = vld [vmem:[%s7503_s1 + $0x5d0] ss:$8 sps:$4 sm:$0xff]  }
 0x146   :  { %3546 = vmatprep.mubr.bf16.mxu1 %v5694_v19  ;;  %v5725_v19 = vld [vmem:[%s7503_s1 + $0xcd0] ss:$8 sps:$4 sm:$0xff]  }
 0x147   :  { %3578 = vmatpush1.bf16.msra.mxu1 %v5638_v20  ;;  %v5732_v20 = vld [vmem:[%s7503_s1 + $0x5e4] ss:$8 sps:$4 sm:$0xff]  }
 0x148   :  { %4075 = vmatpush1.bf16.msra.mxu0 %v5641_v21  ;;  %3579 = vmatprep.subr.bf16.mxu1 %v5646_v22  ;;  %v5736_v21 = vld [vmem:[%s7503_s1 + $0xce4] ss:$8 sps:$4 sm:$0xff]   ;;  %v5730_v22 = vld [vmem:[%s7503_s1 + $0x5e0] ss:$8 sps:$4 sm:$0xff]  }
 0x149   :  { %4076 = vmatprep.subr.bf16.mxu0 %v5649_v23  ;;  %v5734_v23 = vld [vmem:[%s7503_s1 + $0xce0] ss:$8 sps:$4 sm:$0xff]  }
 0x14a   :  { %3547 = vmatmul.mubr.bf16.gmra.mrb[4].mxu1 %v5703_v27  ;;  %v5741_v27 = vld [vmem:[%s7503_s1 + $0xcf0] ss:$8 sps:$4 sm:$0xff]  }
 0x14b   :  { %4044 = vmatmul.mubr.bf16.gmra.mrb[4].mxu0 %v5699_v26  ;;  %3580 = vmatpush1.bf16.msra.mxu1 %v5644_v24  ;;  %v5740_v24 = vld [vmem:[%s7503_s1 + $0x5f4] ss:$8 sps:$4 sm:$0xff]   ;;  %v5738_v26 = vld [vmem:[%s7503_s1 + $0x5f0] ss:$8 sps:$4 sm:$0xff]  }
 0x14c   :  { %4077 = vmatpush1.bf16.msra.mxu0 %v5647_v25  ;;  %3581 = vmatprep.subr.bf16.mxu1 %v5652_v28  ;;  %v5743_v25 = vld [vmem:[%s7503_s1 + $0xcf4] ss:$8 sps:$4 sm:$0xff]   ;;  %v5752_v28 = vld [vmem:[%s7503_s1 + $0x604] ss:$8 sps:$4 sm:$0xff]  }
 0x14d   :  { %4078 = vmatprep.subr.bf16.mxu0 %v5655_v29  ;;  %4053 = vmatprep.mubr.bf16.mxu0 %v5710_v30  ;;  %v5755_v29 = vld [vmem:[%s7503_s1 + $0xd04] ss:$8 sps:$4 sm:$0xff]  }
 0x14e   :  { %3556 = vmatprep.mubr.bf16.mxu1 %v5712_v32  ;;  %v5744_v30 = vld [vmem:[%s7504_s0 + $0x60] ss:$108 sps:$4 sm:$0xff]  }
 0x14f   :  { %3582 = vmatpush1.bf16.msra.mxu1 %v5650_v31  ;;  %v5747_v31 = vld [vmem:[%s7504_s0 + $0x28] ss:$108 sps:$4 sm:$0xff]  }
 0x150   :  { %4079 = vmatpush1.bf16.msra.mxu0 %v5653_v33  ;;  %3583 = vmatprep.subr.bf16.mxu1 %v5658_v34  ;;  %v5750_v32 = vld [vmem:[%s7503_s1 + $0x600] ss:$8 sps:$4 sm:$0xff]   ;;  %v5758_v34 = vld [vmem:[%s7503_s1 + $0x614] ss:$8 sps:$4 sm:$0xff]  }
 0x151   :  { %4080 = vmatprep.subr.bf16.mxu0 %v5661_v35  ;;  %v5753_v33 = vld [vmem:[%s7503_s1 + $0xd00] ss:$8 sps:$4 sm:$0xff]   ;;  %v5761_v35 = vld [vmem:[%s7503_s1 + $0xd14] ss:$8 sps:$4 sm:$0xff]  }
 0x152   :  { %3557 = vmatmul.mubr.bf16.gmra.mrb[8].mxu1 %v5721_v38  ;;  %v5756_v38 = vld [vmem:[%s7503_s1 + $0x610] ss:$8 sps:$4 sm:$0xff]  }
 0x153   :  { %4054 = vmatmul.mubr.bf16.gmra.mrb[8].mxu0 %v5717_v36  ;;  %3584 = vmatpush1.bf16.msra.mxu1 %v5656_v37  ;;  %v5762_v36 = vld [vmem:[%s7504_s0 + $0x13c] ss:$108 sps:$4 sm:$0xff]   ;;  %v5813_v37 = vld [vmem:[%s7504_s0 + $0x104] ss:$108 sps:$4 sm:$0xff]  }
 0x154   :  { %4081 = vmatpush1.bf16.msra.mxu0 %v5659_v41  ;;  %3585 = vmatprep.subr.bf16.mxu1 %v5664_v42  ;;  %v5770_v41 = vld [vmem:[%s7503_s1 + $0xd24] ss:$8 sps:$4 sm:$0xff]  }
 0x155   :  { %4082 = vmatprep.subr.bf16.mxu0 %v5667_v43  ;;  %4063 = vmatprep.mubr.bf16.mxu0 %v4387_v44  ;;  %v5767_v42 = vld [vmem:[%s7504_s0 + $0x138] ss:$108 sps:$4 sm:$0xff]   ;;  %v5815_v43 = vld [vmem:[%s7504_s0 + $0x100] ss:$108 sps:$4 sm:$0xff]  }
 0x156   :  { %3566 = vmatprep.mubr.bf16.mxu1 %v4373_v45  ;;  %v5764_v44 = vld [vmem:[%s7503_s1 + $0x620] ss:$8 sps:$4 sm:$0xff]  }
 0x157   :  { %3586 = vmatpush1.bf16.msra.mxu1 %v5662_v46  ;;  %v5768_v45 = vld [vmem:[%s7503_s1 + $0xd20] ss:$8 sps:$4 sm:$0xff]   ;;  %v5773_v46 = vld [vmem:[%s7503_s1 + $0x634] ss:$8 sps:$4 sm:$0xff]  }
 0x158   :  { %4083 = vmatpush1.bf16.msra.mxu0 %v5665_v47  ;;  %3587 = vmatprep.subr.bf16.mxu1 %v5670_v48  ;;  %v5776_v47 = vld [vmem:[%s7503_s1 + $0xd34] ss:$8 sps:$4 sm:$0xff]  }
 0x159   :  { %4084 = vmatprep.subr.bf16.mxu0 %v5673_v49  ;;  %v5777_v48 = vld [vmem:[%s7504_s0 + $0x214] ss:$108 sps:$4 sm:$0xff]   ;;  %v5823_v49 = vld [vmem:[%s7504_s0 + $0x1dc] ss:$108 sps:$4 sm:$0xff]  }
 0x15a   :  { %3567 = vmatmul.mubr.bf16.gmra.mrb[12].mxu1 %v4372_v53  ;;  %v5785_v53 = vld [vmem:[%s7503_s1 + $0xd44] ss:$8 sps:$4 sm:$0xff]  }
 0x15b   :  { %4064 = vmatmul.mubr.bf16.gmra.mrb[12].mxu0 %v4386_v52  ;;  %3588 = vmatpush1.bf16.msra.mxu1 %v5668_v50  ;;  %v5771_v50 = vld [vmem:[%s7503_s1 + $0x630] ss:$8 sps:$4 sm:$0xff]   ;;  %v5781_v52 = vld [vmem:[%s7503_s1 + $0x644] ss:$8 sps:$4 sm:$0xff]  }
 0x15c   :  { %4085 = vmatpush1.bf16.msra.mxu0 %v5671_v51  ;;  %3589 = vmatprep.subr.bf16.mxu1 %v5676_v54  ;;  %v5774_v51 = vld [vmem:[%s7503_s1 + $0xd30] ss:$8 sps:$4 sm:$0xff]  }
 0x15d   :  { %4086 = vmatprep.subr.bf16.mxu0 %v5679_v55  ;;  %4104 = vmatprep.mubr.bf16.mxu0 %v5746_v56  ;;  %v5782_v54 = vld [vmem:[%s7504_s0 + $0x210] ss:$108 sps:$4 sm:$0xff]   ;;  %v111_v55 = vld [vmem:[%s7504_s0 + $0x2e8] sm:$0x11]  ;;  %v5825_v56 = vld [vmem:[%s7504_s0 + $0x1d8] ss:$108 sps:$4 sm:$0xff]  }
 0x15e   :  { %3607 = vmatprep.mubr.bf16.mxu1 %v5749_v57  ;;  %v104_v57 = vld [vmem:[%s7504_s0 + $0x2b0] sm:$0x11] }
 0x15f   :  { %3590 = vmatpush1.bf16.msra.mxu1 %v5674_v58  ;;  %v5779_v58 = vld [vmem:[%s7503_s1 + $0x640] ss:$8 sps:$4 sm:$0xff]  }
 0x160   :  { %4087 = vmatpush1.bf16.msra.mxu0 %v5677_v59  ;;  %3591 = vmatprep.subr.bf16.mxu1 %v5682_v60  ;;  %v5783_v59 = vld [vmem:[%s7503_s1 + $0xd40] ss:$8 sps:$4 sm:$0xff]   ;;  %v5788_v60 = vld [vmem:[%s7503_s1 + $0x654] ss:$8 sps:$4 sm:$0xff]  }
 0x161   :  { %4088 = vmatprep.subr.bf16.mxu0 %v5685_v61  ;;  %v5791_v61 = vld [vmem:[%s7503_s1 + $0xd54] ss:$8 sps:$4 sm:$0xff]  }
 0x163   :  { %3592 = vmatpush1.bf16.msra.mxu1 %v5680_v62  ;;  %v4389_v62 = vcombine.high %v111_v55, %v111_v55 }
 0x164   :  { %4089 = vmatpush1.bf16.msra.mxu0 %v5683_v63  ;;  %3593 = vmatprep.subr.bf16.mxu1 %v5688_v0  ;;  %v4375_v63 = vcombine.high %v104_v57, %v104_v57  ;;  %v5786_v0 = vld [vmem:[%s7503_s1 + $0x650] ss:$8 sps:$4 sm:$0xff]  }
 0x165   :  { %4090 = vmatprep.subr.bf16.mxu0 %v5691_v1  ;;  %v5789_v1 = vld [vmem:[%s7503_s1 + $0xd50] ss:$8 sps:$4 sm:$0xff]  }
 0x167   :  { %3594 = vmatpush1.bf16.msra.mxu1 %v5686_v2  ;;  %v5795_v2 = vld [vmem:[%s7503_s1 + $0x664] ss:$8 sps:$4 sm:$0xff]  }
 0x168   :  { %4091 = vmatpush1.bf16.msra.mxu0 %v5689_v3  ;;  %3595 = vmatprep.subr.bf16.mxu1 %v5698_v4  ;;  %v5799_v3 = vld [vmem:[%s7503_s1 + $0xd64] ss:$8 sps:$4 sm:$0xff]   ;;  %v4388_v4 = vcombine.low %v111_v55, %v111_v55 }
 0x169   :  { %4092 = vmatprep.subr.bf16.mxu0 %v5702_v5  ;;  %v4374_v5 = vcombine.low %v104_v57, %v104_v57 }
 0x16b   :  { %3596 = vmatpush1.bf16.msra.mxu1 %v5696_v6  ;;  %v5793_v6 = vld [vmem:[%s7503_s1 + $0x660] ss:$8 sps:$4 sm:$0xff]  }
 0x16c   :  { %4093 = vmatpush1.bf16.msra.mxu0 %v5700_v7  ;;  %3597 = vmatprep.subr.bf16.mxu1 %v5706_v8  ;;  %v5797_v7 = vld [vmem:[%s7503_s1 + $0xd60] ss:$8 sps:$4 sm:$0xff]   ;;  %v5802_v8 = vld [vmem:[%s7503_s1 + $0x674] ss:$8 sps:$4 sm:$0xff]  }
 0x16d   :  { %4094 = vmatprep.subr.bf16.mxu0 %v5709_v9  ;;  %v5805_v9 = vld [vmem:[%s7503_s1 + $0xd74] ss:$8 sps:$4 sm:$0xff]  }
 0x16f   :  { %3598 = vmatpush1.bf16.msra.mxu1 %v5704_v10  ;;  %v5844_v10 = vld [vmem:[%s7504_s0 + $0x34] ss:$108 sps:$4 sm:$0xff]  }
 0x170   :  { %4095 = vmatpush1.bf16.msra.mxu0 %v5707_v11  ;;  %3599 = vmatprep.subr.bf16.mxu1 %v5716_v12  ;;  %v5800_v11 = vld [vmem:[%s7503_s1 + $0x670] ss:$8 sps:$4 sm:$0xff]  }
 0x171   :  { %4096 = vmatprep.subr.bf16.mxu0 %v5720_v13  ;;  %v5803_v12 = vld [vmem:[%s7503_s1 + $0xd70] ss:$8 sps:$4 sm:$0xff]   ;;  %v5808_v13 = vld [vmem:[%s7503_s1 + $0x684] ss:$8 sps:$4 sm:$0xff]  }
 0x173   :  { %3600 = vmatpush1.bf16.msra.mxu1 %v5714_v14  ;;  %v5853_v14 = vmov 0  }
 0x174   :  { %4097 = vmatpush1.bf16.msra.mxu0 %v5718_v15  ;;  %3601 = vmatprep.subr.bf16.mxu1 %v5724_v16  ;;  %v5809_v15 = vld [vmem:[%s7504_s0 + $0x68] ss:$108 sps:$4 sm:$0xff]  }
 0x175   :  { %4098 = vmatprep.subr.bf16.mxu0 %v5727_v17  ;;  %v5806_v16 = vld [vmem:[%s7503_s1 + $0x680] ss:$8 sps:$4 sm:$0xff]   ;;  %v5812_v17 = vld [vmem:[%s7503_s1 + $0x694] ss:$8 sps:$4 sm:$0xff]  }
 0x177   :  { %3602 = vmatpush1.bf16.msra.mxu1 %v5722_v18  ;;  %v5810_v18 = vld [vmem:[%s7503_s1 + $0x690] ss:$8 sps:$4 sm:$0xff]  }
 0x178   :  { %4099 = vmatpush1.bf16.msra.mxu0 %v5725_v19  ;;  %3603 = vmatprep.subr.bf16.mxu1 %v5732_v20  ;;  %v5818_v19 = vld [vmem:[%s7503_s1 + $0x6a4] ss:$8 sps:$4 sm:$0xff]  }
 0x179   :  { %4100 = vmatprep.subr.bf16.mxu0 %v5736_v21  ;;  %v5819_v20 = vld [vmem:[%s7504_s0 + $0x140] ss:$108 sps:$4 sm:$0xff]  }
 0x17a   :  { %v5816_v21 = vld [vmem:[%s7503_s1 + $0x6a0] ss:$8 sps:$4 sm:$0xff]  }
 0x17b   :  { %3604 = vmatpush1.bf16.msra.mxu1 %v5730_v22  ;;  %v5822_v22 = vld [vmem:[%s7503_s1 + $0x6b4] ss:$8 sps:$4 sm:$0xff]  }
 0x17c   :  { %4101 = vmatpush1.bf16.msra.mxu0 %v5734_v23  ;;  %3605 = vmatprep.subr.bf16.mxu1 %v5740_v24  ;;  %v5820_v23 = vld [vmem:[%s7503_s1 + $0x6b0] ss:$8 sps:$4 sm:$0xff]   ;;  %v5828_v24 = vld [vmem:[%s7503_s1 + $0x6c4] ss:$8 sps:$4 sm:$0xff]  }
 0x17d   :  { %4102 = vmatprep.subr.bf16.mxu0 %v5743_v25  ;;  %v5829_v25 = vld [vmem:[%s7504_s0 + $0x218] ss:$108 sps:$4 sm:$0xff]  }
 0x17f   :  { %3606 = vmatpush1.bf16.msra.mxu1 %v5738_v26  ;;  %v5826_v26 = vld [vmem:[%s7503_s1 + $0x6c0] ss:$8 sps:$4 sm:$0xff]  }
 0x180   :  { %4103 = vmatpush1.bf16.msra.mxu0 %v5741_v27  ;;  %3646 = vmatprep.subr.bf16.mxu1 %v5752_v28  ;;  %v5832_v27 = vld [vmem:[%s7503_s1 + $0x6d4] ss:$8 sps:$4 sm:$0xff]   ;;  %v5830_v28 = vld [vmem:[%s7503_s1 + $0x6d0] ss:$8 sps:$4 sm:$0xff]  }
 0x181   :  { %4143 = vmatprep.subr.bf16.mxu0 %v5755_v29  ;;  %v5837_v29 = vld [vmem:[%s7503_s1 + $0x6e4] ss:$8 sps:$4 sm:$0xff]  }
 0x182   :  { %3608 = vmatmul.mubr.bf16.vlgmr.msra.gmra.mrb[0].mxu1 %v5747_v31  ;;  %v5835_v31 = vld [vmem:[%s7503_s1 + $0x6e0] ss:$8 sps:$4 sm:$0xff]  }
 0x183   :  { %4105 = vmatmul.mubr.bf16.vlgmr.msra.gmra.mrb[0].mxu0 %v5744_v30  ;;  %3647 = vmatpush1.bf16.msra.mxu1 %v5750_v32  ;;  %v5838_v30 = vld [vmem:[%s7504_s0 + $0x2f0] ss:$0 sps:$4 sm:$0x11]   ;;  %v5841_v32 = vld [vmem:[%s7503_s1 + $0x6f4] ss:$8 sps:$4 sm:$0xff]  }
 0x184   :  { %4144 = vmatpush1.bf16.msra.mxu0 %v5753_v33  ;;  %3648 = vmatprep.subr.bf16.mxu1 %v5758_v34  ;;  %v5839_v33 = vld [vmem:[%s7503_s1 + $0x6f0] ss:$8 sps:$4 sm:$0xff]  }
 0x185   :  { %4145 = vmatprep.subr.bf16.mxu0 %v5761_v35  ;;  %4114 = vmatprep.mubr.bf16.mxu0 %v5762_v36  ;;  %v5842_v34 = vld [vmem:[%s7504_s0 + $0x30] ss:$108 sps:$4 sm:$0xff]   ;;  %v5845_v35 = vld [vmem:[%s7504_s0 + $0x10c] ss:$108 sps:$4 sm:$0xff]   ;;  %v5847_v36 = vld [vmem:[%s7504_s0 + $0x108] ss:$108 sps:$4 sm:$0xff]  }
 0x186   :  { %3617 = vmatprep.mubr.bf16.mxu1 %v5813_v37  ;;  %v5848_v37 = vld [vmem:[%s7504_s0 + $0x1e4] ss:$108 sps:$4 sm:$0xff]  }
 0x187   :  { %3649 = vmatpush1.bf16.msra.mxu1 %v5756_v38  ;;  %v105_v38 = vld [vmem:[%s7504_s0 + $0x2b8] sm:$0x11] }
 0x188   :  { %4146 = vmatpush1.bf16.msra.mxu0 %v5759_v39  ;;  %3650 = vmatprep.subr.bf16.mxu1 %v5766_v40  ;;  %v5850_v39 = vld [vmem:[%s7504_s0 + $0x1e0] ss:$108 sps:$4 sm:$0xff]   ;;  %v4377_v40 = vcombine.high %v105_v38, %v105_v38 }
 0x189   :  { %4147 = vmatprep.subr.bf16.mxu0 %v5770_v41  ;;  %v4376_v41 = vcombine.low %v105_v38, %v105_v38 }
 0x18a   :  { %3618 = vmatmul.mubr.bf16.gmra.mrb[4].mxu1 %v5815_v43 }
 0x18b   :  { %4115 = vmatmul.mubr.bf16.gmra.mrb[4].mxu0 %v5767_v42  ;;  %3651 = vmatpush1.bf16.msra.mxu1 %v5764_v44 }
 0x18c   :  { %4148 = vmatpush1.bf16.msra.mxu0 %v5768_v45  ;;  %3652 = vmatprep.subr.bf16.mxu1 %v5773_v46 }
 0x18d   :  { %4149 = vmatprep.subr.bf16.mxu0 %v5776_v47  ;;  %4124 = vmatprep.mubr.bf16.mxu0 %v5777_v48 }
 0x18e   :  { %3627 = vmatprep.mubr.bf16.mxu1 %v5823_v49 }
 0x18f   :  { %3653 = vmatpush1.bf16.msra.mxu1 %v5771_v50 }
 0x190   :  { %4150 = vmatpush1.bf16.msra.mxu0 %v5774_v51  ;;  %3654 = vmatprep.subr.bf16.mxu1 %v5781_v52  ;;  %v547_v52 = vlaneseq }
 0x191   :  { %4151 = vmatprep.subr.bf16.mxu0 %v5785_v53 }
 0x192   :  { %3628 = vmatmul.mubr.bf16.gmra.mrb[8].mxu1 %v5825_v56  ;;  %v548_v55 = vshrl.u32 %v547_v52, 7 }
 0x193   :  { %4125 = vmatmul.mubr.bf16.gmra.mrb[8].mxu0 %v5782_v54  ;;  %3655 = vmatpush1.bf16.msra.mxu1 %v5779_v58 }
 0x194   :  { %4152 = vmatpush1.bf16.msra.mxu0 %v5783_v59  ;;  %3656 = vmatprep.subr.bf16.mxu1 %v5788_v60  ;;  %v549_v58 = vsub.s32 0, %v548_v55  ;;  %v545_v60 = vld [vmem:[%s7505_s2] sm:$0x3] }
 0x195   :  { %4153 = vmatprep.subr.bf16.mxu0 %v5791_v61  ;;  %4134 = vmatprep.mubr.bf16.mxu0 %v4389_v62  ;;  %v553_v61 = vsub.s32 1, %v548_v55 }
 0x196   :  { %3637 = vmatprep.mubr.bf16.mxu1 %v4375_v63  ;;  %v550_v63 = vrot.slane %v545_v60, %v549_v58 }
 0x197   :  { %3657 = vmatpush1.bf16.msra.mxu1 %v5786_v0  ;;  %v7468_v0 = vrot.slane %v545_v60, %v553_v61 }
 0x198   :  { %4154 = vmatpush1.bf16.msra.mxu0 %v5789_v1  ;;  %3658 = vmatprep.subr.bf16.mxu1 %v5795_v2 }
 0x199   :  { %4155 = vmatprep.subr.bf16.mxu0 %v5799_v3 }
 0x19a   :  { %3638 = vmatmul.mubr.bf16.gmra.mrb[12].mxu1 %v4374_v5 }
 0x19b   :  { %4135 = vmatmul.mubr.bf16.gmra.mrb[12].mxu0 %v4388_v4  ;;  %3659 = vmatpush1.bf16.msra.mxu1 %v5793_v6 }
 0x19c   :  { %4156 = vmatpush1.bf16.msra.mxu0 %v5797_v7  ;;  %3660 = vmatprep.subr.bf16.mxu1 %v5802_v8 }
 0x19d   :  { %4157 = vmatprep.subr.bf16.mxu0 %v5805_v9  ;;  %4175 = vmatprep.mubr.bf16.mxu0 %v5853_v14 }
 0x19e   :  { %3678 = vmatprep.mubr.bf16.mxu1 %v5844_v10 }
 0x19f   :  { %3661 = vmatpush1.bf16.msra.mxu1 %v5800_v11 }
 0x1a0   :  { %4158 = vmatpush1.bf16.msra.mxu0 %v5803_v12  ;;  %3662 = vmatprep.subr.bf16.mxu1 %v5808_v13 }
 0x1a3   :  { %4176 = vmatmul.mubr.bf16.vlgmr.msra.gmra.mrb[0].mxu0 %v5809_v15  ;;  %3663 = vmatpush1.bf16.msra.mxu1 %v5806_v16 }
 0x1a4   :  { %4185 = vmatprep.mubr.bf16.mxu0 %v5853_v14  ;;  %3664 = vmatprep.subr.bf16.mxu1 %v5812_v17 }
 0x1a7   :  { %3665 = vmatpush1.bf16.msra.mxu1 %v5810_v18 }
 0x1a8   :  { %3666 = vmatprep.subr.bf16.mxu1 %v5818_v19 }
 0x1ab   :  { %4186 = vmatmul.mubr.bf16.gmra.mrb[4].mxu0 %v5819_v20  ;;  %3667 = vmatpush1.bf16.msra.mxu1 %v5816_v21 }
 0x1ac   :  { %4195 = vmatprep.mubr.bf16.mxu0 %v5853_v14  ;;  %3668 = vmatprep.subr.bf16.mxu1 %v5822_v22 }
 0x1af   :  { %3669 = vmatpush1.bf16.msra.mxu1 %v5820_v23 }
 0x1b0   :  { %3670 = vmatprep.subr.bf16.mxu1 %v5828_v24 }
 0x1b3   :  { %4196 = vmatmul.mubr.bf16.gmra.mrb[8].mxu0 %v5829_v25  ;;  %3671 = vmatpush1.bf16.msra.mxu1 %v5826_v26 }
 0x1b4   :  { %4205 = vmatprep.mubr.bf16.mxu0 %v5853_v14  ;;  %3672 = vmatprep.subr.bf16.mxu1 %v5832_v27 }
 0x1b7   :  { %3673 = vmatpush1.bf16.msra.mxu1 %v5830_v28 }
 0x1b8   :  { %3674 = vmatprep.subr.bf16.mxu1 %v5837_v29 }
 0x1bb   :  { %4206 = vmatmul.mubr.bf16.gmra.mrb[12].mxu0 %v5838_v30  ;;  %3675 = vmatpush1.bf16.msra.mxu1 %v5835_v31 }
 0x1bc   :  { %3676 = vmatprep.subr.bf16.mxu1 %v5841_v32 }
 0x1bf   :  { %3677 = vmatpush1.bf16.msra.mxu1 %v5839_v33 }
 0x1c2   :  { %3679 = vmatmul.mubr.bf16.vlgmr.msra.gmra.mrb[0].mxu1 %v5842_v34 }
 0x1c3   :  { %3688 = vmatprep.mubr.bf16.mxu1 %v5845_v35 }
 0x1ca   :  { %3689 = vmatmul.mubr.bf16.gmra.mrb[4].mxu1 %v5847_v36 }
 0x1cb   :  { %3698 = vmatprep.mubr.bf16.mxu1 %v5848_v37 }
 0x1d2   :  { %3699 = vmatmul.mubr.bf16.gmra.mrb[8].mxu1 %v5850_v39 }
 0x1d3   :  { %3708 = vmatprep.mubr.bf16.mxu1 %v4377_v40 }
 0x1da   :  { %3709 = vmatmul.mubr.bf16.gmra.mrb[12].mxu1 %v4376_v41 }
 0x276   :  { %v4177_v42 = vpop.f32.mrb[0].mxu0 }
 0x277   :  { %v4179_v43 = vpop.f32.mrb[1].mxu0 }
 0x278   :  { %v4181_v44 = vpop.f32.mrb[2].mxu0 }
 0x279   :  { %v4183_v45 = vpop.f32.mrb[3].mxu0 }
 0x27e   :  { %v4187_v46 = vpop.f32.mrb[4].mxu0 }
 0x27f   :  { %v4189_v47 = vpop.f32.mrb[5].mxu0 }
 0x280   :  { %v4191_v48 = vpop.f32.mrb[6].mxu0 }
 0x281   :  { %v4193_v49 = vpop.f32.mrb[7].mxu0 }
 0x286   :  { %v4197_v50 = vpop.f32.mrb[8].mxu0 }
 0x287   :  { %v7455_v51 = vpop.f32.mrb[9].mxu0 }
 0x288   :  { %v7457_v53 = vpop.f32.mrb[10].mxu0 }
 0x289   :  { %v7459_v54 = vpop.f32.mrb[11].mxu0 }
 0x28e   :  { %v7461_v56 = vpop.f32.mrb[12].mxu0 }
 0x28f   :  { %v7463_v57 = vpop.f32.mrb[13].mxu0 }
 0x290   :  { %v4211_v59 = vpop.f32.mrb[14].mxu0 }
 0x291   :  { %v4212_v62 = vpop.f32.mrb[15].mxu0 }
 0x295   :  { %v3680_v1 = vpop.f32.mrb[0].mxu1 }
 0x296   :  { %v4837_v2 = vadd.f32 %v3680_v1, %v550_v63  ;;  %v3682_v3 = vpop.f32.mrb[1].mxu1 }
 0x297   :  { %v4839_v4 = vadd.f32 %v3682_v3, %v7468_v0  ;;  %v3684_v5 = vpop.f32.mrb[2].mxu1 }
 0x298   :  { %v4838_v6 = vadd.f32 %v4837_v2, %v4177_v42  ;;  %v4841_v7 = vadd.f32 %v3684_v5, %v550_v63  ;;  %v3686_v8 = vpop.f32.mrb[3].mxu1 }
 0x299   :  { %v4840_v9 = vadd.f32 %v4839_v4, %v4179_v43  ;;  %v4843_v10 = vadd.f32 %v3686_v8, %v7468_v0 }
 0x29a   :  { %v4214_v11 = vmax.f32 %v4838_v6, 0.0  ;;  %v4842_v12 = vadd.f32 %v4841_v7, %v4181_v44 }
 0x29b   :  { %v4215_v13 = vmax.f32 %v4840_v9, 0.0  ;;  %v4844_v14 = vadd.f32 %v4843_v10, %v4183_v45 }
 0x29c   :  { %v4216_v15 = vmax.f32 %v4842_v12, 0.0 }
 0x29d   :  { %v4830_v16 = vpack.c.bf16 %v4215_v13, %v4214_v11  ;;  %v4217_v17 = vmax.f32 %v4844_v14, 0.0  ;;  %v3690_v18 = vpop.f32.mrb[4].mxu1 }
 0x29e   :  { %v4845_v19 = vadd.f32 %v3690_v18, %v550_v63  ;;  %v3692_v20 = vpop.f32.mrb[5].mxu1 }
 0x29f   :  { %4272 = vst [vmem:[%s7506_s3] sm:$0xff] %v4830_v16  ;;  %v4831_v21 = vpack.c.bf16 %v4217_v17, %v4216_v15  ;;  %v4847_v22 = vadd.f32 %v3692_v20, %v7468_v0  ;;  %v3694_v23 = vpop.f32.mrb[6].mxu1 }
 0x2a0   :  { %v4846_v24 = vadd.f32 %v4845_v19, %v4187_v46  ;;  %v4849_v25 = vadd.f32 %v3694_v23, %v550_v63  ;;  %v3696_v26 = vpop.f32.mrb[7].mxu1 }
 0x2a1   :  { %4273 = vst [vmem:[%s7506_s3 + $0x8] sm:$0xff] %v4831_v21  ;;  %v4848_v27 = vadd.f32 %v4847_v22, %v4189_v47  ;;  %v4851_v28 = vadd.f32 %v3696_v26, %v7468_v0 }
 0x2a2   :  { %v4218_v29 = vmax.f32 %v4846_v24, 0.0  ;;  %v4850_v30 = vadd.f32 %v4849_v25, %v4191_v48 }
 0x2a3   :  { %v4219_v31 = vmax.f32 %v4848_v27, 0.0  ;;  %v4852_v32 = vadd.f32 %v4851_v28, %v4193_v49 }
 0x2a4   :  { %v4220_v33 = vmax.f32 %v4850_v30, 0.0 }
 0x2a5   :  { %v4832_v34 = vpack.c.bf16 %v4219_v31, %v4218_v29  ;;  %v4221_v35 = vmax.f32 %v4852_v32, 0.0  ;;  %v3700_v36 = vpop.f32.mrb[8].mxu1 }
 0x2a6   :  { %v4853_v37 = vadd.f32 %v3700_v36, %v550_v63  ;;  %v3702_v38 = vpop.f32.mrb[9].mxu1 }
 0x2a7   :  { %4274 = vst [vmem:[%s7506_s3 + $0x10] sm:$0xff] %v4832_v34  ;;  %v4833_v39 = vpack.c.bf16 %v4221_v35, %v4220_v33  ;;  %v4855_v40 = vadd.f32 %v3702_v38, %v7468_v0  ;;  %v3704_v41 = vpop.f32.mrb[10].mxu1 }
 0x2a8   :  { %v4854_v42 = vadd.f32 %v4853_v37, %v4197_v50  ;;  %v4857_v43 = vadd.f32 %v3704_v41, %v550_v63  ;;  %v3706_v44 = vpop.f32.mrb[11].mxu1 }
 0x2a9   :  { %4275 = vst [vmem:[%s7506_s3 + $0x18] sm:$0xff] %v4833_v39  ;;  %v4856_v45 = vadd.f32 %v4855_v40, %v7455_v51  ;;  %v4859_v46 = vadd.f32 %v3706_v44, %v7468_v0 }
 0x2aa   :  { %v4222_v47 = vmax.f32 %v4854_v42, 0.0  ;;  %v4858_v48 = vadd.f32 %v4857_v43, %v7457_v53 }
 0x2ab   :  { %v4223_v49 = vmax.f32 %v4856_v45, 0.0  ;;  %v4860_v52 = vadd.f32 %v4859_v46, %v7459_v54 }
 0x2ac   :  { %v4224_v55 = vmax.f32 %v4858_v48, 0.0 }
 0x2ad   :  { %v4834_v58 = vpack.c.bf16 %v4223_v49, %v4222_v47  ;;  %v4225_v59 = vmax.f32 %v4860_v52, 0.0  ;;  %v3710_v50 = vpop.f32.mrb[12].mxu1 }
 0x2ae   :  { %v4861_v60 = vadd.f32 %v3710_v50, %v550_v63  ;;  %v3712_v61 = vpop.f32.mrb[13].mxu1 }
 0x2af   :  { %4276 = vst [vmem:[%s7506_s3 + $0x20] sm:$0xff] %v4834_v58  ;;  %v4835_v62 = vpack.c.bf16 %v4225_v59, %v4224_v55  ;;  %v4863_v51 = vadd.f32 %v3712_v61, %v7468_v0  ;;  %v3714_v1 = vpop.f32.mrb[14].mxu1 }
 0x2b0   :  { %v4862_v2 = vadd.f32 %v4861_v60, %v7461_v56  ;;  %v3715_v53 = vpop.f32.mrb[15].mxu1 }
 0x2b1   :  { %4277 = vst [vmem:[%s7506_s3 + $0x28] sm:$0xff] %v4835_v62  ;;  %v4864_v54 = vadd.f32 %v4863_v51, %v7463_v57 }
 0x2b2   :  { %v4226_v3 = vmax.f32 %v4862_v2, 0.0 }
 0x2b3   :  { %v4227_v63 = vmax.f32 %v4864_v54, 0.0 }
 0x2b5   :  { %v4836_v4 = vpack.c.bf16 %v4227_v63, %v4226_v3 }
 0x2b7   :  { %4278 = vst [vmem:[%s7506_s3 + $0x30] sm:$0x11] %v4836_v4 }

// kernel: alexnet_restoration_forward.10
= control target key start
LH: loop header
LB: loop body
LE: loop exit
PB: predicated region body
PF: predicated region fallthrough
CT: control target
= control target key end

     0   :  { %s5060_s1 = inlined_call_operand.vmem [shape: bf16[2304,256], index: 1, kind: input, shape index: {}]   ;;  %s5061_s0 = inlined_call_operand.vmem [shape: bf16[50,2304], index: 0, kind: input, shape index: {}]   ;;  %s5062_s2 = inlined_call_operand.vmem [shape: f32[1,256], index: 2, kind: input, shape index: {}]   ;;  %s5063_s3 = inlined_call_operand.vmem [shape: bf16[50,256], index: 3, kind: output, shape index: {}]  }
   0x1   :  { %v3402_v0 = vld [vmem:[%s5060_s1 + $0x4] ss:$8 sps:$4 sm:$0xff]   ;;  %v3406_v2 = vld [vmem:[%s5060_s1] ss:$8 sps:$4 sm:$0xff]   ;;  %v3408_v4 = vld [vmem:[%s5060_s1 + $0x14] ss:$8 sps:$4 sm:$0xff]  }
   0x2   :  { %v3404_v1 = vld [vmem:[%s5060_s1 + $0x404] ss:$8 sps:$4 sm:$0xff]   ;;  %2150 = vmatprep.subr.bf16.mxu1 %v3402_v0  ;;  %v3407_v3 = vld [vmem:[%s5060_s1 + $0x400] ss:$8 sps:$4 sm:$0xff]   ;;  %v3410_v5 = vld [vmem:[%s5060_s1 + $0x414] ss:$8 sps:$4 sm:$0xff]  }
   0x3   :  { %2434 = vmatprep.subr.bf16.mxu0 %v3404_v1  ;;  %2151 = vmatpush1.bf16.msra.mxu1 %v3406_v2  ;;  %v3412_v6 = vld [vmem:[%s5060_s1 + $0x10] ss:$8 sps:$4 sm:$0xff]   ;;  %v3414_v8 = vld [vmem:[%s5060_s1 + $0x24] ss:$8 sps:$4 sm:$0xff]   ;;  %v3418_v10 = vld [vmem:[%s5060_s1 + $0x20] ss:$8 sps:$4 sm:$0xff]  }
   0x4   :  { %2435 = vmatpush1.bf16.msra.mxu0 %v3407_v3  ;;  %2152 = vmatprep.subr.bf16.mxu1 %v3408_v4  ;;  %v3413_v7 = vld [vmem:[%s5060_s1 + $0x410] ss:$8 sps:$4 sm:$0xff]   ;;  %v3416_v9 = vld [vmem:[%s5060_s1 + $0x424] ss:$8 sps:$4 sm:$0xff]   ;;  %v3419_v11 = vld [vmem:[%s5060_s1 + $0x420] ss:$8 sps:$4 sm:$0xff]  }
   0x5   :  { %2436 = vmatprep.subr.bf16.mxu0 %v3410_v5  ;;  %v3420_v12 = vld [vmem:[%s5060_s1 + $0x34] ss:$8 sps:$4 sm:$0xff]   ;;  %v3424_v14 = vld [vmem:[%s5060_s1 + $0x30] ss:$8 sps:$4 sm:$0xff]   ;;  %v3426_v16 = vld [vmem:[%s5060_s1 + $0x44] ss:$8 sps:$4 sm:$0xff]  }
   0x6   :  { %v3422_v13 = vld [vmem:[%s5060_s1 + $0x434] ss:$8 sps:$4 sm:$0xff]   ;;  %v3425_v15 = vld [vmem:[%s5060_s1 + $0x430] ss:$8 sps:$4 sm:$0xff]   ;;  %v3428_v17 = vld [vmem:[%s5060_s1 + $0x444] ss:$8 sps:$4 sm:$0xff]  }
   0x7   :  { %2153 = vmatpush1.bf16.msra.mxu1 %v3412_v6  ;;  %v3430_v18 = vld [vmem:[%s5060_s1 + $0x40] ss:$8 sps:$4 sm:$0xff]   ;;  %v3432_v20 = vld [vmem:[%s5060_s1 + $0x54] ss:$8 sps:$4 sm:$0xff]   ;;  %v3436_v22 = vld [vmem:[%s5060_s1 + $0x50] ss:$8 sps:$4 sm:$0xff]  }
   0x8   :  { %2437 = vmatpush1.bf16.msra.mxu0 %v3413_v7  ;;  %2154 = vmatprep.subr.bf16.mxu1 %v3414_v8  ;;  %v3431_v19 = vld [vmem:[%s5060_s1 + $0x440] ss:$8 sps:$4 sm:$0xff]   ;;  %v3434_v21 = vld [vmem:[%s5060_s1 + $0x454] ss:$8 sps:$4 sm:$0xff]   ;;  %v3437_v23 = vld [vmem:[%s5060_s1 + $0x450] ss:$8 sps:$4 sm:$0xff]  }
   0x9   :  { %2438 = vmatprep.subr.bf16.mxu0 %v3416_v9  ;;  %v3438_v24 = vld [vmem:[%s5060_s1 + $0x64] ss:$8 sps:$4 sm:$0xff]   ;;  %v3442_v26 = vld [vmem:[%s5060_s1 + $0x60] ss:$8 sps:$4 sm:$0xff]   ;;  %v3444_v28 = vld [vmem:[%s5060_s1 + $0x74] ss:$8 sps:$4 sm:$0xff]  }
   0xa   :  { %v3440_v25 = vld [vmem:[%s5060_s1 + $0x464] ss:$8 sps:$4 sm:$0xff]   ;;  %v3443_v27 = vld [vmem:[%s5060_s1 + $0x460] ss:$8 sps:$4 sm:$0xff]   ;;  %v3446_v29 = vld [vmem:[%s5060_s1 + $0x474] ss:$8 sps:$4 sm:$0xff]  }
   0xb   :  { %2155 = vmatpush1.bf16.msra.mxu1 %v3418_v10  ;;  %v3448_v30 = vld [vmem:[%s5060_s1 + $0x70] ss:$8 sps:$4 sm:$0xff]   ;;  %v3450_v32 = vld [vmem:[%s5060_s1 + $0x84] ss:$8 sps:$4 sm:$0xff]   ;;  %v3454_v34 = vld [vmem:[%s5060_s1 + $0x80] ss:$8 sps:$4 sm:$0xff]  }
   0xc   :  { %2439 = vmatpush1.bf16.msra.mxu0 %v3419_v11  ;;  %2156 = vmatprep.subr.bf16.mxu1 %v3420_v12  ;;  %v3449_v31 = vld [vmem:[%s5060_s1 + $0x470] ss:$8 sps:$4 sm:$0xff]   ;;  %v3452_v33 = vld [vmem:[%s5060_s1 + $0x484] ss:$8 sps:$4 sm:$0xff]   ;;  %v3455_v35 = vld [vmem:[%s5060_s1 + $0x480] ss:$8 sps:$4 sm:$0xff]  }
   0xd   :  { %2440 = vmatprep.subr.bf16.mxu0 %v3422_v13  ;;  %v3456_v36 = vld [vmem:[%s5060_s1 + $0x94] ss:$8 sps:$4 sm:$0xff]   ;;  %v3460_v38 = vld [vmem:[%s5060_s1 + $0x90] ss:$8 sps:$4 sm:$0xff]   ;;  %v3462_v40 = vld [vmem:[%s5060_s1 + $0xa4] ss:$8 sps:$4 sm:$0xff]  }
   0xe   :  { %v3458_v37 = vld [vmem:[%s5060_s1 + $0x494] ss:$8 sps:$4 sm:$0xff]   ;;  %v3461_v39 = vld [vmem:[%s5060_s1 + $0x490] ss:$8 sps:$4 sm:$0xff]   ;;  %v3464_v41 = vld [vmem:[%s5060_s1 + $0x4a4] ss:$8 sps:$4 sm:$0xff]  }
   0xf   :  { %2157 = vmatpush1.bf16.msra.mxu1 %v3424_v14  ;;  %v3466_v42 = vld [vmem:[%s5060_s1 + $0xa0] ss:$8 sps:$4 sm:$0xff]   ;;  %v3468_v44 = vld [vmem:[%s5060_s1 + $0xb4] ss:$8 sps:$4 sm:$0xff]   ;;  %v3472_v46 = vld [vmem:[%s5060_s1 + $0xb0] ss:$8 sps:$4 sm:$0xff]  }
  0x10   :  { %2441 = vmatpush1.bf16.msra.mxu0 %v3425_v15  ;;  %2158 = vmatprep.subr.bf16.mxu1 %v3426_v16  ;;  %v3467_v43 = vld [vmem:[%s5060_s1 + $0x4a0] ss:$8 sps:$4 sm:$0xff]   ;;  %v3470_v45 = vld [vmem:[%s5060_s1 + $0x4b4] ss:$8 sps:$4 sm:$0xff]   ;;  %v3473_v47 = vld [vmem:[%s5060_s1 + $0x4b0] ss:$8 sps:$4 sm:$0xff]  }
  0x11   :  { %2442 = vmatprep.subr.bf16.mxu0 %v3428_v17  ;;  %v3500_v48 = vld [vmem:[%s5061_s0 + $0x4] ss:$72 sps:$4 sm:$0xff]   ;;  %v3478_v52 = vld [vmem:[%s5060_s1 + $0xc0] ss:$8 sps:$4 sm:$0xff]   ;;  %v3480_v54 = vld [vmem:[%s5060_s1 + $0xd4] ss:$8 sps:$4 sm:$0xff]  }
  0x12   :  { %v3474_v49 = vld [vmem:[%s5060_s1 + $0xc4] ss:$8 sps:$4 sm:$0xff]   ;;  %2182 = vmatprep.mubr.bf16.mxu1 %v3500_v48  ;;  %v3479_v53 = vld [vmem:[%s5060_s1 + $0x4c0] ss:$8 sps:$4 sm:$0xff]   ;;  %v3482_v55 = vld [vmem:[%s5060_s1 + $0x4d4] ss:$8 sps:$4 sm:$0xff]  }
  0x13   :  { %2159 = vmatpush1.bf16.msra.mxu1 %v3430_v18  ;;  %v3476_v50 = vld [vmem:[%s5060_s1 + $0x4c4] ss:$8 sps:$4 sm:$0xff]   ;;  %v3484_v56 = vld [vmem:[%s5060_s1 + $0xd0] ss:$8 sps:$4 sm:$0xff]   ;;  %v3490_v60 = vld [vmem:[%s5060_s1 + $0xe0] ss:$8 sps:$4 sm:$0xff]  }
  0x14   :  { %2443 = vmatpush1.bf16.msra.mxu0 %v3431_v19  ;;  %2160 = vmatprep.subr.bf16.mxu1 %v3432_v20  ;;  %v3506_v51 = vld [vmem:[%s5061_s0 + $0x24] ss:$72 sps:$4 sm:$0xff]   ;;  %v3485_v57 = vld [vmem:[%s5060_s1 + $0x4d0] ss:$8 sps:$4 sm:$0xff]   ;;  %v3491_v61 = vld [vmem:[%s5060_s1 + $0x4e0] ss:$8 sps:$4 sm:$0xff]  }
  0x15   :  { %2444 = vmatprep.subr.bf16.mxu0 %v3434_v21  ;;  %2466 = vmatprep.mubr.bf16.mxu0 %v3506_v51  ;;  %v3486_v58 = vld [vmem:[%s5060_s1 + $0xe4] ss:$8 sps:$4 sm:$0xff]   ;;  %v3492_v62 = vld [vmem:[%s5060_s1 + $0xf4] ss:$8 sps:$4 sm:$0xff]   ;;  %v3496_v0 = vld [vmem:[%s5060_s1 + $0xf0] ss:$8 sps:$4 sm:$0xff]  }
  0x16   :  { %v3488_v59 = vld [vmem:[%s5060_s1 + $0x4e4] ss:$8 sps:$4 sm:$0xff]   ;;  %v3494_v63 = vld [vmem:[%s5060_s1 + $0x4f4] ss:$8 sps:$4 sm:$0xff]   ;;  %v3497_v1 = vld [vmem:[%s5060_s1 + $0x4f0] ss:$8 sps:$4 sm:$0xff]  }
  0x17   :  { %2161 = vmatpush1.bf16.msra.mxu1 %v3436_v22  ;;  %v3503_v2 = vld [vmem:[%s5060_s1 + $0x104] ss:$8 sps:$4 sm:$0xff]   ;;  %v3498_v4 = vld [vmem:[%s5061_s0] ss:$72 sps:$4 sm:$0xff]   ;;  %v3512_v8 = vld [vmem:[%s5060_s1 + $0x114] ss:$8 sps:$4 sm:$0xff]  }
  0x18   :  { %2445 = vmatpush1.bf16.msra.mxu0 %v3437_v23  ;;  %2162 = vmatprep.subr.bf16.mxu1 %v3438_v24  ;;  %v3509_v3 = vld [vmem:[%s5060_s1 + $0x504] ss:$8 sps:$4 sm:$0xff]   ;;  %v3501_v5 = vld [vmem:[%s5060_s1 + $0x100] ss:$8 sps:$4 sm:$0xff]   ;;  %v3515_v9 = vld [vmem:[%s5060_s1 + $0x514] ss:$8 sps:$4 sm:$0xff]  }
  0x19   :  { %2446 = vmatprep.subr.bf16.mxu0 %v3440_v25  ;;  %v3504_v6 = vld [vmem:[%s5061_s0 + $0x20] ss:$72 sps:$4 sm:$0xff]   ;;  %v3510_v10 = vld [vmem:[%s5060_s1 + $0x110] ss:$8 sps:$4 sm:$0xff]   ;;  %v3518_v12 = vld [vmem:[%s5060_s1 + $0x124] ss:$8 sps:$4 sm:$0xff]  }
  0x1a   :  { %v3507_v7 = vld [vmem:[%s5060_s1 + $0x500] ss:$8 sps:$4 sm:$0xff]   ;;  %v3513_v11 = vld [vmem:[%s5060_s1 + $0x510] ss:$8 sps:$4 sm:$0xff]   ;;  %v3521_v13 = vld [vmem:[%s5060_s1 + $0x524] ss:$8 sps:$4 sm:$0xff]  }
  0x1b   :  { %2163 = vmatpush1.bf16.msra.mxu1 %v3442_v26  ;;  %v3516_v14 = vld [vmem:[%s5060_s1 + $0x120] ss:$8 sps:$4 sm:$0xff]   ;;  %v3524_v16 = vld [vmem:[%s5060_s1 + $0x134] ss:$8 sps:$4 sm:$0xff]   ;;  %v3522_v19 = vld [vmem:[%s5060_s1 + $0x130] ss:$8 sps:$4 sm:$0xff]  }
  0x1c   :  { %2447 = vmatpush1.bf16.msra.mxu0 %v3443_v27  ;;  %2164 = vmatprep.subr.bf16.mxu1 %v3444_v28  ;;  %v3519_v15 = vld [vmem:[%s5060_s1 + $0x520] ss:$8 sps:$4 sm:$0xff]   ;;  %v3564_v17 = vld [vmem:[%s5061_s0 + $0x94] ss:$72 sps:$4 sm:$0xff]   ;;  %v3525_v20 = vld [vmem:[%s5060_s1 + $0x530] ss:$8 sps:$4 sm:$0xff]  }
  0x1d   :  { %2448 = vmatprep.subr.bf16.mxu0 %v3446_v29  ;;  %v3527_v18 = vld [vmem:[%s5060_s1 + $0x534] ss:$8 sps:$4 sm:$0xff]   ;;  %v3530_v22 = vld [vmem:[%s5060_s1 + $0x144] ss:$8 sps:$4 sm:$0xff]   ;;  %v3574_v24 = vld [vmem:[%s5061_s0 + $0x90] ss:$72 sps:$4 sm:$0xff]  }
  0x1e   :  { %v3569_v21 = vld [vmem:[%s5061_s0 + $0xb4] ss:$72 sps:$4 sm:$0xff]   ;;  %v3533_v23 = vld [vmem:[%s5060_s1 + $0x544] ss:$8 sps:$4 sm:$0xff]   ;;  %v3575_v25 = vld [vmem:[%s5061_s0 + $0xb0] ss:$72 sps:$4 sm:$0xff]  }
  0x1f   :  { %2165 = vmatpush1.bf16.msra.mxu1 %v3448_v30  ;;  %v3528_v26 = vld [vmem:[%s5060_s1 + $0x140] ss:$8 sps:$4 sm:$0xff]   ;;  %v3536_v28 = vld [vmem:[%s5060_s1 + $0x154] ss:$8 sps:$4 sm:$0xff]   ;;  %v3582_v29 = vld [vmem:[%s5061_s0 + $0x124] ss:$72 sps:$4 sm:$0xff]  }
  0x20   :  { %2449 = vmatpush1.bf16.msra.mxu0 %v3449_v31  ;;  %2166 = vmatprep.subr.bf16.mxu1 %v3450_v32  ;;  %v3531_v27 = vld [vmem:[%s5060_s1 + $0x540] ss:$8 sps:$4 sm:$0xff]   ;;  %v3539_v30 = vld [vmem:[%s5060_s1 + $0x554] ss:$8 sps:$4 sm:$0xff]   ;;  %v3534_v31 = vld [vmem:[%s5060_s1 + $0x150] ss:$8 sps:$4 sm:$0xff]  }
  0x21   :  { %2450 = vmatprep.subr.bf16.mxu0 %v3452_v33  ;;  %v3537_v32 = vld [vmem:[%s5060_s1 + $0x550] ss:$8 sps:$4 sm:$0xff]   ;;  %v3587_v33 = vld [vmem:[%s5061_s0 + $0x144] ss:$72 sps:$4 sm:$0xff]  }
  0x22   :  { %v3546_v48 = vld [vmem:[%s5060_s1 + $0x170] ss:$8 sps:$4 sm:$0xff]   ;;  %v3557_v51 = vld [vmem:[%s5060_s1 + $0x584] ss:$8 sps:$4 sm:$0xff]  }
  0x23   :  { %2167 = vmatpush1.bf16.msra.mxu1 %v3454_v34  ;;  %v3542_v34 = vld [vmem:[%s5060_s1 + $0x164] ss:$8 sps:$4 sm:$0xff]  }
  0x24   :  { %2451 = vmatpush1.bf16.msra.mxu0 %v3455_v35  ;;  %2168 = vmatprep.subr.bf16.mxu1 %v3456_v36  ;;  %v3545_v35 = vld [vmem:[%s5060_s1 + $0x564] ss:$8 sps:$4 sm:$0xff]   ;;  %v3592_v36 = vld [vmem:[%s5061_s0 + $0x120] ss:$72 sps:$4 sm:$0xff]  }
  0x25   :  { %2452 = vmatprep.subr.bf16.mxu0 %v3458_v37  ;;  %v3593_v37 = vld [vmem:[%s5061_s0 + $0x140] ss:$72 sps:$4 sm:$0xff]  }
  0x27   :  { %2169 = vmatpush1.bf16.msra.mxu1 %v3460_v38  ;;  %v3540_v38 = vld [vmem:[%s5060_s1 + $0x160] ss:$8 sps:$4 sm:$0xff]  }
  0x28   :  { %2453 = vmatpush1.bf16.msra.mxu0 %v3461_v39  ;;  %2170 = vmatprep.subr.bf16.mxu1 %v3462_v40  ;;  %v3543_v39 = vld [vmem:[%s5060_s1 + $0x560] ss:$8 sps:$4 sm:$0xff]   ;;  %v68_v40 = vld [vmem:[%s5061_s0 + $0x1b0] sm:$0x11] }
  0x29   :  { %2454 = vmatprep.subr.bf16.mxu0 %v3464_v41  ;;  %v3548_v41 = vld [vmem:[%s5060_s1 + $0x174] ss:$8 sps:$4 sm:$0xff]  }
  0x2b   :  { %2171 = vmatpush1.bf16.msra.mxu1 %v3466_v42  ;;  %v3551_v42 = vld [vmem:[%s5060_s1 + $0x574] ss:$8 sps:$4 sm:$0xff]  }
  0x2c   :  { %2455 = vmatpush1.bf16.msra.mxu0 %v3467_v43  ;;  %2172 = vmatprep.subr.bf16.mxu1 %v3468_v44  ;;  %v2913_v43 = vcombine.high %v68_v40, %v68_v40  ;;  %v72_v44 = vld [vmem:[%s5061_s0 + $0x1d0] sm:$0x11] }
  0x2d   :  { %2456 = vmatprep.subr.bf16.mxu0 %v3470_v45  ;;  %v2921_v45 = vcombine.high %v72_v44, %v72_v44 }
  0x2f   :  { %2173 = vmatpush1.bf16.msra.mxu1 %v3472_v46  ;;  %v2912_v46 = vcombine.low %v68_v40, %v68_v40  ;;  %v3700_v40 = vld [vmem:[%s5061_s0 + $0x12c] ss:$72 sps:$4 sm:$0xff]  }
  0x30   :  { %2457 = vmatpush1.bf16.msra.mxu0 %v3473_v47  ;;  %2174 = vmatprep.subr.bf16.mxu1 %v3474_v49  ;;  %v2920_v47 = vcombine.low %v72_v44, %v72_v44  ;;  %v3549_v49 = vld [vmem:[%s5060_s1 + $0x570] ss:$8 sps:$4 sm:$0xff]   ;;  %v3648_v44 = vld [vmem:[%s5060_s1 + $0x244] ss:$8 sps:$4 sm:$0xff]  }
  0x31   :  { %2458 = vmatprep.subr.bf16.mxu0 %v3476_v50  ;;  %v3554_v50 = vld [vmem:[%s5060_s1 + $0x184] ss:$8 sps:$4 sm:$0xff]  }
  0x33   :  { %2175 = vmatpush1.bf16.msra.mxu1 %v3478_v52  ;;  %v3552_v52 = vld [vmem:[%s5060_s1 + $0x180] ss:$8 sps:$4 sm:$0xff]  }
  0x34   :  { %2459 = vmatpush1.bf16.msra.mxu0 %v3479_v53  ;;  %2176 = vmatprep.subr.bf16.mxu1 %v3480_v54  ;;  %v3618_v53 = vld [vmem:[%s5061_s0 + $0xc] ss:$72 sps:$4 sm:$0xff]   ;;  %v3555_v54 = vld [vmem:[%s5060_s1 + $0x580] ss:$8 sps:$4 sm:$0xff]  }
  0x35   :  { %2460 = vmatprep.subr.bf16.mxu0 %v3482_v55  ;;  %v3560_v55 = vld [vmem:[%s5060_s1 + $0x194] ss:$8 sps:$4 sm:$0xff]  }
  0x37   :  { %2177 = vmatpush1.bf16.msra.mxu1 %v3484_v56  ;;  %v3563_v56 = vld [vmem:[%s5060_s1 + $0x594] ss:$8 sps:$4 sm:$0xff]  }
  0x38   :  { %2461 = vmatpush1.bf16.msra.mxu0 %v3485_v57  ;;  %2178 = vmatprep.subr.bf16.mxu1 %v3486_v58  ;;  %v3624_v57 = vld [vmem:[%s5061_s0 + $0x2c] ss:$72 sps:$4 sm:$0xff]   ;;  %v3558_v58 = vld [vmem:[%s5060_s1 + $0x190] ss:$8 sps:$4 sm:$0xff]  }
  0x39   :  { %2462 = vmatprep.subr.bf16.mxu0 %v3488_v59  ;;  %v3561_v59 = vld [vmem:[%s5060_s1 + $0x590] ss:$8 sps:$4 sm:$0xff]  }
  0x3b   :  { %2179 = vmatpush1.bf16.msra.mxu1 %v3490_v60  ;;  %v3568_v60 = vld [vmem:[%s5060_s1 + $0x1a4] ss:$8 sps:$4 sm:$0xff]  }
  0x3c   :  { %2463 = vmatpush1.bf16.msra.mxu0 %v3491_v61  ;;  %2180 = vmatprep.subr.bf16.mxu1 %v3492_v62  ;;  %v3573_v61 = vld [vmem:[%s5060_s1 + $0x5a4] ss:$8 sps:$4 sm:$0xff]   ;;  %v3566_v62 = vld [vmem:[%s5060_s1 + $0x1a0] ss:$8 sps:$4 sm:$0xff]  }
  0x3d   :  { %2464 = vmatprep.subr.bf16.mxu0 %v3494_v63  ;;  %v3571_v63 = vld [vmem:[%s5060_s1 + $0x5a0] ss:$8 sps:$4 sm:$0xff]  }
  0x3f   :  { %2181 = vmatpush1.bf16.msra.mxu1 %v3496_v0  ;;  %v3578_v0 = vld [vmem:[%s5060_s1 + $0x1b4] ss:$8 sps:$4 sm:$0xff]  }
  0x40   :  { %2465 = vmatpush1.bf16.msra.mxu0 %v3497_v1  ;;  %2221 = vmatprep.subr.bf16.mxu1 %v3503_v2  ;;  %v3581_v1 = vld [vmem:[%s5060_s1 + $0x5b4] ss:$8 sps:$4 sm:$0xff]   ;;  %v3576_v2 = vld [vmem:[%s5060_s1 + $0x1b0] ss:$8 sps:$4 sm:$0xff]  }
  0x41   :  { %2505 = vmatprep.subr.bf16.mxu0 %v3509_v3  ;;  %v3579_v3 = vld [vmem:[%s5060_s1 + $0x5b0] ss:$8 sps:$4 sm:$0xff]  }
  0x42   :  { %2183 = vmatmul.mubr.bf16.vlgmr.msra.gmra.mrb[0].mxu1 %v3498_v4  ;;  %v3586_v4 = vld [vmem:[%s5060_s1 + $0x1c4] ss:$8 sps:$4 sm:$0xff]  }
  0x43   :  { %2467 = vmatmul.mubr.bf16.vlgmr.msra.gmra.mrb[0].mxu0 %v3504_v6  ;;  %2222 = vmatpush1.bf16.msra.mxu1 %v3501_v5  ;;  %v3591_v5 = vld [vmem:[%s5060_s1 + $0x5c4] ss:$8 sps:$4 sm:$0xff]   ;;  %v3584_v6 = vld [vmem:[%s5060_s1 + $0x1c0] ss:$8 sps:$4 sm:$0xff]  }
  0x44   :  { %2506 = vmatpush1.bf16.msra.mxu0 %v3507_v7  ;;  %2223 = vmatprep.subr.bf16.mxu1 %v3512_v8  ;;  %v3589_v7 = vld [vmem:[%s5060_s1 + $0x5c0] ss:$8 sps:$4 sm:$0xff]   ;;  %v3596_v8 = vld [vmem:[%s5060_s1 + $0x1d4] ss:$8 sps:$4 sm:$0xff]  }
  0x45   :  { %2507 = vmatprep.subr.bf16.mxu0 %v3515_v9  ;;  %2192 = vmatprep.mubr.bf16.mxu1 %v3564_v17  ;;  %v3599_v9 = vld [vmem:[%s5060_s1 + $0x5d4] ss:$8 sps:$4 sm:$0xff]  }
  0x46   :  { %2476 = vmatprep.mubr.bf16.mxu0 %v3569_v21  ;;  %v3615_v17 = vld [vmem:[%s5060_s1 + $0x5f4] ss:$8 sps:$4 sm:$0xff]   ;;  %v3627_v21 = vld [vmem:[%s5060_s1 + $0x604] ss:$8 sps:$4 sm:$0xff]  }
  0x47   :  { %2224 = vmatpush1.bf16.msra.mxu1 %v3510_v10  ;;  %v3594_v10 = vld [vmem:[%s5060_s1 + $0x1d0] ss:$8 sps:$4 sm:$0xff]  }
  0x48   :  { %2508 = vmatpush1.bf16.msra.mxu0 %v3513_v11  ;;  %2225 = vmatprep.subr.bf16.mxu1 %v3518_v12  ;;  %v3597_v11 = vld [vmem:[%s5060_s1 + $0x5d0] ss:$8 sps:$4 sm:$0xff]   ;;  %v3603_v12 = vld [vmem:[%s5060_s1 + $0x1e4] ss:$8 sps:$4 sm:$0xff]  }
  0x49   :  { %2509 = vmatprep.subr.bf16.mxu0 %v3521_v13  ;;  %v3607_v13 = vld [vmem:[%s5060_s1 + $0x5e4] ss:$8 sps:$4 sm:$0xff]  }
  0x4a   :  { %2193 = vmatmul.mubr.bf16.gmra.mrb[4].mxu1 %v3574_v24  ;;  %v3622_v24 = vld [vmem:[%s5061_s0 + $0x28] ss:$72 sps:$4 sm:$0xff]  }
  0x4b   :  { %2226 = vmatpush1.bf16.msra.mxu1 %v3516_v14  ;;  %2477 = vmatmul.mubr.bf16.gmra.mrb[4].mxu0 %v3575_v25  ;;  %v3601_v14 = vld [vmem:[%s5060_s1 + $0x1e0] ss:$8 sps:$4 sm:$0xff]  }
  0x4c   :  { %2510 = vmatpush1.bf16.msra.mxu0 %v3519_v15  ;;  %2227 = vmatprep.subr.bf16.mxu1 %v3524_v16  ;;  %v3605_v15 = vld [vmem:[%s5060_s1 + $0x5e0] ss:$8 sps:$4 sm:$0xff]   ;;  %v3612_v16 = vld [vmem:[%s5060_s1 + $0x1f4] ss:$8 sps:$4 sm:$0xff]  }
  0x4d   :  { %2511 = vmatprep.subr.bf16.mxu0 %v3527_v18  ;;  %2202 = vmatprep.mubr.bf16.mxu1 %v3582_v29  ;;  %v3610_v18 = vld [vmem:[%s5060_s1 + $0x1f0] ss:$8 sps:$4 sm:$0xff]   ;;  %v3625_v25 = vld [vmem:[%s5060_s1 + $0x600] ss:$8 sps:$4 sm:$0xff]   ;;  %v3687_v29 = vld [vmem:[%s5061_s0 + $0xbc] ss:$72 sps:$4 sm:$0xff]  }
  0x4e   :  { %2486 = vmatprep.mubr.bf16.mxu0 %v3587_v33  ;;  %v3639_v33 = vld [vmem:[%s5060_s1 + $0x624] ss:$8 sps:$4 sm:$0xff]  }
  0x4f   :  { %2228 = vmatpush1.bf16.msra.mxu1 %v3522_v19  ;;  %v3613_v19 = vld [vmem:[%s5060_s1 + $0x5f0] ss:$8 sps:$4 sm:$0xff]  }
  0x50   :  { %2512 = vmatpush1.bf16.msra.mxu0 %v3525_v20  ;;  %2229 = vmatprep.subr.bf16.mxu1 %v3530_v22  ;;  %v3621_v20 = vld [vmem:[%s5060_s1 + $0x204] ss:$8 sps:$4 sm:$0xff]   ;;  %v3616_v22 = vld [vmem:[%s5061_s0 + $0x8] ss:$72 sps:$4 sm:$0xff]  }
  0x51   :  { %2513 = vmatprep.subr.bf16.mxu0 %v3533_v23  ;;  %v3619_v23 = vld [vmem:[%s5060_s1 + $0x200] ss:$8 sps:$4 sm:$0xff]  }
  0x52   :  { %2203 = vmatmul.mubr.bf16.gmra.mrb[8].mxu1 %v3592_v36  ;;  %v3693_v36 = vld [vmem:[%s5061_s0 + $0xb8] ss:$72 sps:$4 sm:$0xff]  }
  0x53   :  { %2230 = vmatpush1.bf16.msra.mxu1 %v3528_v26  ;;  %2487 = vmatmul.mubr.bf16.gmra.mrb[8].mxu0 %v3593_v37  ;;  %v3630_v26 = vld [vmem:[%s5060_s1 + $0x214] ss:$8 sps:$4 sm:$0xff]   ;;  %v3637_v37 = vld [vmem:[%s5060_s1 + $0x620] ss:$8 sps:$4 sm:$0xff]  }
  0x54   :  { %2514 = vmatpush1.bf16.msra.mxu0 %v3531_v27  ;;  %2231 = vmatprep.subr.bf16.mxu1 %v3536_v28  ;;  %v3633_v27 = vld [vmem:[%s5060_s1 + $0x614] ss:$8 sps:$4 sm:$0xff]  }
  0x55   :  { %2515 = vmatprep.subr.bf16.mxu0 %v3539_v30  ;;  %2212 = vmatprep.mubr.bf16.mxu1 %v2913_v43  ;;  %v3682_v28 = vld [vmem:[%s5061_s0 + $0x9c] ss:$72 sps:$4 sm:$0xff]   ;;  %v3628_v30 = vld [vmem:[%s5060_s1 + $0x210] ss:$8 sps:$4 sm:$0xff]  }
  0x56   :  { %2496 = vmatprep.mubr.bf16.mxu0 %v2921_v45  ;;  %v3643_v43 = vld [vmem:[%s5060_s1 + $0x630] ss:$8 sps:$4 sm:$0xff]   ;;  %v3651_v45 = vld [vmem:[%s5060_s1 + $0x644] ss:$8 sps:$4 sm:$0xff]  }
  0x57   :  { %2232 = vmatpush1.bf16.msra.mxu1 %v3534_v31  ;;  %v3631_v31 = vld [vmem:[%s5060_s1 + $0x610] ss:$8 sps:$4 sm:$0xff]  }
  0x58   :  { %2516 = vmatpush1.bf16.msra.mxu0 %v3537_v32  ;;  %2233 = vmatprep.subr.bf16.mxu1 %v3542_v34  ;;  %v3636_v32 = vld [vmem:[%s5060_s1 + $0x224] ss:$8 sps:$4 sm:$0xff]   ;;  %v3634_v34 = vld [vmem:[%s5060_s1 + $0x220] ss:$8 sps:$4 sm:$0xff]  }
  0x59   :  { %2517 = vmatprep.subr.bf16.mxu0 %v3545_v35  ;;  %v3692_v35 = vld [vmem:[%s5061_s0 + $0x98] ss:$72 sps:$4 sm:$0xff]  }
  0x5a   :  { %2213 = vmatmul.mubr.bf16.gmra.mrb[12].mxu1 %v2912_v46  ;;  %v3646_v46 = vld [vmem:[%s5060_s1 + $0x240] ss:$8 sps:$4 sm:$0xff]  }
  0x5b   :  { %2234 = vmatpush1.bf16.msra.mxu1 %v3540_v38  ;;  %2497 = vmatmul.mubr.bf16.gmra.mrb[12].mxu0 %v2920_v47  ;;  %v3642_v38 = vld [vmem:[%s5060_s1 + $0x234] ss:$8 sps:$4 sm:$0xff]   ;;  %v3649_v47 = vld [vmem:[%s5060_s1 + $0x640] ss:$8 sps:$4 sm:$0xff]  }
  0x5c   :  { %2518 = vmatpush1.bf16.msra.mxu0 %v3543_v39  ;;  %2235 = vmatprep.subr.bf16.mxu1 %v3548_v41  ;;  %v3645_v39 = vld [vmem:[%s5060_s1 + $0x634] ss:$8 sps:$4 sm:$0xff]  }
  0x5d   :  { %2519 = vmatprep.subr.bf16.mxu0 %v3551_v42  ;;  %2253 = vmatprep.mubr.bf16.mxu1 %v3618_v53  ;;  %v3705_v41 = vld [vmem:[%s5061_s0 + $0x14c] ss:$72 sps:$4 sm:$0xff]   ;;  %v3640_v42 = vld [vmem:[%s5060_s1 + $0x230] ss:$8 sps:$4 sm:$0xff]  }
  0x5e   :  { %2537 = vmatprep.mubr.bf16.mxu0 %v3624_v57  ;;  %v3657_v53 = vld [vmem:[%s5060_s1 + $0x654] ss:$8 sps:$4 sm:$0xff]   ;;  %v3655_v57 = vld [vmem:[%s5060_s1 + $0x650] ss:$8 sps:$4 sm:$0xff]  }
  0x5f   :  { %2236 = vmatpush1.bf16.msra.mxu1 %v3546_v48  ;;  %v3710_v48 = vld [vmem:[%s5061_s0 + $0x128] ss:$72 sps:$4 sm:$0xff]  }
  0x60   :  { %2520 = vmatpush1.bf16.msra.mxu0 %v3549_v49  ;;  %2237 = vmatprep.subr.bf16.mxu1 %v3554_v50  ;;  %v3711_v49 = vld [vmem:[%s5061_s0 + $0x148] ss:$72 sps:$4 sm:$0xff]   ;;  %v69_v50 = vld [vmem:[%s5061_s0 + $0x1b8] sm:$0x11] }
  0x61   :  { %2521 = vmatprep.subr.bf16.mxu0 %v3557_v51  ;;  %v73_v51 = vld [vmem:[%s5061_s0 + $0x1d8] sm:$0x11] }
  0x63   :  { %2238 = vmatpush1.bf16.msra.mxu1 %v3552_v52  ;;  %v3654_v52 = vld [vmem:[%s5060_s1 + $0x254] ss:$8 sps:$4 sm:$0xff]  }
  0x64   :  { %2522 = vmatpush1.bf16.msra.mxu0 %v3555_v54  ;;  %2239 = vmatprep.subr.bf16.mxu1 %v3560_v55  ;;  %v2915_v54 = vcombine.high %v69_v50, %v69_v50  ;;  %v2923_v55 = vcombine.high %v73_v51, %v73_v51 }
  0x65   :  { %2523 = vmatprep.subr.bf16.mxu0 %v3563_v56  ;;  %v3652_v56 = vld [vmem:[%s5060_s1 + $0x250] ss:$8 sps:$4 sm:$0xff]  }
  0x67   :  { %2240 = vmatpush1.bf16.msra.mxu1 %v3558_v58  ;;  %v3660_v58 = vld [vmem:[%s5060_s1 + $0x264] ss:$8 sps:$4 sm:$0xff]  }
  0x68   :  { %2524 = vmatpush1.bf16.msra.mxu0 %v3561_v59  ;;  %2241 = vmatprep.subr.bf16.mxu1 %v3568_v60  ;;  %v3663_v59 = vld [vmem:[%s5060_s1 + $0x664] ss:$8 sps:$4 sm:$0xff]   ;;  %v3658_v60 = vld [vmem:[%s5060_s1 + $0x260] ss:$8 sps:$4 sm:$0xff]  }
  0x69   :  { %2525 = vmatprep.subr.bf16.mxu0 %v3573_v61  ;;  %v3661_v61 = vld [vmem:[%s5060_s1 + $0x660] ss:$8 sps:$4 sm:$0xff]  }
  0x6b   :  { %2242 = vmatpush1.bf16.msra.mxu1 %v3566_v62  ;;  %v2914_v62 = vcombine.low %v69_v50, %v69_v50  ;;  %v3754_v50 = vld [vmem:[%s5060_s1 + $0x324] ss:$8 sps:$4 sm:$0xff]  }
  0x6c   :  { %2526 = vmatpush1.bf16.msra.mxu0 %v3571_v63  ;;  %2243 = vmatprep.subr.bf16.mxu1 %v3578_v0  ;;  %v2922_v63 = vcombine.low %v73_v51, %v73_v51  ;;  %v3666_v0 = vld [vmem:[%s5060_s1 + $0x274] ss:$8 sps:$4 sm:$0xff]   ;;  %v3757_v51 = vld [vmem:[%s5060_s1 + $0x724] ss:$8 sps:$4 sm:$0xff]  }
  0x6d   :  { %2527 = vmatprep.subr.bf16.mxu0 %v3581_v1  ;;  %v3669_v1 = vld [vmem:[%s5060_s1 + $0x674] ss:$8 sps:$4 sm:$0xff]  }
  0x6f   :  { %2244 = vmatpush1.bf16.msra.mxu1 %v3576_v2  ;;  %v3736_v2 = vld [vmem:[%s5061_s0 + $0x14] ss:$72 sps:$4 sm:$0xff]  }
  0x70   :  { %2528 = vmatpush1.bf16.msra.mxu0 %v3579_v3  ;;  %2245 = vmatprep.subr.bf16.mxu1 %v3586_v4  ;;  %v3742_v3 = vld [vmem:[%s5061_s0 + $0x34] ss:$72 sps:$4 sm:$0xff]   ;;  %v3664_v4 = vld [vmem:[%s5060_s1 + $0x270] ss:$8 sps:$4 sm:$0xff]  }
  0x71   :  { %2529 = vmatprep.subr.bf16.mxu0 %v3591_v5  ;;  %v3667_v5 = vld [vmem:[%s5060_s1 + $0x670] ss:$8 sps:$4 sm:$0xff]  }
  0x73   :  { %2246 = vmatpush1.bf16.msra.mxu1 %v3584_v6  ;;  %v3672_v6 = vld [vmem:[%s5060_s1 + $0x284] ss:$8 sps:$4 sm:$0xff]  }
  0x74   :  { %2530 = vmatpush1.bf16.msra.mxu0 %v3589_v7  ;;  %2247 = vmatprep.subr.bf16.mxu1 %v3596_v8  ;;  %v3675_v7 = vld [vmem:[%s5060_s1 + $0x684] ss:$8 sps:$4 sm:$0xff]   ;;  %v3670_v8 = vld [vmem:[%s5060_s1 + $0x280] ss:$8 sps:$4 sm:$0xff]  }
  0x75   :  { %2531 = vmatprep.subr.bf16.mxu0 %v3599_v9  ;;  %v3673_v9 = vld [vmem:[%s5060_s1 + $0x680] ss:$8 sps:$4 sm:$0xff]  }
  0x77   :  { %2248 = vmatpush1.bf16.msra.mxu1 %v3594_v10  ;;  %v3678_v10 = vld [vmem:[%s5060_s1 + $0x294] ss:$8 sps:$4 sm:$0xff]  }
  0x78   :  { %2532 = vmatpush1.bf16.msra.mxu0 %v3597_v11  ;;  %2249 = vmatprep.subr.bf16.mxu1 %v3603_v12  ;;  %v3681_v11 = vld [vmem:[%s5060_s1 + $0x694] ss:$8 sps:$4 sm:$0xff]   ;;  %v3676_v12 = vld [vmem:[%s5060_s1 + $0x290] ss:$8 sps:$4 sm:$0xff]  }
  0x79   :  { %2533 = vmatprep.subr.bf16.mxu0 %v3607_v13  ;;  %v3679_v13 = vld [vmem:[%s5060_s1 + $0x690] ss:$8 sps:$4 sm:$0xff]  }
  0x7b   :  { %2250 = vmatpush1.bf16.msra.mxu1 %v3601_v14  ;;  %v3686_v14 = vld [vmem:[%s5060_s1 + $0x2a4] ss:$8 sps:$4 sm:$0xff]  }
  0x7c   :  { %2534 = vmatpush1.bf16.msra.mxu0 %v3605_v15  ;;  %2251 = vmatprep.subr.bf16.mxu1 %v3612_v16  ;;  %v3691_v15 = vld [vmem:[%s5060_s1 + $0x6a4] ss:$8 sps:$4 sm:$0xff]   ;;  %v3684_v16 = vld [vmem:[%s5060_s1 + $0x2a0] ss:$8 sps:$4 sm:$0xff]  }
  0x7d   :  { %2535 = vmatprep.subr.bf16.mxu0 %v3615_v17  ;;  %v3689_v17 = vld [vmem:[%s5060_s1 + $0x6a0] ss:$8 sps:$4 sm:$0xff]  }
  0x7f   :  { %2252 = vmatpush1.bf16.msra.mxu1 %v3610_v18  ;;  %v3696_v18 = vld [vmem:[%s5060_s1 + $0x2b4] ss:$8 sps:$4 sm:$0xff]  }
  0x80   :  { %2536 = vmatpush1.bf16.msra.mxu0 %v3613_v19  ;;  %2292 = vmatprep.subr.bf16.mxu1 %v3621_v20  ;;  %v3699_v19 = vld [vmem:[%s5060_s1 + $0x6b4] ss:$8 sps:$4 sm:$0xff]   ;;  %v3694_v20 = vld [vmem:[%s5060_s1 + $0x2b0] ss:$8 sps:$4 sm:$0xff]  }
  0x81   :  { %2576 = vmatprep.subr.bf16.mxu0 %v3627_v21  ;;  %v3697_v21 = vld [vmem:[%s5060_s1 + $0x6b0] ss:$8 sps:$4 sm:$0xff]  }
  0x82   :  { %2254 = vmatmul.mubr.bf16.vlgmr.msra.gmra.mrb[0].mxu1 %v3616_v22  ;;  %v3704_v22 = vld [vmem:[%s5060_s1 + $0x2c4] ss:$8 sps:$4 sm:$0xff]  }
  0x83   :  { %2538 = vmatmul.mubr.bf16.vlgmr.msra.gmra.mrb[0].mxu0 %v3622_v24  ;;  %2293 = vmatpush1.bf16.msra.mxu1 %v3619_v23  ;;  %v3709_v23 = vld [vmem:[%s5060_s1 + $0x6c4] ss:$8 sps:$4 sm:$0xff]   ;;  %v3702_v24 = vld [vmem:[%s5060_s1 + $0x2c0] ss:$8 sps:$4 sm:$0xff]  }
  0x84   :  { %2577 = vmatpush1.bf16.msra.mxu0 %v3625_v25  ;;  %2294 = vmatprep.subr.bf16.mxu1 %v3630_v26  ;;  %v3707_v25 = vld [vmem:[%s5060_s1 + $0x6c0] ss:$8 sps:$4 sm:$0xff]   ;;  %v3714_v26 = vld [vmem:[%s5060_s1 + $0x2d4] ss:$8 sps:$4 sm:$0xff]  }
  0x85   :  { %2578 = vmatprep.subr.bf16.mxu0 %v3633_v27  ;;  %2263 = vmatprep.mubr.bf16.mxu1 %v3682_v28  ;;  %v3717_v27 = vld [vmem:[%s5060_s1 + $0x6d4] ss:$8 sps:$4 sm:$0xff]   ;;  %v3712_v28 = vld [vmem:[%s5060_s1 + $0x2d0] ss:$8 sps:$4 sm:$0xff]  }
  0x86   :  { %2547 = vmatprep.mubr.bf16.mxu0 %v3687_v29  ;;  %v3715_v29 = vld [vmem:[%s5060_s1 + $0x6d0] ss:$8 sps:$4 sm:$0xff]  }
  0x87   :  { %2295 = vmatpush1.bf16.msra.mxu1 %v3628_v30  ;;  %v3721_v30 = vld [vmem:[%s5060_s1 + $0x2e4] ss:$8 sps:$4 sm:$0xff]  }
  0x88   :  { %2579 = vmatpush1.bf16.msra.mxu0 %v3631_v31  ;;  %2296 = vmatprep.subr.bf16.mxu1 %v3636_v32  ;;  %v3725_v31 = vld [vmem:[%s5060_s1 + $0x6e4] ss:$8 sps:$4 sm:$0xff]   ;;  %v3719_v32 = vld [vmem:[%s5060_s1 + $0x2e0] ss:$8 sps:$4 sm:$0xff]  }
  0x89   :  { %2580 = vmatprep.subr.bf16.mxu0 %v3639_v33  ;;  %v3723_v33 = vld [vmem:[%s5060_s1 + $0x6e0] ss:$8 sps:$4 sm:$0xff]  }
  0x8a   :  { %2264 = vmatmul.mubr.bf16.gmra.mrb[4].mxu1 %v3692_v35  ;;  %v3733_v35 = vld [vmem:[%s5060_s1 + $0x6f4] ss:$8 sps:$4 sm:$0xff]  }
  0x8b   :  { %2548 = vmatmul.mubr.bf16.gmra.mrb[4].mxu0 %v3693_v36  ;;  %2297 = vmatpush1.bf16.msra.mxu1 %v3634_v34  ;;  %v3730_v34 = vld [vmem:[%s5060_s1 + $0x2f4] ss:$8 sps:$4 sm:$0xff]   ;;  %v3728_v36 = vld [vmem:[%s5060_s1 + $0x2f0] ss:$8 sps:$4 sm:$0xff]  }
  0x8c   :  { %2581 = vmatpush1.bf16.msra.mxu0 %v3637_v37  ;;  %2298 = vmatprep.subr.bf16.mxu1 %v3642_v38  ;;  %v3731_v37 = vld [vmem:[%s5060_s1 + $0x6f0] ss:$8 sps:$4 sm:$0xff]   ;;  %v3739_v38 = vld [vmem:[%s5060_s1 + $0x304] ss:$8 sps:$4 sm:$0xff]  }
  0x8d   :  { %2582 = vmatprep.subr.bf16.mxu0 %v3645_v39  ;;  %2273 = vmatprep.mubr.bf16.mxu1 %v3700_v40  ;;  %v3745_v39 = vld [vmem:[%s5060_s1 + $0x704] ss:$8 sps:$4 sm:$0xff]   ;;  %v3734_v40 = vld [vmem:[%s5061_s0 + $0x10] ss:$72 sps:$4 sm:$0xff]  }
  0x8e   :  { %2557 = vmatprep.mubr.bf16.mxu0 %v3705_v41  ;;  %v3737_v41 = vld [vmem:[%s5060_s1 + $0x300] ss:$8 sps:$4 sm:$0xff]  }
  0x8f   :  { %2299 = vmatpush1.bf16.msra.mxu1 %v3640_v42  ;;  %v3740_v42 = vld [vmem:[%s5061_s0 + $0x30] ss:$72 sps:$4 sm:$0xff]  }
  0x90   :  { %2583 = vmatpush1.bf16.msra.mxu0 %v3643_v43  ;;  %2300 = vmatprep.subr.bf16.mxu1 %v3648_v44  ;;  %v3743_v43 = vld [vmem:[%s5060_s1 + $0x700] ss:$8 sps:$4 sm:$0xff]   ;;  %v3748_v44 = vld [vmem:[%s5060_s1 + $0x314] ss:$8 sps:$4 sm:$0xff]  }
  0x91   :  { %2584 = vmatprep.subr.bf16.mxu0 %v3651_v45  ;;  %v3751_v45 = vld [vmem:[%s5060_s1 + $0x714] ss:$8 sps:$4 sm:$0xff]  }
  0x92   :  { %2274 = vmatmul.mubr.bf16.gmra.mrb[8].mxu1 %v3710_v48  ;;  %v3746_v48 = vld [vmem:[%s5060_s1 + $0x310] ss:$8 sps:$4 sm:$0xff]  }
  0x93   :  { %2558 = vmatmul.mubr.bf16.gmra.mrb[8].mxu0 %v3711_v49  ;;  %2301 = vmatpush1.bf16.msra.mxu1 %v3646_v46  ;;  %v3800_v46 = vld [vmem:[%s5061_s0 + $0xa4] ss:$72 sps:$4 sm:$0xff]   ;;  %v3749_v49 = vld [vmem:[%s5060_s1 + $0x710] ss:$8 sps:$4 sm:$0xff]  }
  0x94   :  { %2585 = vmatpush1.bf16.msra.mxu0 %v3649_v47  ;;  %2302 = vmatprep.subr.bf16.mxu1 %v3654_v52  ;;  %v3802_v47 = vld [vmem:[%s5061_s0 + $0xc4] ss:$72 sps:$4 sm:$0xff]   ;;  %v3752_v52 = vld [vmem:[%s5060_s1 + $0x320] ss:$8 sps:$4 sm:$0xff]  }
  0x95   :  { %2586 = vmatprep.subr.bf16.mxu0 %v3657_v53  ;;  %2283 = vmatprep.mubr.bf16.mxu1 %v2915_v54  ;;  %v3804_v53 = vld [vmem:[%s5061_s0 + $0xa0] ss:$72 sps:$4 sm:$0xff]  }
  0x96   :  { %2567 = vmatprep.mubr.bf16.mxu0 %v2923_v55  ;;  %v3808_v54 = vld [vmem:[%s5061_s0 + $0xc0] ss:$72 sps:$4 sm:$0xff]  }
  0x97   :  { %2303 = vmatpush1.bf16.msra.mxu1 %v3652_v56  ;;  %v3755_v55 = vld [vmem:[%s5060_s1 + $0x720] ss:$8 sps:$4 sm:$0xff]   ;;  %v3760_v56 = vld [vmem:[%s5060_s1 + $0x334] ss:$8 sps:$4 sm:$0xff]  }
  0x98   :  { %2587 = vmatpush1.bf16.msra.mxu0 %v3655_v57  ;;  %2304 = vmatprep.subr.bf16.mxu1 %v3660_v58  ;;  %v3763_v57 = vld [vmem:[%s5060_s1 + $0x734] ss:$8 sps:$4 sm:$0xff]  }
  0x99   :  { %2588 = vmatprep.subr.bf16.mxu0 %v3663_v59  ;;  %v3818_v58 = vld [vmem:[%s5061_s0 + $0x134] ss:$72 sps:$4 sm:$0xff]   ;;  %v3758_v59 = vld [vmem:[%s5060_s1 + $0x330] ss:$8 sps:$4 sm:$0xff]  }
  0x9a   :  { %2284 = vmatmul.mubr.bf16.gmra.mrb[12].mxu1 %v2914_v62  ;;  %v3766_v62 = vld [vmem:[%s5060_s1 + $0x344] ss:$8 sps:$4 sm:$0xff]  }
  0x9b   :  { %2568 = vmatmul.mubr.bf16.gmra.mrb[12].mxu0 %v2922_v63  ;;  %2305 = vmatpush1.bf16.msra.mxu1 %v3658_v60  ;;  %v3820_v60 = vld [vmem:[%s5061_s0 + $0x154] ss:$72 sps:$4 sm:$0xff]   ;;  %v3769_v63 = vld [vmem:[%s5060_s1 + $0x744] ss:$8 sps:$4 sm:$0xff]  }
  0x9c   :  { %2589 = vmatpush1.bf16.msra.mxu0 %v3661_v61  ;;  %2306 = vmatprep.subr.bf16.mxu1 %v3666_v0  ;;  %v3761_v61 = vld [vmem:[%s5060_s1 + $0x730] ss:$8 sps:$4 sm:$0xff]  }
  0x9d   :  { %2590 = vmatprep.subr.bf16.mxu0 %v3669_v1  ;;  %2324 = vmatprep.mubr.bf16.mxu1 %v3736_v2  ;;  %v3822_v0 = vld [vmem:[%s5061_s0 + $0x130] ss:$72 sps:$4 sm:$0xff]   ;;  %v3764_v2 = vld [vmem:[%s5060_s1 + $0x340] ss:$8 sps:$4 sm:$0xff]  }
  0x9e   :  { %2608 = vmatprep.mubr.bf16.mxu0 %v3742_v3  ;;  %v3826_v1 = vld [vmem:[%s5061_s0 + $0x150] ss:$72 sps:$4 sm:$0xff]   ;;  %v70_v3 = vld [vmem:[%s5061_s0 + $0x1c0] sm:$0x11] }
  0x9f   :  { %2307 = vmatpush1.bf16.msra.mxu1 %v3664_v4  ;;  %v74_v4 = vld [vmem:[%s5061_s0 + $0x1e0] sm:$0x11] }
  0xa0   :  { %2591 = vmatpush1.bf16.msra.mxu0 %v3667_v5  ;;  %2308 = vmatprep.subr.bf16.mxu1 %v3672_v6  ;;  %v3767_v5 = vld [vmem:[%s5060_s1 + $0x740] ss:$8 sps:$4 sm:$0xff]   ;;  %v3772_v6 = vld [vmem:[%s5060_s1 + $0x354] ss:$8 sps:$4 sm:$0xff]  }
  0xa1   :  { %2592 = vmatprep.subr.bf16.mxu0 %v3675_v7  ;;  %v3775_v7 = vld [vmem:[%s5060_s1 + $0x754] ss:$8 sps:$4 sm:$0xff]  }
  0xa3   :  { %2309 = vmatpush1.bf16.msra.mxu1 %v3670_v8  ;;  %v2917_v8 = vcombine.high %v70_v3, %v70_v3 }
  0xa4   :  { %2593 = vmatpush1.bf16.msra.mxu0 %v3673_v9  ;;  %2310 = vmatprep.subr.bf16.mxu1 %v3678_v10  ;;  %v2925_v9 = vcombine.high %v74_v4, %v74_v4  ;;  %v3770_v10 = vld [vmem:[%s5060_s1 + $0x350] ss:$8 sps:$4 sm:$0xff]  }
  0xa5   :  { %2594 = vmatprep.subr.bf16.mxu0 %v3681_v11  ;;  %v3773_v11 = vld [vmem:[%s5060_s1 + $0x750] ss:$8 sps:$4 sm:$0xff]  }
  0xa7   :  { %2311 = vmatpush1.bf16.msra.mxu1 %v3676_v12  ;;  %v3778_v12 = vld [vmem:[%s5060_s1 + $0x364] ss:$8 sps:$4 sm:$0xff]  }
  0xa8   :  { %2595 = vmatpush1.bf16.msra.mxu0 %v3679_v13  ;;  %2312 = vmatprep.subr.bf16.mxu1 %v3686_v14  ;;  %v3781_v13 = vld [vmem:[%s5060_s1 + $0x764] ss:$8 sps:$4 sm:$0xff]   ;;  %v3776_v14 = vld [vmem:[%s5060_s1 + $0x360] ss:$8 sps:$4 sm:$0xff]  }
  0xa9   :  { %2596 = vmatprep.subr.bf16.mxu0 %v3691_v15  ;;  %v3779_v15 = vld [vmem:[%s5060_s1 + $0x760] ss:$8 sps:$4 sm:$0xff]  }
  0xab   :  { %2313 = vmatpush1.bf16.msra.mxu1 %v3684_v16  ;;  %v2916_v16 = vcombine.low %v70_v3, %v70_v3  ;;  %v3870_v3 = vld [vmem:[%s5060_s1 + $0x820] ss:$8 sps:$4 sm:$0xff]  }
  0xac   :  { %2597 = vmatpush1.bf16.msra.mxu0 %v3689_v17  ;;  %2314 = vmatprep.subr.bf16.mxu1 %v3696_v18  ;;  %v2924_v17 = vcombine.low %v74_v4, %v74_v4  ;;  %v3784_v18 = vld [vmem:[%s5060_s1 + $0x374] ss:$8 sps:$4 sm:$0xff]  }
  0xad   :  { %2598 = vmatprep.subr.bf16.mxu0 %v3699_v19  ;;  %v3787_v19 = vld [vmem:[%s5060_s1 + $0x774] ss:$8 sps:$4 sm:$0xff]  }
  0xae   :  { %v3875_v4 = vld [vmem:[%s5060_s1 + $0x834] ss:$8 sps:$4 sm:$0xff]  }
  0xaf   :  { %2315 = vmatpush1.bf16.msra.mxu1 %v3694_v20  ;;  %v3854_v20 = vld [vmem:[%s5061_s0 + $0x1c] ss:$72 sps:$4 sm:$0xff]  }
  0xb0   :  { %2599 = vmatpush1.bf16.msra.mxu0 %v3697_v21  ;;  %2316 = vmatprep.subr.bf16.mxu1 %v3704_v22  ;;  %v3857_v21 = vld [vmem:[%s5061_s0 + $0x3c] ss:$72 sps:$4 sm:$0xff]   ;;  %v3782_v22 = vld [vmem:[%s5060_s1 + $0x370] ss:$8 sps:$4 sm:$0xff]  }
  0xb1   :  { %2600 = vmatprep.subr.bf16.mxu0 %v3709_v23  ;;  %v3785_v23 = vld [vmem:[%s5060_s1 + $0x770] ss:$8 sps:$4 sm:$0xff]  }
  0xb3   :  { %2317 = vmatpush1.bf16.msra.mxu1 %v3702_v24  ;;  %v3790_v24 = vld [vmem:[%s5060_s1 + $0x384] ss:$8 sps:$4 sm:$0xff]  }
  0xb4   :  { %2601 = vmatpush1.bf16.msra.mxu0 %v3707_v25  ;;  %2318 = vmatprep.subr.bf16.mxu1 %v3714_v26  ;;  %v3793_v25 = vld [vmem:[%s5060_s1 + $0x784] ss:$8 sps:$4 sm:$0xff]   ;;  %v3788_v26 = vld [vmem:[%s5060_s1 + $0x380] ss:$8 sps:$4 sm:$0xff]  }
  0xb5   :  { %2602 = vmatprep.subr.bf16.mxu0 %v3717_v27  ;;  %v3791_v27 = vld [vmem:[%s5060_s1 + $0x780] ss:$8 sps:$4 sm:$0xff]  }
  0xb7   :  { %2319 = vmatpush1.bf16.msra.mxu1 %v3712_v28  ;;  %v3796_v28 = vld [vmem:[%s5060_s1 + $0x394] ss:$8 sps:$4 sm:$0xff]  }
  0xb8   :  { %2603 = vmatpush1.bf16.msra.mxu0 %v3715_v29  ;;  %2320 = vmatprep.subr.bf16.mxu1 %v3721_v30  ;;  %v3799_v29 = vld [vmem:[%s5060_s1 + $0x794] ss:$8 sps:$4 sm:$0xff]   ;;  %v3794_v30 = vld [vmem:[%s5060_s1 + $0x390] ss:$8 sps:$4 sm:$0xff]  }
  0xb9   :  { %2604 = vmatprep.subr.bf16.mxu0 %v3725_v31  ;;  %v3797_v31 = vld [vmem:[%s5060_s1 + $0x790] ss:$8 sps:$4 sm:$0xff]  }
  0xbb   :  { %2321 = vmatpush1.bf16.msra.mxu1 %v3719_v32  ;;  %v3807_v32 = vld [vmem:[%s5060_s1 + $0x3a4] ss:$8 sps:$4 sm:$0xff]  }
  0xbc   :  { %2605 = vmatpush1.bf16.msra.mxu0 %v3723_v33  ;;  %2322 = vmatprep.subr.bf16.mxu1 %v3730_v34  ;;  %v3811_v33 = vld [vmem:[%s5060_s1 + $0x7a4] ss:$8 sps:$4 sm:$0xff]   ;;  %v3805_v34 = vld [vmem:[%s5060_s1 + $0x3a0] ss:$8 sps:$4 sm:$0xff]  }
  0xbd   :  { %2606 = vmatprep.subr.bf16.mxu0 %v3733_v35  ;;  %v3809_v35 = vld [vmem:[%s5060_s1 + $0x7a0] ss:$8 sps:$4 sm:$0xff]  }
  0xbf   :  { %2323 = vmatpush1.bf16.msra.mxu1 %v3728_v36  ;;  %v3814_v36 = vld [vmem:[%s5060_s1 + $0x3b4] ss:$8 sps:$4 sm:$0xff]  }
  0xc0   :  { %2607 = vmatpush1.bf16.msra.mxu0 %v3731_v37  ;;  %2363 = vmatprep.subr.bf16.mxu1 %v3739_v38  ;;  %v3817_v37 = vld [vmem:[%s5060_s1 + $0x7b4] ss:$8 sps:$4 sm:$0xff]   ;;  %v3812_v38 = vld [vmem:[%s5060_s1 + $0x3b0] ss:$8 sps:$4 sm:$0xff]  }
  0xc1   :  { %2647 = vmatprep.subr.bf16.mxu0 %v3745_v39  ;;  %v3815_v39 = vld [vmem:[%s5060_s1 + $0x7b0] ss:$8 sps:$4 sm:$0xff]  }
  0xc2   :  { %2325 = vmatmul.mubr.bf16.vlgmr.msra.gmra.mrb[0].mxu1 %v3734_v40  ;;  %v3825_v40 = vld [vmem:[%s5060_s1 + $0x3c4] ss:$8 sps:$4 sm:$0xff]  }
  0xc3   :  { %2609 = vmatmul.mubr.bf16.vlgmr.msra.gmra.mrb[0].mxu0 %v3740_v42  ;;  %2364 = vmatpush1.bf16.msra.mxu1 %v3737_v41  ;;  %v3829_v41 = vld [vmem:[%s5060_s1 + $0x7c4] ss:$8 sps:$4 sm:$0xff]   ;;  %v3823_v42 = vld [vmem:[%s5060_s1 + $0x3c0] ss:$8 sps:$4 sm:$0xff]  }
  0xc4   :  { %2648 = vmatpush1.bf16.msra.mxu0 %v3743_v43  ;;  %2365 = vmatprep.subr.bf16.mxu1 %v3748_v44  ;;  %v3827_v43 = vld [vmem:[%s5060_s1 + $0x7c0] ss:$8 sps:$4 sm:$0xff]   ;;  %v3832_v44 = vld [vmem:[%s5060_s1 + $0x3d4] ss:$8 sps:$4 sm:$0xff]  }
  0xc5   :  { %2649 = vmatprep.subr.bf16.mxu0 %v3751_v45  ;;  %2334 = vmatprep.mubr.bf16.mxu1 %v3800_v46  ;;  %v3835_v45 = vld [vmem:[%s5060_s1 + $0x7d4] ss:$8 sps:$4 sm:$0xff]   ;;  %v3830_v46 = vld [vmem:[%s5060_s1 + $0x3d0] ss:$8 sps:$4 sm:$0xff]  }
  0xc6   :  { %2618 = vmatprep.mubr.bf16.mxu0 %v3802_v47  ;;  %v3833_v47 = vld [vmem:[%s5060_s1 + $0x7d0] ss:$8 sps:$4 sm:$0xff]  }
  0xc7   :  { %2366 = vmatpush1.bf16.msra.mxu1 %v3746_v48  ;;  %v3841_v48 = vld [vmem:[%s5060_s1 + $0x3e4] ss:$8 sps:$4 sm:$0xff]  }
  0xc8   :  { %2650 = vmatpush1.bf16.msra.mxu0 %v3749_v49  ;;  %2367 = vmatprep.subr.bf16.mxu1 %v3754_v50  ;;  %v3845_v49 = vld [vmem:[%s5060_s1 + $0x7e4] ss:$8 sps:$4 sm:$0xff]   ;;  %v3839_v50 = vld [vmem:[%s5060_s1 + $0x3e0] ss:$8 sps:$4 sm:$0xff]  }
  0xc9   :  { %2651 = vmatprep.subr.bf16.mxu0 %v3757_v51  ;;  %v3843_v51 = vld [vmem:[%s5060_s1 + $0x7e0] ss:$8 sps:$4 sm:$0xff]  }
  0xca   :  { %2335 = vmatmul.mubr.bf16.gmra.mrb[4].mxu1 %v3804_v53  ;;  %v3851_v53 = vld [vmem:[%s5060_s1 + $0x7f4] ss:$8 sps:$4 sm:$0xff]  }
  0xcb   :  { %2619 = vmatmul.mubr.bf16.gmra.mrb[4].mxu0 %v3808_v54  ;;  %2368 = vmatpush1.bf16.msra.mxu1 %v3752_v52  ;;  %v3848_v52 = vld [vmem:[%s5060_s1 + $0x3f4] ss:$8 sps:$4 sm:$0xff]   ;;  %v3846_v54 = vld [vmem:[%s5060_s1 + $0x3f0] ss:$8 sps:$4 sm:$0xff]  }
  0xcc   :  { %2652 = vmatpush1.bf16.msra.mxu0 %v3755_v55  ;;  %2369 = vmatprep.subr.bf16.mxu1 %v3760_v56  ;;  %v3849_v55 = vld [vmem:[%s5060_s1 + $0x7f0] ss:$8 sps:$4 sm:$0xff]   ;;  %v3860_v56 = vld [vmem:[%s5060_s1 + $0x804] ss:$8 sps:$4 sm:$0xff]  }
  0xcd   :  { %2653 = vmatprep.subr.bf16.mxu0 %v3763_v57  ;;  %2344 = vmatprep.mubr.bf16.mxu1 %v3818_v58  ;;  %v3852_v57 = vld [vmem:[%s5061_s0 + $0x18] ss:$72 sps:$4 sm:$0xff]  }
  0xce   :  { %2628 = vmatprep.mubr.bf16.mxu0 %v3820_v60  ;;  %v3855_v58 = vld [vmem:[%s5061_s0 + $0x38] ss:$72 sps:$4 sm:$0xff]   ;;  %v3863_v60 = vld [vmem:[%s5060_s1 + $0x814] ss:$8 sps:$4 sm:$0xff]  }
  0xcf   :  { %2370 = vmatpush1.bf16.msra.mxu1 %v3758_v59  ;;  %v3858_v59 = vld [vmem:[%s5060_s1 + $0x800] ss:$8 sps:$4 sm:$0xff]  }
  0xd0   :  { %2654 = vmatpush1.bf16.msra.mxu0 %v3761_v61  ;;  %2371 = vmatprep.subr.bf16.mxu1 %v3766_v62  ;;  %v3864_v61 = vld [vmem:[%s5061_s0 + $0xac] ss:$72 sps:$4 sm:$0xff]  }
  0xd1   :  { %2655 = vmatprep.subr.bf16.mxu0 %v3769_v63  ;;  %v3866_v62 = vld [vmem:[%s5061_s0 + $0xcc] ss:$72 sps:$4 sm:$0xff]   ;;  %v3861_v63 = vld [vmem:[%s5060_s1 + $0x810] ss:$8 sps:$4 sm:$0xff]  }
  0xd2   :  { %2345 = vmatmul.mubr.bf16.gmra.mrb[8].mxu1 %v3822_v0  ;;  %v3872_v0 = vld [vmem:[%s5060_s1 + $0x824] ss:$8 sps:$4 sm:$0xff]  }
  0xd3   :  { %2629 = vmatmul.mubr.bf16.gmra.mrb[8].mxu0 %v3826_v1  ;;  %2372 = vmatpush1.bf16.msra.mxu1 %v3764_v2  ;;  %v3868_v1 = vld [vmem:[%s5061_s0 + $0xa8] ss:$72 sps:$4 sm:$0xff]  }
  0xd4   :  { %2656 = vmatpush1.bf16.msra.mxu0 %v3767_v5  ;;  %2373 = vmatprep.subr.bf16.mxu1 %v3772_v6  ;;  %v3869_v2 = vld [vmem:[%s5061_s0 + $0xc8] ss:$72 sps:$4 sm:$0xff]   ;;  %v3876_v5 = vld [vmem:[%s5061_s0 + $0x13c] ss:$72 sps:$4 sm:$0xff]  }
  0xd5   :  { %2657 = vmatprep.subr.bf16.mxu0 %v3775_v7  ;;  %2354 = vmatprep.mubr.bf16.mxu1 %v2917_v8  ;;  %v3878_v6 = vld [vmem:[%s5061_s0 + $0x15c] ss:$72 sps:$4 sm:$0xff]   ;;  %v3873_v7 = vld [vmem:[%s5060_s1 + $0x830] ss:$8 sps:$4 sm:$0xff]  }
  0xd6   :  { %2638 = vmatprep.mubr.bf16.mxu0 %v2925_v9  ;;  %v3884_v8 = vld [vmem:[%s5060_s1 + $0x844] ss:$8 sps:$4 sm:$0xff]   ;;  %v3880_v9 = vld [vmem:[%s5061_s0 + $0x138] ss:$72 sps:$4 sm:$0xff]  }
  0xd7   :  { %2374 = vmatpush1.bf16.msra.mxu1 %v3770_v10  ;;  %v3881_v10 = vld [vmem:[%s5061_s0 + $0x158] ss:$72 sps:$4 sm:$0xff]  }
  0xd8   :  { %2658 = vmatpush1.bf16.msra.mxu0 %v3773_v11  ;;  %2375 = vmatprep.subr.bf16.mxu1 %v3778_v12  ;;  %v71_v11 = vld [vmem:[%s5061_s0 + $0x1c8] sm:$0x11] }
  0xd9   :  { %2659 = vmatprep.subr.bf16.mxu0 %v3781_v13  ;;  %v75_v12 = vld [vmem:[%s5061_s0 + $0x1e8] sm:$0x11] }
  0xda   :  { %2355 = vmatmul.mubr.bf16.gmra.mrb[12].mxu1 %v2916_v16  ;;  %v3882_v13 = vld [vmem:[%s5060_s1 + $0x840] ss:$8 sps:$4 sm:$0xff]   ;;  %v2927_v16 = vcombine.high %v75_v12, %v75_v12 }
  0xdb   :  { %2639 = vmatmul.mubr.bf16.gmra.mrb[12].mxu0 %v2924_v17  ;;  %2376 = vmatpush1.bf16.msra.mxu1 %v3776_v14  ;;  %v3887_v14 = vld [vmem:[%s5060_s1 + $0x854] ss:$8 sps:$4 sm:$0xff]   ;;  %v3885_v17 = vld [vmem:[%s5060_s1 + $0x850] ss:$8 sps:$4 sm:$0xff]  }
  0xdc   :  { %2660 = vmatpush1.bf16.msra.mxu0 %v3779_v15  ;;  %2377 = vmatprep.subr.bf16.mxu1 %v3784_v18  ;;  %v2919_v15 = vcombine.high %v71_v11, %v71_v11  ;;  %v3894_v18 = vld [vmem:[%s5060_s1 + $0x864] ss:$8 sps:$4 sm:$0xff]  }
  0xdd   :  { %2661 = vmatprep.subr.bf16.mxu0 %v3787_v19  ;;  %2395 = vmatprep.mubr.bf16.mxu1 %v3854_v20  ;;  %v2918_v19 = vcombine.low %v71_v11, %v71_v11  ;;  %v2926_v20 = vcombine.low %v75_v12, %v75_v12 }
  0xde   :  { %2679 = vmatprep.mubr.bf16.mxu0 %v3857_v21  ;;  %v3892_v21 = vld [vmem:[%s5060_s1 + $0x860] ss:$8 sps:$4 sm:$0xff]  }
  0xdf   :  { %2378 = vmatpush1.bf16.msra.mxu1 %v3782_v22  ;;  %v3897_v22 = vld [vmem:[%s5060_s1 + $0x874] ss:$8 sps:$4 sm:$0xff]  }
  0xe0   :  { %2662 = vmatpush1.bf16.msra.mxu0 %v3785_v23  ;;  %2379 = vmatprep.subr.bf16.mxu1 %v3790_v24  ;;  %v3924_v23 = vld [vmem:[%s5061_s0 + $0x44] ss:$72 sps:$4 sm:$0xff]  }
  0xe1   :  { %2663 = vmatprep.subr.bf16.mxu0 %v3793_v25  ;;  %v3927_v24 = vld [vmem:[%s5061_s0 + $0x164] ss:$72 sps:$4 sm:$0xff]   ;;  %v3895_v25 = vld [vmem:[%s5060_s1 + $0x870] ss:$8 sps:$4 sm:$0xff]  }
  0xe3   :  { %2380 = vmatpush1.bf16.msra.mxu1 %v3788_v26  ;;  %v3900_v26 = vld [vmem:[%s5060_s1 + $0x884] ss:$8 sps:$4 sm:$0xff]  }
  0xe4   :  { %2664 = vmatpush1.bf16.msra.mxu0 %v3791_v27  ;;  %2381 = vmatprep.subr.bf16.mxu1 %v3796_v28  ;;  %v3898_v27 = vld [vmem:[%s5060_s1 + $0x880] ss:$8 sps:$4 sm:$0xff]   ;;  %v3903_v28 = vld [vmem:[%s5060_s1 + $0x894] ss:$8 sps:$4 sm:$0xff]  }
  0xe5   :  { %2665 = vmatprep.subr.bf16.mxu0 %v3799_v29  ;;  %v3901_v29 = vld [vmem:[%s5060_s1 + $0x890] ss:$8 sps:$4 sm:$0xff]  }
  0xe7   :  { %2382 = vmatpush1.bf16.msra.mxu1 %v3794_v30  ;;  %v3906_v30 = vld [vmem:[%s5060_s1 + $0x8a4] ss:$8 sps:$4 sm:$0xff]  }
  0xe8   :  { %2666 = vmatpush1.bf16.msra.mxu0 %v3797_v31  ;;  %2383 = vmatprep.subr.bf16.mxu1 %v3807_v32  ;;  %v3904_v31 = vld [vmem:[%s5060_s1 + $0x8a0] ss:$8 sps:$4 sm:$0xff]   ;;  %v3909_v32 = vld [vmem:[%s5060_s1 + $0x8b4] ss:$8 sps:$4 sm:$0xff]  }
  0xe9   :  { %2667 = vmatprep.subr.bf16.mxu0 %v3811_v33  ;;  %v3907_v33 = vld [vmem:[%s5060_s1 + $0x8b0] ss:$8 sps:$4 sm:$0xff]  }
  0xeb   :  { %2384 = vmatpush1.bf16.msra.mxu1 %v3805_v34  ;;  %v3912_v34 = vld [vmem:[%s5060_s1 + $0x8c4] ss:$8 sps:$4 sm:$0xff]  }
  0xec   :  { %2668 = vmatpush1.bf16.msra.mxu0 %v3809_v35  ;;  %2385 = vmatprep.subr.bf16.mxu1 %v3814_v36  ;;  %v3910_v35 = vld [vmem:[%s5060_s1 + $0x8c0] ss:$8 sps:$4 sm:$0xff]   ;;  %v3915_v36 = vld [vmem:[%s5060_s1 + $0x8d4] ss:$8 sps:$4 sm:$0xff]  }
  0xed   :  { %2669 = vmatprep.subr.bf16.mxu0 %v3817_v37  ;;  %v3913_v37 = vld [vmem:[%s5060_s1 + $0x8d0] ss:$8 sps:$4 sm:$0xff]  }
  0xef   :  { %2386 = vmatpush1.bf16.msra.mxu1 %v3812_v38  ;;  %v3918_v38 = vld [vmem:[%s5060_s1 + $0x8e4] ss:$8 sps:$4 sm:$0xff]  }
  0xf0   :  { %2670 = vmatpush1.bf16.msra.mxu0 %v3815_v39  ;;  %2387 = vmatprep.subr.bf16.mxu1 %v3825_v40  ;;  %v3916_v39 = vld [vmem:[%s5060_s1 + $0x8e0] ss:$8 sps:$4 sm:$0xff]   ;;  %v3921_v40 = vld [vmem:[%s5060_s1 + $0x8f4] ss:$8 sps:$4 sm:$0xff]  }
  0xf1   :  { %2671 = vmatprep.subr.bf16.mxu0 %v3829_v41  ;;  %v3919_v41 = vld [vmem:[%s5060_s1 + $0x8f0] ss:$8 sps:$4 sm:$0xff]  }
  0xf3   :  { %2388 = vmatpush1.bf16.msra.mxu1 %v3823_v42  ;;  %v76_v42 = vld [vmem:[%s5061_s0 + $0x1f0] sm:$0x11] }
  0xf4   :  { %2672 = vmatpush1.bf16.msra.mxu0 %v3827_v43  ;;  %2389 = vmatprep.subr.bf16.mxu1 %v3832_v44  ;;  %v3922_v43 = vld [vmem:[%s5061_s0 + $0x40] ss:$72 sps:$4 sm:$0xff]  }
  0xf5   :  { %2673 = vmatprep.subr.bf16.mxu0 %v3835_v45  ;;  %v3925_v44 = vld [vmem:[%s5061_s0 + $0x160] ss:$72 sps:$4 sm:$0xff]   ;;  %v3928_v45 = vld [vmem:[%s5061_s0 + $0xd4] ss:$72 sps:$4 sm:$0xff]  }
  0xf7   :  { %2390 = vmatpush1.bf16.msra.mxu1 %v3830_v46  ;;  %v2929_v46 = vcombine.high %v76_v42, %v76_v42 }
  0xf8   :  { %2674 = vmatpush1.bf16.msra.mxu0 %v3833_v47  ;;  %2391 = vmatprep.subr.bf16.mxu1 %v3841_v48  ;;  %v3931_v47 = vld [vmem:[%s5061_s0 + $0xd0] ss:$72 sps:$4 sm:$0xff]   ;;  %v2928_v48 = vcombine.low %v76_v42, %v76_v42 }
  0xf9   :  { %2675 = vmatprep.subr.bf16.mxu0 %v3845_v49 }
  0xfb   :  { %2392 = vmatpush1.bf16.msra.mxu1 %v3839_v50 }
  0xfc   :  { %2676 = vmatpush1.bf16.msra.mxu0 %v3843_v51  ;;  %2393 = vmatprep.subr.bf16.mxu1 %v3848_v52  ;;  %v367_v52 = vlaneseq }
  0xfd   :  { %2677 = vmatprep.subr.bf16.mxu0 %v3851_v53 }
  0xff   :  { %2394 = vmatpush1.bf16.msra.mxu1 %v3846_v54  ;;  %v368_v54 = vshrl.u32 %v367_v52, 7 }
 0x100   :  { %2678 = vmatpush1.bf16.msra.mxu0 %v3849_v55  ;;  %3232 = vmatprep.subr.bf16.mxu1 %v3860_v56 }
 0x101   :  { %2718 = vmatprep.subr.bf16.mxu0 %v3860_v56 }
 0x102   :  { %2396 = vmatmul.mubr.bf16.vlgmr.msra.gmra.mrb[0].mxu1 %v3852_v57 }
 0x103   :  { %2680 = vmatmul.mubr.bf16.vlgmr.msra.gmra.mrb[0].mxu0 %v3855_v58  ;;  %3248 = vmatpush1.bf16.msra.mxu1 %v3858_v59  ;;  %v369_v58 = vsub.s32 0, %v368_v54 }
 0x104   :  { %2719 = vmatpush1.bf16.msra.mxu0 %v3858_v59  ;;  %3233 = vmatprep.subr.bf16.mxu1 %v3863_v60 }
 0x105   :  { %2720 = vmatprep.subr.bf16.mxu0 %v3863_v60  ;;  %2405 = vmatprep.mubr.bf16.mxu1 %v3864_v61  ;;  %v365_v60 = vld [vmem:[%s5062_s2] sm:$0x3]  ;;  %v373_v61 = vsub.s32 1, %v368_v54 }
 0x106   :  { %2689 = vmatprep.mubr.bf16.mxu0 %v3866_v62  ;;  %v5017_v62 = vrot.slane %v365_v60, %v369_v58 }
 0x107   :  { %3249 = vmatpush1.bf16.msra.mxu1 %v3861_v63 }
 0x108   :  { %2721 = vmatpush1.bf16.msra.mxu0 %v3861_v63  ;;  %3234 = vmatprep.subr.bf16.mxu1 %v3872_v0  ;;  %v5019_v63 = vrot.slane %v365_v60, %v373_v61 }
 0x109   :  { %2722 = vmatprep.subr.bf16.mxu0 %v3872_v0 }
 0x10a   :  { %2406 = vmatmul.mubr.bf16.gmra.mrb[4].mxu1 %v3868_v1 }
 0x10b   :  { %2690 = vmatmul.mubr.bf16.gmra.mrb[4].mxu0 %v3869_v2  ;;  %3250 = vmatpush1.bf16.msra.mxu1 %v3870_v3 }
 0x10c   :  { %2723 = vmatpush1.bf16.msra.mxu0 %v3870_v3  ;;  %3235 = vmatprep.subr.bf16.mxu1 %v3875_v4 }
 0x10d   :  { %2724 = vmatprep.subr.bf16.mxu0 %v3875_v4  ;;  %2415 = vmatprep.mubr.bf16.mxu1 %v3876_v5 }
 0x10e   :  { %2699 = vmatprep.mubr.bf16.mxu0 %v3878_v6 }
 0x10f   :  { %3251 = vmatpush1.bf16.msra.mxu1 %v3873_v7 }
 0x110   :  { %2725 = vmatpush1.bf16.msra.mxu0 %v3873_v7  ;;  %3236 = vmatprep.subr.bf16.mxu1 %v3884_v8 }
 0x111   :  { %2726 = vmatprep.subr.bf16.mxu0 %v3884_v8 }
 0x112   :  { %2416 = vmatmul.mubr.bf16.gmra.mrb[8].mxu1 %v3880_v9 }
 0x113   :  { %2700 = vmatmul.mubr.bf16.gmra.mrb[8].mxu0 %v3881_v10  ;;  %3252 = vmatpush1.bf16.msra.mxu1 %v3882_v13 }
 0x114   :  { %2727 = vmatpush1.bf16.msra.mxu0 %v3882_v13  ;;  %3237 = vmatprep.subr.bf16.mxu1 %v3887_v14 }
 0x115   :  { %2728 = vmatprep.subr.bf16.mxu0 %v3887_v14  ;;  %2425 = vmatprep.mubr.bf16.mxu1 %v2919_v15 }
 0x116   :  { %2709 = vmatprep.mubr.bf16.mxu0 %v2927_v16 }
 0x117   :  { %3253 = vmatpush1.bf16.msra.mxu1 %v3885_v17 }
 0x118   :  { %2729 = vmatpush1.bf16.msra.mxu0 %v3885_v17  ;;  %3238 = vmatprep.subr.bf16.mxu1 %v3894_v18 }
 0x119   :  { %2730 = vmatprep.subr.bf16.mxu0 %v3894_v18 }
 0x11a   :  { %2426 = vmatmul.mubr.bf16.gmra.mrb[12].mxu1 %v2918_v19 }
 0x11b   :  { %2710 = vmatmul.mubr.bf16.gmra.mrb[12].mxu0 %v2926_v20  ;;  %3254 = vmatpush1.bf16.msra.mxu1 %v3892_v21 }
 0x11c   :  { %2731 = vmatpush1.bf16.msra.mxu0 %v3892_v21  ;;  %3239 = vmatprep.subr.bf16.mxu1 %v3897_v22 }
 0x11d   :  { %2732 = vmatprep.subr.bf16.mxu0 %v3897_v22  ;;  %2750 = vmatprep.mubr.bf16.mxu0 %v3924_v23 }
 0x11e   :  { %2770 = vmatprep.mubr.bf16.mxu1 %v3927_v24 }
 0x11f   :  { %3255 = vmatpush1.bf16.msra.mxu1 %v3895_v25 }
 0x120   :  { %2733 = vmatpush1.bf16.msra.mxu0 %v3895_v25  ;;  %3240 = vmatprep.subr.bf16.mxu1 %v3900_v26 }
 0x121   :  { %2734 = vmatprep.subr.bf16.mxu0 %v3900_v26 }
 0x123   :  { %3256 = vmatpush1.bf16.msra.mxu1 %v3898_v27 }
 0x124   :  { %2735 = vmatpush1.bf16.msra.mxu0 %v3898_v27  ;;  %3241 = vmatprep.subr.bf16.mxu1 %v3903_v28 }
 0x125   :  { %2736 = vmatprep.subr.bf16.mxu0 %v3903_v28 }
 0x127   :  { %3257 = vmatpush1.bf16.msra.mxu1 %v3901_v29 }
 0x128   :  { %2737 = vmatpush1.bf16.msra.mxu0 %v3901_v29  ;;  %3242 = vmatprep.subr.bf16.mxu1 %v3906_v30 }
 0x129   :  { %2738 = vmatprep.subr.bf16.mxu0 %v3906_v30 }
 0x12b   :  { %3258 = vmatpush1.bf16.msra.mxu1 %v3904_v31 }
 0x12c   :  { %2739 = vmatpush1.bf16.msra.mxu0 %v3904_v31  ;;  %3243 = vmatprep.subr.bf16.mxu1 %v3909_v32 }
 0x12d   :  { %2740 = vmatprep.subr.bf16.mxu0 %v3909_v32 }
 0x12f   :  { %3259 = vmatpush1.bf16.msra.mxu1 %v3907_v33 }
 0x130   :  { %2741 = vmatpush1.bf16.msra.mxu0 %v3907_v33  ;;  %3244 = vmatprep.subr.bf16.mxu1 %v3912_v34 }
 0x131   :  { %2742 = vmatprep.subr.bf16.mxu0 %v3912_v34 }
 0x133   :  { %3260 = vmatpush1.bf16.msra.mxu1 %v3910_v35 }
 0x134   :  { %2743 = vmatpush1.bf16.msra.mxu0 %v3910_v35  ;;  %3245 = vmatprep.subr.bf16.mxu1 %v3915_v36 }
 0x135   :  { %2744 = vmatprep.subr.bf16.mxu0 %v3915_v36 }
 0x137   :  { %3261 = vmatpush1.bf16.msra.mxu1 %v3913_v37 }
 0x138   :  { %2745 = vmatpush1.bf16.msra.mxu0 %v3913_v37  ;;  %3246 = vmatprep.subr.bf16.mxu1 %v3918_v38 }
 0x139   :  { %2746 = vmatprep.subr.bf16.mxu0 %v3918_v38 }
 0x13b   :  { %3262 = vmatpush1.bf16.msra.mxu1 %v3916_v39 }
 0x13c   :  { %2747 = vmatpush1.bf16.msra.mxu0 %v3916_v39  ;;  %3247 = vmatprep.subr.bf16.mxu1 %v3921_v40 }
 0x13d   :  { %2748 = vmatprep.subr.bf16.mxu0 %v3921_v40 }
 0x13f   :  { %3263 = vmatpush1.bf16.msra.mxu1 %v3919_v41 }
 0x140   :  { %2749 = vmatpush1.bf16.msra.mxu0 %v3919_v41 }
 0x142   :  { %2771 = vmatmul.mubr.bf16.vlgmr.msra.gmra.mrb[16].mxu1 %v3925_v44 }
 0x143   :  { %2751 = vmatmul.mubr.bf16.vlgmr.msra.gmra.mrb[0].mxu0 %v3922_v43  ;;  %2780 = vmatprep.mubr.bf16.mxu1 %v2929_v46 }
 0x144   :  { %2760 = vmatprep.mubr.bf16.mxu0 %v3928_v45 }
 0x14a   :  { %2781 = vmatmul.mubr.bf16.gmra.mrb[20].mxu1 %v2928_v48 }
 0x14b   :  { %2761 = vmatmul.mubr.bf16.gmra.mrb[4].mxu0 %v3931_v47 }
 0x1d5   :  { %v2397_v49 = vpop.f32.mrb[0].mxu1 }
 0x1d6   :  { %v2399_v50 = vpop.f32.mrb[1].mxu1  ;;  %v3264_v28 = vadd.f32 %v2397_v49, %v5017_v62 }
 0x1d7   :  { %v2401_v51 = vpop.f32.mrb[2].mxu1  ;;  %v3266_v29 = vadd.f32 %v2399_v50, %v5019_v63 }
 0x1d8   :  { %v2403_v53 = vpop.f32.mrb[3].mxu1  ;;  %v3268_v32 = vadd.f32 %v2401_v51, %v5017_v62 }
 0x1d9   :  { %v3270_v37 = vadd.f32 %v2403_v53, %v5019_v63 }
 0x1dd   :  { %v5006_v55 = vpop.f32.mrb[4].mxu1 }
 0x1de   :  { %v5008_v56 = vpop.f32.mrb[5].mxu1 }
 0x1df   :  { %v5010_v57 = vpop.f32.mrb[6].mxu1 }
 0x1e0   :  { %v5012_v59 = vpop.f32.mrb[7].mxu1 }
 0x1e5   :  { %v2417_v0 = vpop.f32.mrb[8].mxu1 }
 0x1e6   :  { %v2701_v1 = vpop.f32.mrb[8].mxu0  ;;  %v3280_v2 = vadd.f32 %v2417_v0, %v5017_v62  ;;  %v2419_v3 = vpop.f32.mrb[9].mxu1  ;;  %v3272_v0 = vadd.f32 %v5006_v55, %v5017_v62 }
 0x1e7   :  { %v2703_v4 = vpop.f32.mrb[9].mxu0  ;;  %v3283_v5 = vadd.f32 %v2419_v3, %v5019_v63  ;;  %v2421_v6 = vpop.f32.mrb[10].mxu1 }
 0x1e8   :  { %v2705_v7 = vpop.f32.mrb[10].mxu0  ;;  %v3281_v8 = vadd.f32 %v3280_v2, %v2701_v1  ;;  %v3286_v9 = vadd.f32 %v2421_v6, %v5017_v62  ;;  %v2423_v10 = vpop.f32.mrb[11].mxu1  ;;  %v3274_v1 = vadd.f32 %v5008_v56, %v5019_v63  ;;  %v3276_v6 = vadd.f32 %v5010_v57, %v5017_v62 }
 0x1e9   :  { %v2707_v11 = vpop.f32.mrb[11].mxu0  ;;  %v3284_v12 = vadd.f32 %v3283_v5, %v2703_v4  ;;  %v3289_v13 = vadd.f32 %v2423_v10, %v5019_v63  ;;  %v3278_v56 = vadd.f32 %v5012_v59, %v5019_v63 }
 0x1ea   :  { %v3287_v14 = vadd.f32 %v3286_v9, %v2705_v7 }
 0x1eb   :  { %v3290_v15 = vadd.f32 %v3289_v13, %v2707_v11 }
 0x1ed   :  { %v2427_v16 = vpop.f32.mrb[12].mxu1 }
 0x1ee   :  { %v2711_v17 = vpop.f32.mrb[12].mxu0  ;;  %v3292_v18 = vadd.f32 %v2427_v16, %v5017_v62  ;;  %v2429_v19 = vpop.f32.mrb[13].mxu1 }
 0x1ef   :  { %v2713_v20 = vpop.f32.mrb[13].mxu0  ;;  %v3295_v21 = vadd.f32 %v2429_v19, %v5019_v63  ;;  %v2431_v22 = vpop.f32.mrb[14].mxu1 }
 0x1f0   :  { %v2715_v23 = vpop.f32.mrb[14].mxu0  ;;  %v3293_v24 = vadd.f32 %v3292_v18, %v2711_v17  ;;  %v2432_v25 = vpop.f32.mrb[15].mxu1 }
 0x1f1   :  { %v2716_v26 = vpop.f32.mrb[15].mxu0  ;;  %v3296_v27 = vadd.f32 %v3295_v21, %v2713_v20 }
 0x215   :  { %v2772_v31 = vpop.f32.mrb[16].mxu1 }
 0x216   :  { %v2752_v30 = vpop.f32.mrb[0].mxu0  ;;  %v3282_v34 = vadd.f32 %v3281_v8, %v2772_v31  ;;  %v2774_v36 = vpop.f32.mrb[17].mxu1 }
 0x217   :  { %v3265_v33 = vadd.f32 %v3264_v28, %v2752_v30  ;;  %v2754_v35 = vpop.f32.mrb[1].mxu0  ;;  %v3285_v39 = vadd.f32 %v3284_v12, %v2774_v36  ;;  %v2776_v41 = vpop.f32.mrb[18].mxu1 }
 0x218   :  { %v3267_v38 = vadd.f32 %v3266_v29, %v2754_v35  ;;  %v2756_v40 = vpop.f32.mrb[2].mxu0  ;;  %v2797_v43 = vmax.f32 %v3282_v34, 0.0  ;;  %v3288_v45 = vadd.f32 %v3287_v14, %v2776_v41  ;;  %v2778_v47 = vpop.f32.mrb[19].mxu1 }
 0x219   :  { %v2789_v42 = vmax.f32 %v3265_v33, 0.0  ;;  %v3269_v44 = vadd.f32 %v3268_v32, %v2756_v40  ;;  %v2758_v46 = vpop.f32.mrb[3].mxu0  ;;  %v2798_v49 = vmax.f32 %v3285_v39, 0.0  ;;  %v3291_v51 = vadd.f32 %v3290_v15, %v2778_v47 }
 0x21a   :  { %v2790_v48 = vmax.f32 %v3267_v38, 0.0  ;;  %v3271_v50 = vadd.f32 %v3270_v37, %v2758_v46  ;;  %v2799_v54 = vmax.f32 %v3288_v45, 0.0 }
 0x21b   :  { %v2791_v52 = vmax.f32 %v3269_v44, 0.0  ;;  %v3229_v60 = vpack.c.bf16 %v2798_v49, %v2797_v43  ;;  %v2800_v53 = vmax.f32 %v3291_v51, 0.0 }
 0x21c   :  { %v3225_v58 = vpack.c.bf16 %v2790_v48, %v2789_v42  ;;  %v2792_v61 = vmax.f32 %v3271_v50, 0.0 }
 0x21d   :  { %2851 = vst [vmem:[%s5063_s3 + $0x20] sm:$0xff] %v3229_v60  ;;  %v3230_v3 = vpack.c.bf16 %v2800_v53, %v2799_v54  ;;  %v2782_v5 = vpop.f32.mrb[20].mxu1 }
 0x21e   :  { %2847 = vst [vmem:[%s5063_s3] sm:$0xff] %v3225_v58  ;;  %v3226_v2 = vpack.c.bf16 %v2792_v61, %v2791_v52  ;;  %v2762_v4 = vpop.f32.mrb[4].mxu0  ;;  %v3294_v55 = vadd.f32 %v3293_v24, %v2782_v5  ;;  %v2784_v9 = vpop.f32.mrb[21].mxu1 }
 0x21f   :  { %v3273_v7 = vadd.f32 %v3272_v0, %v2762_v4  ;;  %v2764_v8 = vpop.f32.mrb[5].mxu0  ;;  %2852 = vst [vmem:[%s5063_s3 + $0x28] sm:$0xff] %v3230_v3  ;;  %v3297_v11 = vadd.f32 %v3296_v27, %v2784_v9  ;;  %v2786_v13 = vpop.f32.mrb[22].mxu1 }
 0x220   :  { %2848 = vst [vmem:[%s5063_s3 + $0x8] sm:$0xff] %v3226_v2  ;;  %v3275_v10 = vadd.f32 %v3274_v1, %v2764_v8  ;;  %v2766_v12 = vpop.f32.mrb[6].mxu0  ;;  %v2801_v62 = vmax.f32 %v3294_v55, 0.0  ;;  %v2787_v16 = vpop.f32.mrb[23].mxu1 }
 0x221   :  { %v2793_v57 = vmax.f32 %v3273_v7, 0.0  ;;  %v3277_v14 = vadd.f32 %v3276_v6, %v2766_v12  ;;  %v2768_v15 = vpop.f32.mrb[7].mxu0  ;;  %v2802_v18 = vmax.f32 %v3297_v11, 0.0 }
 0x222   :  { %v2794_v17 = vmax.f32 %v3275_v10, 0.0  ;;  %v3279_v59 = vadd.f32 %v3278_v56, %v2768_v15 }
 0x223   :  { %v2795_v63 = vmax.f32 %v3277_v14, 0.0  ;;  %v3231_v20 = vpack.c.bf16 %v2802_v18, %v2801_v62 }
 0x224   :  { %v3227_v19 = vpack.c.bf16 %v2794_v17, %v2793_v57  ;;  %v2796_v21 = vmax.f32 %v3279_v59, 0.0 }
 0x225   :  { %2853 = vst [vmem:[%s5063_s3 + $0x30] sm:$0x11] %v3231_v20 }
 0x226   :  { %2849 = vst [vmem:[%s5063_s3 + $0x10] sm:$0xff] %v3227_v19  ;;  %v3228_v22 = vpack.c.bf16 %v2796_v21, %v2795_v63 }
 0x228   :  { %2850 = vst [vmem:[%s5063_s3 + $0x18] sm:$0xff] %v3228_v22 }

// kernel: alexnet_restoration_forward.11
= control target key start
LH: loop header
LB: loop body
LE: loop exit
PB: predicated region body
PF: predicated region fallthrough
CT: control target
= control target key end

     0   :  { %7 = vsyncpa [#allocation3], 0  ;;  %s1332_s0 = inlined_call_operand.vmem [shape: f32[256,8], index: 0, kind: input, shape index: {}]   ;;  %s1333_s1 = inlined_call_operand.vmem [shape: f32[2,3,8,256], index: 1, kind: input, shape index: {}]   ;;  %s1334_s2 = inlined_call_operand.hbm [shape: f32[2,3,256,256], index: 2, kind: output, shape index: {}]  }
   0x1   :  { %9 = vsyncpa [#allocation3 + $0x1], 0  ;;  %s961_s9 = smov 0   ;;  %s963_s10 = smov 0  }
   0x2   :  { %s965_s11 = smov 0   ;;  %s967_s12 = smov 0  }
   0x3   :  { %s969_s13 = smov 0   ;;  %s971_s14 = smov 0  }
   0x4   :  { %s973_s15 = smov 0   ;;  %s975_s16 = smov 0  }
   0x5 LB: > { %s723_s17 = sadd.s32 4294967295, %s940_s16   ;;  %s724_s18 = sadd.s32 4294967294, %s940_s16   ;;  %s940_s16 = sphi %s975_s16, %s15_s16   ;;  %s936_s15 = sphi %s973_s15, %s1343_s15   ;;  %s932_s14 = sphi %s971_s14, %s1342_s14   ;;  %s928_s13 = sphi %s969_s13, %s1341_s13   ;;  %s924_s12 = sphi %s967_s12, %s1340_s12   ;;  %s920_s11 = sphi %s965_s11, %s1339_s11   ;;  %s916_s10 = sphi %s963_s10, %s1338_s10   ;;  %s912_s9 = sphi %s961_s9, %s1337_s9  }
   0x6   : > { %s24_s19 = sadd.s32 1, %s932_s14  ;;  %s27_s20 = sadd.s32 1, %s936_s15 }
   0x7   : > { %p25_p0 = scmp.ge.s32.totalorder %s24_s19, 3  ;;  %p95_p1 = scmp.ne.s32.totalorder %s920_s11, %s916_s10 }
   0x8   : > { %p96_p2 = scmp.eq.s32.totalorder %s723_s17, 5  ;;  %p101_p5 = scmp.ne.s32.totalorder %s916_s10, %s912_s9 }
   0x9   : > { %s1345_s19 = smov (%p25_p0, %s24_s19), 0  ;;  %s1347_s20 = smov (!%p25_p0, %s27_s20), %s936_s15 }
   0xa   : > { %s81_s21 = ssub.s32 %s932_s14, %s1345_s19  ;;  %p1012_p3 = por %p96_p2, %p95_p1 }
   0xb   : > { %p29_p4 = scmp.ge.s32.totalorder %s1347_s20, 2  ;;  %p102_p6 = scmp.eq.s32.totalorder %s724_s18, 5 }
   0xc   : > { %p727_p7 = scmp.ge.s32.totalorder %s940_s16, 1  ;;  %p135_p9 = scmp.lt.s32.totalorder %s940_s16, 7 }
   0xd   : > { %s1349_s20 = smov (%p29_p4, %s1347_s20), 0  ;;  %p1021_p8 = por %p102_p6, %p101_p5 }
   0xe   : > { %s80_s24 = ssub.s32 %s936_s15, %s1349_s20  ;;  %s85_s25 = sadd.s32 1, %s920_s11 }
   0xf   : > { %s82_s26 = sor.u32 %s81_s21, %s80_s24  ;;  %p136_p10 = pnand %p727_p7, %p135_p9 }
  0x10   : > { %p83_p11 = scmp.eq.s32.totalorder %s82_s26, 0  ;;  %p161_p12 = scmp.lt.s32.totalorder (!%p136_p10), %s928_s13, 1  ;;  %v942_v0 = vmov (!%p136_p10), 0.0   ;;  %v170_v1 = vld [vmem:[%s1332_s0] sm:$0xff] (!%p136_p10)  ;;  %vm204_vm0 = vcmask (!%p136_p10), 64512   ;;  %v171_v5 = vld [vmem:[%s1332_s0 + $0x8] sm:$0xff] (!%p136_p10) }
  0x11   : > { %139 = sbr.rel (%p136_p10) target bundleno = 322 (0x142), region = 28  ;;  %p163_p13 = scmp.lt.s32.totalorder (!%p136_p10), %s924_s12, 2  ;;  %365 = vmatprep.mubr.f32.mxu0 (!%p136_p10), %v942_v0  ;;  %461 = vmatprep.mubr.f32.mxu1 (!%p136_p10), %v942_v0  ;;  %v186_v4 = vld [vmem:[%s1332_s0 + $0x80] sm:$0xff] (!%p136_p10)  ;;  %v187_v6 = vld [vmem:[%s1332_s0 + $0x88] sm:$0xff] (!%p136_p10)  ;;  %v172_v7 = vld [vmem:[%s1332_s0 + $0x10] sm:$0xff] (!%p136_p10) }
  0x12   : > { %s1030_s27 = scalar_select %p83_p11, %s920_s11, %s85_s25  }
  0x13   : > { %v188_v8 = vld [vmem:[%s1332_s0 + $0x90] sm:$0xff] (!%p136_p10)  ;;  %v173_v9 = vld [vmem:[%s1332_s0 + $0x18] sm:$0xff] (!%p136_p10)  ;;  %v174_v11 = vld [vmem:[%s1332_s0 + $0x20] sm:$0xff] (!%p136_p10)  ;;  %s158_s25 = sand.u32 (!%p136_p10), 1, %s916_s10   ;;  %s943_s17 = smov (!%p136_p10), [#allocation2]  }
  0x14   : > { %v189_v10 = vld [vmem:[%s1332_s0 + $0x98] sm:$0xff] (!%p136_p10)  ;;  %v190_v12 = vld [vmem:[%s1332_s0 + $0xa0] sm:$0xff] (!%p136_p10)  ;;  %v175_v13 = vld [vmem:[%s1332_s0 + $0x28] sm:$0xff] (!%p136_p10)  ;;  %s728_s26 = sshll.u32 (!%p136_p10), %s158_s25, 9  ;;  %s1280_s7 = scalar_lea.sflag (!%p136_p10), [#allocation3], %s158_s25 }
  0x15   : > { %v191_v14 = vld [vmem:[%s1332_s0 + $0xa8] sm:$0xff] (!%p136_p10)  ;;  %v176_v15 = vld [vmem:[%s1332_s0 + $0x30] sm:$0xff] (!%p136_p10)  ;;  %v177_v17 = vld [vmem:[%s1332_s0 + $0x38] sm:$0xff] (!%p136_p10)  ;;  %s850_s18 = sshll.u32 (!%p136_p10), %s943_s17, 4  ;;  %s851_s18 = int_to_ptr.vmem [resolvable:$false] %s850_s18 }
  0x16   : > { %v192_v16 = vld [vmem:[%s1332_s0 + $0xb0] sm:$0xff] (!%p136_p10)  ;;  %v193_v18 = vld [vmem:[%s1332_s0 + $0xb8] sm:$0xff] (!%p136_p10)  ;;  %v178_v19 = vld [vmem:[%s1332_s0 + $0x40] sm:$0xff] (!%p136_p10)  ;;  %s852_s21 = scalar_lea.vmem (!%p136_p10), %s851_s18, 16384 }
  0x17   : > { %v194_v20 = vld [vmem:[%s1332_s0 + $0xc0] sm:$0xff] (!%p136_p10)  ;;  %v179_v21 = vld [vmem:[%s1332_s0 + $0x48] sm:$0xff] (!%p136_p10)  ;;  %v180_v23 = vld [vmem:[%s1332_s0 + $0x50] sm:$0xff] (!%p136_p10) }
  0x18   : > { %s162_s28 = scalar_select %p161_p12, %s928_s13, 1  ;;  %v195_v22 = vld [vmem:[%s1332_s0 + $0xc8] sm:$0xff]  ;;  %v196_v24 = vld [vmem:[%s1332_s0 + $0xd0] sm:$0xff]  ;;  %v181_v25 = vld [vmem:[%s1332_s0 + $0x58] sm:$0xff] }
  0x19   : > { %s164_s29 = scalar_select %p163_p13, %s924_s12, 2  ;;  %v197_v26 = vld [vmem:[%s1332_s0 + $0xd8] sm:$0xff]  ;;  %v182_v27 = vld [vmem:[%s1332_s0 + $0x60] sm:$0xff]  ;;  %v183_v29 = vld [vmem:[%s1332_s0 + $0x68] sm:$0xff] }
  0x1a   : > { %s770_s30 = smul.u32 6, %s162_s28  ;;  %v198_v28 = vld [vmem:[%s1332_s0 + $0xe0] sm:$0xff]  ;;  %v199_v30 = vld [vmem:[%s1332_s0 + $0xe8] sm:$0xff]  ;;  %v184_v31 = vld [vmem:[%s1332_s0 + $0x70] sm:$0xff]  ;;  %s1202_s28 = scalar_lea.vmem [#allocation2], %s728_s26 }
  0x1b   : > { %s729_s3 = sshll.u32 %s164_s29, 1  ;;  %v200_v32 = vld [vmem:[%s1332_s0 + $0xf0] sm:$0xff]  ;;  %v185_v33 = vld [vmem:[%s1332_s0 + $0x78] sm:$0xff]  ;;  %s771_s29 = smul.u32 192, %s928_s13 }
  0x1c   : > { %s167_s4 = sadd.s32 %s770_s30, %s729_s3  ;;  %v201_v34 = vld [vmem:[%s1332_s0 + $0xf8] sm:$0xff]  ;;  %s764_s30 = sshll.u32 %s924_s12, 6 }
  0x1d   : > { %s730_s5 = sshll.u32 %s167_s4, 3  ;;  %s635_s3 = sadd.s32 %s771_s29, %s764_s30 }
  0x1e   : > { %s169_s8 = scalar_lea.vmem %s1333_s1, %s730_s5  ;;  %s765_s13 = sshll.u32 %s635_s3, 7 }
  0x1f   : > { %v203_v2 = vld [vmem:[%s169_s8 + $0x8] sm:$0xff]  ;;  %v202_v3 = vld [vmem:[%s169_s8] sm:$0xff]  ;;  %s638_s4 = sshll.u32 %s1202_s28, 4  ;;  %s1270_s6 = scalar_lea.hbm %s1334_s2, %s765_s13  ;;  %s1272_s4 = int_to_ptr.vmem [resolvable:$true] %s638_s4 }
  0x20   : > { %301 = vmatprep.subr.mxu0 %v203_v2  ;;  %768 = vmatprep.subr.mxu1 %v203_v2  ;;  %s846_s8 = scalar_lea.vmem %s1272_s4, 8192  ;;  %p853_p4 = scmp.lt.s32.totalorder %s1272_s4, %s851_s18 }
  0x21   : > { %302 = vmatpush1.msra.mxu0 %v202_v3  ;;  %769 = vmatpush1.msra.mxu1 %v202_v3  ;;  %p847_p0 = scmp.ne.s32.totalorder %s1272_s4, %s846_s8  ;;  %p854_p5 = scmp.lt.s32.totalorder %s852_s21, %s846_s8 }
  0x22   : > { %731 = vmatmul.mubr.msk.f32.vlgmr.msra.gmra.mrb[0].mxu0 %vm204_vm0, %v170_v1  ;;  %747 = vmatmul.mubr.msk.f32.vlgmr.msra.gmra.mrb[0].mxu1 %vm204_vm0, %v186_v4 }
  0x23   : > { %371 = vmatprep.mubr.f32.mxu0 %v942_v0  ;;  %467 = vmatprep.mubr.f32.mxu1 %v942_v0  ;;  %p848_p1 = pnand %p847_p0, %p1012_p3  ;;  %p855_p6 = por %p854_p5, %p853_p4 }
  0x25   : > { %p849_p2 = pneg %p848_p1 }
  0x26   : > { %732 = vmatmul.mubr.msk.f32.gmra.mrb[2].mxu0 %vm204_vm0, %v171_v5  ;;  %748 = vmatmul.mubr.msk.f32.gmra.mrb[2].mxu1 %vm204_vm0, %v187_v6 }
  0x27   : > { %377 = vmatprep.mubr.f32.mxu0 %v942_v0  ;;  %473 = vmatprep.mubr.f32.mxu1 %v942_v0  ;;  %p856_p7 = pnand %p855_p6, %p849_p2 }
  0x2a   : > { %733 = vmatmul.mubr.msk.f32.gmra.mrb[4].mxu0 %vm204_vm0, %v172_v7  ;;  %749 = vmatmul.mubr.msk.f32.gmra.mrb[4].mxu1 %vm204_vm0, %v188_v8 }
  0x2b   : > { %383 = vmatprep.mubr.f32.mxu0 %v942_v0  ;;  %479 = vmatprep.mubr.f32.mxu1 %v942_v0 }
  0x2e   : > { %734 = vmatmul.mubr.msk.f32.gmra.mrb[6].mxu0 %vm204_vm0, %v173_v9  ;;  %750 = vmatmul.mubr.msk.f32.gmra.mrb[6].mxu1 %vm204_vm0, %v189_v10 }
  0x2f   : > { %389 = vmatprep.mubr.f32.mxu0 %v942_v0  ;;  %485 = vmatprep.mubr.f32.mxu1 %v942_v0 }
  0x32   : > { %735 = vmatmul.mubr.msk.f32.gmra.mrb[8].mxu0 %vm204_vm0, %v174_v11  ;;  %751 = vmatmul.mubr.msk.f32.gmra.mrb[8].mxu1 %vm204_vm0, %v190_v12 }
  0x33   : > { %395 = vmatprep.mubr.f32.mxu0 %v942_v0  ;;  %491 = vmatprep.mubr.f32.mxu1 %v942_v0 }
  0x36   : > { %736 = vmatmul.mubr.msk.f32.gmra.mrb[10].mxu0 %vm204_vm0, %v175_v13  ;;  %752 = vmatmul.mubr.msk.f32.gmra.mrb[10].mxu1 %vm204_vm0, %v191_v14 }
  0x37   : > { %401 = vmatprep.mubr.f32.mxu0 %v942_v0  ;;  %497 = vmatprep.mubr.f32.mxu1 %v942_v0 }
  0x3a   : > { %737 = vmatmul.mubr.msk.f32.gmra.mrb[12].mxu0 %vm204_vm0, %v176_v15  ;;  %753 = vmatmul.mubr.msk.f32.gmra.mrb[12].mxu1 %vm204_vm0, %v192_v16 }
  0x3b   : > { %407 = vmatprep.mubr.f32.mxu0 %v942_v0  ;;  %503 = vmatprep.mubr.f32.mxu1 %v942_v0 }
  0x3e   : > { %738 = vmatmul.mubr.msk.f32.gmra.mrb[14].mxu0 %vm204_vm0, %v177_v17  ;;  %754 = vmatmul.mubr.msk.f32.gmra.mrb[14].mxu1 %vm204_vm0, %v193_v18 }
  0x3f   : > { %413 = vmatprep.mubr.f32.mxu0 %v942_v0  ;;  %509 = vmatprep.mubr.f32.mxu1 %v942_v0 }
  0x42   : > { %739 = vmatmul.mubr.msk.f32.gmra.mrb[16].mxu0 %vm204_vm0, %v178_v19  ;;  %755 = vmatmul.mubr.msk.f32.gmra.mrb[16].mxu1 %vm204_vm0, %v194_v20 }
  0x43   : > { %419 = vmatprep.mubr.f32.mxu0 %v942_v0  ;;  %515 = vmatprep.mubr.f32.mxu1 %v942_v0 }
  0x46   : > { %740 = vmatmul.mubr.msk.f32.gmra.mrb[18].mxu0 %vm204_vm0, %v179_v21  ;;  %756 = vmatmul.mubr.msk.f32.gmra.mrb[18].mxu1 %vm204_vm0, %v195_v22 }
  0x47   : > { %425 = vmatprep.mubr.f32.mxu0 %v942_v0  ;;  %521 = vmatprep.mubr.f32.mxu1 %v942_v0 }
  0x4a   : > { %741 = vmatmul.mubr.msk.f32.gmra.mrb[20].mxu0 %vm204_vm0, %v180_v23  ;;  %757 = vmatmul.mubr.msk.f32.gmra.mrb[20].mxu1 %vm204_vm0, %v196_v24 }
  0x4b   : > { %431 = vmatprep.mubr.f32.mxu0 %v942_v0  ;;  %527 = vmatprep.mubr.f32.mxu1 %v942_v0 }
  0x4e   : > { %742 = vmatmul.mubr.msk.f32.gmra.mrb[22].mxu0 %vm204_vm0, %v181_v25  ;;  %758 = vmatmul.mubr.msk.f32.gmra.mrb[22].mxu1 %vm204_vm0, %v197_v26 }
  0x4f   : > { %437 = vmatprep.mubr.f32.mxu0 %v942_v0  ;;  %533 = vmatprep.mubr.f32.mxu1 %v942_v0 }
  0x52   : > { %743 = vmatmul.mubr.msk.f32.gmra.mrb[24].mxu0 %vm204_vm0, %v182_v27  ;;  %759 = vmatmul.mubr.msk.f32.gmra.mrb[24].mxu1 %vm204_vm0, %v198_v28 }
  0x53   : > { %443 = vmatprep.mubr.f32.mxu0 %v942_v0  ;;  %539 = vmatprep.mubr.f32.mxu1 %v942_v0 }
  0x56   : > { %744 = vmatmul.mubr.msk.f32.gmra.mrb[26].mxu0 %vm204_vm0, %v183_v29  ;;  %760 = vmatmul.mubr.msk.f32.gmra.mrb[26].mxu1 %vm204_vm0, %v199_v30 }
  0x57   : > { %449 = vmatprep.mubr.f32.mxu0 %v942_v0  ;;  %545 = vmatprep.mubr.f32.mxu1 %v942_v0 }
  0x5a   : > { %745 = vmatmul.mubr.msk.f32.gmra.mrb[28].mxu0 %vm204_vm0, %v184_v31  ;;  %761 = vmatmul.mubr.msk.f32.gmra.mrb[28].mxu1 %vm204_vm0, %v200_v32 }
  0x5b   : > { %455 = vmatprep.mubr.f32.mxu0 %v942_v0  ;;  %551 = vmatprep.mubr.f32.mxu1 %v942_v0 }
  0x5e   : > { %746 = vmatmul.mubr.msk.f32.gmra.mrb[30].mxu0 %vm204_vm0, %v185_v33  ;;  %762 = vmatmul.mubr.msk.f32.gmra.mrb[30].mxu1 %vm204_vm0, %v201_v34 }
  0xf5   : > { %v367_v35 = vpop.f32.mrb[0].mxu0  ;;  %v463_v36 = vpop.f32.mrb[0].mxu1 }
  0xf6   : > { %558 = vst [vmem:[%s1202_s28] sm:$0xff] %v367_v35  ;;  %590 = vst [vmem:[%s1202_s28 + $0x100] sm:$0xff] %v463_v36  ;;  %v369_v37 = vpop.f32.mrb[1].mxu0  ;;  %v465_v38 = vpop.f32.mrb[1].mxu1 }
  0xf7   : > { %559 = vst [vmem:[%s1202_s28 + $0x8] sm:$0xff] %v369_v37  ;;  %591 = vst [vmem:[%s1202_s28 + $0x108] sm:$0xff] %v465_v38 }
  0xf9   : > { %v373_v39 = vpop.f32.mrb[2].mxu0  ;;  %v469_v40 = vpop.f32.mrb[2].mxu1 }
  0xfa   : > { %560 = vst [vmem:[%s1202_s28 + $0x10] sm:$0xff] %v373_v39  ;;  %592 = vst [vmem:[%s1202_s28 + $0x110] sm:$0xff] %v469_v40  ;;  %v375_v41 = vpop.f32.mrb[3].mxu0  ;;  %v471_v42 = vpop.f32.mrb[3].mxu1 }
  0xfb   : > { %561 = vst [vmem:[%s1202_s28 + $0x18] sm:$0xff] %v375_v41  ;;  %593 = vst [vmem:[%s1202_s28 + $0x118] sm:$0xff] %v471_v42 }
  0xfd   : > { %v379_v43 = vpop.f32.mrb[4].mxu0  ;;  %v475_v44 = vpop.f32.mrb[4].mxu1 }
  0xfe   : > { %562 = vst [vmem:[%s1202_s28 + $0x20] sm:$0xff] %v379_v43  ;;  %594 = vst [vmem:[%s1202_s28 + $0x120] sm:$0xff] %v475_v44  ;;  %v381_v45 = vpop.f32.mrb[5].mxu0  ;;  %v477_v46 = vpop.f32.mrb[5].mxu1 }
  0xff   : > { %563 = vst [vmem:[%s1202_s28 + $0x28] sm:$0xff] %v381_v45  ;;  %595 = vst [vmem:[%s1202_s28 + $0x128] sm:$0xff] %v477_v46 }
 0x101   : > { %v385_v47 = vpop.f32.mrb[6].mxu0  ;;  %v481_v48 = vpop.f32.mrb[6].mxu1 }
 0x102   : > { %564 = vst [vmem:[%s1202_s28 + $0x30] sm:$0xff] %v385_v47  ;;  %596 = vst [vmem:[%s1202_s28 + $0x130] sm:$0xff] %v481_v48  ;;  %v387_v49 = vpop.f32.mrb[7].mxu0  ;;  %v483_v50 = vpop.f32.mrb[7].mxu1 }
 0x103   : > { %565 = vst [vmem:[%s1202_s28 + $0x38] sm:$0xff] %v387_v49  ;;  %597 = vst [vmem:[%s1202_s28 + $0x138] sm:$0xff] %v483_v50 }
 0x105   : > { %v391_v51 = vpop.f32.mrb[8].mxu0  ;;  %v487_v52 = vpop.f32.mrb[8].mxu1 }
 0x106   : > { %566 = vst [vmem:[%s1202_s28 + $0x40] sm:$0xff] %v391_v51  ;;  %598 = vst [vmem:[%s1202_s28 + $0x140] sm:$0xff] %v487_v52  ;;  %v393_v53 = vpop.f32.mrb[9].mxu0  ;;  %v489_v54 = vpop.f32.mrb[9].mxu1 }
 0x107   : > { %567 = vst [vmem:[%s1202_s28 + $0x48] sm:$0xff] %v393_v53  ;;  %599 = vst [vmem:[%s1202_s28 + $0x148] sm:$0xff] %v489_v54 }
 0x109   : > { %v397_v55 = vpop.f32.mrb[10].mxu0  ;;  %v493_v56 = vpop.f32.mrb[10].mxu1 }
 0x10a   : > { %568 = vst [vmem:[%s1202_s28 + $0x50] sm:$0xff] %v397_v55  ;;  %600 = vst [vmem:[%s1202_s28 + $0x150] sm:$0xff] %v493_v56  ;;  %v399_v57 = vpop.f32.mrb[11].mxu0  ;;  %v495_v58 = vpop.f32.mrb[11].mxu1 }
 0x10b   : > { %569 = vst [vmem:[%s1202_s28 + $0x58] sm:$0xff] %v399_v57  ;;  %601 = vst [vmem:[%s1202_s28 + $0x158] sm:$0xff] %v495_v58 }
 0x10d   : > { %v403_v59 = vpop.f32.mrb[12].mxu0  ;;  %v499_v60 = vpop.f32.mrb[12].mxu1 }
 0x10e   : > { %570 = vst [vmem:[%s1202_s28 + $0x60] sm:$0xff] %v403_v59  ;;  %602 = vst [vmem:[%s1202_s28 + $0x160] sm:$0xff] %v499_v60  ;;  %v405_v61 = vpop.f32.mrb[13].mxu0  ;;  %v501_v62 = vpop.f32.mrb[13].mxu1 }
 0x10f   : > { %571 = vst [vmem:[%s1202_s28 + $0x68] sm:$0xff] %v405_v61  ;;  %603 = vst [vmem:[%s1202_s28 + $0x168] sm:$0xff] %v501_v62 }
 0x111   : > { %v409_v63 = vpop.f32.mrb[14].mxu0  ;;  %v505_v0 = vpop.f32.mrb[14].mxu1 }
 0x112   : > { %572 = vst [vmem:[%s1202_s28 + $0x70] sm:$0xff] %v409_v63  ;;  %604 = vst [vmem:[%s1202_s28 + $0x170] sm:$0xff] %v505_v0  ;;  %v411_v1 = vpop.f32.mrb[15].mxu0  ;;  %v507_v2 = vpop.f32.mrb[15].mxu1 }
 0x113   : > { %573 = vst [vmem:[%s1202_s28 + $0x78] sm:$0xff] %v411_v1  ;;  %605 = vst [vmem:[%s1202_s28 + $0x178] sm:$0xff] %v507_v2 }
 0x115   : > { %v415_v3 = vpop.f32.mrb[16].mxu0  ;;  %v511_v4 = vpop.f32.mrb[16].mxu1 }
 0x116   : > { %574 = vst [vmem:[%s1202_s28 + $0x80] sm:$0xff] %v415_v3  ;;  %606 = vst [vmem:[%s1202_s28 + $0x180] sm:$0xff] %v511_v4  ;;  %v417_v5 = vpop.f32.mrb[17].mxu0  ;;  %v513_v6 = vpop.f32.mrb[17].mxu1 }
 0x117   : > { %575 = vst [vmem:[%s1202_s28 + $0x88] sm:$0xff] %v417_v5  ;;  %607 = vst [vmem:[%s1202_s28 + $0x188] sm:$0xff] %v513_v6 }
 0x119   : > { %v421_v7 = vpop.f32.mrb[18].mxu0  ;;  %v517_v8 = vpop.f32.mrb[18].mxu1 }
 0x11a   : > { %576 = vst [vmem:[%s1202_s28 + $0x90] sm:$0xff] %v421_v7  ;;  %608 = vst [vmem:[%s1202_s28 + $0x190] sm:$0xff] %v517_v8  ;;  %v423_v9 = vpop.f32.mrb[19].mxu0  ;;  %v519_v10 = vpop.f32.mrb[19].mxu1 }
 0x11b   : > { %577 = vst [vmem:[%s1202_s28 + $0x98] sm:$0xff] %v423_v9  ;;  %609 = vst [vmem:[%s1202_s28 + $0x198] sm:$0xff] %v519_v10 }
 0x11d   : > { %v427_v11 = vpop.f32.mrb[20].mxu0  ;;  %v523_v12 = vpop.f32.mrb[20].mxu1 }
 0x11e   : > { %578 = vst [vmem:[%s1202_s28 + $0xa0] sm:$0xff] %v427_v11  ;;  %610 = vst [vmem:[%s1202_s28 + $0x1a0] sm:$0xff] %v523_v12  ;;  %v429_v13 = vpop.f32.mrb[21].mxu0  ;;  %v525_v14 = vpop.f32.mrb[21].mxu1 }
 0x11f   : > { %579 = vst [vmem:[%s1202_s28 + $0xa8] sm:$0xff] %v429_v13  ;;  %611 = vst [vmem:[%s1202_s28 + $0x1a8] sm:$0xff] %v525_v14 }
 0x121   : > { %v433_v15 = vpop.f32.mrb[22].mxu0  ;;  %v529_v16 = vpop.f32.mrb[22].mxu1 }
 0x122   : > { %580 = vst [vmem:[%s1202_s28 + $0xb0] sm:$0xff] %v433_v15  ;;  %612 = vst [vmem:[%s1202_s28 + $0x1b0] sm:$0xff] %v529_v16  ;;  %v435_v17 = vpop.f32.mrb[23].mxu0  ;;  %v531_v18 = vpop.f32.mrb[23].mxu1 }
 0x123   : > { %581 = vst [vmem:[%s1202_s28 + $0xb8] sm:$0xff] %v435_v17  ;;  %613 = vst [vmem:[%s1202_s28 + $0x1b8] sm:$0xff] %v531_v18 }
 0x125   : > { %v439_v19 = vpop.f32.mrb[24].mxu0  ;;  %v535_v20 = vpop.f32.mrb[24].mxu1 }
 0x126   : > { %582 = vst [vmem:[%s1202_s28 + $0xc0] sm:$0xff] %v439_v19  ;;  %614 = vst [vmem:[%s1202_s28 + $0x1c0] sm:$0xff] %v535_v20  ;;  %v441_v21 = vpop.f32.mrb[25].mxu0  ;;  %v537_v22 = vpop.f32.mrb[25].mxu1 }
 0x127   : > { %583 = vst [vmem:[%s1202_s28 + $0xc8] sm:$0xff] %v441_v21  ;;  %615 = vst [vmem:[%s1202_s28 + $0x1c8] sm:$0xff] %v537_v22 }
 0x129   : > { %v445_v23 = vpop.f32.mrb[26].mxu0  ;;  %v541_v24 = vpop.f32.mrb[26].mxu1 }
 0x12a   : > { %584 = vst [vmem:[%s1202_s28 + $0xd0] sm:$0xff] %v445_v23  ;;  %616 = vst [vmem:[%s1202_s28 + $0x1d0] sm:$0xff] %v541_v24  ;;  %v447_v25 = vpop.f32.mrb[27].mxu0  ;;  %v543_v26 = vpop.f32.mrb[27].mxu1 }
 0x12b   : > { %585 = vst [vmem:[%s1202_s28 + $0xd8] sm:$0xff] %v447_v25  ;;  %617 = vst [vmem:[%s1202_s28 + $0x1d8] sm:$0xff] %v543_v26 }
 0x12d   : > { %v451_v27 = vpop.f32.mrb[28].mxu0  ;;  %v547_v28 = vpop.f32.mrb[28].mxu1 }
 0x12e   : > { %586 = vst [vmem:[%s1202_s28 + $0xe0] sm:$0xff] %v451_v27  ;;  %618 = vst [vmem:[%s1202_s28 + $0x1e0] sm:$0xff] %v547_v28  ;;  %v453_v29 = vpop.f32.mrb[29].mxu0  ;;  %v549_v30 = vpop.f32.mrb[29].mxu1 }
 0x12f   : > { %587 = vst [vmem:[%s1202_s28 + $0xe8] sm:$0xff] %v453_v29  ;;  %619 = vst [vmem:[%s1202_s28 + $0x1e8] sm:$0xff] %v549_v30 }
 0x131   : > { %v457_v31 = vpop.f32.mrb[30].mxu0  ;;  %v553_v32 = vpop.f32.mrb[30].mxu1 }
 0x132   : > { %588 = vst [vmem:[%s1202_s28 + $0xf0] sm:$0xff] %v457_v31  ;;  %620 = vst [vmem:[%s1202_s28 + $0x1f0] sm:$0xff] %v553_v32  ;;  %v459_v33 = vpop.f32.mrb[31].mxu0  ;;  %v555_v34 = vpop.f32.mrb[31].mxu1 }
 0x133   : > { %589 = vst [vmem:[%s1202_s28 + $0xf8] sm:$0xff] %v459_v33  ;;  %621 = vst [vmem:[%s1202_s28 + $0x1f8] sm:$0xff] %v555_v34 }
 0x134   : > { %859 = shalt.err (!%p856_p7)
}
 0x135   : > { %s860_s24 = scalar_lea.hbm %s1270_s6, 8192  ;;  %s864_s28 = scalar_lea.hbm %s1334_s2, 49152 }
 0x136   : > { %p861_p9 = scmp.ne.s32.totalorder %s1270_s6, %s860_s24  ;;  %p865_p12 = scmp.lt.u32.totalorder %s1270_s6, %s1334_s2 }
 0x137   : > { %p866_p13 = scmp.lt.u32.totalorder %s864_s28, %s860_s24  ;;  %p868_p1 = scmp.lt.u32.totalorder %s860_s24, %s1270_s6 }
 0x138   : > { %p862_p10 = pnand %p861_p9, %p1012_p3 }
 0x139   : > { %p867_p0 = por %p866_p13, %p865_p12 }
 0x13a   : > { %p863_p11 = pneg %p862_p10 }
 0x13b   : > { %p869_p2 = por %p868_p1, %p867_p0 }
 0x13d   : > { %p870_p4 = pnand %p869_p2, %p863_p11 }
 0x13f   : > { %873 = shalt.err (!%p870_p4)
}
 0x140   : > { %s944_s3 = smov 256   ;;  %s945_s13 = smov 16  }
 0x141   : > { %772 = dma.vmem_to_hbm [thread:$0]  (%p1012_p3), %s1272_s4, 8192, %s1270_s6, %s1280_s7, %s944_s3, %s944_s3, %s945_s13  }
 0x142 PF: > { %p778_p5 = scmp.ge.s32.totalorder %s940_s16, 2  ;;  %s653_s12 = sand.u32 1, %s912_s9  }
 0x143   : > { %s654_s5 = scalar_lea.sflag [#allocation3], %s653_s12 }
 0x144   : > { %p775_p6 = pnand %p778_p5, %p1021_p8 }
 0x146   : > { %907 = dma.done.wait (!%p775_p6), %s654_s5, 8192  }
 0x147   : > { %909 = vsyncadd (!%p775_p6), %s654_s5, 4294959104  ;;  %s15_s16 = sadd.s32 1, %s940_s16   ;;  %s1337_s9 = smov %s916_s10 }
 0x148   : > { %p12_p7 = scmp.ge.s32.totalorder %s15_s16, 8   ;;  %s1338_s10 = smov %s920_s11 }
 0x149   : > { %s1339_s11 = smov %s1030_s27  ;;  %s1340_s12 = smov %s932_s14 }
 0x14a   : > { %s1341_s13 = smov %s936_s15  ;;  %s1342_s14 = smov %s1345_s19 }
 0x14b   : > { %s1343_s15 = smov %s1349_s20  ;;  %14 = sbr.rel (!%p12_p7) target bundleno = 5 (0x5), region = 63 }
 0x152   :  { %659 = vsyncpa [#allocation3], 1 }
 0x153   :  { %661 = vsyncpa [#allocation3 + $0x1], 1 }

</bundles_post_ra>
